<compile_context>
chip_gen: v6e
topology: v6e:2x2x1
jax: 0.10.0
libtpu: 0.0.40
codegen_flags: <defaults>
</compile_context>

<pallas_src>
import jax
import jax.numpy as jnp
from jax.experimental import pallas as pl
from jax.experimental.pallas import tpu as pltpu

EPS = 1e-5                     # nn.InstanceNorm2d default eps (affine=False)
TK_CAP = 1024                  # max K tile (bf16 weight tile <= 1 MiB at Wout=512)
VMEM_LIMIT = 48 * 1024 * 1024  # explicit scoped-VMEM budget (safe on v5e/v6e/v7x)


def _round_up(x, m):
    return (x + m - 1) // m * m


def _choose_tk(k_padded, cap=TK_CAP):
    """Largest multiple of 128 that divides k_padded and is <= cap."""
    best, t = 128, 128
    while t <= min(k_padded, cap):
        if k_padded % t == 0:
            best = t
        t += 128
    return best


# ----------------------------- fused conv matmul kernel -----------------------------

def _make_conv_kernel(epilogue, groups, inv_count):
    """epilogue in {"in_relu", "in_add", "bias", "bias_sigmoid"}; groups = phase groups."""
    has_fold = groups > 1
    has_res = epilogue == "in_add"

    def kernel(*refs):
        a_ref, w_ref, b_ref = refs[0], refs[1], refs[2]
        idx = 3
        fold_ref = r_ref = None
        if has_fold:
            fold_ref = refs[idx]; idx += 1
        if has_res:
            r_ref = refs[idx]; idx += 1
        o_ref, acc_ref = refs[idx], refs[idx + 1]

        k = pl.program_id(1)

        @pl.when(k == 0)
        def _init():
            acc_ref[...] = jnp.zeros_like(acc_ref)

        # bf16 x bf16 -> f32 MXU accumulation over the K grid axis.
        acc_ref[...] += jnp.dot(a_ref[0], w_ref[...],
                                preferred_element_type=jnp.float32)

        @pl.when(k == pl.num_programs(1) - 1)
        def _finalize():
            acc = acc_ref[...] + b_ref[...]                       # (M, G*C) f32
            if epilogue in ("in_relu", "in_add"):
                # InstanceNorm over spatial rows and (for phase-grouped transpose
                # convs) over the G channel groups: the fold matrix sums the
                # per-group column stats and broadcasts them back to every group.
                mean = jnp.sum(acc, axis=0, keepdims=True) * inv_count
                if has_fold:
                    mean = jnp.dot(mean, fold_ref[...],
                                   preferred_element_type=jnp.float32)
                xc = acc - mean
                var = jnp.sum(xc * xc, axis=0, keepdims=True) * inv_count
                if has_fold:
                    var = jnp.dot(var, fold_ref[...],
                                  preferred_element_type=jnp.float32)
                y = xc * jax.lax.rsqrt(var + EPS)
                if epilogue == "in_relu":
                    y = jnp.maximum(y, 0.0)
                else:
                    y = y + r_ref[0].astype(jnp.float32)
            elif epilogue == "bias_sigmoid":
                y = 1.0 / (1.0 + jnp.exp(-acc))                   # sigmoid kept in f32
            else:
                y = acc
            o_ref[0] = y.astype(o_ref.dtype)

    return kernel


def fused_conv_matmul(patches, weight, bias, *, epilogue="in_relu", groups=1,
                      residual=None):
    """patches: (N, M, K); weight: (K, Wout); bias: (Wout,) -> (N, M, Wout) f32.
    Wout must be a multiple of 128 (callers pad). The per-image (M, Wout) output
    stays resident in VMEM across the K grid axis so the IN epilogue can fuse.
    """
    N, M, K = patches.shape
    Wout = weight.shape[1]
    assert Wout % 128 == 0 and M % 8 == 0

    # K tiling: single full-K block when small, else pad to a multiple of 128 and tile.
    if K <= TK_CAP:
        tk, nsteps = K, 1
    else:
        k_p = _round_up(K, 128)
        if k_p != K:
            patches = jnp.pad(patches, ((0, 0), (0, 0), (0, k_p - K)))
            weight = jnp.pad(weight, ((0, k_p - K), (0, 0)))
        tk = _choose_tk(k_p)
        nsteps = k_p // tk

    patches = patches.astype(jnp.bfloat16)
    weight = weight.astype(jnp.bfloat16)
    bias2 = bias.reshape(1, Wout).astype(jnp.float32)

    in_specs = [
        pl.BlockSpec((1, M, tk), lambda n, k: (n, 0, k)),       # im2col patches
        pl.BlockSpec((tk, Wout), lambda n, k: (k, 0)),          # weights
        pl.BlockSpec((1, Wout), lambda n, k: (0, 0)),           # bias
    ]
    args = [patches, weight, bias2]

    if groups > 1:                                              # phase-group fold matrix
        c = Wout // groups
        idx = jnp.arange(Wout)
        fold = (idx[:, None] % c == idx[None, :] % c).astype(jnp.float32)
        in_specs.append(pl.BlockSpec((Wout, Wout), lambda n, k: (0, 0)))
        args.append(fold)
    if epilogue == "in_add":
        assert residual is not None and residual.shape == (N, M, Wout)
        in_specs.append(pl.BlockSpec((1, M, Wout), lambda n, k: (n, 0, 0)))
        args.append(residual.astype(jnp.float32))

    kernel = _make_conv_kernel(epilogue, groups, 1.0 / float(M * groups))
    return pl.pallas_call(
        kernel,
        grid=(N, nsteps),
        out_shape=jax.ShapeDtypeStruct((N, M, Wout), jnp.float32),
        in_specs=in_specs,
        out_specs=pl.BlockSpec((1, M, Wout), lambda n, k: (n, 0, 0)),
        scratch_shapes=[pltpu.VMEM((M, Wout), jnp.float32)],
        compiler_params=pltpu.CompilerParams(
            dimension_semantics=("parallel", "arbitrary"),
            vmem_limit_bytes=VMEM_LIMIT),
    )(*args)


# ----------------------------- layer wrappers (XLA glue) -----------------------------

def _im2col(x, kh, kw, stride):
    """x: (N, H, W, C) already padded -> ((N, oh*ow, kh*kw*C), oh, ow)."""
    # TODO(synk): replace materialized im2col with per-tap accumulation reading the
    # padded NHWC activation directly inside the kernel (biggest remaining HBM win on v5e).
    N, H, W, C = x.shape
    oh = (H - kh) // stride + 1
    ow = (W - kw) // stride + 1
    cols = []
    for i in range(kh):
        for j in range(kw):
            cols.append(x[:, i:i + stride * oh:stride, j:j + stride * ow:stride, :])
    p = jnp.stack(cols, axis=3)                                  # (N, oh, ow, kh*kw, C)
    return p.reshape(N, oh * ow, kh * kw * C), oh, ow


def conv_block(x_padded, w, b, *, stride=1, epilogue="in_relu", residual=None):
    """Conv (as matmul) with fused bias / InstanceNorm / ReLU / residual / sigmoid."""
    kh, kw, cin, cout = w.shape
    patches, oh, ow = _im2col(x_padded, kh, kw, stride)
    N = x_padded.shape[0]

    cout_p = max(_round_up(cout, 128), 128)                      # lane-dense output
    wk = w.reshape(kh * kw * cin, cout)
    bk = b
    if cout_p != cout:
        wk = jnp.pad(wk, ((0, 0), (0, cout_p - cout)))
        bk = jnp.pad(b, (0, cout_p - cout))

    res = None
    if residual is not None:
        res = residual.reshape(N, oh * ow, residual.shape[-1])
        if cout_p != cout:
            res = jnp.pad(res, ((0, 0), (0, 0), (0, cout_p - cout)))

    out = fused_conv_matmul(patches, wk, bk, epilogue=epilogue, groups=1,
                            residual=res)
    return out[..., :cout].reshape(N, oh, ow, cout)


def up_block(x, wf, b):
    """ConvTranspose2d(Cin->Cout, 3, stride=2, padding=1, output_padding=1) + IN + ReLU
    via sub-pixel phase decomposition (one matmul over the 2x2 input neighbourhood).
    wf: weights stored in the equivalent forward-conv layout (3, 3, Cin, Cout)."""
    # TODO(synk): loading real PyTorch ConvTranspose2d weights requires flip + Cin/Cout
    # transpose into this layout; synthetic init stores them directly in this form.
    N, H, W, Cin = x.shape
    Cout = wf.shape[3]
    assert (4 * Cout) % 128 == 0

    xp = jnp.pad(x, ((0, 0), (0, 1), (0, 1), (0, 0)))            # bottom/right zeros
    taps = [xp[:, dy:dy + H, dx:dx + W, :] for dy in (0, 1) for dx in (0, 1)]
    patches = jnp.stack(taps, axis=3).reshape(N, H * W, 4 * Cin)

    # Per-phase sub-kernels; phase g = 2*py + px produces output pixel (2m+py, 2n+px).
    Wp = jnp.zeros((4, Cin, 4, Cout), jnp.float32)
    Wp = Wp.at[0, :, 0, :].set(wf[1, 1])                         # (even, even)
    Wp = Wp.at[0, :, 1, :].set(wf[1, 0])                         # (even, odd)
    Wp = Wp.at[1, :, 1, :].set(wf[1, 2])
    Wp = Wp.at[0, :, 2, :].set(wf[0, 1])                         # (odd, even)
    Wp = Wp.at[2, :, 2, :].set(wf[2, 1])
    Wp = Wp.at[0, :, 3, :].set(wf[0, 0])                         # (odd, odd)
    Wp = Wp.at[1, :, 3, :].set(wf[0, 2])
    Wp = Wp.at[2, :, 3, :].set(wf[2, 0])
    Wp = Wp.at[3, :, 3, :].set(wf[2, 2])

    out = fused_conv_matmul(patches, Wp.reshape(4 * Cin, 4 * Cout), jnp.tile(b, 4),
                            epilogue="in_relu", groups=4)
    # Pixel shuffle: (N, H*W, 4*Cout) -> (N, 2H, 2W, Cout).
    out = out.reshape(N, H, W, 2, 2, Cout)
    return out.transpose(0, 1, 3, 2, 4, 5).reshape(N, 2 * H, 2 * W, Cout)


# ----------------------------- parameters (deterministic synthetic init) -----------------------------

def init_params(key):
    ks = iter(jax.random.split(key, 32))

    def conv(cin, cout, k):
        w = jax.random.normal(next(ks), (k, k, cin, cout), jnp.float32) / jnp.sqrt(k * k * cin)
        b = 0.01 * jax.random.normal(next(ks), (cout,), jnp.float32)
        return w, b

    p = {}
    p["c0"] = conv(3, 64, 7)                                     # model0 conv 7x7
    p["d1"] = conv(64, 128, 3)                                   # model1 stride-2 conv
    p["d2"] = conv(128, 256, 3)                                  # model1 stride-2 conv
    p["res"] = [(conv(256, 256, 3), conv(256, 256, 3)) for _ in range(3)]  # model2
    p["u1"] = conv(256, 128, 3)                                  # model3 transpose convs
    p["u2"] = conv(128, 64, 3)                                   # (forward-conv layout)
    p["c4"] = conv(64, 1, 7)                                     # model4 conv 7x7
    return p


# ----------------------------- full forward -----------------------------

def line_drawing_forward(params, x_nchw):
    x = jnp.transpose(x_nchw, (0, 2, 3, 1)).astype(jnp.float32)  # NCHW -> NHWC

    # model0: ReflectionPad(3) -> Conv 7x7 (3->64) -> InstanceNorm -> ReLU
    w, b = params["c0"]
    y = conv_block(jnp.pad(x, ((0, 0), (3, 3), (3, 3), (0, 0)), mode="reflect"),
                   w, b, stride=1, epilogue="in_relu")

    # model1: two [Conv 3x3 s2 p1 -> InstanceNorm -> ReLU], 64 -> 128 -> 256
    for name in ("d1", "d2"):
        w, b = params[name]
        y = conv_block(jnp.pad(y, ((0, 0), (1, 1), (1, 1), (0, 0))),
                       w, b, stride=2, epilogue="in_relu")

    # model2: 3 residual blocks at 256 channels (second conv fuses IN + residual add)
    for (w1, b1), (w2, b2) in params["res"]:
        r = y
        t = conv_block(jnp.pad(y, ((0, 0), (1, 1), (1, 1), (0, 0)), mode="reflect"),
                       w1, b1, epilogue="in_relu")
        y = conv_block(jnp.pad(t, ((0, 0), (1, 1), (1, 1), (0, 0)), mode="reflect"),
                       w2, b2, epilogue="in_add", residual=r)

    # model3: two ConvTranspose(3, s2, p1, op1) -> InstanceNorm -> ReLU, 256 -> 128 -> 64
    for name in ("u1", "u2"):
        w, b = params[name]
        y = up_block(y, w, b)

    # model4: ReflectionPad(3) -> Conv 7x7 (64->1) -> Sigmoid
    w, b = params["c4"]
    y = conv_block(jnp.pad(y, ((0, 0), (3, 3), (3, 3), (0, 0)), mode="reflect"),
                   w, b, stride=1, epilogue="bias_sigmoid")

    return jnp.transpose(y, (0, 3, 1, 2))                        # NHWC -> NCHW (N, 1, H, W)


if __name__ == "__main__":
    key = jax.random.PRNGKey(0)
    pkey, xkey = jax.random.split(key)
    params = init_params(pkey)
    x = jax.random.normal(xkey, (2, 3, 16, 16), jnp.float32)     # NCHW, like the PyTorch module
    out = jax.jit(line_drawing_forward)(params, x)
    jax.block_until_ready(out)
    assert out.shape == (2, 1, 16, 16), out.shape
    assert bool(jnp.all(jnp.isfinite(out)))
    print("KERNEL_OK")
</pallas_src>

<mosaic_0001>
module attributes {stable_mosaic.version = 11 : i64} {
  func.func @kernel(%arg0: i32, %arg1: i32, %arg2: memref<1x256x147xbf16, #tpu.memory_space<vmem>>, %arg3: memref<147x128xbf16, #tpu.memory_space<vmem>>, %arg4: memref<1x128xf32, #tpu.memory_space<vmem>>, %arg5: memref<1x256x128xf32, #tpu.memory_space<vmem>>, %arg6: memref<256x128xf32, #tpu.memory_space<vmem>>) attributes {dimension_semantics = [#tpu.dimension_semantics<parallel>, #tpu.dimension_semantics<arbitrary>], iteration_bounds = array<i64: 2, 1>, scalar_prefetch = 0 : i64, scratch_operands = 1 : i64, tpu.core_type = #tpu.core_type<tc>, window_params = [{transform_indices = @transform_0, window_bounds = array<i64: 1, 256, 147>}, {transform_indices = @transform_1, window_bounds = array<i64: 147, 128>}, {pipeline_mode = #tpu.pipeline_mode<synchronous>, transform_indices = @transform_2, window_bounds = array<i64: 1, 128>}, {transform_indices = @transform_3, window_bounds = array<i64: 1, 256, 128>}]} {
    %c0_i32 = arith.constant 0 : i32
    %0 = arith.cmpi eq, %arg1, %c0_i32 : i32
    %1 = arith.extui %0 : i1 to i32
    %c0_i32_0 = arith.constant 0 : i32
    %2 = arith.cmpi ne, %1, %c0_i32_0 : i32
    scf.if %2 {
      %cst_11 = arith.constant 0.000000e+00 : f32
      %13 = vector.broadcast %cst_11 : f32 to vector<256x128xf32>
      %c0_12 = arith.constant 0 : index
      %c0_13 = arith.constant 0 : index
      %14 = vector.load %arg6[%c0_12, %c0_13] : memref<256x128xf32, #tpu.memory_space<vmem>>, vector<256x128xf32>
      tpu.vector_store %arg6[%c0_12, %c0_13], %13 {strides = array<i32>} : memref<256x128xf32, #tpu.memory_space<vmem>>, vector<256x128xf32>,
    } else {
    }
    %c0 = arith.constant 0 : index
    %c0_1 = arith.constant 0 : index
    %3 = vector.load %arg6[%c0, %c0_1] : memref<256x128xf32, #tpu.memory_space<vmem>>, vector<256x128xf32>
    %c0_2 = arith.constant 0 : index
    %c0_3 = arith.constant 0 : index
    %c0_4 = arith.constant 0 : index
    %4 = vector.load %arg2[%c0_2, %c0_3, %c0_4] : memref<1x256x147xbf16, #tpu.memory_space<vmem>>, vector<1x256x147xbf16>
    %5 = vector.shape_cast %4 : vector<1x256x147xbf16> to vector<256x147xbf16>
    %c0_5 = arith.constant 0 : index
    %c0_6 = arith.constant 0 : index
    %6 = vector.load %arg3[%c0_5, %c0_6] : memref<147x128xbf16, #tpu.memory_space<vmem>>, vector<147x128xbf16>
    %cst = arith.constant dense<0.000000e+00> : vector<256x128xf32>
    %7 = tpu.matmul %5, %6, %cst {dimension_numbers = #tpu.dot_dimension_numbers<[1], [0], [0], [1], [0, 0, 1, 1], [], []>} : vector<256x147xbf16>, vector<147x128xbf16>, vector<256x128xf32> -> vector<256x128xf32>
    %8 = arith.addf %3, %7 : vector<256x128xf32>
    %c0_7 = arith.constant 0 : index
    %c0_8 = arith.constant 0 : index
    %9 = vector.load %arg6[%c0_7, %c0_8] : memref<256x128xf32, #tpu.memory_space<vmem>>, vector<256x128xf32>
    tpu.vector_store %arg6[%c0_7, %c0_8], %8 {strides = array<i32>} : memref<256x128xf32, #tpu.memory_space<vmem>>, vector<256x128xf32>,
    %c0_i32_9 = arith.constant 0 : i32
    %10 = arith.cmpi eq, %arg1, %c0_i32_9 : i32
    %11 = arith.extui %10 : i1 to i32
    %c0_i32_10 = arith.constant 0 : i32
    %12 = arith.cmpi ne, %11, %c0_i32_10 : i32
    scf.if %12 {
      %c0_11 = arith.constant 0 : index
      %c0_12 = arith.constant 0 : index
      %13 = vector.load %arg6[%c0_11, %c0_12] : memref<256x128xf32, #tpu.memory_space<vmem>>, vector<256x128xf32>
      %c0_13 = arith.constant 0 : index
      %c0_14 = arith.constant 0 : index
      %14 = vector.load %arg4[%c0_13, %c0_14] : memref<1x128xf32, #tpu.memory_space<vmem>>, vector<1x128xf32>
      %15 = vector.broadcast %14 : vector<1x128xf32> to vector<256x128xf32>
      %16 = arith.addf %13, %15 : vector<256x128xf32>
      %cst_15 = arith.constant dense<0.000000e+00> : vector<128xf32>
      %17 = vector.multi_reduction <add>, %16, %cst_15 [0] : vector<256x128xf32> to vector<128xf32>
      %18 = vector.shape_cast %17 : vector<128xf32> to vector<1x128xf32>
      %cst_16 = arith.constant 3.906250e-03 : f32
      %19 = vector.broadcast %cst_16 : f32 to vector<1x128xf32>
      %20 = arith.mulf %18, %19 : vector<1x128xf32>
      %21 = vector.broadcast %20 : vector<1x128xf32> to vector<256x128xf32>
      %22 = arith.subf %16, %21 : vector<256x128xf32>
      %23 = arith.mulf %22, %22 : vector<256x128xf32>
      %cst_17 = arith.constant dense<0.000000e+00> : vector<128xf32>
      %24 = vector.multi_reduction <add>, %23, %cst_17 [0] : vector<256x128xf32> to vector<128xf32>
      %25 = vector.shape_cast %24 : vector<128xf32> to vector<1x128xf32>
      %cst_18 = arith.constant 3.906250e-03 : f32
      %26 = vector.broadcast %cst_18 : f32 to vector<1x128xf32>
      %27 = arith.mulf %25, %26 : vector<1x128xf32>
      %cst_19 = arith.constant 9.99999974E-6 : f32
      %28 = vector.broadcast %cst_19 : f32 to vector<1x128xf32>
      %29 = arith.addf %27, %28 : vector<1x128xf32>
      %30 = math.rsqrt %29 : vector<1x128xf32>
      %31 = vector.broadcast %30 : vector<1x128xf32> to vector<256x128xf32>
      %32 = arith.mulf %22, %31 : vector<256x128xf32>
      %cst_20 = arith.constant 0.000000e+00 : f32
      %33 = vector.broadcast %cst_20 : f32 to vector<256x128xf32>
      %34 = arith.maximumf %32, %33 : vector<256x128xf32>
      %c0_21 = arith.constant 0 : index
      %c0_22 = arith.constant 0 : index
      %c0_23 = arith.constant 0 : index
      %35 = vector.load %arg5[%c0_21, %c0_22, %c0_23] : memref<1x256x128xf32, #tpu.memory_space<vmem>>, vector<1x256x128xf32>
      %36 = vector.shape_cast %35 : vector<1x256x128xf32> to vector<256x128xf32>
      %37 = vector.shape_cast %34 : vector<256x128xf32> to vector<1x256x128xf32>
      tpu.vector_store %arg5[%c0_21, %c0_22, %c0_23], %37 {strides = array<i32>} : memref<1x256x128xf32, #tpu.memory_space<vmem>>, vector<1x256x128xf32>,
    } else {
    }
    return
  }
  func.func @transform_0(%arg0: i32, %arg1: i32) -> (i32, i32, i32) {
    %c0_i32 = arith.constant 0 : i32
    %c0_i32_0 = arith.constant 0 : i32
    return %arg0, %c0_i32, %arg1 : i32, i32, i32
  }
  func.func @transform_1(%arg0: i32, %arg1: i32) -> (i32, i32) {
    %c0_i32 = arith.constant 0 : i32
    %c0_i32_0 = arith.constant 0 : i32
    return %arg1, %c0_i32 : i32, i32
  }
  func.func @transform_2(%arg0: i32, %arg1: i32) -> (i32, i32) {
    %c0_i32 = arith.constant 0 : i32
    %c0_i32_0 = arith.constant 0 : i32
    %c0_i32_1 = arith.constant 0 : i32
    return %c0_i32, %c0_i32_0 : i32, i32
  }
  func.func @transform_3(%arg0: i32, %arg1: i32) -> (i32, i32, i32) {
    %c0_i32 = arith.constant 0 : i32
    %c0_i32_0 = arith.constant 0 : i32
    %c0_i32_1 = arith.constant 0 : i32
    return %arg0, %c0_i32, %c0_i32_0 : i32, i32, i32
  }
}

module attributes {stable_mosaic.version = 11 : i64} {
  func.func @kernel(%arg0: i32, %arg1: i32, %arg2: memref<1x64x576xbf16, #tpu.memory_space<vmem>>, %arg3: memref<576x128xbf16, #tpu.memory_space<vmem>>, %arg4: memref<1x128xf32, #tpu.memory_space<vmem>>, %arg5: memref<1x64x128xf32, #tpu.memory_space<vmem>>, %arg6: memref<64x128xf32, #tpu.memory_space<vmem>>) attributes {dimension_semantics = [#tpu.dimension_semantics<parallel>, #tpu.dimension_semantics<arbitrary>], iteration_bounds = array<i64: 2, 1>, scalar_prefetch = 0 : i64, scratch_operands = 1 : i64, tpu.core_type = #tpu.core_type<tc>, window_params = [{transform_indices = @transform_0, window_bounds = array<i64: 1, 64, 576>}, {transform_indices = @transform_1, window_bounds = array<i64: 576, 128>}, {pipeline_mode = #tpu.pipeline_mode<synchronous>, transform_indices = @transform_2, window_bounds = array<i64: 1, 128>}, {transform_indices = @transform_3, window_bounds = array<i64: 1, 64, 128>}]} {
    %c0_i32 = arith.constant 0 : i32
    %0 = arith.cmpi eq, %arg1, %c0_i32 : i32
    %1 = arith.extui %0 : i1 to i32
    %c0_i32_0 = arith.constant 0 : i32
    %2 = arith.cmpi ne, %1, %c0_i32_0 : i32
    scf.if %2 {
      %cst_11 = arith.constant 0.000000e+00 : f32
      %13 = vector.broadcast %cst_11 : f32 to vector<64x128xf32>
      %c0_12 = arith.constant 0 : index
      %c0_13 = arith.constant 0 : index
      %14 = vector.load %arg6[%c0_12, %c0_13] : memref<64x128xf32, #tpu.memory_space<vmem>>, vector<64x128xf32>
      tpu.vector_store %arg6[%c0_12, %c0_13], %13 {strides = array<i32>} : memref<64x128xf32, #tpu.memory_space<vmem>>, vector<64x128xf32>,
    } else {
    }
    %c0 = arith.constant 0 : index
    %c0_1 = arith.constant 0 : index
    %3 = vector.load %arg6[%c0, %c0_1] : memref<64x128xf32, #tpu.memory_space<vmem>>, vector<64x128xf32>
    %c0_2 = arith.constant 0 : index
    %c0_3 = arith.constant 0 : index
    %c0_4 = arith.constant 0 : index
    %4 = vector.load %arg2[%c0_2, %c0_3, %c0_4] : memref<1x64x576xbf16, #tpu.memory_space<vmem>>, vector<1x64x576xbf16>
    %5 = vector.shape_cast %4 : vector<1x64x576xbf16> to vector<64x576xbf16>
    %c0_5 = arith.constant 0 : index
    %c0_6 = arith.constant 0 : index
    %6 = vector.load %arg3[%c0_5, %c0_6] : memref<576x128xbf16, #tpu.memory_space<vmem>>, vector<576x128xbf16>
    %cst = arith.constant dense<0.000000e+00> : vector<64x128xf32>
    %7 = tpu.matmul %5, %6, %cst {dimension_numbers = #tpu.dot_dimension_numbers<[1], [0], [0], [1], [0, 0, 1, 1], [], []>} : vector<64x576xbf16>, vector<576x128xbf16>, vector<64x128xf32> -> vector<64x128xf32>
    %8 = arith.addf %3, %7 : vector<64x128xf32>
    %c0_7 = arith.constant 0 : index
    %c0_8 = arith.constant 0 : index
    %9 = vector.load %arg6[%c0_7, %c0_8] : memref<64x128xf32, #tpu.memory_space<vmem>>, vector<64x128xf32>
    tpu.vector_store %arg6[%c0_7, %c0_8], %8 {strides = array<i32>} : memref<64x128xf32, #tpu.memory_space<vmem>>, vector<64x128xf32>,
    %c0_i32_9 = arith.constant 0 : i32
    %10 = arith.cmpi eq, %arg1, %c0_i32_9 : i32
    %11 = arith.extui %10 : i1 to i32
    %c0_i32_10 = arith.constant 0 : i32
    %12 = arith.cmpi ne, %11, %c0_i32_10 : i32
    scf.if %12 {
      %c0_11 = arith.constant 0 : index
      %c0_12 = arith.constant 0 : index
      %13 = vector.load %arg6[%c0_11, %c0_12] : memref<64x128xf32, #tpu.memory_space<vmem>>, vector<64x128xf32>
      %c0_13 = arith.constant 0 : index
      %c0_14 = arith.constant 0 : index
      %14 = vector.load %arg4[%c0_13, %c0_14] : memref<1x128xf32, #tpu.memory_space<vmem>>, vector<1x128xf32>
      %15 = vector.broadcast %14 : vector<1x128xf32> to vector<64x128xf32>
      %16 = arith.addf %13, %15 : vector<64x128xf32>
      %cst_15 = arith.constant dense<0.000000e+00> : vector<128xf32>
      %17 = vector.multi_reduction <add>, %16, %cst_15 [0] : vector<64x128xf32> to vector<128xf32>
      %18 = vector.shape_cast %17 : vector<128xf32> to vector<1x128xf32>
      %cst_16 = arith.constant 1.562500e-02 : f32
      %19 = vector.broadcast %cst_16 : f32 to vector<1x128xf32>
      %20 = arith.mulf %18, %19 : vector<1x128xf32>
      %21 = vector.broadcast %20 : vector<1x128xf32> to vector<64x128xf32>
      %22 = arith.subf %16, %21 : vector<64x128xf32>
      %23 = arith.mulf %22, %22 : vector<64x128xf32>
      %cst_17 = arith.constant dense<0.000000e+00> : vector<128xf32>
      %24 = vector.multi_reduction <add>, %23, %cst_17 [0] : vector<64x128xf32> to vector<128xf32>
      %25 = vector.shape_cast %24 : vector<128xf32> to vector<1x128xf32>
      %cst_18 = arith.constant 1.562500e-02 : f32
      %26 = vector.broadcast %cst_18 : f32 to vector<1x128xf32>
      %27 = arith.mulf %25, %26 : vector<1x128xf32>
      %cst_19 = arith.constant 9.99999974E-6 : f32
      %28 = vector.broadcast %cst_19 : f32 to vector<1x128xf32>
      %29 = arith.addf %27, %28 : vector<1x128xf32>
      %30 = math.rsqrt %29 : vector<1x128xf32>
      %31 = vector.broadcast %30 : vector<1x128xf32> to vector<64x128xf32>
      %32 = arith.mulf %22, %31 : vector<64x128xf32>
      %cst_20 = arith.constant 0.000000e+00 : f32
      %33 = vector.broadcast %cst_20 : f32 to vector<64x128xf32>
      %34 = arith.maximumf %32, %33 : vector<64x128xf32>
      %c0_21 = arith.constant 0 : index
      %c0_22 = arith.constant 0 : index
      %c0_23 = arith.constant 0 : index
      %35 = vector.load %arg5[%c0_21, %c0_22, %c0_23] : memref<1x64x128xf32, #tpu.memory_space<vmem>>, vector<1x64x128xf32>
      %36 = vector.shape_cast %35 : vector<1x64x128xf32> to vector<64x128xf32>
      %37 = vector.shape_cast %34 : vector<64x128xf32> to vector<1x64x128xf32>
      tpu.vector_store %arg5[%c0_21, %c0_22, %c0_23], %37 {strides = array<i32>} : memref<1x64x128xf32, #tpu.memory_space<vmem>>, vector<1x64x128xf32>,
    } else {
    }
    return
  }
  func.func @transform_0(%arg0: i32, %arg1: i32) -> (i32, i32, i32) {
    %c0_i32 = arith.constant 0 : i32
    %c0_i32_0 = arith.constant 0 : i32
    return %arg0, %c0_i32, %arg1 : i32, i32, i32
  }
  func.func @transform_1(%arg0: i32, %arg1: i32) -> (i32, i32) {
    %c0_i32 = arith.constant 0 : i32
    %c0_i32_0 = arith.constant 0 : i32
    return %arg1, %c0_i32 : i32, i32
  }
  func.func @transform_2(%arg0: i32, %arg1: i32) -> (i32, i32) {
    %c0_i32 = arith.constant 0 : i32
    %c0_i32_0 = arith.constant 0 : i32
    %c0_i32_1 = arith.constant 0 : i32
    return %c0_i32, %c0_i32_0 : i32, i32
  }
  func.func @transform_3(%arg0: i32, %arg1: i32) -> (i32, i32, i32) {
    %c0_i32 = arith.constant 0 : i32
    %c0_i32_0 = arith.constant 0 : i32
    %c0_i32_1 = arith.constant 0 : i32
    return %arg0, %c0_i32, %c0_i32_0 : i32, i32, i32
  }
}

module attributes {stable_mosaic.version = 11 : i64} {
  func.func @kernel(%arg0: i32, %arg1: i32, %arg2: memref<1x16x384xbf16, #tpu.memory_space<vmem>>, %arg3: memref<384x256xbf16, #tpu.memory_space<vmem>>, %arg4: memref<1x256xf32, #tpu.memory_space<vmem>>, %arg5: memref<1x16x256xf32, #tpu.memory_space<vmem>>, %arg6: memref<16x256xf32, #tpu.memory_space<vmem>>) attributes {dimension_semantics = [#tpu.dimension_semantics<parallel>, #tpu.dimension_semantics<arbitrary>], iteration_bounds = array<i64: 2, 3>, scalar_prefetch = 0 : i64, scratch_operands = 1 : i64, tpu.core_type = #tpu.core_type<tc>, window_params = [{transform_indices = @transform_0, window_bounds = array<i64: 1, 16, 384>}, {transform_indices = @transform_1, window_bounds = array<i64: 384, 256>}, {pipeline_mode = #tpu.pipeline_mode<synchronous>, transform_indices = @transform_2, window_bounds = array<i64: 1, 256>}, {transform_indices = @transform_3, window_bounds = array<i64: 1, 16, 256>}]} {
    %c0_i32 = arith.constant 0 : i32
    %0 = arith.cmpi eq, %arg1, %c0_i32 : i32
    %1 = arith.extui %0 : i1 to i32
    %c0_i32_0 = arith.constant 0 : i32
    %2 = arith.cmpi ne, %1, %c0_i32_0 : i32
    scf.if %2 {
      %cst_10 = arith.constant 0.000000e+00 : f32
      %13 = vector.broadcast %cst_10 : f32 to vector<16x256xf32>
      %c0_11 = arith.constant 0 : index
      %c0_12 = arith.constant 0 : index
      %14 = vector.load %arg6[%c0_11, %c0_12] : memref<16x256xf32, #tpu.memory_space<vmem>>, vector<16x256xf32>
      tpu.vector_store %arg6[%c0_11, %c0_12], %13 {strides = array<i32>} : memref<16x256xf32, #tpu.memory_space<vmem>>, vector<16x256xf32>,
    } else {
    }
    %c0 = arith.constant 0 : index
    %c0_1 = arith.constant 0 : index
    %3 = vector.load %arg6[%c0, %c0_1] : memref<16x256xf32, #tpu.memory_space<vmem>>, vector<16x256xf32>
    %c0_2 = arith.constant 0 : index
    %c0_3 = arith.constant 0 : index
    %c0_4 = arith.constant 0 : index
    %4 = vector.load %arg2[%c0_2, %c0_3, %c0_4] : memref<1x16x384xbf16, #tpu.memory_space<vmem>>, vector<1x16x384xbf16>
    %5 = vector.shape_cast %4 : vector<1x16x384xbf16> to vector<16x384xbf16>
    %c0_5 = arith.constant 0 : index
    %c0_6 = arith.constant 0 : index
    %6 = vector.load %arg3[%c0_5, %c0_6] : memref<384x256xbf16, #tpu.memory_space<vmem>>, vector<384x256xbf16>
    %cst = arith.constant dense<0.000000e+00> : vector<16x256xf32>
    %7 = tpu.matmul %5, %6, %cst {dimension_numbers = #tpu.dot_dimension_numbers<[1], [0], [0], [1], [0, 0, 1, 1], [], []>} : vector<16x384xbf16>, vector<384x256xbf16>, vector<16x256xf32> -> vector<16x256xf32>
    %8 = arith.addf %3, %7 : vector<16x256xf32>
    %c0_7 = arith.constant 0 : index
    %c0_8 = arith.constant 0 : index
    %9 = vector.load %arg6[%c0_7, %c0_8] : memref<16x256xf32, #tpu.memory_space<vmem>>, vector<16x256xf32>
    tpu.vector_store %arg6[%c0_7, %c0_8], %8 {strides = array<i32>} : memref<16x256xf32, #tpu.memory_space<vmem>>, vector<16x256xf32>,
    %c2_i32 = arith.constant 2 : i32
    %10 = arith.cmpi eq, %arg1, %c2_i32 : i32
    %11 = arith.extui %10 : i1 to i32
    %c0_i32_9 = arith.constant 0 : i32
    %12 = arith.cmpi ne, %11, %c0_i32_9 : i32
    scf.if %12 {
      %c0_10 = arith.constant 0 : index
      %c0_11 = arith.constant 0 : index
      %13 = vector.load %arg6[%c0_10, %c0_11] : memref<16x256xf32, #tpu.memory_space<vmem>>, vector<16x256xf32>
      %c0_12 = arith.constant 0 : index
      %c0_13 = arith.constant 0 : index
      %14 = vector.load %arg4[%c0_12, %c0_13] : memref<1x256xf32, #tpu.memory_space<vmem>>, vector<1x256xf32>
      %15 = vector.broadcast %14 : vector<1x256xf32> to vector<16x256xf32>
      %16 = arith.addf %13, %15 : vector<16x256xf32>
      %cst_14 = arith.constant dense<0.000000e+00> : vector<256xf32>
      %17 = vector.multi_reduction <add>, %16, %cst_14 [0] : vector<16x256xf32> to vector<256xf32>
      %18 = vector.shape_cast %17 : vector<256xf32> to vector<1x256xf32>
      %cst_15 = arith.constant 6.250000e-02 : f32
      %19 = vector.broadcast %cst_15 : f32 to vector<1x256xf32>
      %20 = arith.mulf %18, %19 : vector<1x256xf32>
      %21 = vector.broadcast %20 : vector<1x256xf32> to vector<16x256xf32>
      %22 = arith.subf %16, %21 : vector<16x256xf32>
      %23 = arith.mulf %22, %22 : vector<16x256xf32>
      %cst_16 = arith.constant dense<0.000000e+00> : vector<256xf32>
      %24 = vector.multi_reduction <add>, %23, %cst_16 [0] : vector<16x256xf32> to vector<256xf32>
      %25 = vector.shape_cast %24 : vector<256xf32> to vector<1x256xf32>
      %cst_17 = arith.constant 6.250000e-02 : f32
      %26 = vector.broadcast %cst_17 : f32 to vector<1x256xf32>
      %27 = arith.mulf %25, %26 : vector<1x256xf32>
      %cst_18 = arith.constant 9.99999974E-6 : f32
      %28 = vector.broadcast %cst_18 : f32 to vector<1x256xf32>
      %29 = arith.addf %27, %28 : vector<1x256xf32>
      %30 = math.rsqrt %29 : vector<1x256xf32>
      %31 = vector.broadcast %30 : vector<1x256xf32> to vector<16x256xf32>
      %32 = arith.mulf %22, %31 : vector<16x256xf32>
      %cst_19 = arith.constant 0.000000e+00 : f32
      %33 = vector.broadcast %cst_19 : f32 to vector<16x256xf32>
      %34 = arith.maximumf %32, %33 : vector<16x256xf32>
      %c0_20 = arith.constant 0 : index
      %c0_21 = arith.constant 0 : index
      %c0_22 = arith.constant 0 : index
      %35 = vector.load %arg5[%c0_20, %c0_21, %c0_22] : memref<1x16x256xf32, #tpu.memory_space<vmem>>, vector<1x16x256xf32>
      %36 = vector.shape_cast %35 : vector<1x16x256xf32> to vector<16x256xf32>
      %37 = vector.shape_cast %34 : vector<16x256xf32> to vector<1x16x256xf32>
      tpu.vector_store %arg5[%c0_20, %c0_21, %c0_22], %37 {strides = array<i32>} : memref<1x16x256xf32, #tpu.memory_space<vmem>>, vector<1x16x256xf32>,
    } else {
    }
    return
  }
  func.func @transform_0(%arg0: i32, %arg1: i32) -> (i32, i32, i32) {
    %c0_i32 = arith.constant 0 : i32
    %c0_i32_0 = arith.constant 0 : i32
    return %arg0, %c0_i32, %arg1 : i32, i32, i32
  }
  func.func @transform_1(%arg0: i32, %arg1: i32) -> (i32, i32) {
    %c0_i32 = arith.constant 0 : i32
    %c0_i32_0 = arith.constant 0 : i32
    return %arg1, %c0_i32 : i32, i32
  }
  func.func @transform_2(%arg0: i32, %arg1: i32) -> (i32, i32) {
    %c0_i32 = arith.constant 0 : i32
    %c0_i32_0 = arith.constant 0 : i32
    %c0_i32_1 = arith.constant 0 : i32
    return %c0_i32, %c0_i32_0 : i32, i32
  }
  func.func @transform_3(%arg0: i32, %arg1: i32) -> (i32, i32, i32) {
    %c0_i32 = arith.constant 0 : i32
    %c0_i32_0 = arith.constant 0 : i32
    %c0_i32_1 = arith.constant 0 : i32
    return %arg0, %c0_i32, %c0_i32_0 : i32, i32, i32
  }
}

module attributes {stable_mosaic.version = 11 : i64} {
  func.func @kernel(%arg0: i32, %arg1: i32, %arg2: memref<1x16x768xbf16, #tpu.memory_space<vmem>>, %arg3: memref<768x256xbf16, #tpu.memory_space<vmem>>, %arg4: memref<1x256xf32, #tpu.memory_space<vmem>>, %arg5: memref<1x16x256xf32, #tpu.memory_space<vmem>>, %arg6: memref<16x256xf32, #tpu.memory_space<vmem>>) attributes {dimension_semantics = [#tpu.dimension_semantics<parallel>, #tpu.dimension_semantics<arbitrary>], iteration_bounds = array<i64: 2, 3>, scalar_prefetch = 0 : i64, scratch_operands = 1 : i64, tpu.core_type = #tpu.core_type<tc>, window_params = [{transform_indices = @transform_0, window_bounds = array<i64: 1, 16, 768>}, {transform_indices = @transform_1, window_bounds = array<i64: 768, 256>}, {pipeline_mode = #tpu.pipeline_mode<synchronous>, transform_indices = @transform_2, window_bounds = array<i64: 1, 256>}, {transform_indices = @transform_3, window_bounds = array<i64: 1, 16, 256>}]} {
    %c0_i32 = arith.constant 0 : i32
    %0 = arith.cmpi eq, %arg1, %c0_i32 : i32
    %1 = arith.extui %0 : i1 to i32
    %c0_i32_0 = arith.constant 0 : i32
    %2 = arith.cmpi ne, %1, %c0_i32_0 : i32
    scf.if %2 {
      %cst_10 = arith.constant 0.000000e+00 : f32
      %13 = vector.broadcast %cst_10 : f32 to vector<16x256xf32>
      %c0_11 = arith.constant 0 : index
      %c0_12 = arith.constant 0 : index
      %14 = vector.load %arg6[%c0_11, %c0_12] : memref<16x256xf32, #tpu.memory_space<vmem>>, vector<16x256xf32>
      tpu.vector_store %arg6[%c0_11, %c0_12], %13 {strides = array<i32>} : memref<16x256xf32, #tpu.memory_space<vmem>>, vector<16x256xf32>,
    } else {
    }
    %c0 = arith.constant 0 : index
    %c0_1 = arith.constant 0 : index
    %3 = vector.load %arg6[%c0, %c0_1] : memref<16x256xf32, #tpu.memory_space<vmem>>, vector<16x256xf32>
    %c0_2 = arith.constant 0 : index
    %c0_3 = arith.constant 0 : index
    %c0_4 = arith.constant 0 : index
    %4 = vector.load %arg2[%c0_2, %c0_3, %c0_4] : memref<1x16x768xbf16, #tpu.memory_space<vmem>>, vector<1x16x768xbf16>
    %5 = vector.shape_cast %4 : vector<1x16x768xbf16> to vector<16x768xbf16>
    %c0_5 = arith.constant 0 : index
    %c0_6 = arith.constant 0 : index
    %6 = vector.load %arg3[%c0_5, %c0_6] : memref<768x256xbf16, #tpu.memory_space<vmem>>, vector<768x256xbf16>
    %cst = arith.constant dense<0.000000e+00> : vector<16x256xf32>
    %7 = tpu.matmul %5, %6, %cst {dimension_numbers = #tpu.dot_dimension_numbers<[1], [0], [0], [1], [0, 0, 1, 1], [], []>} : vector<16x768xbf16>, vector<768x256xbf16>, vector<16x256xf32> -> vector<16x256xf32>
    %8 = arith.addf %3, %7 : vector<16x256xf32>
    %c0_7 = arith.constant 0 : index
    %c0_8 = arith.constant 0 : index
    %9 = vector.load %arg6[%c0_7, %c0_8] : memref<16x256xf32, #tpu.memory_space<vmem>>, vector<16x256xf32>
    tpu.vector_store %arg6[%c0_7, %c0_8], %8 {strides = array<i32>} : memref<16x256xf32, #tpu.memory_space<vmem>>, vector<16x256xf32>,
    %c2_i32 = arith.constant 2 : i32
    %10 = arith.cmpi eq, %arg1, %c2_i32 : i32
    %11 = arith.extui %10 : i1 to i32
    %c0_i32_9 = arith.constant 0 : i32
    %12 = arith.cmpi ne, %11, %c0_i32_9 : i32
    scf.if %12 {
      %c0_10 = arith.constant 0 : index
      %c0_11 = arith.constant 0 : index
      %13 = vector.load %arg6[%c0_10, %c0_11] : memref<16x256xf32, #tpu.memory_space<vmem>>, vector<16x256xf32>
      %c0_12 = arith.constant 0 : index
      %c0_13 = arith.constant 0 : index
      %14 = vector.load %arg4[%c0_12, %c0_13] : memref<1x256xf32, #tpu.memory_space<vmem>>, vector<1x256xf32>
      %15 = vector.broadcast %14 : vector<1x256xf32> to vector<16x256xf32>
      %16 = arith.addf %13, %15 : vector<16x256xf32>
      %cst_14 = arith.constant dense<0.000000e+00> : vector<256xf32>
      %17 = vector.multi_reduction <add>, %16, %cst_14 [0] : vector<16x256xf32> to vector<256xf32>
      %18 = vector.shape_cast %17 : vector<256xf32> to vector<1x256xf32>
      %cst_15 = arith.constant 6.250000e-02 : f32
      %19 = vector.broadcast %cst_15 : f32 to vector<1x256xf32>
      %20 = arith.mulf %18, %19 : vector<1x256xf32>
      %21 = vector.broadcast %20 : vector<1x256xf32> to vector<16x256xf32>
      %22 = arith.subf %16, %21 : vector<16x256xf32>
      %23 = arith.mulf %22, %22 : vector<16x256xf32>
      %cst_16 = arith.constant dense<0.000000e+00> : vector<256xf32>
      %24 = vector.multi_reduction <add>, %23, %cst_16 [0] : vector<16x256xf32> to vector<256xf32>
      %25 = vector.shape_cast %24 : vector<256xf32> to vector<1x256xf32>
      %cst_17 = arith.constant 6.250000e-02 : f32
      %26 = vector.broadcast %cst_17 : f32 to vector<1x256xf32>
      %27 = arith.mulf %25, %26 : vector<1x256xf32>
      %cst_18 = arith.constant 9.99999974E-6 : f32
      %28 = vector.broadcast %cst_18 : f32 to vector<1x256xf32>
      %29 = arith.addf %27, %28 : vector<1x256xf32>
      %30 = math.rsqrt %29 : vector<1x256xf32>
      %31 = vector.broadcast %30 : vector<1x256xf32> to vector<16x256xf32>
      %32 = arith.mulf %22, %31 : vector<16x256xf32>
      %cst_19 = arith.constant 0.000000e+00 : f32
      %33 = vector.broadcast %cst_19 : f32 to vector<16x256xf32>
      %34 = arith.maximumf %32, %33 : vector<16x256xf32>
      %c0_20 = arith.constant 0 : index
      %c0_21 = arith.constant 0 : index
      %c0_22 = arith.constant 0 : index
      %35 = vector.load %arg5[%c0_20, %c0_21, %c0_22] : memref<1x16x256xf32, #tpu.memory_space<vmem>>, vector<1x16x256xf32>
      %36 = vector.shape_cast %35 : vector<1x16x256xf32> to vector<16x256xf32>
      %37 = vector.shape_cast %34 : vector<16x256xf32> to vector<1x16x256xf32>
      tpu.vector_store %arg5[%c0_20, %c0_21, %c0_22], %37 {strides = array<i32>} : memref<1x16x256xf32, #tpu.memory_space<vmem>>, vector<1x16x256xf32>,
    } else {
    }
    return
  }
  func.func @transform_0(%arg0: i32, %arg1: i32) -> (i32, i32, i32) {
    %c0_i32 = arith.constant 0 : i32
    %c0_i32_0 = arith.constant 0 : i32
    return %arg0, %c0_i32, %arg1 : i32, i32, i32
  }
  func.func @transform_1(%arg0: i32, %arg1: i32) -> (i32, i32) {
    %c0_i32 = arith.constant 0 : i32
    %c0_i32_0 = arith.constant 0 : i32
    return %arg1, %c0_i32 : i32, i32
  }
  func.func @transform_2(%arg0: i32, %arg1: i32) -> (i32, i32) {
    %c0_i32 = arith.constant 0 : i32
    %c0_i32_0 = arith.constant 0 : i32
    %c0_i32_1 = arith.constant 0 : i32
    return %c0_i32, %c0_i32_0 : i32, i32
  }
  func.func @transform_3(%arg0: i32, %arg1: i32) -> (i32, i32, i32) {
    %c0_i32 = arith.constant 0 : i32
    %c0_i32_0 = arith.constant 0 : i32
    %c0_i32_1 = arith.constant 0 : i32
    return %arg0, %c0_i32, %c0_i32_0 : i32, i32, i32
  }
}

module attributes {stable_mosaic.version = 11 : i64} {
  func.func @kernel(%arg0: i32, %arg1: i32, %arg2: memref<1x16x768xbf16, #tpu.memory_space<vmem>>, %arg3: memref<768x256xbf16, #tpu.memory_space<vmem>>, %arg4: memref<1x256xf32, #tpu.memory_space<vmem>>, %arg5: memref<1x16x256xf32, #tpu.memory_space<vmem>>, %arg6: memref<1x16x256xf32, #tpu.memory_space<vmem>>, %arg7: memref<16x256xf32, #tpu.memory_space<vmem>>) attributes {dimension_semantics = [#tpu.dimension_semantics<parallel>, #tpu.dimension_semantics<arbitrary>], iteration_bounds = array<i64: 2, 3>, scalar_prefetch = 0 : i64, scratch_operands = 1 : i64, tpu.core_type = #tpu.core_type<tc>, window_params = [{transform_indices = @transform_0, window_bounds = array<i64: 1, 16, 768>}, {transform_indices = @transform_1, window_bounds = array<i64: 768, 256>}, {pipeline_mode = #tpu.pipeline_mode<synchronous>, transform_indices = @transform_2, window_bounds = array<i64: 1, 256>}, {transform_indices = @transform_3, window_bounds = array<i64: 1, 16, 256>}, {transform_indices = @transform_4, window_bounds = array<i64: 1, 16, 256>}]} {
    %c0_i32 = arith.constant 0 : i32
    %0 = arith.cmpi eq, %arg1, %c0_i32 : i32
    %1 = arith.extui %0 : i1 to i32
    %c0_i32_0 = arith.constant 0 : i32
    %2 = arith.cmpi ne, %1, %c0_i32_0 : i32
    scf.if %2 {
      %cst_10 = arith.constant 0.000000e+00 : f32
      %13 = vector.broadcast %cst_10 : f32 to vector<16x256xf32>
      %c0_11 = arith.constant 0 : index
      %c0_12 = arith.constant 0 : index
      %14 = vector.load %arg7[%c0_11, %c0_12] : memref<16x256xf32, #tpu.memory_space<vmem>>, vector<16x256xf32>
      tpu.vector_store %arg7[%c0_11, %c0_12], %13 {strides = array<i32>} : memref<16x256xf32, #tpu.memory_space<vmem>>, vector<16x256xf32>,
    } else {
    }
    %c0 = arith.constant 0 : index
    %c0_1 = arith.constant 0 : index
    %3 = vector.load %arg7[%c0, %c0_1] : memref<16x256xf32, #tpu.memory_space<vmem>>, vector<16x256xf32>
    %c0_2 = arith.constant 0 : index
    %c0_3 = arith.constant 0 : index
    %c0_4 = arith.constant 0 : index
    %4 = vector.load %arg2[%c0_2, %c0_3, %c0_4] : memref<1x16x768xbf16, #tpu.memory_space<vmem>>, vector<1x16x768xbf16>
    %5 = vector.shape_cast %4 : vector<1x16x768xbf16> to vector<16x768xbf16>
    %c0_5 = arith.constant 0 : index
    %c0_6 = arith.constant 0 : index
    %6 = vector.load %arg3[%c0_5, %c0_6] : memref<768x256xbf16, #tpu.memory_space<vmem>>, vector<768x256xbf16>
    %cst = arith.constant dense<0.000000e+00> : vector<16x256xf32>
    %7 = tpu.matmul %5, %6, %cst {dimension_numbers = #tpu.dot_dimension_numbers<[1], [0], [0], [1], [0, 0, 1, 1], [], []>} : vector<16x768xbf16>, vector<768x256xbf16>, vector<16x256xf32> -> vector<16x256xf32>
    %8 = arith.addf %3, %7 : vector<16x256xf32>
    %c0_7 = arith.constant 0 : index
    %c0_8 = arith.constant 0 : index
    %9 = vector.load %arg7[%c0_7, %c0_8] : memref<16x256xf32, #tpu.memory_space<vmem>>, vector<16x256xf32>
    tpu.vector_store %arg7[%c0_7, %c0_8], %8 {strides = array<i32>} : memref<16x256xf32, #tpu.memory_space<vmem>>, vector<16x256xf32>,
    %c2_i32 = arith.constant 2 : i32
    %10 = arith.cmpi eq, %arg1, %c2_i32 : i32
    %11 = arith.extui %10 : i1 to i32
    %c0_i32_9 = arith.constant 0 : i32
    %12 = arith.cmpi ne, %11, %c0_i32_9 : i32
    scf.if %12 {
      %c0_10 = arith.constant 0 : index
      %c0_11 = arith.constant 0 : index
      %13 = vector.load %arg7[%c0_10, %c0_11] : memref<16x256xf32, #tpu.memory_space<vmem>>, vector<16x256xf32>
      %c0_12 = arith.constant 0 : index
      %c0_13 = arith.constant 0 : index
      %14 = vector.load %arg4[%c0_12, %c0_13] : memref<1x256xf32, #tpu.memory_space<vmem>>, vector<1x256xf32>
      %15 = vector.broadcast %14 : vector<1x256xf32> to vector<16x256xf32>
      %16 = arith.addf %13, %15 : vector<16x256xf32>
      %cst_14 = arith.constant dense<0.000000e+00> : vector<256xf32>
      %17 = vector.multi_reduction <add>, %16, %cst_14 [0] : vector<16x256xf32> to vector<256xf32>
      %18 = vector.shape_cast %17 : vector<256xf32> to vector<1x256xf32>
      %cst_15 = arith.constant 6.250000e-02 : f32
      %19 = vector.broadcast %cst_15 : f32 to vector<1x256xf32>
      %20 = arith.mulf %18, %19 : vector<1x256xf32>
      %21 = vector.broadcast %20 : vector<1x256xf32> to vector<16x256xf32>
      %22 = arith.subf %16, %21 : vector<16x256xf32>
      %23 = arith.mulf %22, %22 : vector<16x256xf32>
      %cst_16 = arith.constant dense<0.000000e+00> : vector<256xf32>
      %24 = vector.multi_reduction <add>, %23, %cst_16 [0] : vector<16x256xf32> to vector<256xf32>
      %25 = vector.shape_cast %24 : vector<256xf32> to vector<1x256xf32>
      %cst_17 = arith.constant 6.250000e-02 : f32
      %26 = vector.broadcast %cst_17 : f32 to vector<1x256xf32>
      %27 = arith.mulf %25, %26 : vector<1x256xf32>
      %cst_18 = arith.constant 9.99999974E-6 : f32
      %28 = vector.broadcast %cst_18 : f32 to vector<1x256xf32>
      %29 = arith.addf %27, %28 : vector<1x256xf32>
      %30 = math.rsqrt %29 : vector<1x256xf32>
      %31 = vector.broadcast %30 : vector<1x256xf32> to vector<16x256xf32>
      %32 = arith.mulf %22, %31 : vector<16x256xf32>
      %c0_19 = arith.constant 0 : index
      %c0_20 = arith.constant 0 : index
      %c0_21 = arith.constant 0 : index
      %33 = vector.load %arg5[%c0_19, %c0_20, %c0_21] : memref<1x16x256xf32, #tpu.memory_space<vmem>>, vector<1x16x256xf32>
      %34 = vector.shape_cast %33 : vector<1x16x256xf32> to vector<16x256xf32>
      %35 = arith.addf %32, %34 : vector<16x256xf32>
      %c0_22 = arith.constant 0 : index
      %c0_23 = arith.constant 0 : index
      %c0_24 = arith.constant 0 : index
      %36 = vector.load %arg6[%c0_22, %c0_23, %c0_24] : memref<1x16x256xf32, #tpu.memory_space<vmem>>, vector<1x16x256xf32>
      %37 = vector.shape_cast %36 : vector<1x16x256xf32> to vector<16x256xf32>
      %38 = vector.shape_cast %35 : vector<16x256xf32> to vector<1x16x256xf32>
      tpu.vector_store %arg6[%c0_22, %c0_23, %c0_24], %38 {strides = array<i32>} : memref<1x16x256xf32, #tpu.memory_space<vmem>>, vector<1x16x256xf32>,
    } else {
    }
    return
  }
  func.func @transform_0(%arg0: i32, %arg1: i32) -> (i32, i32, i32) {
    %c0_i32 = arith.constant 0 : i32
    %c0_i32_0 = arith.constant 0 : i32
    return %arg0, %c0_i32, %arg1 : i32, i32, i32
  }
  func.func @transform_1(%arg0: i32, %arg1: i32) -> (i32, i32) {
    %c0_i32 = arith.constant 0 : i32
    %c0_i32_0 = arith.constant 0 : i32
    return %arg1, %c0_i32 : i32, i32
  }
  func.func @transform_2(%arg0: i32, %arg1: i32) -> (i32, i32) {
    %c0_i32 = arith.constant 0 : i32
    %c0_i32_0 = arith.constant 0 : i32
    %c0_i32_1 = arith.constant 0 : i32
    return %c0_i32, %c0_i32_0 : i32, i32
  }
  func.func @transform_3(%arg0: i32, %arg1: i32) -> (i32, i32, i32) {
    %c0_i32 = arith.constant 0 : i32
    %c0_i32_0 = arith.constant 0 : i32
    %c0_i32_1 = arith.constant 0 : i32
    return %arg0, %c0_i32, %c0_i32_0 : i32, i32, i32
  }
  func.func @transform_4(%arg0: i32, %arg1: i32) -> (i32, i32, i32) {
    %c0_i32 = arith.constant 0 : i32
    %c0_i32_0 = arith.constant 0 : i32
    %c0_i32_1 = arith.constant 0 : i32
    return %arg0, %c0_i32, %c0_i32_0 : i32, i32, i32
  }
}

module attributes {stable_mosaic.version = 11 : i64} {
  func.func @kernel(%arg0: i32, %arg1: i32, %arg2: memref<1x16x1024xbf16, #tpu.memory_space<vmem>>, %arg3: memref<1024x512xbf16, #tpu.memory_space<vmem>>, %arg4: memref<1x512xf32, #tpu.memory_space<vmem>>, %arg5: memref<512x512xf32, #tpu.memory_space<vmem>>, %arg6: memref<1x16x512xf32, #tpu.memory_space<vmem>>, %arg7: memref<16x512xf32, #tpu.memory_space<vmem>>) attributes {dimension_semantics = [#tpu.dimension_semantics<parallel>, #tpu.dimension_semantics<arbitrary>], iteration_bounds = array<i64: 2, 1>, scalar_prefetch = 0 : i64, scratch_operands = 1 : i64, tpu.core_type = #tpu.core_type<tc>, window_params = [{transform_indices = @transform_0, window_bounds = array<i64: 1, 16, 1024>}, {transform_indices = @transform_1, window_bounds = array<i64: 1024, 512>}, {pipeline_mode = #tpu.pipeline_mode<synchronous>, transform_indices = @transform_2, window_bounds = array<i64: 1, 512>}, {pipeline_mode = #tpu.pipeline_mode<synchronous>, transform_indices = @transform_3, window_bounds = array<i64: 512, 512>}, {transform_indices = @transform_4, window_bounds = array<i64: 1, 16, 512>}]} {
    %c0_i32 = arith.constant 0 : i32
    %0 = arith.cmpi eq, %arg1, %c0_i32 : i32
    %1 = arith.extui %0 : i1 to i32
    %c0_i32_0 = arith.constant 0 : i32
    %2 = arith.cmpi ne, %1, %c0_i32_0 : i32
    scf.if %2 {
      %cst_11 = arith.constant 0.000000e+00 : f32
      %13 = vector.broadcast %cst_11 : f32 to vector<16x512xf32>
      %c0_12 = arith.constant 0 : index
      %c0_13 = arith.constant 0 : index
      %14 = vector.load %arg7[%c0_12, %c0_13] : memref<16x512xf32, #tpu.memory_space<vmem>>, vector<16x512xf32>
      tpu.vector_store %arg7[%c0_12, %c0_13], %13 {strides = array<i32>} : memref<16x512xf32, #tpu.memory_space<vmem>>, vector<16x512xf32>,
    } else {
    }
    %c0 = arith.constant 0 : index
    %c0_1 = arith.constant 0 : index
    %3 = vector.load %arg7[%c0, %c0_1] : memref<16x512xf32, #tpu.memory_space<vmem>>, vector<16x512xf32>
    %c0_2 = arith.constant 0 : index
    %c0_3 = arith.constant 0 : index
    %c0_4 = arith.constant 0 : index
    %4 = vector.load %arg2[%c0_2, %c0_3, %c0_4] : memref<1x16x1024xbf16, #tpu.memory_space<vmem>>, vector<1x16x1024xbf16>
    %5 = vector.shape_cast %4 : vector<1x16x1024xbf16> to vector<16x1024xbf16>
    %c0_5 = arith.constant 0 : index
    %c0_6 = arith.constant 0 : index
    %6 = vector.load %arg3[%c0_5, %c0_6] : memref<1024x512xbf16, #tpu.memory_space<vmem>>, vector<1024x512xbf16>
    %cst = arith.constant dense<0.000000e+00> : vector<16x512xf32>
    %7 = tpu.matmul %5, %6, %cst {dimension_numbers = #tpu.dot_dimension_numbers<[1], [0], [0], [1], [0, 0, 1, 1], [], []>} : vector<16x1024xbf16>, vector<1024x512xbf16>, vector<16x512xf32> -> vector<16x512xf32>
    %8 = arith.addf %3, %7 : vector<16x512xf32>
    %c0_7 = arith.constant 0 : index
    %c0_8 = arith.constant 0 : index
    %9 = vector.load %arg7[%c0_7, %c0_8] : memref<16x512xf32, #tpu.memory_space<vmem>>, vector<16x512xf32>
    tpu.vector_store %arg7[%c0_7, %c0_8], %8 {strides = array<i32>} : memref<16x512xf32, #tpu.memory_space<vmem>>, vector<16x512xf32>,
    %c0_i32_9 = arith.constant 0 : i32
    %10 = arith.cmpi eq, %arg1, %c0_i32_9 : i32
    %11 = arith.extui %10 : i1 to i32
    %c0_i32_10 = arith.constant 0 : i32
    %12 = arith.cmpi ne, %11, %c0_i32_10 : i32
    scf.if %12 {
      %c0_11 = arith.constant 0 : index
      %c0_12 = arith.constant 0 : index
      %13 = vector.load %arg7[%c0_11, %c0_12] : memref<16x512xf32, #tpu.memory_space<vmem>>, vector<16x512xf32>
      %c0_13 = arith.constant 0 : index
      %c0_14 = arith.constant 0 : index
      %14 = vector.load %arg4[%c0_13, %c0_14] : memref<1x512xf32, #tpu.memory_space<vmem>>, vector<1x512xf32>
      %15 = vector.broadcast %14 : vector<1x512xf32> to vector<16x512xf32>
      %16 = arith.addf %13, %15 : vector<16x512xf32>
      %cst_15 = arith.constant dense<0.000000e+00> : vector<512xf32>
      %17 = vector.multi_reduction <add>, %16, %cst_15 [0] : vector<16x512xf32> to vector<512xf32>
      %18 = vector.shape_cast %17 : vector<512xf32> to vector<1x512xf32>
      %cst_16 = arith.constant 1.562500e-02 : f32
      %19 = vector.broadcast %cst_16 : f32 to vector<1x512xf32>
      %20 = arith.mulf %18, %19 : vector<1x512xf32>
      %c0_17 = arith.constant 0 : index
      %c0_18 = arith.constant 0 : index
      %21 = vector.load %arg5[%c0_17, %c0_18] : memref<512x512xf32, #tpu.memory_space<vmem>>, vector<512x512xf32>
      %cst_19 = arith.constant dense<0.000000e+00> : vector<1x512xf32>
      %22 = tpu.matmul %20, %21, %cst_19 {dimension_numbers = #tpu.dot_dimension_numbers<[1], [0], [0], [1], [0, 0, 1, 1], [], []>} : vector<1x512xf32>, vector<512x512xf32>, vector<1x512xf32> -> vector<1x512xf32>
      %23 = vector.broadcast %22 : vector<1x512xf32> to vector<16x512xf32>
      %24 = arith.subf %16, %23 : vector<16x512xf32>
      %25 = arith.mulf %24, %24 : vector<16x512xf32>
      %cst_20 = arith.constant dense<0.000000e+00> : vector<512xf32>
      %26 = vector.multi_reduction <add>, %25, %cst_20 [0] : vector<16x512xf32> to vector<512xf32>
      %27 = vector.shape_cast %26 : vector<512xf32> to vector<1x512xf32>
      %cst_21 = arith.constant 1.562500e-02 : f32
      %28 = vector.broadcast %cst_21 : f32 to vector<1x512xf32>
      %29 = arith.mulf %27, %28 : vector<1x512xf32>
      %c0_22 = arith.constant 0 : index
      %c0_23 = arith.constant 0 : index
      %30 = vector.load %arg5[%c0_22, %c0_23] : memref<512x512xf32, #tpu.memory_space<vmem>>, vector<512x512xf32>
      %cst_24 = arith.constant dense<0.000000e+00> : vector<1x512xf32>
      %31 = tpu.matmul %29, %30, %cst_24 {dimension_numbers = #tpu.dot_dimension_numbers<[1], [0], [0], [1], [0, 0, 1, 1], [], []>} : vector<1x512xf32>, vector<512x512xf32>, vector<1x512xf32> -> vector<1x512xf32>
      %cst_25 = arith.constant 9.99999974E-6 : f32
      %32 = vector.broadcast %cst_25 : f32 to vector<1x512xf32>
      %33 = arith.addf %31, %32 : vector<1x512xf32>
      %34 = math.rsqrt %33 : vector<1x512xf32>
      %35 = vector.broadcast %34 : vector<1x512xf32> to vector<16x512xf32>
      %36 = arith.mulf %24, %35 : vector<16x512xf32>
      %cst_26 = arith.constant 0.000000e+00 : f32
      %37 = vector.broadcast %cst_26 : f32 to vector<16x512xf32>
      %38 = arith.maximumf %36, %37 : vector<16x512xf32>
      %c0_27 = arith.constant 0 : index
      %c0_28 = arith.constant 0 : index
      %c0_29 = arith.constant 0 : index
      %39 = vector.load %arg6[%c0_27, %c0_28, %c0_29] : memref<1x16x512xf32, #tpu.memory_space<vmem>>, vector<1x16x512xf32>
      %40 = vector.shape_cast %39 : vector<1x16x512xf32> to vector<16x512xf32>
      %41 = vector.shape_cast %38 : vector<16x512xf32> to vector<1x16x512xf32>
      tpu.vector_store %arg6[%c0_27, %c0_28, %c0_29], %41 {strides = array<i32>} : memref<1x16x512xf32, #tpu.memory_space<vmem>>, vector<1x16x512xf32>,
    } else {
    }
    return
  }
  func.func @transform_0(%arg0: i32, %arg1: i32) -> (i32, i32, i32) {
    %c0_i32 = arith.constant 0 : i32
    %c0_i32_0 = arith.constant 0 : i32
    return %arg0, %c0_i32, %arg1 : i32, i32, i32
  }
  func.func @transform_1(%arg0: i32, %arg1: i32) -> (i32, i32) {
    %c0_i32 = arith.constant 0 : i32
    %c0_i32_0 = arith.constant 0 : i32
    return %arg1, %c0_i32 : i32, i32
  }
  func.func @transform_2(%arg0: i32, %arg1: i32) -> (i32, i32) {
    %c0_i32 = arith.constant 0 : i32
    %c0_i32_0 = arith.constant 0 : i32
    %c0_i32_1 = arith.constant 0 : i32
    return %c0_i32, %c0_i32_0 : i32, i32
  }
  func.func @transform_3(%arg0: i32, %arg1: i32) -> (i32, i32) {
    %c0_i32 = arith.constant 0 : i32
    %c0_i32_0 = arith.constant 0 : i32
    %c0_i32_1 = arith.constant 0 : i32
    return %c0_i32, %c0_i32_0 : i32, i32
  }
  func.func @transform_4(%arg0: i32, %arg1: i32) -> (i32, i32, i32) {
    %c0_i32 = arith.constant 0 : i32
    %c0_i32_0 = arith.constant 0 : i32
    %c0_i32_1 = arith.constant 0 : i32
    return %arg0, %c0_i32, %c0_i32_0 : i32, i32, i32
  }
}

module attributes {stable_mosaic.version = 11 : i64} {
  func.func @kernel(%arg0: i32, %arg1: i32, %arg2: memref<1x64x512xbf16, #tpu.memory_space<vmem>>, %arg3: memref<512x256xbf16, #tpu.memory_space<vmem>>, %arg4: memref<1x256xf32, #tpu.memory_space<vmem>>, %arg5: memref<256x256xf32, #tpu.memory_space<vmem>>, %arg6: memref<1x64x256xf32, #tpu.memory_space<vmem>>, %arg7: memref<64x256xf32, #tpu.memory_space<vmem>>) attributes {dimension_semantics = [#tpu.dimension_semantics<parallel>, #tpu.dimension_semantics<arbitrary>], iteration_bounds = array<i64: 2, 1>, scalar_prefetch = 0 : i64, scratch_operands = 1 : i64, tpu.core_type = #tpu.core_type<tc>, window_params = [{transform_indices = @transform_0, window_bounds = array<i64: 1, 64, 512>}, {transform_indices = @transform_1, window_bounds = array<i64: 512, 256>}, {pipeline_mode = #tpu.pipeline_mode<synchronous>, transform_indices = @transform_2, window_bounds = array<i64: 1, 256>}, {pipeline_mode = #tpu.pipeline_mode<synchronous>, transform_indices = @transform_3, window_bounds = array<i64: 256, 256>}, {transform_indices = @transform_4, window_bounds = array<i64: 1, 64, 256>}]} {
    %c0_i32 = arith.constant 0 : i32
    %0 = arith.cmpi eq, %arg1, %c0_i32 : i32
    %1 = arith.extui %0 : i1 to i32
    %c0_i32_0 = arith.constant 0 : i32
    %2 = arith.cmpi ne, %1, %c0_i32_0 : i32
    scf.if %2 {
      %cst_11 = arith.constant 0.000000e+00 : f32
      %13 = vector.broadcast %cst_11 : f32 to vector<64x256xf32>
      %c0_12 = arith.constant 0 : index
      %c0_13 = arith.constant 0 : index
      %14 = vector.load %arg7[%c0_12, %c0_13] : memref<64x256xf32, #tpu.memory_space<vmem>>, vector<64x256xf32>
      tpu.vector_store %arg7[%c0_12, %c0_13], %13 {strides = array<i32>} : memref<64x256xf32, #tpu.memory_space<vmem>>, vector<64x256xf32>,
    } else {
    }
    %c0 = arith.constant 0 : index
    %c0_1 = arith.constant 0 : index
    %3 = vector.load %arg7[%c0, %c0_1] : memref<64x256xf32, #tpu.memory_space<vmem>>, vector<64x256xf32>
    %c0_2 = arith.constant 0 : index
    %c0_3 = arith.constant 0 : index
    %c0_4 = arith.constant 0 : index
    %4 = vector.load %arg2[%c0_2, %c0_3, %c0_4] : memref<1x64x512xbf16, #tpu.memory_space<vmem>>, vector<1x64x512xbf16>
    %5 = vector.shape_cast %4 : vector<1x64x512xbf16> to vector<64x512xbf16>
    %c0_5 = arith.constant 0 : index
    %c0_6 = arith.constant 0 : index
    %6 = vector.load %arg3[%c0_5, %c0_6] : memref<512x256xbf16, #tpu.memory_space<vmem>>, vector<512x256xbf16>
    %cst = arith.constant dense<0.000000e+00> : vector<64x256xf32>
    %7 = tpu.matmul %5, %6, %cst {dimension_numbers = #tpu.dot_dimension_numbers<[1], [0], [0], [1], [0, 0, 1, 1], [], []>} : vector<64x512xbf16>, vector<512x256xbf16>, vector<64x256xf32> -> vector<64x256xf32>
    %8 = arith.addf %3, %7 : vector<64x256xf32>
    %c0_7 = arith.constant 0 : index
    %c0_8 = arith.constant 0 : index
    %9 = vector.load %arg7[%c0_7, %c0_8] : memref<64x256xf32, #tpu.memory_space<vmem>>, vector<64x256xf32>
    tpu.vector_store %arg7[%c0_7, %c0_8], %8 {strides = array<i32>} : memref<64x256xf32, #tpu.memory_space<vmem>>, vector<64x256xf32>,
    %c0_i32_9 = arith.constant 0 : i32
    %10 = arith.cmpi eq, %arg1, %c0_i32_9 : i32
    %11 = arith.extui %10 : i1 to i32
    %c0_i32_10 = arith.constant 0 : i32
    %12 = arith.cmpi ne, %11, %c0_i32_10 : i32
    scf.if %12 {
      %c0_11 = arith.constant 0 : index
      %c0_12 = arith.constant 0 : index
      %13 = vector.load %arg7[%c0_11, %c0_12] : memref<64x256xf32, #tpu.memory_space<vmem>>, vector<64x256xf32>
      %c0_13 = arith.constant 0 : index
      %c0_14 = arith.constant 0 : index
      %14 = vector.load %arg4[%c0_13, %c0_14] : memref<1x256xf32, #tpu.memory_space<vmem>>, vector<1x256xf32>
      %15 = vector.broadcast %14 : vector<1x256xf32> to vector<64x256xf32>
      %16 = arith.addf %13, %15 : vector<64x256xf32>
      %cst_15 = arith.constant dense<0.000000e+00> : vector<256xf32>
      %17 = vector.multi_reduction <add>, %16, %cst_15 [0] : vector<64x256xf32> to vector<256xf32>
      %18 = vector.shape_cast %17 : vector<256xf32> to vector<1x256xf32>
      %cst_16 = arith.constant 3.906250e-03 : f32
      %19 = vector.broadcast %cst_16 : f32 to vector<1x256xf32>
      %20 = arith.mulf %18, %19 : vector<1x256xf32>
      %c0_17 = arith.constant 0 : index
      %c0_18 = arith.constant 0 : index
      %21 = vector.load %arg5[%c0_17, %c0_18] : memref<256x256xf32, #tpu.memory_space<vmem>>, vector<256x256xf32>
      %cst_19 = arith.constant dense<0.000000e+00> : vector<1x256xf32>
      %22 = tpu.matmul %20, %21, %cst_19 {dimension_numbers = #tpu.dot_dimension_numbers<[1], [0], [0], [1], [0, 0, 1, 1], [], []>} : vector<1x256xf32>, vector<256x256xf32>, vector<1x256xf32> -> vector<1x256xf32>
      %23 = vector.broadcast %22 : vector<1x256xf32> to vector<64x256xf32>
      %24 = arith.subf %16, %23 : vector<64x256xf32>
      %25 = arith.mulf %24, %24 : vector<64x256xf32>
      %cst_20 = arith.constant dense<0.000000e+00> : vector<256xf32>
      %26 = vector.multi_reduction <add>, %25, %cst_20 [0] : vector<64x256xf32> to vector<256xf32>
      %27 = vector.shape_cast %26 : vector<256xf32> to vector<1x256xf32>
      %cst_21 = arith.constant 3.906250e-03 : f32
      %28 = vector.broadcast %cst_21 : f32 to vector<1x256xf32>
      %29 = arith.mulf %27, %28 : vector<1x256xf32>
      %c0_22 = arith.constant 0 : index
      %c0_23 = arith.constant 0 : index
      %30 = vector.load %arg5[%c0_22, %c0_23] : memref<256x256xf32, #tpu.memory_space<vmem>>, vector<256x256xf32>
      %cst_24 = arith.constant dense<0.000000e+00> : vector<1x256xf32>
      %31 = tpu.matmul %29, %30, %cst_24 {dimension_numbers = #tpu.dot_dimension_numbers<[1], [0], [0], [1], [0, 0, 1, 1], [], []>} : vector<1x256xf32>, vector<256x256xf32>, vector<1x256xf32> -> vector<1x256xf32>
      %cst_25 = arith.constant 9.99999974E-6 : f32
      %32 = vector.broadcast %cst_25 : f32 to vector<1x256xf32>
      %33 = arith.addf %31, %32 : vector<1x256xf32>
      %34 = math.rsqrt %33 : vector<1x256xf32>
      %35 = vector.broadcast %34 : vector<1x256xf32> to vector<64x256xf32>
      %36 = arith.mulf %24, %35 : vector<64x256xf32>
      %cst_26 = arith.constant 0.000000e+00 : f32
      %37 = vector.broadcast %cst_26 : f32 to vector<64x256xf32>
      %38 = arith.maximumf %36, %37 : vector<64x256xf32>
      %c0_27 = arith.constant 0 : index
      %c0_28 = arith.constant 0 : index
      %c0_29 = arith.constant 0 : index
      %39 = vector.load %arg6[%c0_27, %c0_28, %c0_29] : memref<1x64x256xf32, #tpu.memory_space<vmem>>, vector<1x64x256xf32>
      %40 = vector.shape_cast %39 : vector<1x64x256xf32> to vector<64x256xf32>
      %41 = vector.shape_cast %38 : vector<64x256xf32> to vector<1x64x256xf32>
      tpu.vector_store %arg6[%c0_27, %c0_28, %c0_29], %41 {strides = array<i32>} : memref<1x64x256xf32, #tpu.memory_space<vmem>>, vector<1x64x256xf32>,
    } else {
    }
    return
  }
  func.func @transform_0(%arg0: i32, %arg1: i32) -> (i32, i32, i32) {
    %c0_i32 = arith.constant 0 : i32
    %c0_i32_0 = arith.constant 0 : i32
    return %arg0, %c0_i32, %arg1 : i32, i32, i32
  }
  func.func @transform_1(%arg0: i32, %arg1: i32) -> (i32, i32) {
    %c0_i32 = arith.constant 0 : i32
    %c0_i32_0 = arith.constant 0 : i32
    return %arg1, %c0_i32 : i32, i32
  }
  func.func @transform_2(%arg0: i32, %arg1: i32) -> (i32, i32) {
    %c0_i32 = arith.constant 0 : i32
    %c0_i32_0 = arith.constant 0 : i32
    %c0_i32_1 = arith.constant 0 : i32
    return %c0_i32, %c0_i32_0 : i32, i32
  }
  func.func @transform_3(%arg0: i32, %arg1: i32) -> (i32, i32) {
    %c0_i32 = arith.constant 0 : i32
    %c0_i32_0 = arith.constant 0 : i32
    %c0_i32_1 = arith.constant 0 : i32
    return %c0_i32, %c0_i32_0 : i32, i32
  }
  func.func @transform_4(%arg0: i32, %arg1: i32) -> (i32, i32, i32) {
    %c0_i32 = arith.constant 0 : i32
    %c0_i32_0 = arith.constant 0 : i32
    %c0_i32_1 = arith.constant 0 : i32
    return %arg0, %c0_i32, %c0_i32_0 : i32, i32, i32
  }
}

module attributes {stable_mosaic.version = 11 : i64} {
  func.func @kernel(%arg0: i32, %arg1: i32, %arg2: memref<1x256x640xbf16, #tpu.memory_space<vmem>>, %arg3: memref<640x128xbf16, #tpu.memory_space<vmem>>, %arg4: memref<1x128xf32, #tpu.memory_space<vmem>>, %arg5: memref<1x256x128xf32, #tpu.memory_space<vmem>>, %arg6: memref<256x128xf32, #tpu.memory_space<vmem>>) attributes {dimension_semantics = [#tpu.dimension_semantics<parallel>, #tpu.dimension_semantics<arbitrary>], iteration_bounds = array<i64: 2, 5>, scalar_prefetch = 0 : i64, scratch_operands = 1 : i64, tpu.core_type = #tpu.core_type<tc>, window_params = [{transform_indices = @transform_0, window_bounds = array<i64: 1, 256, 640>}, {transform_indices = @transform_1, window_bounds = array<i64: 640, 128>}, {pipeline_mode = #tpu.pipeline_mode<synchronous>, transform_indices = @transform_2, window_bounds = array<i64: 1, 128>}, {transform_indices = @transform_3, window_bounds = array<i64: 1, 256, 128>}]} {
    %c0_i32 = arith.constant 0 : i32
    %0 = arith.cmpi eq, %arg1, %c0_i32 : i32
    %1 = arith.extui %0 : i1 to i32
    %c0_i32_0 = arith.constant 0 : i32
    %2 = arith.cmpi ne, %1, %c0_i32_0 : i32
    scf.if %2 {
      %cst_10 = arith.constant 0.000000e+00 : f32
      %13 = vector.broadcast %cst_10 : f32 to vector<256x128xf32>
      %c0_11 = arith.constant 0 : index
      %c0_12 = arith.constant 0 : index
      %14 = vector.load %arg6[%c0_11, %c0_12] : memref<256x128xf32, #tpu.memory_space<vmem>>, vector<256x128xf32>
      tpu.vector_store %arg6[%c0_11, %c0_12], %13 {strides = array<i32>} : memref<256x128xf32, #tpu.memory_space<vmem>>, vector<256x128xf32>,
    } else {
    }
    %c0 = arith.constant 0 : index
    %c0_1 = arith.constant 0 : index
    %3 = vector.load %arg6[%c0, %c0_1] : memref<256x128xf32, #tpu.memory_space<vmem>>, vector<256x128xf32>
    %c0_2 = arith.constant 0 : index
    %c0_3 = arith.constant 0 : index
    %c0_4 = arith.constant 0 : index
    %4 = vector.load %arg2[%c0_2, %c0_3, %c0_4] : memref<1x256x640xbf16, #tpu.memory_space<vmem>>, vector<1x256x640xbf16>
    %5 = vector.shape_cast %4 : vector<1x256x640xbf16> to vector<256x640xbf16>
    %c0_5 = arith.constant 0 : index
    %c0_6 = arith.constant 0 : index
    %6 = vector.load %arg3[%c0_5, %c0_6] : memref<640x128xbf16, #tpu.memory_space<vmem>>, vector<640x128xbf16>
    %cst = arith.constant dense<0.000000e+00> : vector<256x128xf32>
    %7 = tpu.matmul %5, %6, %cst {dimension_numbers = #tpu.dot_dimension_numbers<[1], [0], [0], [1], [0, 0, 1, 1], [], []>} : vector<256x640xbf16>, vector<640x128xbf16>, vector<256x128xf32> -> vector<256x128xf32>
    %8 = arith.addf %3, %7 : vector<256x128xf32>
    %c0_7 = arith.constant 0 : index
    %c0_8 = arith.constant 0 : index
    %9 = vector.load %arg6[%c0_7, %c0_8] : memref<256x128xf32, #tpu.memory_space<vmem>>, vector<256x128xf32>
    tpu.vector_store %arg6[%c0_7, %c0_8], %8 {strides = array<i32>} : memref<256x128xf32, #tpu.memory_space<vmem>>, vector<256x128xf32>,
    %c4_i32 = arith.constant 4 : i32
    %10 = arith.cmpi eq, %arg1, %c4_i32 : i32
    %11 = arith.extui %10 : i1 to i32
    %c0_i32_9 = arith.constant 0 : i32
    %12 = arith.cmpi ne, %11, %c0_i32_9 : i32
    scf.if %12 {
      %c0_10 = arith.constant 0 : index
      %c0_11 = arith.constant 0 : index
      %13 = vector.load %arg6[%c0_10, %c0_11] : memref<256x128xf32, #tpu.memory_space<vmem>>, vector<256x128xf32>
      %c0_12 = arith.constant 0 : index
      %c0_13 = arith.constant 0 : index
      %14 = vector.load %arg4[%c0_12, %c0_13] : memref<1x128xf32, #tpu.memory_space<vmem>>, vector<1x128xf32>
      %15 = vector.broadcast %14 : vector<1x128xf32> to vector<256x128xf32>
      %16 = arith.addf %13, %15 : vector<256x128xf32>
      %cst_14 = arith.constant 0.000000e+00 : f32
      %17 = vector.broadcast %cst_14 : f32 to vector<256x128xf32>
      %18 = arith.subf %17, %16 : vector<256x128xf32>
      %19 = math.exp %18 : vector<256x128xf32>
      %cst_15 = arith.constant 1.000000e+00 : f32
      %20 = vector.broadcast %cst_15 : f32 to vector<256x128xf32>
      %21 = arith.addf %20, %19 : vector<256x128xf32>
      %cst_16 = arith.constant 1.000000e+00 : f32
      %22 = vector.broadcast %cst_16 : f32 to vector<256x128xf32>
      %23 = arith.divf %22, %21 : vector<256x128xf32>
      %c0_17 = arith.constant 0 : index
      %c0_18 = arith.constant 0 : index
      %c0_19 = arith.constant 0 : index
      %24 = vector.load %arg5[%c0_17, %c0_18, %c0_19] : memref<1x256x128xf32, #tpu.memory_space<vmem>>, vector<1x256x128xf32>
      %25 = vector.shape_cast %24 : vector<1x256x128xf32> to vector<256x128xf32>
      %26 = vector.shape_cast %23 : vector<256x128xf32> to vector<1x256x128xf32>
      tpu.vector_store %arg5[%c0_17, %c0_18, %c0_19], %26 {strides = array<i32>} : memref<1x256x128xf32, #tpu.memory_space<vmem>>, vector<1x256x128xf32>,
    } else {
    }
    return
  }
  func.func @transform_0(%arg0: i32, %arg1: i32) -> (i32, i32, i32) {
    %c0_i32 = arith.constant 0 : i32
    %c0_i32_0 = arith.constant 0 : i32
    return %arg0, %c0_i32, %arg1 : i32, i32, i32
  }
  func.func @transform_1(%arg0: i32, %arg1: i32) -> (i32, i32) {
    %c0_i32 = arith.constant 0 : i32
    %c0_i32_0 = arith.constant 0 : i32
    return %arg1, %c0_i32 : i32, i32
  }
  func.func @transform_2(%arg0: i32, %arg1: i32) -> (i32, i32) {
    %c0_i32 = arith.constant 0 : i32
    %c0_i32_0 = arith.constant 0 : i32
    %c0_i32_1 = arith.constant 0 : i32
    return %c0_i32, %c0_i32_0 : i32, i32
  }
  func.func @transform_3(%arg0: i32, %arg1: i32) -> (i32, i32, i32) {
    %c0_i32 = arith.constant 0 : i32
    %c0_i32_0 = arith.constant 0 : i32
    %c0_i32_1 = arith.constant 0 : i32
    return %arg0, %c0_i32, %c0_i32_0 : i32, i32, i32
  }
}

</mosaic_0001>

<bundles_post_ra>
// kernel: line_drawing_forward.12
= control target key start
LH: loop header
LB: loop body
LE: loop exit
PB: predicated region body
PF: predicated region fallthrough
CT: control target
= control target key end

     0   :  { %s1445_s12 = smov 0   ;;  %s1447_s13 = smov 0   ;;  %s1913_s0 = inlined_call_operand.vmem [shape: bf16[2,256,147], index: 0, kind: input, shape index: {}]   ;;  %s1914_s1 = inlined_call_operand.vmem [shape: bf16[147,128], index: 1, kind: input, shape index: {}]   ;;  %s1915_s2 = inlined_call_operand.vmem [shape: f32[1,128], index: 2, kind: input, shape index: {}]   ;;  %s1916_s3 = inlined_call_operand.vmem [shape: f32[2,256,128], index: 3, kind: output, shape index: {}]  }
   0x1   :  { %s1449_s14 = smov 0  }
   0x2 LB: > { %s25_s15 = sadd.s32 1, %s1417_s13  ;;  %p1225_p0 = scmp.ge.s32.totalorder %s1421_s14, 1  ;;  %s1421_s14 = sphi %s1449_s14, %s13_s14   ;;  %s1417_s13 = sphi %s1447_s13, %s1918_s13   ;;  %s1413_s12 = sphi %s1445_s12, %s1917_s12  }
   0x3   : > { %p27_p1 = scmp.ge.s32.totalorder %s25_s15, 2  ;;  %p167_p2 = scmp.lt.s32.totalorder %s1421_s14, 3 }
   0x5   : > { %s1920_s15 = smov (%p27_p1, %s25_s15), 0  ;;  %p168_p3 = pnand %p1225_p0, %p167_p2 }
   0x6   : > { %p201_p4 = scmp.lt.s32.totalorder (!%p168_p3), %s1413_s12, 1 }
   0x7   : > { %171 = sbr.rel (%p168_p3) target bundleno = 483 (0x1e3), region = 32 }
   0xc   : > { %v1339_v0 = vld [vmem:[%s1914_s1 + $0x38] sm:$0xff]   ;;  %v1423_v1 = vmov 0   ;;  %v1340_v2 = vld [vmem:[%s1914_s1 + $0x30] sm:$0xff]   ;;  %v1341_v3 = vld [vmem:[%s1914_s1 + $0x28] sm:$0xff]   ;;  %s1922_s12 = smov (!%p201_p4, %s1413_s12), 1  ;;  %vm542_vm0 = vcmask 154624  }
   0xd   : > { %598 = vmatprep.subr.bf16.mxu0 %v1423_v1  ;;  %1293 = vmatprep.subr.bf16.mxu1 %v1423_v1  ;;  %v1342_v4 = vld [vmem:[%s1914_s1 + $0x20] sm:$0xff]   ;;  %s1291_s24 = sshll.u32 %s1922_s12, 8  ;;  %v1343_v5 = vld [vmem:[%s1914_s1 + $0x18] sm:$0xff]   ;;  %v1344_v7 = vld [vmem:[%s1914_s1 + $0x10] sm:$0xff]   ;;  %vm591_vm1 = vcmask 1040384   ;;  %vm592_vm2 = vcmask 1041408  }
   0xe   : > { %599 = vmatpush1.bf16.msra.mxu0 %v1339_v0  ;;  %1303 = vmatpush1.bf16.msra.mxu1 %v1339_v0  ;;  %s1483_s27 = scalar_lea.vmem %s1913_s0, %s1291_s24  ;;  %v1345_v9 = vld [vmem:[%s1914_s1 + $0x8] sm:$0xff]   ;;  %v1424_v10 = vmov 65535   ;;  %v1346_v12 = vld [vmem:[%s1914_s1] sm:$0xff]   ;;  %s1846_s21 = scalar_lea.vmem %s1916_s3, %s1291_s24 }
   0xf   : > { %600 = vmatprep.subr.bf16.mxu0 %v1423_v1  ;;  %1294 = vmatprep.subr.bf16.mxu1 %v1423_v1  ;;  %v1351_v6 = vld [vmem:[%s1483_s27 + $0x4] ss:$8 sps:$4 sm:$0xff]   ;;  %v593_v11 = vsel %vm591_vm1, 4294967295, %v1424_v10  ;;  %v1347_v13 = vld [vmem:[%s1914_s1 + $0x48] ss:$0 sps:$4 sm:$0x33]  }
  0x10   : > { %1272 = vmatprep.mubr.msk.bf16.mxu0 %vm542_vm0, %v1351_v6  ;;  %v1363_v8 = vld [vmem:[%s1483_s27 + $0x84] ss:$8 sps:$4 sm:$0xff]   ;;  %v594_v14 = vsel %vm592_vm2, %v593_v11, 0  ;;  %v1349_v17 = vld [vmem:[%s1483_s27] ss:$8 sps:$4 sm:$0xff]  }
  0x11   : > { %1280 = vmatprep.mubr.msk.bf16.mxu1 %vm542_vm0, %v1363_v8  ;;  %v596_v15 = vand.u32 %v1347_v13, %v594_v14  ;;  %v1348_v16 = vld [vmem:[%s1914_s1 + $0x40] sm:$0xff]   ;;  %v1352_v19 = vld [vmem:[%s1483_s27 + $0x14] ss:$8 sps:$4 sm:$0xff]   ;;  %v1354_v21 = vld [vmem:[%s1483_s27 + $0x10] ss:$8 sps:$4 sm:$0xff]  }
  0x12   : > { %601 = vmatpush1.bf16.msra.mxu0 %v1340_v2  ;;  %1304 = vmatpush1.bf16.msra.mxu1 %v1340_v2  ;;  %v1361_v18 = vld [vmem:[%s1483_s27 + $0x80] ss:$8 sps:$4 sm:$0xff]   ;;  %v1367_v20 = vld [vmem:[%s1483_s27 + $0x94] ss:$8 sps:$4 sm:$0xff]   ;;  %v1369_v22 = vld [vmem:[%s1483_s27 + $0x90] ss:$8 sps:$4 sm:$0xff]  }
  0x13   : > { %602 = vmatprep.subr.bf16.mxu0 %v1423_v1  ;;  %1295 = vmatprep.subr.bf16.mxu1 %v1423_v1  ;;  %v1355_v23 = vld [vmem:[%s1483_s27 + $0x24] ss:$8 sps:$4 sm:$0xff]   ;;  %v1357_v25 = vld [vmem:[%s1483_s27 + $0x20] ss:$8 sps:$4 sm:$0xff]   ;;  %v1358_v27 = vld [vmem:[%s1483_s27 + $0x34] ss:$8 sps:$4 sm:$0xff]  }
  0x14   : > { %v1373_v24 = vld [vmem:[%s1483_s27 + $0xa4] ss:$8 sps:$4 sm:$0xff]   ;;  %v1375_v26 = vld [vmem:[%s1483_s27 + $0xa0] ss:$8 sps:$4 sm:$0xff]   ;;  %v1379_v28 = vld [vmem:[%s1483_s27 + $0xb4] ss:$8 sps:$4 sm:$0xff]  }
  0x15   : > { %v1360_v29 = vld [vmem:[%s1483_s27 + $0x30] ss:$8 sps:$4 sm:$0xff]   ;;  %v1364_v31 = vld [vmem:[%s1483_s27 + $0x44] ss:$8 sps:$4 sm:$0xff]   ;;  %v1366_v33 = vld [vmem:[%s1483_s27 + $0x40] ss:$8 sps:$4 sm:$0xff]  }
  0x16   : > { %603 = vmatpush1.bf16.msra.mxu0 %v1341_v3  ;;  %1305 = vmatpush1.bf16.msra.mxu1 %v1341_v3  ;;  %v1381_v30 = vld [vmem:[%s1483_s27 + $0xb0] ss:$8 sps:$4 sm:$0xff]   ;;  %v1385_v32 = vld [vmem:[%s1483_s27 + $0xc4] ss:$8 sps:$4 sm:$0xff]   ;;  %v1387_v34 = vld [vmem:[%s1483_s27 + $0xc0] ss:$8 sps:$4 sm:$0xff]  }
  0x17   : > { %604 = vmatprep.subr.bf16.mxu0 %v1423_v1  ;;  %1296 = vmatprep.subr.bf16.mxu1 %v1423_v1  ;;  %v1370_v35 = vld [vmem:[%s1483_s27 + $0x54] ss:$8 sps:$4 sm:$0xff]   ;;  %v1372_v37 = vld [vmem:[%s1483_s27 + $0x50] ss:$8 sps:$4 sm:$0xff]   ;;  %v1376_v39 = vld [vmem:[%s1483_s27 + $0x64] ss:$8 sps:$4 sm:$0xff]  }
  0x18   : > { %v1388_v36 = vld [vmem:[%s1483_s27 + $0xd4] ss:$8 sps:$4 sm:$0xff]   ;;  %v1390_v38 = vld [vmem:[%s1483_s27 + $0xd0] ss:$8 sps:$4 sm:$0xff]   ;;  %v1391_v40 = vld [vmem:[%s1483_s27 + $0xe4] ss:$8 sps:$4 sm:$0xff]  }
  0x19   : > { %v1378_v41 = vld [vmem:[%s1483_s27 + $0x60] ss:$8 sps:$4 sm:$0xff]   ;;  %v1382_v43 = vld [vmem:[%s1483_s27 + $0x74] ss:$8 sps:$4 sm:$0xff]   ;;  %v1384_v45 = vld [vmem:[%s1483_s27 + $0x70] ss:$8 sps:$4 sm:$0xff]  }
  0x1a   : > { %605 = vmatpush1.bf16.msra.mxu0 %v1342_v4  ;;  %1306 = vmatpush1.bf16.msra.mxu1 %v1342_v4  ;;  %v1393_v42 = vld [vmem:[%s1483_s27 + $0xe0] ss:$8 sps:$4 sm:$0xff]   ;;  %v1394_v44 = vld [vmem:[%s1483_s27 + $0xf4] ss:$8 sps:$4 sm:$0xff]   ;;  %v1396_v46 = vld [vmem:[%s1483_s27 + $0xf0] ss:$8 sps:$4 sm:$0xff]  }
  0x1b   : > { %606 = vmatprep.subr.bf16.mxu0 %v1423_v1  ;;  %1297 = vmatprep.subr.bf16.mxu1 %v1423_v1  ;;  %v1570_v13 = vld [vmem:[%s1915_s2] ss:$0 sm:$0xff] }
  0x1e   : > { %607 = vmatpush1.bf16.msra.mxu0 %v1343_v5  ;;  %1307 = vmatpush1.bf16.msra.mxu1 %v1343_v5 }
  0x1f   : > { %608 = vmatprep.subr.bf16.mxu0 %v1423_v1  ;;  %1298 = vmatprep.subr.bf16.mxu1 %v1423_v1 }
  0x22   : > { %609 = vmatpush1.bf16.msra.mxu0 %v1344_v7  ;;  %1308 = vmatpush1.bf16.msra.mxu1 %v1344_v7 }
  0x23   : > { %610 = vmatprep.subr.bf16.mxu0 %v1423_v1  ;;  %1299 = vmatprep.subr.bf16.mxu1 %v1423_v1 }
  0x26   : > { %611 = vmatpush1.bf16.msra.mxu0 %v1345_v9  ;;  %1309 = vmatpush1.bf16.msra.mxu1 %v1345_v9 }
  0x27   : > { %612 = vmatprep.subr.bf16.mxu0 %v1423_v1  ;;  %1300 = vmatprep.subr.bf16.mxu1 %v1423_v1 }
  0x2a   : > { %613 = vmatpush1.bf16.msra.mxu0 %v1346_v12  ;;  %1310 = vmatpush1.bf16.msra.mxu1 %v1346_v12 }
  0x2b   : > { %626 = vmatprep.subr.bf16.mxu0 %v1423_v1  ;;  %1301 = vmatprep.subr.bf16.mxu1 %v1423_v1 }
  0x2e   : > { %627 = vmatpush2.bf16.msra.mxu0 %v596_v15  ;;  %1311 = vmatpush2.bf16.msra.mxu1 %v596_v15 }
  0x2f   : > { %628 = vmatprep.subr.bf16.mxu0 %v1423_v1  ;;  %1302 = vmatprep.subr.bf16.mxu1 %v1423_v1 }
  0x32   : > { %629 = vmatpush2.bf16.msra.mxu0 %v1348_v16  ;;  %1312 = vmatpush2.bf16.msra.mxu1 %v1348_v16 }
  0x35   : > { %631 = vmatmul.mubr.bf16.vlgmr.msra.gmra.mxu0 %v1349_v17  ;;  %695 = vmatmul.mubr.bf16.vlgmr.msra.gmra.mxu1 %v1361_v18 }
  0x36   : > { %1273 = vmatprep.mubr.msk.bf16.mxu0 %vm542_vm0, %v1352_v19  ;;  %1281 = vmatprep.mubr.msk.bf16.mxu1 %vm542_vm0, %v1367_v20 }
  0x3d   : > { %639 = vmatmul.mubr.bf16.gmra.mxu0 %v1354_v21  ;;  %703 = vmatmul.mubr.bf16.gmra.mxu1 %v1369_v22 }
  0x3e   : > { %1274 = vmatprep.mubr.msk.bf16.mxu0 %vm542_vm0, %v1355_v23  ;;  %1282 = vmatprep.mubr.msk.bf16.mxu1 %vm542_vm0, %v1373_v24 }
  0x45   : > { %647 = vmatmul.mubr.bf16.gmra.mxu0 %v1357_v25  ;;  %711 = vmatmul.mubr.bf16.gmra.mxu1 %v1375_v26 }
  0x46   : > { %1275 = vmatprep.mubr.msk.bf16.mxu0 %vm542_vm0, %v1358_v27  ;;  %1283 = vmatprep.mubr.msk.bf16.mxu1 %vm542_vm0, %v1379_v28 }
  0x4d   : > { %655 = vmatmul.mubr.bf16.gmra.mxu0 %v1360_v29  ;;  %719 = vmatmul.mubr.bf16.gmra.mxu1 %v1381_v30 }
  0x4e   : > { %1276 = vmatprep.mubr.msk.bf16.mxu0 %vm542_vm0, %v1364_v31  ;;  %1284 = vmatprep.mubr.msk.bf16.mxu1 %vm542_vm0, %v1385_v32 }
  0x55   : > { %663 = vmatmul.mubr.bf16.gmra.mxu0 %v1366_v33  ;;  %727 = vmatmul.mubr.bf16.gmra.mxu1 %v1387_v34 }
  0x56   : > { %1277 = vmatprep.mubr.msk.bf16.mxu0 %vm542_vm0, %v1370_v35  ;;  %1285 = vmatprep.mubr.msk.bf16.mxu1 %vm542_vm0, %v1388_v36 }
  0x5d   : > { %671 = vmatmul.mubr.bf16.gmra.mxu0 %v1372_v37  ;;  %735 = vmatmul.mubr.bf16.gmra.mxu1 %v1390_v38 }
  0x5e   : > { %1278 = vmatprep.mubr.msk.bf16.mxu0 %vm542_vm0, %v1376_v39  ;;  %1286 = vmatprep.mubr.msk.bf16.mxu1 %vm542_vm0, %v1391_v40 }
  0x65   : > { %679 = vmatmul.mubr.bf16.gmra.mxu0 %v1378_v41  ;;  %743 = vmatmul.mubr.bf16.gmra.mxu1 %v1393_v42 }
  0x66   : > { %1279 = vmatprep.mubr.msk.bf16.mxu0 %vm542_vm0, %v1382_v43  ;;  %1287 = vmatprep.mubr.msk.bf16.mxu1 %vm542_vm0, %v1394_v44 }
  0x6d   : > { %687 = vmatmul.mubr.bf16.gmra.mxu0 %v1384_v45  ;;  %751 = vmatmul.mubr.bf16.gmra.mxu1 %v1396_v46 }
  0xf5   : > { %v632_v47 = vpop.f32.mrf.mxu0  ;;  %v1551_v48 = vpop.f32.mrf.mxu1 }
  0xf6   : > { %v1578_v19 = vadd.f32 %v1570_v13, %v632_v47 }
  0xf7   : > { %v634_v49 = vpop.f32.mrf.mxu0  ;;  %v698_v50 = vpop.f32.mrf.mxu1 }
  0xf9   : > { %v635_v51 = vpop.f32.mrf.mxu0  ;;  %v1553_v52 = vpop.f32.mrf.mxu1 }
  0xfa   : > { %v1573_v16 = vadd.f32 %v1570_v13, %v635_v51 }
  0xfb   : > { %v637_v53 = vpop.f32.mrf.mxu0  ;;  %v701_v54 = vpop.f32.mrf.mxu1 }
  0xfc   : > { %v897_v23 = vadd.f32 %v1573_v16, %v1578_v19 }
  0xfd   : > { %v640_v55 = vpop.f32.mrf.mxu0  ;;  %v1555_v56 = vpop.f32.mrf.mxu1 }
  0xfe   : > { %v1581_v20 = vadd.f32 %v1570_v13, %v640_v55 }
  0xff   : > { %v642_v57 = vpop.f32.mrf.mxu0  ;;  %v706_v58 = vpop.f32.mrf.mxu1 }
 0x100   : > { %v898_v27 = vadd.f32 %v897_v23, %v1581_v20 }
 0x101   : > { %v643_v59 = vpop.f32.mrf.mxu0  ;;  %v1557_v60 = vpop.f32.mrf.mxu1 }
 0x102   : > { %v1586_v24 = vadd.f32 %v1570_v13, %v643_v59 }
 0x103   : > { %v645_v61 = vpop.f32.mrf.mxu0  ;;  %v709_v62 = vpop.f32.mrf.mxu1 }
 0x104   : > { %v899_v31 = vadd.f32 %v898_v27, %v1586_v24 }
 0x105   : > { %v648_v63 = vpop.f32.mrf.mxu0  ;;  %v1559_v0 = vpop.f32.mrf.mxu1 }
 0x106   : > { %v1592_v28 = vadd.f32 %v1570_v13, %v648_v63 }
 0x107   : > { %v650_v1 = vpop.f32.mrf.mxu0  ;;  %v714_v2 = vpop.f32.mrf.mxu1 }
 0x108   : > { %v900_v35 = vadd.f32 %v899_v31, %v1592_v28 }
 0x109   : > { %v651_v3 = vpop.f32.mrf.mxu0  ;;  %v1561_v4 = vpop.f32.mrf.mxu1 }
 0x10a   : > { %v1596_v32 = vadd.f32 %v1570_v13, %v651_v3 }
 0x10b   : > { %v653_v5 = vpop.f32.mrf.mxu0  ;;  %v717_v6 = vpop.f32.mrf.mxu1 }
 0x10c   : > { %v901_v39 = vadd.f32 %v900_v35, %v1596_v32 }
 0x10d   : > { %v656_v7 = vpop.f32.mrf.mxu0  ;;  %v1563_v8 = vpop.f32.mrf.mxu1 }
 0x10e   : > { %v1602_v36 = vadd.f32 %v1570_v13, %v656_v7 }
 0x10f   : > { %v658_v9 = vpop.f32.mrf.mxu0  ;;  %v722_v10 = vpop.f32.mrf.mxu1 }
 0x110   : > { %v902_v43 = vadd.f32 %v901_v39, %v1602_v36  ;;  %v884_v39 = vadd.f32 %v1570_v13, %v1557_v60 }
 0x111   : > { %v659_v11 = vpop.f32.mrf.mxu0  ;;  %v1565_v12 = vpop.f32.mrf.mxu1 }
 0x112   : > { %v1606_v40 = vadd.f32 %v1570_v13, %v659_v11 }
 0x113   : > { %v661_v14 = vpop.f32.mrf.mxu0  ;;  %v725_v15 = vpop.f32.mrf.mxu1 }
 0x114   : > { %v903_v47 = vadd.f32 %v902_v43, %v1606_v40  ;;  %v885_v43 = vadd.f32 %v1570_v13, %v1559_v0 }
 0x115   : > { %v664_v17 = vpop.f32.mrf.mxu0  ;;  %v1575_v18 = vpop.f32.mrf.mxu1 }
 0x116   : > { %v1610_v44 = vadd.f32 %v1570_v13, %v664_v17  ;;  %v889_v60 = vadd.f32 %v1570_v13, %v1575_v18 }
 0x117   : > { %v666_v21 = vpop.f32.mrf.mxu0  ;;  %v730_v22 = vpop.f32.mrf.mxu1 }
 0x118   : > { %v904_v53 = vadd.f32 %v903_v47, %v1610_v44 }
 0x119   : > { %v667_v25 = vpop.f32.mrf.mxu0  ;;  %v1588_v26 = vpop.f32.mrf.mxu1 }
 0x11a   : > { %v1614_v49 = vadd.f32 %v1570_v13, %v667_v25  ;;  %v890_v0 = vadd.f32 %v1570_v13, %v1588_v26 }
 0x11b   : > { %v669_v29 = vpop.f32.mrf.mxu0  ;;  %v733_v30 = vpop.f32.mrf.mxu1 }
 0x11c   : > { %v905_v58 = vadd.f32 %v904_v53, %v1614_v49  ;;  %v881_v30 = vadd.f32 %v1570_v13, %v1551_v48  ;;  %v886_v48 = vadd.f32 %v1570_v13, %v1561_v4 }
 0x11d   : > { %v672_v33 = vpop.f32.mrf.mxu0  ;;  %v1598_v34 = vpop.f32.mrf.mxu1 }
 0x11e   : > { %v1618_v54 = vadd.f32 %v1570_v13, %v672_v33  ;;  %v882_v33 = vadd.f32 %v1570_v13, %v1553_v52  ;;  %v887_v52 = vadd.f32 %v1570_v13, %v1563_v8  ;;  %v891_v4 = vadd.f32 %v1570_v13, %v1598_v34 }
 0x11f   : > { %v674_v37 = vpop.f32.mrf.mxu0  ;;  %v738_v38 = vpop.f32.mrf.mxu1 }
 0x120   : > { %v906_v63 = vadd.f32 %v905_v58, %v1618_v54  ;;  %v883_v37 = vadd.f32 %v1570_v13, %v1555_v56  ;;  %v888_v56 = vadd.f32 %v1570_v13, %v1565_v12 }
 0x121   : > { %v675_v41 = vpop.f32.mrf.mxu0  ;;  %v739_v42 = vpop.f32.mrf.mxu1 }
 0x122   : > { %v1622_v59 = vadd.f32 %v1570_v13, %v675_v41  ;;  %v892_v8 = vadd.f32 %v1570_v13, %v739_v42 }
 0x123   : > { %v677_v45 = vpop.f32.mrf.mxu0  ;;  %v741_v46 = vpop.f32.mrf.mxu1 }
 0x124   : > { %v907_v5 = vadd.f32 %v906_v63, %v1622_v59 }
 0x125   : > { %v680_v50 = vpop.f32.mrf.mxu0  ;;  %v744_v51 = vpop.f32.mrf.mxu1 }
 0x126   : > { %v877_v1 = vadd.f32 %v1570_v13, %v680_v50  ;;  %v893_v63 = vadd.f32 %v1570_v13, %v744_v51 }
 0x127   : > { %v682_v55 = vpop.f32.mrf.mxu0  ;;  %v746_v57 = vpop.f32.mrf.mxu1 }
 0x128   : > { %v908_v10 = vadd.f32 %v907_v5, %v877_v1 }
 0x129   : > { %v683_v61 = vpop.f32.mrf.mxu0  ;;  %v747_v62 = vpop.f32.mrf.mxu1 }
 0x12a   : > { %v878_v6 = vadd.f32 %v1570_v13, %v683_v61 }
 0x12b   : > { %v685_v2 = vpop.f32.mrf.mxu0  ;;  %v749_v3 = vpop.f32.mrf.mxu1 }
 0x12c   : > { %v909_v17 = vadd.f32 %v908_v10, %v878_v6  ;;  %v894_v2 = vadd.f32 %v1570_v13, %v747_v62 }
 0x12d   : > { %v688_v7 = vpop.f32.mrf.mxu0  ;;  %v752_v9 = vpop.f32.mrf.mxu1 }
 0x12e   : > { %v879_v11 = vadd.f32 %v1570_v13, %v688_v7  ;;  %v895_v18 = vadd.f32 %v1570_v13, %v752_v9 }
 0x12f   : > { %v690_v14 = vpop.f32.mrf.mxu0  ;;  %v754_v15 = vpop.f32.mrf.mxu1 }
 0x130   : > { %v910_v23 = vadd.f32 %v909_v17, %v879_v11 }
 0x131   : > { %v691_v21 = vpop.f32.mrf.mxu0  ;;  %v755_v22 = vpop.f32.mrf.mxu1 }
 0x132   : > { %v880_v25 = vadd.f32 %v1570_v13, %v691_v21  ;;  %v896_v26 = vadd.f32 %v1570_v13, %v755_v22 }
 0x133   : > { %v693_v27 = vpop.f32.mrf.mxu0  ;;  %v757_v29 = vpop.f32.mrf.mxu1 }
 0x134   : > { %v911_v31 = vadd.f32 %v910_v23, %v880_v25 }
 0x136   : > { %v912_v35 = vadd.f32 %v911_v31, %v881_v30 }
 0x138   : > { %v913_v38 = vadd.f32 %v912_v35, %v882_v33 }
 0x13a   : > { %v914_v41 = vadd.f32 %v913_v38, %v883_v37 }
 0x13c   : > { %v915_v45 = vadd.f32 %v914_v41, %v884_v39 }
 0x13e   : > { %v916_v46 = vadd.f32 %v915_v45, %v885_v43 }
 0x140   : > { %v917_v47 = vadd.f32 %v916_v46, %v886_v48 }
 0x142   : > { %v918_v50 = vadd.f32 %v917_v47, %v887_v52 }
 0x144   : > { %v919_v53 = vadd.f32 %v918_v50, %v888_v56 }
 0x146   : > { %v920_v55 = vadd.f32 %v919_v53, %v889_v60 }
 0x148   : > { %v921_v57 = vadd.f32 %v920_v55, %v890_v0 }
 0x14a   : > { %v922_v58 = vadd.f32 %v921_v57, %v891_v4 }
 0x14c   : > { %v923_v61 = vadd.f32 %v922_v58, %v892_v8 }
 0x14e   : > { %v924_v12 = vadd.f32 %v923_v61, %v893_v63 }
 0x150   : > { %v925_v3 = vadd.f32 %v924_v12, %v894_v2 }
 0x152   : > { %v926_v5 = vadd.f32 %v925_v3, %v895_v18 }
 0x154   : > { %v927_v7 = vadd.f32 %v926_v5, %v896_v26 }
 0x156   : > { %v928_v10 = vrot.slane %v927_v7, 4 }
 0x158   : > { %v929_v14 = vadd.f32 %v928_v10, %v927_v7 }
 0x15a   : > { %v930_v15 = vrot.slane %v929_v14, 2 }
 0x15c   : > { %v931_v34 = vadd.f32 %v930_v15, %v929_v14 }
 0x15e   : > { %v932_v17 = vrot.slane %v931_v34, 1 }
 0x160   : > { %v933_v21 = vadd.f32 %v932_v17, %v931_v34 }
 0x162   : > { %v934_v42 = vmul.f32 0.00390625, %v933_v21 }
 0x164   : > { %v1657_v23 = vsub.f32 %v877_v1, %v934_v42  ;;  %v1659_v51 = vsub.f32 %v878_v6, %v934_v42  ;;  %v1661_v27 = vsub.f32 %v879_v11, %v934_v42  ;;  %v1663_v62 = vsub.f32 %v880_v25, %v934_v42 }
 0x165   : > { %v1665_v9 = vsub.f32 %v881_v30, %v934_v42  ;;  %v1667_v29 = vsub.f32 %v882_v33, %v934_v42  ;;  %v1669_v13 = vsub.f32 %v883_v37, %v934_v42  ;;  %v1671_v22 = vsub.f32 %v884_v39, %v934_v42 }
 0x166   : > { %v1673_v31 = vsub.f32 %v885_v43, %v934_v42  ;;  %v1675_v35 = vsub.f32 %v886_v48, %v934_v42  ;;  %v1677_v1 = vsub.f32 %v887_v52, %v934_v42  ;;  %v1679_v6 = vsub.f32 %v888_v56, %v934_v42 }
 0x167   : > { %v1681_v11 = vsub.f32 %v889_v60, %v934_v42  ;;  %v1683_v25 = vsub.f32 %v890_v0, %v934_v42  ;;  %v1685_v30 = vsub.f32 %v891_v4, %v934_v42  ;;  %v1687_v33 = vsub.f32 %v892_v8, %v934_v42 }
 0x168   : > { %v1689_v37 = vsub.f32 %v893_v63, %v934_v42  ;;  %v1691_v38 = vsub.f32 %v894_v2, %v934_v42  ;;  %v1693_v39 = vsub.f32 %v895_v18, %v934_v42  ;;  %v1695_v41 = vsub.f32 %v896_v26, %v934_v42 }
 0x169   : > { %v1698_v43 = vsub.f32 %v1578_v19, %v934_v42  ;;  %v1701_v45 = vsub.f32 %v1573_v16, %v934_v42  ;;  %v1704_v48 = vsub.f32 %v1581_v20, %v934_v42  ;;  %v1711_v47 = vsub.f32 %v1586_v24, %v934_v42 }
 0x16a   : > { %v1714_v56 = vsub.f32 %v1592_v28, %v934_v42  ;;  %v1719_v50 = vsub.f32 %v1596_v32, %v934_v42  ;;  %v1724_v53 = vsub.f32 %v1602_v36, %v934_v42  ;;  %v1729_v28 = vsub.f32 %v1606_v40, %v934_v42 }
 0x16b   : > { %v967_v46 = vmul.f32 %v1698_v43, %v1698_v43  ;;  %v968_v52 = vmul.f32 %v1701_v45, %v1701_v45  ;;  %v969_v19 = vmul.f32 %v1704_v48, %v1704_v48  ;;  %v970_v20 = vmul.f32 %v1711_v47, %v1711_v47 }
 0x16c   : > { %v971_v24 = vmul.f32 %v1714_v56, %v1714_v56  ;;  %v972_v55 = vmul.f32 %v1719_v50, %v1719_v50  ;;  %v1734_v32 = vsub.f32 %v1610_v44, %v934_v42  ;;  %v973_v4 = vmul.f32 %v1724_v53, %v1724_v53 }
 0x16d   : > { %v999_v16 = vadd.f32 %v968_v52, %v967_v46  ;;  %v1739_v36 = vsub.f32 %v1614_v49, %v934_v42  ;;  %v974_v8 = vmul.f32 %v1729_v28, %v1729_v28  ;;  %v1744_v40 = vsub.f32 %v1618_v54, %v934_v42 }
 0x16e   : > { %v975_v63 = vmul.f32 %v1734_v32, %v1734_v32  ;;  %v1749_v44 = vsub.f32 %v1622_v59, %v934_v42  ;;  %v979_v26 = vmul.f32 %v1657_v23, %v1657_v23  ;;  %v980_v59 = vmul.f32 %v1659_v51, %v1659_v51 }
 0x16f   : > { %v1000_v60 = vadd.f32 %v999_v16, %v969_v19  ;;  %v976_v2 = vmul.f32 %v1739_v36, %v1739_v36  ;;  %v977_v49 = vmul.f32 %v1744_v40, %v1744_v40  ;;  %v981_v14 = vmul.f32 %v1661_v27, %v1661_v27 }
 0x170   : > { %v978_v5 = vmul.f32 %v1749_v44, %v1749_v44  ;;  %v982_v34 = vmul.f32 %v1663_v62, %v1663_v62  ;;  %v983_v21 = vmul.f32 %v1665_v9, %v1665_v9  ;;  %v984_v46 = vmul.f32 %v1667_v29, %v1667_v29 }
 0x171   : > { %v1001_v0 = vadd.f32 %v1000_v60, %v970_v20  ;;  %v985_v19 = vmul.f32 %v1669_v13, %v1669_v13  ;;  %v986_v20 = vmul.f32 %v1671_v22, %v1671_v22 }
 0x173   : > { %v1002_v57 = vadd.f32 %v1001_v0, %v971_v24  ;;  %v987_v24 = vmul.f32 %v1673_v31, %v1673_v31 }
 0x175   : > { %v1003_v58 = vadd.f32 %v1002_v57, %v972_v55  ;;  %v988_v55 = vmul.f32 %v1675_v35, %v1675_v35 }
 0x177   : > { %v1004_v61 = vadd.f32 %v1003_v58, %v973_v4  ;;  %v989_v4 = vmul.f32 %v1677_v1, %v1677_v1 }
 0x179   : > { %v1005_v12 = vadd.f32 %v1004_v61, %v974_v8  ;;  %v990_v8 = vmul.f32 %v1679_v6, %v1679_v6 }
 0x17b   : > { %v1006_v3 = vadd.f32 %v1005_v12, %v975_v63  ;;  %v991_v63 = vmul.f32 %v1681_v11, %v1681_v11 }
 0x17d   : > { %v1007_v18 = vadd.f32 %v1006_v3, %v976_v2  ;;  %v992_v2 = vmul.f32 %v1683_v25, %v1683_v25 }
 0x17f   : > { %v1008_v54 = vadd.f32 %v1007_v18, %v977_v49  ;;  %v993_v49 = vmul.f32 %v1685_v30, %v1685_v30 }
 0x181   : > { %v1009_v7 = vadd.f32 %v1008_v54, %v978_v5  ;;  %v994_v5 = vmul.f32 %v1687_v33, %v1687_v33 }
 0x183   : > { %v1010_v10 = vadd.f32 %v1009_v7, %v979_v26  ;;  %v995_v26 = vmul.f32 %v1689_v37, %v1689_v37 }
 0x185   : > { %v1011_v15 = vadd.f32 %v1010_v10, %v980_v59  ;;  %v996_v59 = vmul.f32 %v1691_v38, %v1691_v38 }
 0x187   : > { %v1012_v17 = vadd.f32 %v1011_v15, %v981_v14  ;;  %v997_v14 = vmul.f32 %v1693_v39, %v1693_v39 }
 0x189   : > { %v1013_v42 = vadd.f32 %v1012_v17, %v982_v34  ;;  %v998_v34 = vmul.f32 %v1695_v41, %v1695_v41 }
 0x18b   : > { %v1014_v52 = vadd.f32 %v1013_v42, %v983_v21 }
 0x18d   : > { %v1015_v16 = vadd.f32 %v1014_v52, %v984_v46 }
 0x18f   : > { %v1016_v60 = vadd.f32 %v1015_v16, %v985_v19 }
 0x191   : > { %v1017_v0 = vadd.f32 %v1016_v60, %v986_v20 }
 0x193   : > { %v1018_v57 = vadd.f32 %v1017_v0, %v987_v24 }
 0x195   : > { %v1019_v58 = vadd.f32 %v1018_v57, %v988_v55 }
 0x197   : > { %v1020_v61 = vadd.f32 %v1019_v58, %v989_v4 }
 0x199   : > { %v1021_v12 = vadd.f32 %v1020_v61, %v990_v8 }
 0x19b   : > { %v1022_v3 = vadd.f32 %v1021_v12, %v991_v63 }
 0x19d   : > { %v1023_v18 = vadd.f32 %v1022_v3, %v992_v2 }
 0x19f   : > { %v1024_v54 = vadd.f32 %v1023_v18, %v993_v49 }
 0x1a1   : > { %v1025_v7 = vadd.f32 %v1024_v54, %v994_v5 }
 0x1a3   : > { %v1026_v10 = vadd.f32 %v1025_v7, %v995_v26 }
 0x1a5   : > { %v1027_v15 = vadd.f32 %v1026_v10, %v996_v59 }
 0x1a7   : > { %v1028_v17 = vadd.f32 %v1027_v15, %v997_v14 }
 0x1a9   : > { %v1029_v21 = vadd.f32 %v1028_v17, %v998_v34 }
 0x1ab   : > { %v1030_v42 = vrot.slane %v1029_v21, 4 }
 0x1ad   : > { %v1031_v46 = vadd.f32 %v1030_v42, %v1029_v21 }
 0x1af   : > { %v1032_v52 = vrot.slane %v1031_v46, 2 }
 0x1b1   : > { %v1033_v19 = vadd.f32 %v1032_v52, %v1031_v46 }
 0x1b3   : > { %v1034_v16 = vrot.slane %v1033_v19, 1 }
 0x1b5   : > { %v1035_v20 = vadd.f32 %v1034_v16, %v1033_v19 }
 0x1b7   : > { %v1036_v60 = vmul.f32 0.00390625, %v1035_v20 }
 0x1b9   : > { %v1037_v24 = vadd.f32 1e-05, %v1036_v60 }
 0x1bb   : > { %1397 = vrsqrt.f32 %v1037_v24 }
 0x1c8   : > { %v1398_v0 = vpop.eup %1397 }
 0x1c9   : > { %v1039_v55 = vmul.f32 %v1398_v0, %v1698_v43  ;;  %v1040_v57 = vmul.f32 %v1398_v0, %v1701_v45  ;;  %v1041_v4 = vmul.f32 %v1398_v0, %v1704_v48  ;;  %v1042_v58 = vmul.f32 %v1398_v0, %v1711_v47 }
 0x1ca   : > { %v1043_v8 = vmul.f32 %v1398_v0, %v1714_v56  ;;  %v1044_v61 = vmul.f32 %v1398_v0, %v1719_v50  ;;  %v1045_v63 = vmul.f32 %v1398_v0, %v1724_v53  ;;  %v1046_v12 = vmul.f32 %v1398_v0, %v1729_v28 }
 0x1cb   : > { %v1047_v2 = vmul.f32 %v1398_v0, %v1734_v32  ;;  %v1048_v3 = vmul.f32 %v1398_v0, %v1739_v36  ;;  %v1049_v43 = vmul.f32 %v1398_v0, %v1744_v40  ;;  %v1050_v45 = vmul.f32 %v1398_v0, %v1749_v44 }
 0x1cc   : > { %v1051_v48 = vmul.f32 %v1398_v0, %v1657_v23  ;;  %v1052_v47 = vmul.f32 %v1398_v0, %v1659_v51  ;;  %v1053_v56 = vmul.f32 %v1398_v0, %v1661_v27  ;;  %v1054_v50 = vmul.f32 %v1398_v0, %v1663_v62 }
 0x1cd   : > { %v1055_v53 = vmul.f32 %v1398_v0, %v1665_v9  ;;  %v1056_v28 = vmul.f32 %v1398_v0, %v1667_v29  ;;  %v1057_v32 = vmul.f32 %v1398_v0, %v1669_v13  ;;  %v1058_v36 = vmul.f32 %v1398_v0, %v1671_v22 }
 0x1ce   : > { %v1818_v40 = vmul.f32 %v1398_v0, %v1673_v31  ;;  %v1821_v23 = vmul.f32 %v1398_v0, %v1675_v35  ;;  %v1824_v51 = vmul.f32 %v1398_v0, %v1677_v1  ;;  %v1827_v27 = vmul.f32 %v1398_v0, %v1679_v6 }
 0x1cf   : > { %v1830_v62 = vmul.f32 %v1398_v0, %v1681_v11  ;;  %v1833_v9 = vmul.f32 %v1398_v0, %v1683_v25  ;;  %v1836_v29 = vmul.f32 %v1398_v0, %v1685_v30  ;;  %v1839_v13 = vmul.f32 %v1398_v0, %v1687_v33 }
 0x1d0   : > { %v1849_v22 = vmul.f32 %v1398_v0, %v1689_v37  ;;  %v1852_v31 = vmul.f32 %v1398_v0, %v1691_v38  ;;  %v1855_v35 = vmul.f32 %v1398_v0, %v1693_v39  ;;  %v1858_v1 = vmul.f32 %v1398_v0, %v1695_v41 }
 0x1d1   : > { %v1071_v6 = vmax.f32 %v1039_v55, 0.0  ;;  %v1072_v11 = vmax.f32 %v1040_v57, 0.0  ;;  %v1073_v25 = vmax.f32 %v1041_v4, 0.0  ;;  %v1074_v30 = vmax.f32 %v1042_v58, 0.0 }
 0x1d2   : > { %v1075_v33 = vmax.f32 %v1043_v8, 0.0  ;;  %v1076_v37 = vmax.f32 %v1044_v61, 0.0  ;;  %v1077_v44 = vmax.f32 %v1045_v63, 0.0  ;;  %v1078_v38 = vmax.f32 %v1046_v12, 0.0 }
 0x1d3   : > { %v1079_v49 = vmax.f32 %v1047_v2, 0.0  ;;  %v1080_v39 = vmax.f32 %v1048_v3, 0.0  ;;  %v1081_v18 = vmax.f32 %v1049_v43, 0.0  ;;  %v1082_v5 = vmax.f32 %v1050_v45, 0.0  ;;  %1103 = vst [vmem:[%s1846_s21] sm:$0xff] %v1071_v6  ;;  %1104 = vst [vmem:[%s1846_s21 + $0x8] sm:$0xff] %v1072_v11 }
 0x1d4   : > { %1105 = vst [vmem:[%s1846_s21 + $0x10] sm:$0xff] %v1073_v25  ;;  %1106 = vst [vmem:[%s1846_s21 + $0x18] sm:$0xff] %v1074_v30  ;;  %v1083_v41 = vmax.f32 %v1051_v48, 0.0  ;;  %v1084_v54 = vmax.f32 %v1052_v47, 0.0  ;;  %v1085_v26 = vmax.f32 %v1053_v56, 0.0  ;;  %v1086_v7 = vmax.f32 %v1054_v50, 0.0 }
 0x1d5   : > { %1107 = vst [vmem:[%s1846_s21 + $0x20] sm:$0xff] %v1075_v33  ;;  %1108 = vst [vmem:[%s1846_s21 + $0x28] sm:$0xff] %v1076_v37  ;;  %v1087_v59 = vmax.f32 %v1055_v53, 0.0  ;;  %v1088_v10 = vmax.f32 %v1056_v28, 0.0  ;;  %v1089_v14 = vmax.f32 %v1057_v32, 0.0  ;;  %v1090_v15 = vmax.f32 %v1058_v36, 0.0 }
 0x1d6   : > { %1109 = vst [vmem:[%s1846_s21 + $0x30] sm:$0xff] %v1077_v44  ;;  %1110 = vst [vmem:[%s1846_s21 + $0x38] sm:$0xff] %v1078_v38  ;;  %v1091_v34 = vmax.f32 %v1818_v40, 0.0  ;;  %v1092_v17 = vmax.f32 %v1821_v23, 0.0  ;;  %v1093_v21 = vmax.f32 %v1824_v51, 0.0  ;;  %v1094_v42 = vmax.f32 %v1827_v27, 0.0 }
 0x1d7   : > { %1111 = vst [vmem:[%s1846_s21 + $0x40] sm:$0xff] %v1079_v49  ;;  %1112 = vst [vmem:[%s1846_s21 + $0x48] sm:$0xff] %v1080_v39  ;;  %v1095_v46 = vmax.f32 %v1830_v62, 0.0  ;;  %v1096_v52 = vmax.f32 %v1833_v9, 0.0  ;;  %v1097_v19 = vmax.f32 %v1836_v29, 0.0  ;;  %v1098_v16 = vmax.f32 %v1839_v13, 0.0 }
 0x1d8   : > { %1113 = vst [vmem:[%s1846_s21 + $0x50] sm:$0xff] %v1081_v18  ;;  %1114 = vst [vmem:[%s1846_s21 + $0x58] sm:$0xff] %v1082_v5  ;;  %v1099_v20 = vmax.f32 %v1849_v22, 0.0  ;;  %v1100_v60 = vmax.f32 %v1852_v31, 0.0  ;;  %v1101_v24 = vmax.f32 %v1855_v35, 0.0  ;;  %v1102_v0 = vmax.f32 %v1858_v1, 0.0 }
 0x1d9   : > { %1115 = vst [vmem:[%s1846_s21 + $0x60] sm:$0xff] %v1083_v41  ;;  %1116 = vst [vmem:[%s1846_s21 + $0x68] sm:$0xff] %v1084_v54 }
 0x1da   : > { %1117 = vst [vmem:[%s1846_s21 + $0x70] sm:$0xff] %v1085_v26  ;;  %1118 = vst [vmem:[%s1846_s21 + $0x78] sm:$0xff] %v1086_v7 }
 0x1db   : > { %1119 = vst [vmem:[%s1846_s21 + $0x80] sm:$0xff] %v1087_v59  ;;  %1120 = vst [vmem:[%s1846_s21 + $0x88] sm:$0xff] %v1088_v10 }
 0x1dc   : > { %1121 = vst [vmem:[%s1846_s21 + $0x90] sm:$0xff] %v1089_v14  ;;  %1122 = vst [vmem:[%s1846_s21 + $0x98] sm:$0xff] %v1090_v15 }
 0x1dd   : > { %1123 = vst [vmem:[%s1846_s21 + $0xa0] sm:$0xff] %v1091_v34  ;;  %1124 = vst [vmem:[%s1846_s21 + $0xa8] sm:$0xff] %v1092_v17 }
 0x1de   : > { %1125 = vst [vmem:[%s1846_s21 + $0xb0] sm:$0xff] %v1093_v21  ;;  %1126 = vst [vmem:[%s1846_s21 + $0xb8] sm:$0xff] %v1094_v42 }
 0x1df   : > { %1127 = vst [vmem:[%s1846_s21 + $0xc0] sm:$0xff] %v1095_v46  ;;  %1128 = vst [vmem:[%s1846_s21 + $0xc8] sm:$0xff] %v1096_v52 }
 0x1e0   : > { %1129 = vst [vmem:[%s1846_s21 + $0xd0] sm:$0xff] %v1097_v19  ;;  %1130 = vst [vmem:[%s1846_s21 + $0xd8] sm:$0xff] %v1098_v16 }
 0x1e1   : > { %1131 = vst [vmem:[%s1846_s21 + $0xe0] sm:$0xff] %v1099_v20  ;;  %1132 = vst [vmem:[%s1846_s21 + $0xe8] sm:$0xff] %v1100_v60 }
 0x1e2   : > { %1133 = vst [vmem:[%s1846_s21 + $0xf0] sm:$0xff] %v1101_v24  ;;  %1134 = vst [vmem:[%s1846_s21 + $0xf8] sm:$0xff] %v1102_v0 }
 0x1e3 PF: > { %s13_s14 = sadd.s32 1, %s1421_s14   ;;  %s1917_s12 = smov %s1417_s13 }
 0x1e4   : > { %p10_p5 = scmp.ge.s32.totalorder %s13_s14, 4   ;;  %s1918_s13 = smov %s1920_s15 }
 0x1e6   :  { %12 = sbr.rel (!%p10_p5) target bundleno = 2 (0x2), region = 73 }

// kernel: line_drawing_forward.13
= control target key start
LH: loop header
LB: loop body
LE: loop exit
PB: predicated region body
PF: predicated region fallthrough
CT: control target
= control target key end

     0   :  { %s1379_s12 = smov 0   ;;  %s1381_s13 = smov 0   ;;  %s1553_s0 = inlined_call_operand.vmem [shape: bf16[2,64,576], index: 0, kind: input, shape index: {}]   ;;  %s1554_s1 = inlined_call_operand.vmem [shape: bf16[576,128], index: 1, kind: input, shape index: {}]   ;;  %s1555_s2 = inlined_call_operand.vmem [shape: f32[1,128], index: 2, kind: input, shape index: {}]   ;;  %s1556_s3 = inlined_call_operand.vmem [shape: f32[2,64,128], index: 3, kind: output, shape index: {}]  }
   0x1   :  { %s1383_s14 = smov 0  }
   0x2 LB: > { %s25_s15 = sadd.s32 1, %s1353_s13  ;;  %p1064_p0 = scmp.ge.s32.totalorder %s1357_s14, 1  ;;  %s1357_s14 = sphi %s1383_s14, %s13_s14   ;;  %s1353_s13 = sphi %s1381_s13, %s1558_s13   ;;  %s1349_s12 = sphi %s1379_s12, %s1557_s12  }
   0x3   : > { %p27_p1 = scmp.ge.s32.totalorder %s25_s15, 2  ;;  %p167_p2 = scmp.lt.s32.totalorder %s1357_s14, 3 }
   0x5   : > { %s1560_s15 = smov (%p27_p1, %s25_s15), 0  ;;  %p168_p3 = pnand %p1064_p0, %p167_p2 }
   0x6   : > { %p201_p4 = scmp.lt.s32.totalorder (!%p168_p3), %s1349_s12, 1 }
   0x7   : > { %171 = sbr.rel (%p168_p3) target bundleno = 365 (0x16d), region = 32 }
   0xc   : > { %v1269_v0 = vld [vmem:[%s1554_s1 + $0x78] sm:$0xff]   ;;  %v1273_v4 = vld [vmem:[%s1554_s1 + $0x70] sm:$0xff]   ;;  %v1277_v8 = vld [vmem:[%s1554_s1 + $0x68] sm:$0xff]   ;;  %s1562_s12 = smov (!%p201_p4, %s1349_s12), 1  ;;  %vm654_vm0 = vcmask 523264  }
   0xd   : > { %v1270_v1 = vld [vmem:[%s1554_s1 + $0xf8] sm:$0xff]   ;;  %1132 = vmatprep.subr.bf16.mxu0 %v1269_v0  ;;  %v1274_v5 = vld [vmem:[%s1554_s1 + $0xf0] sm:$0xff]   ;;  %v1278_v9 = vld [vmem:[%s1554_s1 + $0xe8] sm:$0xff]   ;;  %s1244_s22 = smul.u32 160, %s1562_s12  ;;  %s1131_s25 = sshll.u32 %s1562_s12, 6 }
   0xe   : > { %v1271_v2 = vld [vmem:[%s1554_s1 + $0x38] sm:$0xff]   ;;  %1172 = vmatprep.subr.bf16.mxu1 %v1270_v1  ;;  %v1275_v6 = vld [vmem:[%s1554_s1 + $0x30] sm:$0xff]   ;;  %v1279_v10 = vld [vmem:[%s1554_s1 + $0x28] sm:$0xff]   ;;  %s220_s28 = scalar_lea.vmem %s1556_s3, %s1131_s25 }
   0xf   : > { %v1272_v3 = vld [vmem:[%s1554_s1 + $0xb8] sm:$0xff]   ;;  %1133 = vmatpush3.bf16.msra.mxu0 %v1271_v2  ;;  %v1276_v7 = vld [vmem:[%s1554_s1 + $0xb0] sm:$0xff]   ;;  %v1280_v11 = vld [vmem:[%s1554_s1 + $0xa8] sm:$0xff]   ;;  %s1497_s6 = scalar_lea.vmem %s1553_s0, %s1244_s22 }
  0x10   : > { %1173 = vmatpush3.bf16.msra.mxu1 %v1272_v3  ;;  %1134 = vmatprep.subr.bf16.mxu0 %v1273_v4  ;;  %v1281_v12 = vld [vmem:[%s1554_s1 + $0x60] sm:$0xff]   ;;  %v1285_v16 = vld [vmem:[%s1554_s1 + $0x58] sm:$0xff]   ;;  %v1289_v20 = vld [vmem:[%s1554_s1 + $0x50] sm:$0xff]  }
  0x11   : > { %1174 = vmatprep.subr.bf16.mxu1 %v1274_v5  ;;  %v1282_v13 = vld [vmem:[%s1554_s1 + $0xe0] sm:$0xff]   ;;  %v1286_v17 = vld [vmem:[%s1554_s1 + $0xd8] sm:$0xff]   ;;  %v1290_v21 = vld [vmem:[%s1554_s1 + $0xd0] sm:$0xff]  }
  0x12   : > { %v1283_v14 = vld [vmem:[%s1554_s1 + $0x20] sm:$0xff]   ;;  %v1287_v18 = vld [vmem:[%s1554_s1 + $0x18] sm:$0xff]   ;;  %v1291_v22 = vld [vmem:[%s1554_s1 + $0x10] sm:$0xff]  }
  0x13   : > { %1135 = vmatpush3.bf16.msra.mxu0 %v1275_v6  ;;  %v1284_v15 = vld [vmem:[%s1554_s1 + $0xa0] sm:$0xff]   ;;  %v1288_v19 = vld [vmem:[%s1554_s1 + $0x98] sm:$0xff]   ;;  %v1292_v23 = vld [vmem:[%s1554_s1 + $0x90] sm:$0xff]  }
  0x14   : > { %1175 = vmatpush3.bf16.msra.mxu1 %v1276_v7  ;;  %1136 = vmatprep.subr.bf16.mxu0 %v1277_v8  ;;  %v1293_v24 = vld [vmem:[%s1554_s1 + $0x48] sm:$0xff]   ;;  %v1297_v28 = vld [vmem:[%s1554_s1 + $0x40] sm:$0xff]   ;;  %v1307_v36 = vld [vmem:[%s1554_s1 + $0x118] sm:$0xff]  }
  0x15   : > { %1176 = vmatprep.subr.bf16.mxu1 %v1278_v9  ;;  %v1294_v25 = vld [vmem:[%s1554_s1 + $0xc8] sm:$0xff]   ;;  %v1298_v29 = vld [vmem:[%s1554_s1 + $0xc0] sm:$0xff]   ;;  %v1314_v39 = vld [vmem:[%s1554_s1 + $0x110] sm:$0xff]  }
  0x16   : > { %v1295_v26 = vld [vmem:[%s1554_s1 + $0x8] sm:$0xff]   ;;  %v1299_v30 = vld [vmem:[%s1554_s1] sm:$0xff]   ;;  %v1317_v43 = vld [vmem:[%s1497_s6 + $0x5c] ss:$20 sps:$4 sm:$0xff]  }
  0x17   : > { %1137 = vmatpush3.bf16.msra.mxu0 %v1279_v10  ;;  %v1296_v27 = vld [vmem:[%s1554_s1 + $0x88] sm:$0xff]   ;;  %v1300_v31 = vld [vmem:[%s1554_s1 + $0x80] sm:$0xff]   ;;  %v1322_v48 = vld [vmem:[%s1497_s6 + $0x7c] ss:$20 sps:$4 sm:$0xff]  }
  0x18   : > { %1177 = vmatpush3.bf16.msra.mxu1 %v1280_v11  ;;  %1138 = vmatprep.subr.bf16.mxu0 %v1281_v12  ;;  %v1301_v32 = vld [vmem:[%s1497_s6] ss:$20 sps:$4 sm:$0xff]   ;;  %v1303_v33 = vld [vmem:[%s1497_s6 + $0x4] ss:$20 sps:$4 sm:$0xff]   ;;  %v1304_v34 = vld [vmem:[%s1497_s6 + $0x8] ss:$20 sps:$4 sm:$0xff]  }
  0x19   : > { %1178 = vmatprep.subr.bf16.mxu1 %v1282_v13  ;;  %v1306_v35 = vld [vmem:[%s1497_s6 + $0xc] ss:$20 sps:$4 sm:$0xff]   ;;  %699 = vmatprep.mubr.bf16.mxu0 %v1303_v33  ;;  %v1310_v38 = vld [vmem:[%s1497_s6 + $0x34] ss:$20 sps:$4 sm:$0xff]   ;;  %v1313_v41 = vld [vmem:[%s1497_s6 + $0x30] ss:$20 sps:$4 sm:$0xff]  }
  0x1a   : > { %764 = vmatprep.mubr.bf16.mxu1 %v1306_v35  ;;  %v1308_v37 = vld [vmem:[%s1497_s6 + $0x2c] ss:$20 sps:$4 sm:$0xff]   ;;  %v1312_v40 = vld [vmem:[%s1497_s6 + $0x28] ss:$20 sps:$4 sm:$0xff]   ;;  %v1319_v46 = vld [vmem:[%s1497_s6 + $0x50] ss:$20 sps:$4 sm:$0xff]  }
  0x1b   : > { %1139 = vmatpush3.bf16.msra.mxu0 %v1283_v14  ;;  %v1315_v42 = vld [vmem:[%s1497_s6 + $0x54] ss:$20 sps:$4 sm:$0xff]   ;;  %v1328_v45 = vld [vmem:[%s1554_s1 + $0x100] sm:$0xff]   ;;  %v1320_v47 = vld [vmem:[%s1497_s6 + $0x58] ss:$20 sps:$4 sm:$0xff]  }
  0x1c   : > { %1179 = vmatpush3.bf16.msra.mxu1 %v1284_v15  ;;  %1140 = vmatprep.subr.bf16.mxu0 %v1285_v16  ;;  %v1321_v44 = vld [vmem:[%s1554_s1 + $0x108] sm:$0xff]   ;;  %v1324_v49 = vld [vmem:[%s1497_s6 + $0x84] ss:$20 sps:$4 sm:$0xff]   ;;  %v1327_v51 = vld [vmem:[%s1497_s6 + $0x80] ss:$20 sps:$4 sm:$0xff]  }
  0x1d   : > { %1180 = vmatprep.subr.bf16.mxu1 %v1286_v17  ;;  %v1326_v50 = vld [vmem:[%s1497_s6 + $0x78] ss:$20 sps:$4 sm:$0xff]   ;;  %v1329_v52 = vld [vmem:[%s1497_s6 + $0x10] ss:$20 sps:$4 sm:$0xff]   ;;  %v1330_v53 = vld [vmem:[%s1497_s6 + $0x60] ss:$20 sps:$4 sm:$0xff]  }
  0x1e   : > { %v1331_v54 = vld [vmem:[%s1497_s6 + $0x38] ss:$20 sps:$4 sm:$0xff]   ;;  %v1332_v55 = vld [vmem:[%s1497_s6 + $0x88] ss:$20 sps:$4 sm:$0xff]  }
  0x1f   : > { %1141 = vmatpush3.bf16.msra.mxu0 %v1287_v18 }
  0x20   : > { %1181 = vmatpush3.bf16.msra.mxu1 %v1288_v19  ;;  %1142 = vmatprep.subr.bf16.mxu0 %v1289_v20 }
  0x21   : > { %1182 = vmatprep.subr.bf16.mxu1 %v1290_v21 }
  0x23   : > { %1143 = vmatpush3.bf16.msra.mxu0 %v1291_v22 }
  0x24   : > { %1183 = vmatpush3.bf16.msra.mxu1 %v1292_v23  ;;  %1144 = vmatprep.subr.bf16.mxu0 %v1293_v24 }
  0x25   : > { %1184 = vmatprep.subr.bf16.mxu1 %v1294_v25 }
  0x27   : > { %1145 = vmatpush3.bf16.msra.mxu0 %v1295_v26 }
  0x28   : > { %1185 = vmatpush3.bf16.msra.mxu1 %v1296_v27  ;;  %1146 = vmatprep.subr.bf16.mxu0 %v1297_v28 }
  0x29   : > { %1186 = vmatprep.subr.bf16.mxu1 %v1298_v29 }
  0x2b   : > { %1147 = vmatpush3.bf16.msra.mxu0 %v1299_v30 }
  0x2c   : > { %1187 = vmatpush3.bf16.msra.mxu1 %v1300_v31  ;;  %1220 = vmatprep.subr.bf16.mxu0 %v1307_v36 }
  0x2d   : > { %1236 = vmatprep.subr.bf16.mxu1 %v1307_v36 }
  0x2e   : > { %700 = vmatmul.mubr.bf16.vlgmr.msra.gmra.mxu0 %v1301_v32 }
  0x2f   : > { %765 = vmatmul.mubr.bf16.vlgmr.msra.gmra.mxu1 %v1304_v34  ;;  %1221 = vmatpush3.bf16.msra.mxu0 %v1307_v36 }
  0x30   : > { %707 = vmatprep.mubr.bf16.mxu0 %v1308_v37  ;;  %772 = vmatprep.mubr.bf16.mxu1 %v1310_v38 }
  0x31   : > { %1240 = vmatpush3.bf16.msra.mxu1 %v1307_v36  ;;  %1222 = vmatprep.subr.bf16.mxu0 %v1314_v39 }
  0x32   : > { %1237 = vmatprep.subr.bf16.mxu1 %v1314_v39 }
  0x33   : > { %1223 = vmatpush3.bf16.msra.mxu0 %v1314_v39 }
  0x34   : > { %1224 = vmatprep.subr.bf16.mxu0 %v1321_v44 }
  0x35   : > { %1241 = vmatpush3.bf16.msra.mxu1 %v1314_v39 }
  0x36   : > { %708 = vmatmul.mubr.bf16.gmra.mxu0 %v1312_v40  ;;  %1238 = vmatprep.subr.bf16.mxu1 %v1321_v44 }
  0x37   : > { %773 = vmatmul.mubr.bf16.gmra.mxu1 %v1313_v41  ;;  %715 = vmatprep.mubr.bf16.mxu0 %v1315_v42 }
  0x38   : > { %780 = vmatprep.mubr.bf16.mxu1 %v1317_v43  ;;  %1225 = vmatpush3.bf16.msra.mxu0 %v1321_v44 }
  0x39   : > { %1226 = vmatprep.subr.bf16.mxu0 %v1328_v45  ;;  %1242 = vmatpush3.bf16.msra.mxu1 %v1321_v44 }
  0x3a   : > { %1239 = vmatprep.subr.bf16.mxu1 %v1328_v45 }
  0x3c   : > { %1227 = vmatpush3.bf16.msra.mxu0 %v1328_v45 }
  0x3d   : > { %1243 = vmatpush3.bf16.msra.mxu1 %v1328_v45 }
  0x3e   : > { %716 = vmatmul.mubr.bf16.gmra.mxu0 %v1319_v46 }
  0x3f   : > { %781 = vmatmul.mubr.bf16.gmra.mxu1 %v1320_v47  ;;  %723 = vmatprep.mubr.bf16.mxu0 %v1322_v48 }
  0x40   : > { %788 = vmatprep.mubr.bf16.mxu1 %v1324_v49 }
  0x46   : > { %724 = vmatmul.mubr.bf16.gmra.mxu0 %v1326_v50 }
  0x47   : > { %789 = vmatmul.mubr.bf16.gmra.mxu1 %v1327_v51  ;;  %1228 = vmatprep.mubr.msk.bf16.mxu0 %vm654_vm0, %v1329_v52  ;;  %v1128_v51 = vld [vmem:[%s1555_s2] ss:$0 sm:$0xff] }
  0x48   : > { %1232 = vmatprep.mubr.msk.bf16.mxu1 %vm654_vm0, %v1330_v53 }
  0x4e   : > { %1229 = vmatmul.mubr.msk.bf16.vlgmr.msra.gmra.mxu0 %vm654_vm0, %v1331_v54 }
  0x4f   : > { %1233 = vmatmul.mubr.msk.bf16.vlgmr.msra.gmra.mxu1 %vm654_vm0, %v1332_v55 }
  0xee   : > { %v1148_v56 = vpop.f32.mrf.mxu0 }
  0xef   : > { %v1188_v57 = vpop.f32.mrf.mxu1 }
  0xf0   : > { %v1149_v58 = vpop.f32.mrf.mxu0 }
  0xf1   : > { %v1189_v59 = vpop.f32.mrf.mxu1  ;;  %v1150_v23 = vadd.f32 %v1149_v58, %v1148_v56 }
  0xf2   : > { %v1151_v60 = vpop.f32.mrf.mxu0  ;;  %v1190_v24 = vadd.f32 %v1189_v59, %v1188_v57 }
  0xf3   : > { %v1191_v61 = vpop.f32.mrf.mxu1 }
  0xf4   : > { %v1152_v62 = vpop.f32.mrf.mxu0  ;;  %v767_v35 = vadd.f32 %v1190_v24, %v1150_v23 }
  0xf5   : > { %v1192_v63 = vpop.f32.mrf.mxu1  ;;  %v1153_v27 = vadd.f32 %v1152_v62, %v1151_v60 }
  0xf6   : > { %v1154_v0 = vpop.f32.mrf.mxu0  ;;  %v1193_v28 = vadd.f32 %v1192_v63, %v1191_v61 }
  0xf7   : > { %v1194_v1 = vpop.f32.mrf.mxu1 }
  0xf8   : > { %v1155_v2 = vpop.f32.mrf.mxu0  ;;  %v770_v42 = vadd.f32 %v1193_v28, %v1153_v27 }
  0xf9   : > { %v1195_v3 = vpop.f32.mrf.mxu1  ;;  %v1156_v29 = vadd.f32 %v1155_v2, %v1154_v0 }
  0xfa   : > { %v1157_v4 = vpop.f32.mrf.mxu0  ;;  %v1196_v30 = vadd.f32 %v1195_v3, %v1194_v1 }
  0xfb   : > { %v1197_v5 = vpop.f32.mrf.mxu1 }
  0xfc   : > { %v1158_v6 = vpop.f32.mrf.mxu0  ;;  %v775_v40 = vadd.f32 %v1196_v30, %v1156_v29 }
  0xfd   : > { %v1198_v7 = vpop.f32.mrf.mxu1  ;;  %v1159_v33 = vadd.f32 %v1158_v6, %v1157_v4 }
  0xfe   : > { %v1160_v8 = vpop.f32.mrf.mxu0  ;;  %v1199_v34 = vadd.f32 %v1198_v7, %v1197_v5 }
  0xff   : > { %v1200_v9 = vpop.f32.mrf.mxu1 }
 0x100   : > { %v1161_v10 = vpop.f32.mrf.mxu0  ;;  %v778_v48 = vadd.f32 %v1199_v34, %v1159_v33 }
 0x101   : > { %v1201_v11 = vpop.f32.mrf.mxu1  ;;  %v1162_v37 = vadd.f32 %v1161_v10, %v1160_v8 }
 0x102   : > { %v1163_v12 = vpop.f32.mrf.mxu0  ;;  %v1202_v38 = vadd.f32 %v1201_v11, %v1200_v9 }
 0x103   : > { %v1203_v13 = vpop.f32.mrf.mxu1 }
 0x104   : > { %v1164_v14 = vpop.f32.mrf.mxu0  ;;  %v783_v52 = vadd.f32 %v1202_v38, %v1162_v37 }
 0x105   : > { %v1204_v15 = vpop.f32.mrf.mxu1  ;;  %v1165_v43 = vadd.f32 %v1164_v14, %v1163_v12 }
 0x106   : > { %v1166_v16 = vpop.f32.mrf.mxu0  ;;  %v1205_v44 = vadd.f32 %v1204_v15, %v1203_v13 }
 0x107   : > { %v1206_v17 = vpop.f32.mrf.mxu1 }
 0x108   : > { %v1167_v18 = vpop.f32.mrf.mxu0  ;;  %v786_v58 = vadd.f32 %v1205_v44, %v1165_v43 }
 0x109   : > { %v1207_v19 = vpop.f32.mrf.mxu1  ;;  %v1168_v50 = vadd.f32 %v1167_v18, %v1166_v16 }
 0x10a   : > { %v1169_v20 = vpop.f32.mrf.mxu0  ;;  %v1208_v53 = vadd.f32 %v1207_v19, %v1206_v17 }
 0x10b   : > { %v1209_v21 = vpop.f32.mrf.mxu1 }
 0x10c   : > { %v1170_v22 = vpop.f32.mrf.mxu0  ;;  %v791_v0 = vadd.f32 %v1208_v53, %v1168_v50 }
 0x10d   : > { %v1210_v25 = vpop.f32.mrf.mxu1  ;;  %v1171_v57 = vadd.f32 %v1170_v22, %v1169_v20 }
 0x10e   : > { %v1230_v26 = vpop.f32.mrf.mxu0  ;;  %v1211_v60 = vadd.f32 %v1210_v25, %v1209_v21 }
 0x10f   : > { %v1234_v31 = vpop.f32.mrf.mxu1  ;;  %v840_v47 = vadd.f32 %v1230_v26, %v775_v40 }
 0x110   : > { %v831_v32 = vpop.f32.mrf.mxu0  ;;  %v856_v4 = vadd.f32 %v1234_v31, %v791_v0  ;;  %v794_v6 = vadd.f32 %v1211_v60, %v1171_v57 }
 0x111   : > { %v847_v36 = vpop.f32.mrf.mxu1  ;;  %v832_v41 = vadd.f32 %v831_v32, %v767_v35  ;;  %v898_v61 = vadd.f32 %v1128_v51, %v840_v47 }
 0x112   : > { %v1231_v39 = vpop.f32.mrf.mxu0  ;;  %v848_v62 = vadd.f32 %v847_v36, %v783_v52  ;;  %v902_v11 = vadd.f32 %v1128_v51, %v856_v4 }
 0x113   : > { %v1235_v45 = vpop.f32.mrf.mxu1  ;;  %v896_v54 = vadd.f32 %v1128_v51, %v832_v41  ;;  %v843_v55 = vadd.f32 %v1231_v39, %v778_v48 }
 0x114   : > { %v834_v46 = vpop.f32.mrf.mxu0  ;;  %v900_v5 = vadd.f32 %v1128_v51, %v848_v62  ;;  %v859_v8 = vadd.f32 %v1235_v45, %v794_v6 }
 0x115   : > { %v835_v49 = vadd.f32 %v834_v46, %v770_v42  ;;  %v850_v59 = vpop.f32.mrf.mxu1  ;;  %v899_v1 = vadd.f32 %v1128_v51, %v843_v55 }
 0x116   : > { %v851_v3 = vadd.f32 %v850_v59, %v786_v58  ;;  %v903_v13 = vadd.f32 %v1128_v51, %v859_v8 }
 0x117   : > { %v897_v56 = vadd.f32 %v1128_v51, %v835_v49 }
 0x118   : > { %v901_v9 = vadd.f32 %v1128_v51, %v851_v3 }
 0x119   : > { %v904_v63 = vadd.f32 %v897_v56, %v896_v54 }
 0x11b   : > { %v905_v2 = vadd.f32 %v904_v63, %v898_v61 }
 0x11d   : > { %v906_v7 = vadd.f32 %v905_v2, %v899_v1 }
 0x11f   : > { %v907_v10 = vadd.f32 %v906_v7, %v900_v5 }
 0x121   : > { %v908_v12 = vadd.f32 %v907_v10, %v901_v9 }
 0x123   : > { %v909_v14 = vadd.f32 %v908_v12, %v902_v11 }
 0x125   : > { %v910_v15 = vadd.f32 %v909_v14, %v903_v13 }
 0x127   : > { %v911_v16 = vrot.slane %v910_v15, 4 }
 0x129   : > { %v912_v17 = vadd.f32 %v911_v16, %v910_v15 }
 0x12b   : > { %v913_v18 = vrot.slane %v912_v17, 2 }
 0x12d   : > { %v914_v19 = vadd.f32 %v913_v18, %v912_v17 }
 0x12f   : > { %v915_v20 = vrot.slane %v914_v19, 1 }
 0x131   : > { %v916_v21 = vadd.f32 %v915_v20, %v914_v19 }
 0x133   : > { %v917_v22 = vmul.f32 0.015625, %v916_v21 }
 0x135   : > { %v918_v23 = vsub.f32 %v896_v54, %v917_v22  ;;  %v919_v24 = vsub.f32 %v897_v56, %v917_v22  ;;  %v920_v25 = vsub.f32 %v898_v61, %v917_v22  ;;  %v921_v26 = vsub.f32 %v899_v1, %v917_v22 }
 0x136   : > { %v922_v29 = vsub.f32 %v900_v5, %v917_v22  ;;  %v923_v32 = vsub.f32 %v901_v9, %v917_v22  ;;  %v924_v35 = vsub.f32 %v902_v11, %v917_v22  ;;  %v925_v38 = vsub.f32 %v903_v13, %v917_v22 }
 0x137   : > { %v926_v27 = vmul.f32 %v918_v23, %v918_v23  ;;  %v927_v28 = vmul.f32 %v919_v24, %v919_v24  ;;  %v928_v30 = vmul.f32 %v920_v25, %v920_v25  ;;  %v929_v33 = vmul.f32 %v921_v26, %v921_v26 }
 0x138   : > { %v930_v36 = vmul.f32 %v922_v29, %v922_v29  ;;  %v931_v39 = vmul.f32 %v923_v32, %v923_v32  ;;  %v932_v41 = vmul.f32 %v924_v35, %v924_v35  ;;  %v933_v43 = vmul.f32 %v925_v38, %v925_v38 }
 0x139   : > { %v934_v31 = vadd.f32 %v927_v28, %v926_v27 }
 0x13b   : > { %v935_v34 = vadd.f32 %v934_v31, %v928_v30 }
 0x13d   : > { %v936_v37 = vadd.f32 %v935_v34, %v929_v33 }
 0x13f   : > { %v937_v40 = vadd.f32 %v936_v37, %v930_v36 }
 0x141   : > { %v938_v42 = vadd.f32 %v937_v40, %v931_v39 }
 0x143   : > { %v939_v44 = vadd.f32 %v938_v42, %v932_v41 }
 0x145   : > { %v940_v45 = vadd.f32 %v939_v44, %v933_v43 }
 0x147   : > { %v941_v46 = vrot.slane %v940_v45, 4 }
 0x149   : > { %v942_v47 = vadd.f32 %v941_v46, %v940_v45 }
 0x14b   : > { %v943_v48 = vrot.slane %v942_v47, 2 }
 0x14d   : > { %v944_v49 = vadd.f32 %v943_v48, %v942_v47 }
 0x14f   : > { %v945_v50 = vrot.slane %v944_v49, 1 }
 0x151   : > { %v946_v51 = vadd.f32 %v945_v50, %v944_v49 }
 0x153   : > { %v947_v52 = vmul.f32 0.015625, %v946_v51 }
 0x155   : > { %v948_v53 = vadd.f32 1e-05, %v947_v52 }
 0x157   : > { %1333 = vrsqrt.f32 %v948_v53 }
 0x164   : > { %v1334_v54 = vpop.eup %1333 }
 0x165   : > { %v950_v55 = vmul.f32 %v1334_v54, %v918_v23  ;;  %v951_v56 = vmul.f32 %v1334_v54, %v919_v24  ;;  %v952_v57 = vmul.f32 %v1334_v54, %v920_v25  ;;  %v953_v58 = vmul.f32 %v1334_v54, %v921_v26 }
 0x166   : > { %v954_v59 = vmul.f32 %v1334_v54, %v922_v29  ;;  %v955_v60 = vmul.f32 %v1334_v54, %v923_v32  ;;  %v956_v61 = vmul.f32 %v1334_v54, %v924_v35  ;;  %v957_v62 = vmul.f32 %v1334_v54, %v925_v38 }
 0x167   : > { %v958_v63 = vmax.f32 %v950_v55, 0.0  ;;  %v959_v0 = vmax.f32 %v951_v56, 0.0  ;;  %v960_v1 = vmax.f32 %v952_v57, 0.0  ;;  %v961_v2 = vmax.f32 %v953_v58, 0.0 }
 0x168   : > { %v962_v3 = vmax.f32 %v954_v59, 0.0  ;;  %v963_v4 = vmax.f32 %v955_v60, 0.0  ;;  %v964_v5 = vmax.f32 %v956_v61, 0.0  ;;  %v965_v6 = vmax.f32 %v957_v62, 0.0 }
 0x169   : > { %966 = vst [vmem:[%s220_s28] sm:$0xff] %v958_v63  ;;  %967 = vst [vmem:[%s220_s28 + $0x8] sm:$0xff] %v959_v0 }
 0x16a   : > { %968 = vst [vmem:[%s220_s28 + $0x10] sm:$0xff] %v960_v1  ;;  %969 = vst [vmem:[%s220_s28 + $0x18] sm:$0xff] %v961_v2 }
 0x16b   : > { %970 = vst [vmem:[%s220_s28 + $0x20] sm:$0xff] %v962_v3  ;;  %971 = vst [vmem:[%s220_s28 + $0x28] sm:$0xff] %v963_v4 }
 0x16c   : > { %972 = vst [vmem:[%s220_s28 + $0x30] sm:$0xff] %v964_v5  ;;  %973 = vst [vmem:[%s220_s28 + $0x38] sm:$0xff] %v965_v6 }
 0x16d PF: > { %s13_s14 = sadd.s32 1, %s1357_s14   ;;  %s1557_s12 = smov %s1353_s13 }
 0x16e   : > { %p10_p5 = scmp.ge.s32.totalorder %s13_s14, 4   ;;  %s1558_s13 = smov %s1560_s15 }
 0x170   :  { %12 = sbr.rel (!%p10_p5) target bundleno = 2 (0x2), region = 73 }

// kernel: line_drawing_forward.14
= control target key start
LH: loop header
LB: loop body
LE: loop exit
PB: predicated region body
PF: predicated region fallthrough
CT: control target
= control target key end

     0   :  { %s1125_s12 = smov 0   ;;  %s1127_s13 = smov 0   ;;  %s1284_s0 = inlined_call_operand.vmem [shape: bf16[2,16,1152], index: 0, kind: input, shape index: {}]   ;;  %s1285_s1 = inlined_call_operand.vmem [shape: bf16[1152,256], index: 1, kind: input, shape index: {}]   ;;  %s1286_s2 = inlined_call_operand.vmem [shape: f32[1,256], index: 2, kind: input, shape index: {}]   ;;  %s1287_s3 = inlined_call_operand.vmem [shape: f32[2,16,256], index: 3, kind: output, shape index: {}]  }
   0x1   :  { %s1129_s14 = smov 0   ;;  %s1131_s15 = smov 0  }
   0x2   :  { %s1133_s16 = smov 0   ;;  %s1135_s17 = smov 0  }
   0x3   :  { %s1137_s18 = smov 0  }
   0x4 LB: > { %s22_s19 = sadd.s32 1, %s1093_s16  ;;  %s25_s20 = sadd.s32 1, %s1097_s17  ;;  %s1101_s18 = sphi %s1137_s18, %s13_s18   ;;  %s1097_s17 = sphi %s1135_s17, %s1293_s17   ;;  %s1093_s16 = sphi %s1133_s16, %s1292_s16   ;;  %s1089_s15 = sphi %s1131_s15, %s1291_s15   ;;  %s1085_s14 = sphi %s1129_s14, %s1290_s14   ;;  %s1081_s13 = sphi %s1127_s13, %s1289_s13   ;;  %s1077_s12 = sphi %s1125_s12, %s1288_s12  }
   0x5   : > { %p23_p0 = scmp.ge.s32.totalorder %s22_s19, 3  ;;  %p41_p1 = scmp.ne.s32.totalorder %s1081_s13, %s1077_s12 }
   0x6   : > { %p42_p2 = scmp.eq.s32.totalorder %s1101_s18, 0  ;;  %s34_s24 = sadd.s32 1, %s1081_s13 }
   0x7   : > { %s1295_s19 = smov (%p23_p0, %s22_s19), 0  ;;  %s1297_s20 = smov (!%p23_p0, %s25_s20), %s1097_s17 }
   0x8   : > { %p43_p3 = por %p42_p2, %p41_p1  ;;  %p27_p4 = scmp.ge.s32.totalorder %s1297_s20, 2 }
   0x9   : > { %s30_s21 = ssub.s32 %s1093_s16, %s1295_s19  ;;  %p838_p6 = scmp.ge.s32.totalorder %s1101_s18, 6 }
   0xa   : > { %s1299_s20 = smov (%p27_p4, %s1297_s20), 0 }
   0xb   : > { %s29_s22 = ssub.s32 %s1097_s17, %s1299_s20  ;;  %143 = sbr.rel (%p838_p6) target bundleno = 27 (0x1b), region = 20 }
   0xc   : > { %s31_s23 = sor.u32 %s30_s21, %s29_s22 }
   0xd   : > { %p32_p5 = scmp.eq.s32.totalorder %s31_s23, 0 }
   0xf   : > { %s1176_s25 = scalar_select %p32_p5, %s1081_s13, %s34_s24  }
  0x10   : > { %146 = sbr.rel (!%p43_p3) target bundleno = 27 (0x1b), region = 24  ;;  %s148_s26 = sand.u32 (%p43_p3), 1, %s1081_s13  }
  0x11   : > { %s151_s27 = smul.u32 (%p43_p3), 3, %s1093_s16 }
  0x12   : > { %s906_s28 = smul.u32 (%p43_p3), 24, %s148_s26 }
  0x13   : > { %s907_s29 = smul.u32 (%p43_p3), 18, %s1097_s17 }
  0x14   : > { %s150_s8 = scalar_lea.vmem (%p43_p3), [#allocation3], %s906_s28 }
  0x15   : > { %s153_s30 = sadd.s32 %s907_s29, %s151_s27 }
  0x16   : > { %s839_s4 = sshll.u32 %s153_s30, 2 }
  0x17   : > { %s155_s7 = scalar_lea.vmem %s1284_s0, %s839_s4 }
  0x18   : > { %v170_v0 = vld [vmem:[%s155_s7] sm:$0xff]  ;;  %v840_v2 = vld [vmem:[%s155_s7 + $0x8] sm:$0xf]  ;;  %v842_v3 = vld [vmem:[%s155_s7 + $0x2c] sm:$0xf] }
  0x19   : > { %v172_v1 = vld [vmem:[%s155_s7 + $0x24] sm:$0xff]  ;;  %171 = vst [vmem:[%s150_s8] sm:$0xff] %v170_v0  ;;  %841 = vst [vmem:[%s150_s8 + $0x8] sm:$0xf] %v840_v2 }
  0x1a   : > { %173 = vst [vmem:[%s150_s8 + $0xc] sm:$0xff] %v172_v1  ;;  %843 = vst [vmem:[%s150_s8 + $0x14] sm:$0xf] %v842_v3 }
  0x1b PF: > { %p844_p7 = scmp.ge.s32.totalorder %s1101_s18, 1  ;;  %p200_p8 = scmp.lt.s32.totalorder %s1101_s18, 7 }
  0x1d   : > { %p201_p9 = pnand %p844_p7, %p200_p8 }
  0x1e   : > { %s207_s9 = sand.u32 (!%p201_p9), 1, %s1077_s12   ;;  %s237_s10 = smul.u32 (!%p201_p9), 48, %s1085_s14 }
  0x1f   : > { %204 = sbr.rel (%p201_p9) target bundleno = 384 (0x180), region = 54  ;;  %p244_p10 = scmp.lt.s32.totalorder (!%p201_p9), %s1089_s15, 1 }
  0x20   : > { %s908_s11 = smul.u32 (!%p201_p9), 24, %s207_s9  ;;  %p238_p11 = scmp.lt.s32.totalorder (!%p201_p9), %s237_s10, 143 }
  0x21   : > { %p849_p12 = scmp.ne.s32.totalorder (!%p201_p9), %s1085_s14, 0 }
  0x22   : > { %s1201_s30 = scalar_lea.vmem (!%p201_p9), [#allocation3], %s908_s11 }
  0x24   : > { %s1301_s10 = smov (!%p238_p11, %s237_s10), 143  ;;  %s1303_s15 = smov (!%p244_p10, %s1089_s15), 1 }
  0x25   : > { %s904_s21 = sshll.u32 %s1301_s10, 3  ;;  %s905_s26 = sshll.u32 %s1303_s15, 5 }
  0x26   : > { %s1194_s24 = scalar_lea.vmem %s1285_s1, %s904_s21  ;;  %s1199_s29 = scalar_lea.vmem %s1287_s3, %s905_s26 }
  0x27   : > { %253 = sbr.rel (%p849_p12) target bundleno = 47 (0x2f), region = 62 }
  0x2c   : > { %v1103_v4 = vmov 0.0  }
  0x2d   : > { %254 = vst [vmem:[#allocation2 + $0x10] sm:$0xff] %v1103_v4  ;;  %255 = vst [vmem:[#allocation2] sm:$0xff] %v1103_v4 }
  0x2e   : > { %256 = vst [vmem:[#allocation2 + $0x18] sm:$0xff] %v1103_v4  ;;  %257 = vst [vmem:[#allocation2 + $0x8] sm:$0xff] %v1103_v4 }
  0x2f PF: > { %v967_v5 = vld [vmem:[%s1194_s24 + $0x74] ss:$8 sps:$4 sm:$0xff]   ;;  %v969_v6 = vld [vmem:[%s1194_s24 + $0x70] ss:$8 sps:$4 sm:$0xff]   ;;  %v1104_v7 = vmov 0   ;;  %p901_p13 = scmp.ne.s32.totalorder %s1085_s14, 2 }
  0x30   : > { %645 = vmatprep.mubr.bf16.mxu1 %v1104_v7  ;;  %570 = vmatprep.subr.bf16.mxu0 %v967_v5  ;;  %v970_v8 = vld [vmem:[%s1194_s24 + $0x64] ss:$8 sps:$4 sm:$0xff]   ;;  %v972_v9 = vld [vmem:[%s1194_s24 + $0x60] ss:$8 sps:$4 sm:$0xff]   ;;  %v973_v10 = vld [vmem:[%s1194_s24 + $0x54] ss:$8 sps:$4 sm:$0xff]  }
  0x31   : > { %571 = vmatpush1.bf16.msra.mxu0 %v969_v6  ;;  %v975_v11 = vld [vmem:[%s1194_s24 + $0x50] ss:$8 sps:$4 sm:$0xff]   ;;  %v976_v12 = vld [vmem:[%s1194_s24 + $0x44] ss:$8 sps:$4 sm:$0xff]   ;;  %v988_v13 = vld [vmem:[%s1194_s24 + $0x174] ss:$8 sps:$4 sm:$0xff]  }
  0x32   : > { %572 = vmatprep.subr.bf16.mxu0 %v970_v8  ;;  %v990_v14 = vld [vmem:[%s1194_s24 + $0x170] ss:$8 sps:$4 sm:$0xff]   ;;  %v978_v15 = vld [vmem:[%s1194_s24 + $0x40] ss:$8 sps:$4 sm:$0xff]   ;;  %v979_v16 = vld [vmem:[%s1194_s24 + $0x34] ss:$8 sps:$4 sm:$0xff]   ;;  %613 = vmatprep.subr.bf16.mxu1 %v988_v13 }
  0x33   : > { %v994_v17 = vld [vmem:[%s1194_s24 + $0x164] ss:$8 sps:$4 sm:$0xff]   ;;  %614 = vmatpush1.bf16.msra.mxu1 %v990_v14  ;;  %v996_v18 = vld [vmem:[%s1194_s24 + $0x160] ss:$8 sps:$4 sm:$0xff]   ;;  %v981_v19 = vld [vmem:[%s1194_s24 + $0x30] ss:$8 sps:$4 sm:$0xff]  }
  0x34   : > { %615 = vmatprep.subr.bf16.mxu1 %v994_v17  ;;  %v1000_v20 = vld [vmem:[%s1194_s24 + $0x154] ss:$8 sps:$4 sm:$0xff]   ;;  %v982_v21 = vld [vmem:[%s1194_s24 + $0x24] ss:$8 sps:$4 sm:$0xff]   ;;  %v1002_v22 = vld [vmem:[%s1194_s24 + $0x150] ss:$8 sps:$4 sm:$0xff]  }
  0x35   : > { %573 = vmatpush1.bf16.msra.mxu0 %v972_v9  ;;  %v1006_v23 = vld [vmem:[%s1194_s24 + $0x144] ss:$8 sps:$4 sm:$0xff]   ;;  %v984_v24 = vld [vmem:[%s1194_s24 + $0x20] ss:$8 sps:$4 sm:$0xff]   ;;  %v985_v25 = vld [vmem:[%s1194_s24 + $0x14] ss:$8 sps:$4 sm:$0xff]  }
  0x36   : > { %574 = vmatprep.subr.bf16.mxu0 %v973_v10  ;;  %v1008_v26 = vld [vmem:[%s1194_s24 + $0x140] ss:$8 sps:$4 sm:$0xff]   ;;  %v1012_v27 = vld [vmem:[%s1194_s24 + $0x134] ss:$8 sps:$4 sm:$0xff]   ;;  %v987_v28 = vld [vmem:[%s1194_s24 + $0x10] ss:$8 sps:$4 sm:$0xff]  }
  0x37   : > { %616 = vmatpush1.bf16.msra.mxu1 %v996_v18  ;;  %v991_v29 = vld [vmem:[%s1194_s24 + $0x4] ss:$8 sps:$4 sm:$0xff]   ;;  %v1014_v30 = vld [vmem:[%s1194_s24 + $0x130] ss:$8 sps:$4 sm:$0xff]   ;;  %v993_v32 = vld [vmem:[%s1194_s24] ss:$8 sps:$4 sm:$0xff]  }
  0x38   : > { %617 = vmatprep.subr.bf16.mxu1 %v1000_v20  ;;  %v1018_v31 = vld [vmem:[%s1194_s24 + $0x124] ss:$8 sps:$4 sm:$0xff]   ;;  %v997_v33 = vld [vmem:[%s1194_s24 + $0xf4] ss:$8 sps:$4 sm:$0xff]   ;;  %v1020_v34 = vld [vmem:[%s1194_s24 + $0x120] ss:$8 sps:$4 sm:$0xff]  }
  0x39   : > { %575 = vmatpush1.bf16.msra.mxu0 %v975_v11  ;;  %v1024_v35 = vld [vmem:[%s1194_s24 + $0x114] ss:$8 sps:$4 sm:$0xff]   ;;  %v999_v36 = vld [vmem:[%s1194_s24 + $0xf0] ss:$8 sps:$4 sm:$0xff]   ;;  %v1003_v37 = vld [vmem:[%s1194_s24 + $0xe4] ss:$8 sps:$4 sm:$0xff]  }
  0x3a   : > { %576 = vmatprep.subr.bf16.mxu0 %v976_v12  ;;  %v1026_v38 = vld [vmem:[%s1194_s24 + $0x110] ss:$8 sps:$4 sm:$0xff]   ;;  %v1030_v39 = vld [vmem:[%s1194_s24 + $0x104] ss:$8 sps:$4 sm:$0xff]   ;;  %v1005_v41 = vld [vmem:[%s1194_s24 + $0xe0] ss:$8 sps:$4 sm:$0xff]  }
  0x3b   : > { %618 = vmatpush1.bf16.msra.mxu1 %v1002_v22  ;;  %v1042_v40 = vld [vmem:[%s1201_s30 + $0x4] ss:$12 sps:$4 sm:$0xff]   ;;  %v1036_v46 = vld [vmem:[%s1201_s30 + $0x8] ss:$12 sps:$4 sm:$0xff]   ;;  %v1040_v56 = vld [vmem:[%s1201_s30] ss:$12 sps:$4 sm:$0xff]  }
  0x3c   : > { %619 = vmatprep.subr.bf16.mxu1 %v1006_v23  ;;  %v1009_v42 = vld [vmem:[%s1194_s24 + $0xd4] ss:$8 sps:$4 sm:$0xff]   ;;  %602 = vmatprep.mubr.bf16.mxu0 %v1042_v40  ;;  %v1032_v43 = vld [vmem:[%s1194_s24 + $0x100] ss:$8 sps:$4 sm:$0xff]   ;;  %v1011_v44 = vld [vmem:[%s1194_s24 + $0xd0] ss:$8 sps:$4 sm:$0xff]  }
  0x3d   : > { %577 = vmatpush1.bf16.msra.mxu0 %v978_v15  ;;  %v1015_v45 = vld [vmem:[%s1194_s24 + $0xc4] ss:$8 sps:$4 sm:$0xff]   ;;  %v1017_v47 = vld [vmem:[%s1194_s24 + $0xc0] ss:$8 sps:$4 sm:$0xff]   ;;  %v1021_v48 = vld [vmem:[%s1194_s24 + $0xb4] ss:$8 sps:$4 sm:$0xff]  }
  0x3e   : > { %578 = vmatprep.subr.bf16.mxu0 %v979_v16  ;;  %v1023_v49 = vld [vmem:[%s1194_s24 + $0xb0] ss:$8 sps:$4 sm:$0xff]   ;;  %v1027_v50 = vld [vmem:[%s1194_s24 + $0xa4] ss:$8 sps:$4 sm:$0xff]   ;;  %v1029_v51 = vld [vmem:[%s1194_s24 + $0xa0] ss:$8 sps:$4 sm:$0xff]  }
  0x3f   : > { %620 = vmatpush1.bf16.msra.mxu1 %v1008_v26  ;;  %v1033_v52 = vld [vmem:[%s1194_s24 + $0x94] ss:$8 sps:$4 sm:$0xff]   ;;  %v1035_v53 = vld [vmem:[%s1194_s24 + $0x90] ss:$8 sps:$4 sm:$0xff]   ;;  %v1037_v54 = vld [vmem:[%s1194_s24 + $0x84] ss:$8 sps:$4 sm:$0xff]  }
  0x40   : > { %621 = vmatprep.subr.bf16.mxu1 %v1012_v27  ;;  %v1039_v55 = vld [vmem:[%s1194_s24 + $0x80] ss:$8 sps:$4 sm:$0xff]   ;;  %v258_v59 = vld [vmem:[#allocation2 + $0x10] sm:$0xff]  ;;  %v260_v3 = vld [vmem:[#allocation2 + $0x18] sm:$0xff] }
  0x41   : > { %579 = vmatpush1.bf16.msra.mxu0 %v981_v19  ;;  %v259_v63 = vld [vmem:[#allocation2] sm:$0xff]  ;;  %v261_v8 = vld [vmem:[#allocation2 + $0x8] sm:$0xff] }
  0x42   : > { %580 = vmatprep.subr.bf16.mxu0 %v982_v21 }
  0x43   : > { %622 = vmatpush1.bf16.msra.mxu1 %v1014_v30 }
  0x44   : > { %623 = vmatprep.subr.bf16.mxu1 %v1018_v31 }
  0x45   : > { %581 = vmatpush1.bf16.msra.mxu0 %v984_v24 }
  0x46   : > { %582 = vmatprep.subr.bf16.mxu0 %v985_v25 }
  0x47   : > { %624 = vmatpush1.bf16.msra.mxu1 %v1020_v34 }
  0x48   : > { %625 = vmatprep.subr.bf16.mxu1 %v1024_v35 }
  0x49   : > { %583 = vmatpush1.bf16.msra.mxu0 %v987_v28 }
  0x4a   : > { %584 = vmatprep.subr.bf16.mxu0 %v991_v29 }
  0x4b   : > { %626 = vmatpush1.bf16.msra.mxu1 %v1026_v38 }
  0x4c   : > { %627 = vmatprep.subr.bf16.mxu1 %v1030_v39 }
  0x4d   : > { %585 = vmatpush1.bf16.msra.mxu0 %v993_v32 }
  0x4e   : > { %586 = vmatprep.subr.bf16.mxu0 %v997_v33 }
  0x4f   : > { %628 = vmatpush1.bf16.msra.mxu1 %v1032_v43 }
  0x51   : > { %587 = vmatpush2.bf16.msra.mxu0 %v999_v36 }
  0x52   : > { %588 = vmatprep.subr.bf16.mxu0 %v1003_v37  ;;  %646 = vmatmul.mubr.bf16.vlgmr.msra.gmra.mxu1 %v1036_v46 }
  0x55   : > { %589 = vmatpush2.bf16.msra.mxu0 %v1005_v41 }
  0x56   : > { %590 = vmatprep.subr.bf16.mxu0 %v1009_v42 }
  0x59   : > { %591 = vmatpush2.bf16.msra.mxu0 %v1011_v44 }
  0x5a   : > { %592 = vmatprep.subr.bf16.mxu0 %v1015_v45 }
  0x5d   : > { %593 = vmatpush2.bf16.msra.mxu0 %v1017_v47 }
  0x5e   : > { %594 = vmatprep.subr.bf16.mxu0 %v1021_v48 }
  0x61   : > { %595 = vmatpush2.bf16.msra.mxu0 %v1023_v49 }
  0x62   : > { %596 = vmatprep.subr.bf16.mxu0 %v1027_v50 }
  0x65   : > { %597 = vmatpush2.bf16.msra.mxu0 %v1029_v51 }
  0x66   : > { %598 = vmatprep.subr.bf16.mxu0 %v1033_v52 }
  0x69   : > { %599 = vmatpush2.bf16.msra.mxu0 %v1035_v53 }
  0x6a   : > { %600 = vmatprep.subr.bf16.mxu0 %v1037_v54 }
  0x6d   : > { %601 = vmatpush2.bf16.msra.mxu0 %v1039_v55 }
  0x70   : > { %603 = vmatmul.mubr.bf16.vlgmr.msra.gmra.mxu0 %v1040_v56 }
 0x112   : > { %v647_v57 = vpop.f32.mrf.mxu1 }
 0x114   : > { %v649_v58 = vpop.f32.mrf.mxu1 }
 0x116   : > { %v651_v62 = vpop.f32.mrf.mxu1 }
 0x118   : > { %v653_v7 = vpop.f32.mrf.mxu1 }
 0x130   : > { %v604_v60 = vpop.f32.mrf.mxu0 }
 0x131   : > { %v648_v61 = vadd.f32 %v647_v57, %v604_v60 }
 0x132   : > { %v606_v0 = vpop.f32.mrf.mxu0 }
 0x133   : > { %v656_v1 = vadd.f32 %v648_v61, %v258_v59  ;;  %v650_v2 = vadd.f32 %v649_v58, %v606_v0 }
 0x134   : > { %v608_v4 = vpop.f32.mrf.mxu0 }
 0x135   : > { %660 = vst [vmem:[#allocation2 + $0x10] sm:$0xff] %v656_v1  ;;  %v657_v5 = vadd.f32 %v650_v2, %v259_v63  ;;  %v652_v6 = vadd.f32 %v651_v62, %v608_v4 }
 0x136   : > { %v610_v9 = vpop.f32.mrf.mxu0 }
 0x137   : > { %661 = vst [vmem:[#allocation2] sm:$0xff] %v657_v5  ;;  %v658_v10 = vadd.f32 %v652_v6, %v260_v3  ;;  %v654_v11 = vadd.f32 %v653_v7, %v610_v9  ;;  %667 = sbr.rel (%p901_p13) target bundleno = 384 (0x180), region = 66 }
 0x139   : > { %662 = vst [vmem:[#allocation2 + $0x18] sm:$0xff] %v658_v10  ;;  %v659_v12 = vadd.f32 %v654_v11, %v261_v8 }
 0x13b   : > { %663 = vst [vmem:[#allocation2 + $0x8] sm:$0xff] %v659_v12 }
 0x13c   : > { %v674_v13 = vlaneseq  ;;  %v672_v15 = vld [vmem:[%s1286_s2] sm:$0x3]  ;;  %v668_v16 = vld [vmem:[#allocation2 + $0x10] sm:$0xff] }
 0x13e   : > { %v675_v14 = vshrl.u32 %v674_v13, 7  ;;  %v669_v20 = vld [vmem:[#allocation2] sm:$0xff] }
 0x140   : > { %v676_v17 = vsub.s32 0, %v675_v14  ;;  %v680_v18 = vsub.s32 1, %v675_v14  ;;  %v670_v19 = vld [vmem:[#allocation2 + $0x18] sm:$0xff] }
 0x142   : > { %v671_v21 = vld [vmem:[#allocation2 + $0x8] sm:$0xff]  ;;  %v677_v22 = vrot.slane %v672_v15, %v676_v17  ;;  %v681_v23 = vrot.slane %v672_v15, %v680_v18 }
 0x144   : > { %v684_v24 = vadd.f32 %v677_v22, %v668_v16  ;;  %v686_v25 = vadd.f32 %v677_v22, %v670_v19  ;;  %v685_v26 = vadd.f32 %v681_v23, %v669_v20  ;;  %v687_v27 = vadd.f32 %v681_v23, %v671_v21 }
 0x146   : > { %v688_v28 = vadd.f32 %v686_v25, %v684_v24  ;;  %v695_v29 = vadd.f32 %v687_v27, %v685_v26 }
 0x148   : > { %v689_v30 = vrot.slane %v688_v28, 4  ;;  %v696_v31 = vrot.slane %v695_v29, 4 }
 0x14a   : > { %v690_v32 = vadd.f32 %v689_v30, %v688_v28  ;;  %v697_v33 = vadd.f32 %v696_v31, %v695_v29 }
 0x14c   : > { %v691_v34 = vrot.slane %v690_v32, 2  ;;  %v698_v35 = vrot.slane %v697_v33, 2 }
 0x14e   : > { %v692_v36 = vadd.f32 %v691_v34, %v690_v32  ;;  %v699_v37 = vadd.f32 %v698_v35, %v697_v33 }
 0x150   : > { %v693_v38 = vrot.slane %v692_v36, 1  ;;  %v700_v39 = vrot.slane %v699_v37, 1 }
 0x152   : > { %v694_v40 = vadd.f32 %v693_v38, %v692_v36  ;;  %v701_v41 = vadd.f32 %v700_v39, %v699_v37 }
 0x154   : > { %v702_v42 = vmul.f32 0.0625, %v694_v40  ;;  %v703_v43 = vmul.f32 0.0625, %v701_v41 }
 0x156   : > { %v704_v44 = vsub.f32 %v684_v24, %v702_v42  ;;  %v706_v45 = vsub.f32 %v686_v25, %v702_v42  ;;  %v705_v46 = vsub.f32 %v685_v26, %v703_v43  ;;  %v707_v47 = vsub.f32 %v687_v27, %v703_v43 }
 0x158   : > { %v708_v48 = vmul.f32 %v704_v44, %v704_v44  ;;  %v710_v49 = vmul.f32 %v706_v45, %v706_v45  ;;  %v709_v50 = vmul.f32 %v705_v46, %v705_v46  ;;  %v711_v51 = vmul.f32 %v707_v47, %v707_v47 }
 0x15a   : > { %v712_v52 = vadd.f32 %v710_v49, %v708_v48  ;;  %v719_v53 = vadd.f32 %v711_v51, %v709_v50 }
 0x15c   : > { %v713_v54 = vrot.slane %v712_v52, 4  ;;  %v720_v55 = vrot.slane %v719_v53, 4 }
 0x15e   : > { %v714_v56 = vadd.f32 %v713_v54, %v712_v52  ;;  %v721_v57 = vadd.f32 %v720_v55, %v719_v53 }
 0x160   : > { %v715_v58 = vrot.slane %v714_v56, 2  ;;  %v722_v59 = vrot.slane %v721_v57, 2 }
 0x162   : > { %v716_v60 = vadd.f32 %v715_v58, %v714_v56  ;;  %v723_v61 = vadd.f32 %v722_v59, %v721_v57 }
 0x164   : > { %v717_v62 = vrot.slane %v716_v60, 1  ;;  %v724_v63 = vrot.slane %v723_v61, 1 }
 0x166   : > { %v718_v0 = vadd.f32 %v717_v62, %v716_v60  ;;  %v725_v1 = vadd.f32 %v724_v63, %v723_v61 }
 0x168   : > { %v726_v2 = vmul.f32 0.0625, %v718_v0  ;;  %v727_v3 = vmul.f32 0.0625, %v725_v1 }
 0x16a   : > { %v728_v4 = vadd.f32 1e-05, %v726_v2  ;;  %v729_v5 = vadd.f32 1e-05, %v727_v3 }
 0x16c   : > { %1043 = vrsqrt.f32 %v728_v4 }
 0x16d   : > { %1045 = vrsqrt.f32 %v729_v5 }
 0x179   : > { %v1044_v6 = vpop.eup %1043 }
 0x17a   : > { %v1046_v7 = vpop.eup %1045  ;;  %v732_v8 = vmul.f32 %v1044_v6, %v704_v44  ;;  %v734_v9 = vmul.f32 %v1044_v6, %v706_v45 }
 0x17b   : > { %v733_v10 = vmul.f32 %v1046_v7, %v705_v46  ;;  %v735_v11 = vmul.f32 %v1046_v7, %v707_v47 }
 0x17c   : > { %v736_v12 = vmax.f32 %v732_v8, 0.0  ;;  %v738_v13 = vmax.f32 %v734_v9, 0.0 }
 0x17d   : > { %v737_v14 = vmax.f32 %v733_v10, 0.0  ;;  %v739_v15 = vmax.f32 %v735_v11, 0.0 }
 0x17e   : > { %740 = vst [vmem:[%s1199_s29] sm:$0xff] %v736_v12  ;;  %742 = vst [vmem:[%s1199_s29 + $0x10] sm:$0xff] %v738_v13 }
 0x17f   : > { %741 = vst [vmem:[%s1199_s29 + $0x8] sm:$0xff] %v737_v14  ;;  %743 = vst [vmem:[%s1199_s29 + $0x18] sm:$0xff] %v739_v15 }
 0x180 PF: > { %s13_s18 = sadd.s32 1, %s1101_s18   ;;  %s1288_s12 = smov %s1081_s13 }
 0x181   : > { %p10_p0 = scmp.ge.s32.totalorder %s13_s18, 8   ;;  %s1289_s13 = smov %s1176_s25 }
 0x182   : > { %s1290_s14 = smov %s1093_s16  ;;  %s1291_s15 = smov %s1097_s17 }
 0x183   : > { %s1292_s16 = smov %s1295_s19  ;;  %s1293_s17 = smov %s1299_s20 }
 0x184   :  { %12 = sbr.rel (!%p10_p0) target bundleno = 4 (0x4), region = 110 }

// kernel: line_drawing_forward.15
= control target key start
LH: loop header
LB: loop body
LE: loop exit
PB: predicated region body
PF: predicated region fallthrough
CT: control target
= control target key end

     0   :  { %s1583_s12 = smov 0   ;;  %s1585_s13 = smov 0   ;;  %s1793_s0 = inlined_call_operand.vmem [shape: bf16[2,16,2304], index: 0, kind: input, shape index: {}]   ;;  %s1794_s1 = inlined_call_operand.vmem [shape: bf16[2304,256], index: 1, kind: input, shape index: {}]   ;;  %s1795_s2 = inlined_call_operand.vmem [shape: f32[1,256], index: 2, kind: input, shape index: {}]   ;;  %s1796_s3 = inlined_call_operand.vmem [shape: f32[2,16,256], index: 3, kind: output, shape index: {}]  }
   0x1   :  { %s1587_s14 = smov 0   ;;  %s1589_s15 = smov 0  }
   0x2   :  { %s1591_s16 = smov 0   ;;  %s1593_s17 = smov 0  }
   0x3   :  { %s1595_s18 = smov 0  }
   0x4 LB: > { %s22_s19 = sadd.s32 1, %s1552_s16  ;;  %s25_s20 = sadd.s32 1, %s1556_s17  ;;  %s1560_s18 = sphi %s1595_s18, %s13_s18   ;;  %s1556_s17 = sphi %s1593_s17, %s1802_s17   ;;  %s1552_s16 = sphi %s1591_s16, %s1801_s16   ;;  %s1548_s15 = sphi %s1589_s15, %s1800_s15   ;;  %s1544_s14 = sphi %s1587_s14, %s1799_s14   ;;  %s1540_s13 = sphi %s1585_s13, %s1798_s13   ;;  %s1536_s12 = sphi %s1583_s12, %s1797_s12  }
   0x5   : > { %p23_p0 = scmp.ge.s32.totalorder %s22_s19, 3  ;;  %p41_p1 = scmp.ne.s32.totalorder %s1540_s13, %s1536_s12 }
   0x6   : > { %p42_p2 = scmp.eq.s32.totalorder %s1560_s18, 0  ;;  %s34_s24 = sadd.s32 1, %s1540_s13 }
   0x7   : > { %s1804_s19 = smov (%p23_p0, %s22_s19), 0  ;;  %s1806_s20 = smov (!%p23_p0, %s25_s20), %s1556_s17 }
   0x8   : > { %p43_p3 = por %p42_p2, %p41_p1  ;;  %p27_p4 = scmp.ge.s32.totalorder %s1806_s20, 2 }
   0x9   : > { %s30_s21 = ssub.s32 %s1552_s16, %s1804_s19  ;;  %p1174_p6 = scmp.ge.s32.totalorder %s1560_s18, 6 }
   0xa   : > { %s1808_s20 = smov (%p27_p4, %s1806_s20), 0 }
   0xb   : > { %s29_s22 = ssub.s32 %s1556_s17, %s1808_s20  ;;  %143 = sbr.rel (%p1174_p6) target bundleno = 28 (0x1c), region = 20 }
   0xc   : > { %s31_s23 = sor.u32 %s30_s21, %s29_s22 }
   0xd   : > { %p32_p5 = scmp.eq.s32.totalorder %s31_s23, 0 }
   0xf   : > { %s1634_s25 = scalar_select %p32_p5, %s1540_s13, %s34_s24  }
  0x10   : > { %146 = sbr.rel (!%p43_p3) target bundleno = 28 (0x1c), region = 24  ;;  %s148_s26 = sand.u32 (%p43_p3), 1, %s1540_s13  }
  0x11   : > { %s151_s27 = smul.u32 (%p43_p3), 6, %s1552_s16 }
  0x12   : > { %s1289_s28 = smul.u32 (%p43_p3), 48, %s148_s26 }
  0x13   : > { %s1290_s29 = smul.u32 (%p43_p3), 36, %s1556_s17 }
  0x14   : > { %s150_s8 = scalar_lea.vmem (%p43_p3), [#allocation3], %s1289_s28 }
  0x15   : > { %s153_s30 = sadd.s32 %s1290_s29, %s151_s27 }
  0x16   : > { %s1175_s4 = sshll.u32 %s153_s30, 2 }
  0x17   : > { %s155_s7 = scalar_lea.vmem %s1793_s0, %s1175_s4 }
  0x18   : > { %v168_v0 = vld [vmem:[%s155_s7] sm:$0xff]  ;;  %v170_v1 = vld [vmem:[%s155_s7 + $0x8] sm:$0xff]  ;;  %v172_v2 = vld [vmem:[%s155_s7 + $0x10] sm:$0xff] }
  0x19   : > { %169 = vst [vmem:[%s150_s8] sm:$0xff] %v168_v0  ;;  %171 = vst [vmem:[%s150_s8 + $0x8] sm:$0xff] %v170_v1  ;;  %v174_v3 = vld [vmem:[%s155_s7 + $0x48] sm:$0xff]  ;;  %v176_v4 = vld [vmem:[%s155_s7 + $0x50] sm:$0xff] }
  0x1a   : > { %173 = vst [vmem:[%s150_s8 + $0x10] sm:$0xff] %v172_v2  ;;  %v178_v5 = vld [vmem:[%s155_s7 + $0x58] sm:$0xff]  ;;  %175 = vst [vmem:[%s150_s8 + $0x18] sm:$0xff] %v174_v3 }
  0x1b   : > { %177 = vst [vmem:[%s150_s8 + $0x20] sm:$0xff] %v176_v4  ;;  %179 = vst [vmem:[%s150_s8 + $0x28] sm:$0xff] %v178_v5 }
  0x1c PF: > { %p1176_p7 = scmp.ge.s32.totalorder %s1560_s18, 1  ;;  %p194_p8 = scmp.lt.s32.totalorder %s1560_s18, 7 }
  0x1e   : > { %p195_p9 = pnand %p1176_p7, %p194_p8 }
  0x1f   : > { %s201_s9 = sand.u32 (!%p195_p9), 1, %s1536_s12   ;;  %s231_s10 = smul.u32 (!%p195_p9), 96, %s1544_s14 }
  0x20   : > { %198 = sbr.rel (%p195_p9) target bundleno = 449 (0x1c1), region = 51  ;;  %p238_p10 = scmp.lt.s32.totalorder (!%p195_p9), %s1548_s15, 1 }
  0x21   : > { %s1291_s11 = smul.u32 (!%p195_p9), 48, %s201_s9  ;;  %p232_p11 = scmp.lt.s32.totalorder (!%p195_p9), %s231_s10, 287 }
  0x22   : > { %p1181_p12 = scmp.ne.s32.totalorder (!%p195_p9), %s1544_s14, 0 }
  0x23   : > { %s1659_s30 = scalar_lea.vmem (!%p195_p9), [#allocation3], %s1291_s11 }
  0x25   : > { %s1810_s10 = smov (!%p232_p11, %s231_s10), 287  ;;  %s1812_s15 = smov (!%p238_p10, %s1548_s15), 1 }
  0x26   : > { %s1287_s21 = sshll.u32 %s1810_s10, 3  ;;  %s1288_s26 = sshll.u32 %s1812_s15, 5 }
  0x27   : > { %s1652_s24 = scalar_lea.vmem %s1794_s1, %s1287_s21  ;;  %s1657_s29 = scalar_lea.vmem %s1796_s3, %s1288_s26 }
  0x28   : > { %246 = sbr.rel (%p1181_p12) target bundleno = 48 (0x30), region = 59 }
  0x2d   : > { %v1562_v6 = vmov 0.0  }
  0x2e   : > { %247 = vst [vmem:[#allocation2 + $0x10] sm:$0xff] %v1562_v6  ;;  %248 = vst [vmem:[#allocation2] sm:$0xff] %v1562_v6 }
  0x2f   : > { %249 = vst [vmem:[#allocation2 + $0x18] sm:$0xff] %v1562_v6  ;;  %250 = vst [vmem:[#allocation2 + $0x8] sm:$0xff] %v1562_v6 }
  0x30 PF: > { %v1349_v7 = vld [vmem:[%s1652_s24 + $0x74] ss:$8 sps:$4 sm:$0xff]   ;;  %v1353_v9 = vld [vmem:[%s1652_s24 + $0x70] ss:$8 sps:$4 sm:$0xff]   ;;  %v1355_v11 = vld [vmem:[%s1652_s24 + $0x64] ss:$8 sps:$4 sm:$0xff]  }
  0x31   : > { %v1351_v8 = vld [vmem:[%s1652_s24 + $0x174] ss:$8 sps:$4 sm:$0xff]   ;;  %867 = vmatprep.subr.bf16.mxu0 %v1349_v7  ;;  %v1354_v10 = vld [vmem:[%s1652_s24 + $0x170] ss:$8 sps:$4 sm:$0xff]   ;;  %v1357_v12 = vld [vmem:[%s1652_s24 + $0x164] ss:$8 sps:$4 sm:$0xff]  }
  0x32   : > { %910 = vmatprep.subr.bf16.mxu1 %v1351_v8  ;;  %868 = vmatpush1.bf16.msra.mxu0 %v1353_v9  ;;  %v1359_v13 = vld [vmem:[%s1652_s24 + $0x60] ss:$8 sps:$4 sm:$0xff]   ;;  %v1361_v15 = vld [vmem:[%s1652_s24 + $0x54] ss:$8 sps:$4 sm:$0xff]   ;;  %v1365_v17 = vld [vmem:[%s1652_s24 + $0x50] ss:$8 sps:$4 sm:$0xff]  }
  0x33   : > { %911 = vmatpush1.bf16.msra.mxu1 %v1354_v10  ;;  %869 = vmatprep.subr.bf16.mxu0 %v1355_v11  ;;  %v1360_v14 = vld [vmem:[%s1652_s24 + $0x160] ss:$8 sps:$4 sm:$0xff]   ;;  %v1363_v16 = vld [vmem:[%s1652_s24 + $0x154] ss:$8 sps:$4 sm:$0xff]   ;;  %v1366_v18 = vld [vmem:[%s1652_s24 + $0x150] ss:$8 sps:$4 sm:$0xff]  }
  0x34   : > { %912 = vmatprep.subr.bf16.mxu1 %v1357_v12  ;;  %v1367_v19 = vld [vmem:[%s1652_s24 + $0x44] ss:$8 sps:$4 sm:$0xff]   ;;  %v1371_v21 = vld [vmem:[%s1652_s24 + $0x40] ss:$8 sps:$4 sm:$0xff]   ;;  %v1373_v23 = vld [vmem:[%s1652_s24 + $0x34] ss:$8 sps:$4 sm:$0xff]  }
  0x35   : > { %v1369_v20 = vld [vmem:[%s1652_s24 + $0x144] ss:$8 sps:$4 sm:$0xff]   ;;  %v1372_v22 = vld [vmem:[%s1652_s24 + $0x140] ss:$8 sps:$4 sm:$0xff]   ;;  %v1375_v24 = vld [vmem:[%s1652_s24 + $0x134] ss:$8 sps:$4 sm:$0xff]  }
  0x36   : > { %870 = vmatpush1.bf16.msra.mxu0 %v1359_v13  ;;  %v1377_v25 = vld [vmem:[%s1652_s24 + $0x30] ss:$8 sps:$4 sm:$0xff]   ;;  %v1379_v27 = vld [vmem:[%s1652_s24 + $0x24] ss:$8 sps:$4 sm:$0xff]   ;;  %v1383_v29 = vld [vmem:[%s1652_s24 + $0x20] ss:$8 sps:$4 sm:$0xff]  }
  0x37   : > { %913 = vmatpush1.bf16.msra.mxu1 %v1360_v14  ;;  %871 = vmatprep.subr.bf16.mxu0 %v1361_v15  ;;  %v1378_v26 = vld [vmem:[%s1652_s24 + $0x130] ss:$8 sps:$4 sm:$0xff]   ;;  %v1381_v28 = vld [vmem:[%s1652_s24 + $0x124] ss:$8 sps:$4 sm:$0xff]   ;;  %v1384_v30 = vld [vmem:[%s1652_s24 + $0x120] ss:$8 sps:$4 sm:$0xff]  }
  0x38   : > { %914 = vmatprep.subr.bf16.mxu1 %v1363_v16  ;;  %v1385_v31 = vld [vmem:[%s1652_s24 + $0x14] ss:$8 sps:$4 sm:$0xff]   ;;  %v1389_v33 = vld [vmem:[%s1652_s24 + $0x10] ss:$8 sps:$4 sm:$0xff]   ;;  %v1391_v35 = vld [vmem:[%s1652_s24 + $0x4] ss:$8 sps:$4 sm:$0xff]  }
  0x39   : > { %v1387_v32 = vld [vmem:[%s1652_s24 + $0x114] ss:$8 sps:$4 sm:$0xff]   ;;  %v1390_v34 = vld [vmem:[%s1652_s24 + $0x110] ss:$8 sps:$4 sm:$0xff]   ;;  %v1393_v36 = vld [vmem:[%s1652_s24 + $0x104] ss:$8 sps:$4 sm:$0xff]  }
  0x3a   : > { %872 = vmatpush1.bf16.msra.mxu0 %v1365_v17  ;;  %v1395_v37 = vld [vmem:[%s1652_s24] ss:$8 sps:$4 sm:$0xff]   ;;  %v1397_v39 = vld [vmem:[%s1652_s24 + $0xf4] ss:$8 sps:$4 sm:$0xff]   ;;  %v1401_v41 = vld [vmem:[%s1652_s24 + $0xf0] ss:$8 sps:$4 sm:$0xff]  }
  0x3b   : > { %915 = vmatpush1.bf16.msra.mxu1 %v1366_v18  ;;  %873 = vmatprep.subr.bf16.mxu0 %v1367_v19  ;;  %v1396_v38 = vld [vmem:[%s1652_s24 + $0x100] ss:$8 sps:$4 sm:$0xff]   ;;  %v1399_v40 = vld [vmem:[%s1652_s24 + $0x1f4] ss:$8 sps:$4 sm:$0xff]   ;;  %v1402_v42 = vld [vmem:[%s1652_s24 + $0x1f0] ss:$8 sps:$4 sm:$0xff]  }
  0x3c   : > { %916 = vmatprep.subr.bf16.mxu1 %v1369_v20  ;;  %v1403_v43 = vld [vmem:[%s1652_s24 + $0xe4] ss:$8 sps:$4 sm:$0xff]   ;;  %v1407_v45 = vld [vmem:[%s1652_s24 + $0xe0] ss:$8 sps:$4 sm:$0xff]   ;;  %v1409_v47 = vld [vmem:[%s1652_s24 + $0xd4] ss:$8 sps:$4 sm:$0xff]  }
  0x3d   : > { %v1405_v44 = vld [vmem:[%s1652_s24 + $0x1e4] ss:$8 sps:$4 sm:$0xff]   ;;  %v1408_v46 = vld [vmem:[%s1652_s24 + $0x1e0] ss:$8 sps:$4 sm:$0xff]   ;;  %v1411_v48 = vld [vmem:[%s1652_s24 + $0x1d4] ss:$8 sps:$4 sm:$0xff]  }
  0x3e   : > { %874 = vmatpush1.bf16.msra.mxu0 %v1371_v21  ;;  %v1413_v49 = vld [vmem:[%s1652_s24 + $0xd0] ss:$8 sps:$4 sm:$0xff]   ;;  %v1415_v51 = vld [vmem:[%s1652_s24 + $0xc4] ss:$8 sps:$4 sm:$0xff]   ;;  %v1419_v53 = vld [vmem:[%s1652_s24 + $0xc0] ss:$8 sps:$4 sm:$0xff]  }
  0x3f   : > { %917 = vmatpush1.bf16.msra.mxu1 %v1372_v22  ;;  %875 = vmatprep.subr.bf16.mxu0 %v1373_v23  ;;  %v1414_v50 = vld [vmem:[%s1652_s24 + $0x1d0] ss:$8 sps:$4 sm:$0xff]   ;;  %v1417_v52 = vld [vmem:[%s1652_s24 + $0x1c4] ss:$8 sps:$4 sm:$0xff]   ;;  %v1420_v54 = vld [vmem:[%s1652_s24 + $0x1c0] ss:$8 sps:$4 sm:$0xff]  }
  0x40   : > { %918 = vmatprep.subr.bf16.mxu1 %v1375_v24  ;;  %v1421_v55 = vld [vmem:[%s1652_s24 + $0xb4] ss:$8 sps:$4 sm:$0xff]   ;;  %v1425_v59 = vld [vmem:[%s1652_s24 + $0xb0] ss:$8 sps:$4 sm:$0xff]   ;;  %v1427_v61 = vld [vmem:[%s1652_s24 + $0xa4] ss:$8 sps:$4 sm:$0xff]  }
  0x41   : > { %v1447_v56 = vld [vmem:[%s1659_s30 + $0x4] ss:$24 sps:$4 sm:$0xff]   ;;  %v1426_v60 = vld [vmem:[%s1652_s24 + $0x1b0] ss:$8 sps:$4 sm:$0xff]   ;;  %v1431_v63 = vld [vmem:[%s1652_s24 + $0xa0] ss:$8 sps:$4 sm:$0xff]  }
  0x42   : > { %876 = vmatpush1.bf16.msra.mxu0 %v1377_v25  ;;  %v1423_v57 = vld [vmem:[%s1652_s24 + $0x1b4] ss:$8 sps:$4 sm:$0xff]   ;;  %899 = vmatprep.mubr.bf16.mxu0 %v1447_v56  ;;  %v1429_v62 = vld [vmem:[%s1652_s24 + $0x1a4] ss:$8 sps:$4 sm:$0xff]   ;;  %v1432_v0 = vld [vmem:[%s1652_s24 + $0x1a0] ss:$8 sps:$4 sm:$0xff]  }
  0x43   : > { %919 = vmatpush1.bf16.msra.mxu1 %v1378_v26  ;;  %877 = vmatprep.subr.bf16.mxu0 %v1379_v27  ;;  %v1450_v58 = vld [vmem:[%s1659_s30 + $0xc] ss:$24 sps:$4 sm:$0xff]   ;;  %v1437_v3 = vld [vmem:[%s1652_s24 + $0x90] ss:$8 sps:$4 sm:$0xff]   ;;  %v1443_v7 = vld [vmem:[%s1652_s24 + $0x80] ss:$8 sps:$4 sm:$0xff]  }
  0x44   : > { %920 = vmatprep.subr.bf16.mxu1 %v1381_v28  ;;  %942 = vmatprep.mubr.bf16.mxu1 %v1450_v58  ;;  %v1433_v1 = vld [vmem:[%s1652_s24 + $0x94] ss:$8 sps:$4 sm:$0xff]   ;;  %v1438_v4 = vld [vmem:[%s1652_s24 + $0x190] ss:$8 sps:$4 sm:$0xff]   ;;  %v1439_v5 = vld [vmem:[%s1652_s24 + $0x84] ss:$8 sps:$4 sm:$0xff]  }
  0x45   : > { %v1435_v2 = vld [vmem:[%s1652_s24 + $0x194] ss:$8 sps:$4 sm:$0xff]   ;;  %v1441_v6 = vld [vmem:[%s1652_s24 + $0x184] ss:$8 sps:$4 sm:$0xff]   ;;  %v1444_v8 = vld [vmem:[%s1652_s24 + $0x180] ss:$8 sps:$4 sm:$0xff]  }
  0x46   : > { %878 = vmatpush1.bf16.msra.mxu0 %v1383_v29  ;;  %v1453_v9 = vld [vmem:[%s1652_s24 + $0x274] ss:$8 sps:$4 sm:$0xff]   ;;  %v1445_v10 = vld [vmem:[%s1659_s30] ss:$24 sps:$4 sm:$0xff]   ;;  %v1456_v13 = vld [vmem:[%s1652_s24 + $0x264] ss:$8 sps:$4 sm:$0xff]  }
  0x47   : > { %921 = vmatpush1.bf16.msra.mxu1 %v1384_v30  ;;  %879 = vmatprep.subr.bf16.mxu0 %v1385_v31  ;;  %v1448_v11 = vld [vmem:[%s1659_s30 + $0x8] ss:$24 sps:$4 sm:$0xff]   ;;  %v1501_v14 = vld [vmem:[%s1659_s30 + $0x14] ss:$24 sps:$4 sm:$0xff]   ;;  %p1284_p13 = scmp.ne.s32.totalorder %s1544_s14, 2 }
  0x48   : > { %922 = vmatprep.subr.bf16.mxu1 %v1387_v32  ;;  %v1451_v12 = vld [vmem:[%s1652_s24 + $0x270] ss:$8 sps:$4 sm:$0xff]   ;;  %v1454_v15 = vld [vmem:[%s1652_s24 + $0x260] ss:$8 sps:$4 sm:$0xff]   ;;  %v1459_v16 = vld [vmem:[%s1652_s24 + $0x254] ss:$8 sps:$4 sm:$0xff]  }
  0x49   : > { %v1457_v17 = vld [vmem:[%s1652_s24 + $0x250] ss:$8 sps:$4 sm:$0xff]   ;;  %v1462_v18 = vld [vmem:[%s1652_s24 + $0x244] ss:$8 sps:$4 sm:$0xff]   ;;  %v1460_v19 = vld [vmem:[%s1652_s24 + $0x240] ss:$8 sps:$4 sm:$0xff]  }
  0x4a   : > { %880 = vmatpush1.bf16.msra.mxu0 %v1389_v33  ;;  %v1465_v20 = vld [vmem:[%s1652_s24 + $0x234] ss:$8 sps:$4 sm:$0xff]   ;;  %v1463_v21 = vld [vmem:[%s1652_s24 + $0x230] ss:$8 sps:$4 sm:$0xff]   ;;  %v1468_v22 = vld [vmem:[%s1652_s24 + $0x224] ss:$8 sps:$4 sm:$0xff]  }
  0x4b   : > { %923 = vmatpush1.bf16.msra.mxu1 %v1390_v34  ;;  %881 = vmatprep.subr.bf16.mxu0 %v1391_v35  ;;  %v1466_v23 = vld [vmem:[%s1652_s24 + $0x220] ss:$8 sps:$4 sm:$0xff]   ;;  %v1471_v24 = vld [vmem:[%s1652_s24 + $0x214] ss:$8 sps:$4 sm:$0xff]   ;;  %v1469_v25 = vld [vmem:[%s1652_s24 + $0x210] ss:$8 sps:$4 sm:$0xff]  }
  0x4c   : > { %924 = vmatprep.subr.bf16.mxu1 %v1393_v36  ;;  %v1474_v26 = vld [vmem:[%s1652_s24 + $0x204] ss:$8 sps:$4 sm:$0xff]   ;;  %v1472_v27 = vld [vmem:[%s1652_s24 + $0x200] ss:$8 sps:$4 sm:$0xff]   ;;  %v1477_v28 = vld [vmem:[%s1652_s24 + $0x2f4] ss:$8 sps:$4 sm:$0xff]  }
  0x4d   : > { %v1475_v29 = vld [vmem:[%s1652_s24 + $0x2f0] ss:$8 sps:$4 sm:$0xff]   ;;  %v1480_v30 = vld [vmem:[%s1652_s24 + $0x2e4] ss:$8 sps:$4 sm:$0xff]   ;;  %v1478_v31 = vld [vmem:[%s1652_s24 + $0x2e0] ss:$8 sps:$4 sm:$0xff]  }
  0x4e   : > { %882 = vmatpush1.bf16.msra.mxu0 %v1395_v37  ;;  %v1483_v32 = vld [vmem:[%s1652_s24 + $0x2d4] ss:$8 sps:$4 sm:$0xff]   ;;  %v1481_v33 = vld [vmem:[%s1652_s24 + $0x2d0] ss:$8 sps:$4 sm:$0xff]   ;;  %v1486_v34 = vld [vmem:[%s1652_s24 + $0x2c4] ss:$8 sps:$4 sm:$0xff]  }
  0x4f   : > { %925 = vmatpush1.bf16.msra.mxu1 %v1396_v38  ;;  %883 = vmatprep.subr.bf16.mxu0 %v1397_v39  ;;  %v1484_v35 = vld [vmem:[%s1652_s24 + $0x2c0] ss:$8 sps:$4 sm:$0xff]   ;;  %v1489_v36 = vld [vmem:[%s1652_s24 + $0x2b4] ss:$8 sps:$4 sm:$0xff]   ;;  %v1487_v37 = vld [vmem:[%s1652_s24 + $0x2b0] ss:$8 sps:$4 sm:$0xff]  }
  0x50   : > { %926 = vmatprep.subr.bf16.mxu1 %v1399_v40  ;;  %v1492_v38 = vld [vmem:[%s1652_s24 + $0x2a4] ss:$8 sps:$4 sm:$0xff]   ;;  %v1490_v39 = vld [vmem:[%s1652_s24 + $0x2a0] ss:$8 sps:$4 sm:$0xff]   ;;  %v1495_v40 = vld [vmem:[%s1652_s24 + $0x294] ss:$8 sps:$4 sm:$0xff]  }
  0x51   : > { %v252_v58 = vld [vmem:[#allocation2] sm:$0xff] }
  0x52   : > { %884 = vmatpush2.bf16.msra.mxu0 %v1401_v41  ;;  %v1493_v41 = vld [vmem:[%s1652_s24 + $0x290] ss:$8 sps:$4 sm:$0xff]  }
  0x53   : > { %927 = vmatpush2.bf16.msra.mxu1 %v1402_v42  ;;  %885 = vmatprep.subr.bf16.mxu0 %v1403_v43  ;;  %v1498_v42 = vld [vmem:[%s1652_s24 + $0x284] ss:$8 sps:$4 sm:$0xff]   ;;  %v1496_v43 = vld [vmem:[%s1652_s24 + $0x280] ss:$8 sps:$4 sm:$0xff]  }
  0x54   : > { %928 = vmatprep.subr.bf16.mxu1 %v1405_v44  ;;  %v1499_v44 = vld [vmem:[%s1659_s30 + $0x10] ss:$24 sps:$4 sm:$0xff]  }
  0x56   : > { %886 = vmatpush2.bf16.msra.mxu0 %v1407_v45 }
  0x57   : > { %929 = vmatpush2.bf16.msra.mxu1 %v1408_v46  ;;  %887 = vmatprep.subr.bf16.mxu0 %v1409_v47 }
  0x58   : > { %930 = vmatprep.subr.bf16.mxu1 %v1411_v48 }
  0x5a   : > { %888 = vmatpush2.bf16.msra.mxu0 %v1413_v49 }
  0x5b   : > { %931 = vmatpush2.bf16.msra.mxu1 %v1414_v50  ;;  %889 = vmatprep.subr.bf16.mxu0 %v1415_v51 }
  0x5c   : > { %932 = vmatprep.subr.bf16.mxu1 %v1417_v52 }
  0x5e   : > { %890 = vmatpush2.bf16.msra.mxu0 %v1419_v53  ;;  %v251_v53 = vld [vmem:[#allocation2 + $0x10] sm:$0xff] }
  0x5f   : > { %933 = vmatpush2.bf16.msra.mxu1 %v1420_v54  ;;  %891 = vmatprep.subr.bf16.mxu0 %v1421_v55 }
  0x60   : > { %934 = vmatprep.subr.bf16.mxu1 %v1423_v57 }
  0x62   : > { %892 = vmatpush2.bf16.msra.mxu0 %v1425_v59 }
  0x63   : > { %935 = vmatpush2.bf16.msra.mxu1 %v1426_v60  ;;  %893 = vmatprep.subr.bf16.mxu0 %v1427_v61 }
  0x64   : > { %936 = vmatprep.subr.bf16.mxu1 %v1429_v62 }
  0x66   : > { %894 = vmatpush2.bf16.msra.mxu0 %v1431_v63  ;;  %v253_v63 = vld [vmem:[#allocation2 + $0x18] sm:$0xff] }
  0x67   : > { %937 = vmatpush2.bf16.msra.mxu1 %v1432_v0  ;;  %895 = vmatprep.subr.bf16.mxu0 %v1433_v1 }
  0x68   : > { %938 = vmatprep.subr.bf16.mxu1 %v1435_v2 }
  0x6a   : > { %896 = vmatpush2.bf16.msra.mxu0 %v1437_v3 }
  0x6b   : > { %939 = vmatpush2.bf16.msra.mxu1 %v1438_v4  ;;  %897 = vmatprep.subr.bf16.mxu0 %v1439_v5  ;;  %v254_v4 = vld [vmem:[#allocation2 + $0x8] sm:$0xff] }
  0x6c   : > { %940 = vmatprep.subr.bf16.mxu1 %v1441_v6 }
  0x6e   : > { %898 = vmatpush2.bf16.msra.mxu0 %v1443_v7 }
  0x6f   : > { %941 = vmatpush2.bf16.msra.mxu1 %v1444_v8  ;;  %953 = vmatprep.subr.bf16.mxu0 %v1453_v9 }
  0x71   : > { %900 = vmatmul.mubr.bf16.vlgmr.msra.gmra.mxu0 %v1445_v10 }
  0x72   : > { %943 = vmatmul.mubr.bf16.vlgmr.msra.gmra.mxu1 %v1448_v11  ;;  %954 = vmatpush1.bf16.msra.mxu0 %v1451_v12 }
  0x73   : > { %955 = vmatprep.subr.bf16.mxu0 %v1456_v13  ;;  %985 = vmatprep.mubr.bf16.mxu0 %v1501_v14 }
  0x76   : > { %956 = vmatpush1.bf16.msra.mxu0 %v1454_v15 }
  0x77   : > { %957 = vmatprep.subr.bf16.mxu0 %v1459_v16 }
  0x7a   : > { %958 = vmatpush1.bf16.msra.mxu0 %v1457_v17 }
  0x7b   : > { %959 = vmatprep.subr.bf16.mxu0 %v1462_v18 }
  0x7e   : > { %960 = vmatpush1.bf16.msra.mxu0 %v1460_v19 }
  0x7f   : > { %961 = vmatprep.subr.bf16.mxu0 %v1465_v20 }
  0x82   : > { %962 = vmatpush1.bf16.msra.mxu0 %v1463_v21 }
  0x83   : > { %963 = vmatprep.subr.bf16.mxu0 %v1468_v22 }
  0x86   : > { %964 = vmatpush1.bf16.msra.mxu0 %v1466_v23 }
  0x87   : > { %965 = vmatprep.subr.bf16.mxu0 %v1471_v24 }
  0x8a   : > { %966 = vmatpush1.bf16.msra.mxu0 %v1469_v25 }
  0x8b   : > { %967 = vmatprep.subr.bf16.mxu0 %v1474_v26 }
  0x8e   : > { %968 = vmatpush1.bf16.msra.mxu0 %v1472_v27 }
  0x8f   : > { %969 = vmatprep.subr.bf16.mxu0 %v1477_v28 }
  0x92   : > { %970 = vmatpush2.bf16.msra.mxu0 %v1475_v29 }
  0x93   : > { %971 = vmatprep.subr.bf16.mxu0 %v1480_v30 }
  0x96   : > { %972 = vmatpush2.bf16.msra.mxu0 %v1478_v31 }
  0x97   : > { %973 = vmatprep.subr.bf16.mxu0 %v1483_v32 }
  0x9a   : > { %974 = vmatpush2.bf16.msra.mxu0 %v1481_v33 }
  0x9b   : > { %975 = vmatprep.subr.bf16.mxu0 %v1486_v34 }
  0x9e   : > { %976 = vmatpush2.bf16.msra.mxu0 %v1484_v35 }
  0x9f   : > { %977 = vmatprep.subr.bf16.mxu0 %v1489_v36 }
  0xa2   : > { %978 = vmatpush2.bf16.msra.mxu0 %v1487_v37 }
  0xa3   : > { %979 = vmatprep.subr.bf16.mxu0 %v1492_v38 }
  0xa6   : > { %980 = vmatpush2.bf16.msra.mxu0 %v1490_v39 }
  0xa7   : > { %981 = vmatprep.subr.bf16.mxu0 %v1495_v40 }
  0xaa   : > { %982 = vmatpush2.bf16.msra.mxu0 %v1493_v41 }
  0xab   : > { %983 = vmatprep.subr.bf16.mxu0 %v1498_v42 }
  0xae   : > { %984 = vmatpush2.bf16.msra.mxu0 %v1496_v43 }
  0xb1   : > { %986 = vmatmul.mubr.bf16.vlgmr.msra.gmra.mxu0 %v1499_v44 }
 0x131   : > { %v901_v45 = vpop.f32.mrf.mxu0 }
 0x132   : > { %v944_v46 = vpop.f32.mrf.mxu1 }
 0x133   : > { %v903_v47 = vpop.f32.mrf.mxu0  ;;  %v945_v52 = vadd.f32 %v944_v46, %v901_v45 }
 0x134   : > { %v946_v48 = vpop.f32.mrf.mxu1 }
 0x135   : > { %v905_v49 = vpop.f32.mrf.mxu0  ;;  %v947_v55 = vadd.f32 %v946_v48, %v903_v47 }
 0x136   : > { %v948_v50 = vpop.f32.mrf.mxu1 }
 0x137   : > { %v907_v51 = vpop.f32.mrf.mxu0  ;;  %v949_v60 = vadd.f32 %v948_v50, %v905_v49 }
 0x138   : > { %v950_v57 = vpop.f32.mrf.mxu1 }
 0x139   : > { %v951_v1 = vadd.f32 %v950_v57, %v907_v51 }
 0x171   : > { %v987_v54 = vpop.f32.mrf.mxu0 }
 0x172   : > { %v988_v56 = vadd.f32 %v987_v54, %v945_v52 }
 0x173   : > { %v989_v59 = vpop.f32.mrf.mxu0 }
 0x174   : > { %v996_v61 = vadd.f32 %v988_v56, %v251_v53  ;;  %v990_v62 = vadd.f32 %v989_v59, %v947_v55 }
 0x175   : > { %v991_v0 = vpop.f32.mrf.mxu0 }
 0x176   : > { %1000 = vst [vmem:[#allocation2 + $0x10] sm:$0xff] %v996_v61  ;;  %v997_v2 = vadd.f32 %v990_v62, %v252_v58  ;;  %v992_v3 = vadd.f32 %v991_v0, %v949_v60 }
 0x177   : > { %v993_v5 = vpop.f32.mrf.mxu0 }
 0x178   : > { %1001 = vst [vmem:[#allocation2] sm:$0xff] %v997_v2  ;;  %v998_v6 = vadd.f32 %v992_v3, %v253_v63  ;;  %v994_v7 = vadd.f32 %v993_v5, %v951_v1  ;;  %1007 = sbr.rel (%p1284_p13) target bundleno = 449 (0x1c1), region = 63 }
 0x17a   : > { %1002 = vst [vmem:[#allocation2 + $0x18] sm:$0xff] %v998_v6  ;;  %v999_v8 = vadd.f32 %v994_v7, %v254_v4 }
 0x17c   : > { %1003 = vst [vmem:[#allocation2 + $0x8] sm:$0xff] %v999_v8 }
 0x17d   : > { %v1014_v9 = vlaneseq  ;;  %v1012_v11 = vld [vmem:[%s1795_s2] sm:$0x3]  ;;  %v1008_v12 = vld [vmem:[#allocation2 + $0x10] sm:$0xff] }
 0x17f   : > { %v1015_v10 = vshrl.u32 %v1014_v9, 7  ;;  %v1009_v16 = vld [vmem:[#allocation2] sm:$0xff] }
 0x181   : > { %v1016_v13 = vsub.s32 0, %v1015_v10  ;;  %v1020_v14 = vsub.s32 1, %v1015_v10  ;;  %v1010_v15 = vld [vmem:[#allocation2 + $0x18] sm:$0xff] }
 0x183   : > { %v1011_v17 = vld [vmem:[#allocation2 + $0x8] sm:$0xff]  ;;  %v1017_v18 = vrot.slane %v1012_v11, %v1016_v13  ;;  %v1021_v19 = vrot.slane %v1012_v11, %v1020_v14 }
 0x185   : > { %v1024_v20 = vadd.f32 %v1017_v18, %v1008_v12  ;;  %v1026_v21 = vadd.f32 %v1017_v18, %v1010_v15  ;;  %v1025_v22 = vadd.f32 %v1021_v19, %v1009_v16  ;;  %v1027_v23 = vadd.f32 %v1021_v19, %v1011_v17 }
 0x187   : > { %v1028_v24 = vadd.f32 %v1026_v21, %v1024_v20  ;;  %v1035_v25 = vadd.f32 %v1027_v23, %v1025_v22 }
 0x189   : > { %v1029_v26 = vrot.slane %v1028_v24, 4  ;;  %v1036_v27 = vrot.slane %v1035_v25, 4 }
 0x18b   : > { %v1030_v28 = vadd.f32 %v1029_v26, %v1028_v24  ;;  %v1037_v29 = vadd.f32 %v1036_v27, %v1035_v25 }
 0x18d   : > { %v1031_v30 = vrot.slane %v1030_v28, 2  ;;  %v1038_v31 = vrot.slane %v1037_v29, 2 }
 0x18f   : > { %v1032_v32 = vadd.f32 %v1031_v30, %v1030_v28  ;;  %v1039_v33 = vadd.f32 %v1038_v31, %v1037_v29 }
 0x191   : > { %v1033_v34 = vrot.slane %v1032_v32, 1  ;;  %v1040_v35 = vrot.slane %v1039_v33, 1 }
 0x193   : > { %v1034_v36 = vadd.f32 %v1033_v34, %v1032_v32  ;;  %v1041_v37 = vadd.f32 %v1040_v35, %v1039_v33 }
 0x195   : > { %v1042_v38 = vmul.f32 0.0625, %v1034_v36  ;;  %v1043_v39 = vmul.f32 0.0625, %v1041_v37 }
 0x197   : > { %v1044_v40 = vsub.f32 %v1024_v20, %v1042_v38  ;;  %v1046_v41 = vsub.f32 %v1026_v21, %v1042_v38  ;;  %v1045_v42 = vsub.f32 %v1025_v22, %v1043_v39  ;;  %v1047_v43 = vsub.f32 %v1027_v23, %v1043_v39 }
 0x199   : > { %v1048_v44 = vmul.f32 %v1044_v40, %v1044_v40  ;;  %v1050_v45 = vmul.f32 %v1046_v41, %v1046_v41  ;;  %v1049_v46 = vmul.f32 %v1045_v42, %v1045_v42  ;;  %v1051_v47 = vmul.f32 %v1047_v43, %v1047_v43 }
 0x19b   : > { %v1052_v48 = vadd.f32 %v1050_v45, %v1048_v44  ;;  %v1059_v49 = vadd.f32 %v1051_v47, %v1049_v46 }
 0x19d   : > { %v1053_v50 = vrot.slane %v1052_v48, 4  ;;  %v1060_v51 = vrot.slane %v1059_v49, 4 }
 0x19f   : > { %v1054_v52 = vadd.f32 %v1053_v50, %v1052_v48  ;;  %v1061_v53 = vadd.f32 %v1060_v51, %v1059_v49 }
 0x1a1   : > { %v1055_v54 = vrot.slane %v1054_v52, 2  ;;  %v1062_v55 = vrot.slane %v1061_v53, 2 }
 0x1a3   : > { %v1056_v56 = vadd.f32 %v1055_v54, %v1054_v52  ;;  %v1063_v57 = vadd.f32 %v1062_v55, %v1061_v53 }
 0x1a5   : > { %v1057_v58 = vrot.slane %v1056_v56, 1  ;;  %v1064_v59 = vrot.slane %v1063_v57, 1 }
 0x1a7   : > { %v1058_v60 = vadd.f32 %v1057_v58, %v1056_v56  ;;  %v1065_v61 = vadd.f32 %v1064_v59, %v1063_v57 }
 0x1a9   : > { %v1066_v62 = vmul.f32 0.0625, %v1058_v60  ;;  %v1067_v63 = vmul.f32 0.0625, %v1065_v61 }
 0x1ab   : > { %v1068_v0 = vadd.f32 1e-05, %v1066_v62  ;;  %v1069_v1 = vadd.f32 1e-05, %v1067_v63 }
 0x1ad   : > { %1502 = vrsqrt.f32 %v1068_v0 }
 0x1ae   : > { %1504 = vrsqrt.f32 %v1069_v1 }
 0x1ba   : > { %v1503_v2 = vpop.eup %1502 }
 0x1bb   : > { %v1505_v3 = vpop.eup %1504  ;;  %v1072_v4 = vmul.f32 %v1503_v2, %v1044_v40  ;;  %v1074_v5 = vmul.f32 %v1503_v2, %v1046_v41 }
 0x1bc   : > { %v1073_v6 = vmul.f32 %v1505_v3, %v1045_v42  ;;  %v1075_v7 = vmul.f32 %v1505_v3, %v1047_v43 }
 0x1bd   : > { %v1076_v8 = vmax.f32 %v1072_v4, 0.0  ;;  %v1078_v9 = vmax.f32 %v1074_v5, 0.0 }
 0x1be   : > { %v1077_v10 = vmax.f32 %v1073_v6, 0.0  ;;  %v1079_v11 = vmax.f32 %v1075_v7, 0.0 }
 0x1bf   : > { %1080 = vst [vmem:[%s1657_s29] sm:$0xff] %v1076_v8  ;;  %1082 = vst [vmem:[%s1657_s29 + $0x10] sm:$0xff] %v1078_v9 }
 0x1c0   : > { %1081 = vst [vmem:[%s1657_s29 + $0x8] sm:$0xff] %v1077_v10  ;;  %1083 = vst [vmem:[%s1657_s29 + $0x18] sm:$0xff] %v1079_v11 }
 0x1c1 PF: > { %s13_s18 = sadd.s32 1, %s1560_s18   ;;  %s1797_s12 = smov %s1540_s13 }
 0x1c2   : > { %p10_p0 = scmp.ge.s32.totalorder %s13_s18, 8   ;;  %s1798_s13 = smov %s1634_s25 }
 0x1c3   : > { %s1799_s14 = smov %s1552_s16  ;;  %s1800_s15 = smov %s1556_s17 }
 0x1c4   : > { %s1801_s16 = smov %s1804_s19  ;;  %s1802_s17 = smov %s1808_s20 }
 0x1c5   :  { %12 = sbr.rel (!%p10_p0) target bundleno = 4 (0x4), region = 101 }

// kernel: line_drawing_forward.16
= control target key start
LH: loop header
LB: loop body
LE: loop exit
PB: predicated region body
PF: predicated region fallthrough
CT: control target
= control target key end

     0   :  { %s1654_s15 = smov 0   ;;  %s1656_s16 = smov 0   ;;  %s1873_s0 = inlined_call_operand.vmem [shape: bf16[2,16,2304], index: 0, kind: input, shape index: {}]   ;;  %s1874_s1 = inlined_call_operand.vmem [shape: bf16[2304,256], index: 1, kind: input, shape index: {}]   ;;  %s1875_s2 = inlined_call_operand.vmem [shape: f32[1,256], index: 2, kind: input, shape index: {}]   ;;  %s1876_s3 = inlined_call_operand.vmem [shape: f32[2,16,256], index: 3, kind: input, shape index: {}]   ;;  %s1877_s4 = inlined_call_operand.vmem [shape: f32[2,16,256], index: 4, kind: output, shape index: {}]  }
   0x1   :  { %s1658_s17 = smov 0   ;;  %s1660_s18 = smov 0  }
   0x2   :  { %s1662_s19 = smov 0   ;;  %s1664_s20 = smov 0  }
   0x3   :  { %s1666_s21 = smov 0  }
   0x4 LB: > { %s23_s22 = sadd.s32 1, %s1618_s19  ;;  %s26_s23 = sadd.s32 1, %s1622_s20  ;;  %s1626_s21 = sphi %s1666_s21, %s14_s21   ;;  %s1622_s20 = sphi %s1664_s20, %s1883_s20   ;;  %s1618_s19 = sphi %s1662_s19, %s1882_s19   ;;  %s1614_s18 = sphi %s1660_s18, %s1881_s18   ;;  %s1610_s17 = sphi %s1658_s17, %s1880_s17   ;;  %s1606_s16 = sphi %s1656_s16, %s1879_s16   ;;  %s1602_s15 = sphi %s1654_s15, %s1878_s15  }
   0x5   : > { %p24_p0 = scmp.ge.s32.totalorder %s23_s22, 3  ;;  %p42_p1 = scmp.ne.s32.totalorder %s1606_s16, %s1602_s15 }
   0x6   : > { %p43_p2 = scmp.eq.s32.totalorder %s1626_s21, 0  ;;  %s35_s27 = sadd.s32 1, %s1606_s16 }
   0x7   : > { %s1885_s22 = smov (%p24_p0, %s23_s22), 0  ;;  %s1887_s23 = smov (!%p24_p0, %s26_s23), %s1622_s20 }
   0x8   : > { %p44_p3 = por %p43_p2, %p42_p1  ;;  %p28_p4 = scmp.ge.s32.totalorder %s1887_s23, 2 }
   0x9   : > { %s31_s24 = ssub.s32 %s1618_s19, %s1885_s22  ;;  %p1237_p6 = scmp.ge.s32.totalorder %s1626_s21, 6 }
   0xa   : > { %s1889_s23 = smov (%p28_p4, %s1887_s23), 0 }
   0xb   : > { %s30_s25 = ssub.s32 %s1622_s20, %s1889_s23  ;;  %170 = sbr.rel (%p1237_p6) target bundleno = 28 (0x1c), region = 20 }
   0xc   : > { %s32_s26 = sor.u32 %s31_s24, %s30_s25 }
   0xd   : > { %p33_p5 = scmp.eq.s32.totalorder %s32_s26, 0 }
   0xf   : > { %s1705_s28 = scalar_select %p33_p5, %s1606_s16, %s35_s27  }
  0x10   : > { %173 = sbr.rel (!%p44_p3) target bundleno = 28 (0x1c), region = 24  ;;  %s175_s29 = sand.u32 (%p44_p3), 1, %s1606_s16  }
  0x11   : > { %s178_s30 = smul.u32 (%p44_p3), 6, %s1618_s19 }
  0x12   : > { %s1355_s5 = smul.u32 (%p44_p3), 48, %s175_s29 }
  0x13   : > { %s1356_s6 = smul.u32 (%p44_p3), 36, %s1622_s20 }
  0x14   : > { %s177_s12 = scalar_lea.vmem (%p44_p3), [#allocation3], %s1355_s5 }
  0x15   : > { %s180_s7 = sadd.s32 %s1356_s6, %s178_s30 }
  0x16   : > { %s1238_s8 = sshll.u32 %s180_s7, 2 }
  0x17   : > { %s182_s11 = scalar_lea.vmem %s1873_s0, %s1238_s8 }
  0x18   : > { %v195_v0 = vld [vmem:[%s182_s11] sm:$0xff]  ;;  %v197_v1 = vld [vmem:[%s182_s11 + $0x8] sm:$0xff]  ;;  %v199_v2 = vld [vmem:[%s182_s11 + $0x10] sm:$0xff] }
  0x19   : > { %196 = vst [vmem:[%s177_s12] sm:$0xff] %v195_v0  ;;  %198 = vst [vmem:[%s177_s12 + $0x8] sm:$0xff] %v197_v1  ;;  %v201_v3 = vld [vmem:[%s182_s11 + $0x48] sm:$0xff]  ;;  %v203_v4 = vld [vmem:[%s182_s11 + $0x50] sm:$0xff] }
  0x1a   : > { %200 = vst [vmem:[%s177_s12 + $0x10] sm:$0xff] %v199_v2  ;;  %v205_v5 = vld [vmem:[%s182_s11 + $0x58] sm:$0xff]  ;;  %202 = vst [vmem:[%s177_s12 + $0x18] sm:$0xff] %v201_v3 }
  0x1b   : > { %204 = vst [vmem:[%s177_s12 + $0x20] sm:$0xff] %v203_v4  ;;  %206 = vst [vmem:[%s177_s12 + $0x28] sm:$0xff] %v205_v5 }
  0x1c PF: > { %p1239_p7 = scmp.ge.s32.totalorder %s1626_s21, 1  ;;  %p229_p8 = scmp.lt.s32.totalorder %s1626_s21, 7 }
  0x1e   : > { %p230_p9 = pnand %p1239_p7, %p229_p8 }
  0x1f   : > { %s236_s13 = sand.u32 (!%p230_p9), 1, %s1602_s15   ;;  %s273_s14 = smul.u32 (!%p230_p9), 96, %s1610_s17 }
  0x20   : > { %233 = sbr.rel (%p230_p9) target bundleno = 449 (0x1c1), region = 55  ;;  %p280_p10 = scmp.lt.s32.totalorder (!%p230_p9), %s1614_s18, 1 }
  0x21   : > { %s1357_s24 = smul.u32 (!%p230_p9), 48, %s236_s13  ;;  %p274_p11 = scmp.lt.s32.totalorder (!%p230_p9), %s273_s14, 287 }
  0x22   : > { %p1246_p12 = scmp.ne.s32.totalorder (!%p230_p9), %s1610_s17, 0 }
  0x23   : > { %s1735_s10 = scalar_lea.vmem (!%p230_p9), [#allocation3], %s1357_s24 }
  0x25   : > { %s1891_s14 = smov (!%p274_p11, %s273_s14), 287  ;;  %s1893_s18 = smov (!%p280_p10, %s1614_s18), 1 }
  0x26   : > { %s1352_s25 = sshll.u32 %s1891_s14, 3  ;;  %s1353_s30 = sshll.u32 %s1893_s18, 5 }
  0x27   : > { %s1723_s29 = scalar_lea.vmem %s1874_s1, %s1352_s25  ;;  %s1728_s7 = scalar_lea.vmem %s1876_s3, %s1353_s30 }
  0x28   : > { %s1733_s9 = scalar_lea.vmem %s1877_s4, %s1353_s30  ;;  %293 = sbr.rel (%p1246_p12) target bundleno = 48 (0x30), region = 63 }
  0x2d   : > { %v1628_v6 = vmov 0.0  }
  0x2e   : > { %294 = vst [vmem:[#allocation2 + $0x10] sm:$0xff] %v1628_v6  ;;  %295 = vst [vmem:[#allocation2] sm:$0xff] %v1628_v6 }
  0x2f   : > { %296 = vst [vmem:[#allocation2 + $0x18] sm:$0xff] %v1628_v6  ;;  %297 = vst [vmem:[#allocation2 + $0x8] sm:$0xff] %v1628_v6 }
  0x30 PF: > { %v1415_v7 = vld [vmem:[%s1723_s29 + $0x74] ss:$8 sps:$4 sm:$0xff]   ;;  %v1419_v9 = vld [vmem:[%s1723_s29 + $0x70] ss:$8 sps:$4 sm:$0xff]   ;;  %v1421_v11 = vld [vmem:[%s1723_s29 + $0x64] ss:$8 sps:$4 sm:$0xff]  }
  0x31   : > { %v1417_v8 = vld [vmem:[%s1723_s29 + $0x174] ss:$8 sps:$4 sm:$0xff]   ;;  %914 = vmatprep.subr.bf16.mxu0 %v1415_v7  ;;  %v1420_v10 = vld [vmem:[%s1723_s29 + $0x170] ss:$8 sps:$4 sm:$0xff]   ;;  %v1423_v12 = vld [vmem:[%s1723_s29 + $0x164] ss:$8 sps:$4 sm:$0xff]  }
  0x32   : > { %957 = vmatprep.subr.bf16.mxu1 %v1417_v8  ;;  %915 = vmatpush1.bf16.msra.mxu0 %v1419_v9  ;;  %v1425_v13 = vld [vmem:[%s1723_s29 + $0x60] ss:$8 sps:$4 sm:$0xff]   ;;  %v1427_v15 = vld [vmem:[%s1723_s29 + $0x54] ss:$8 sps:$4 sm:$0xff]   ;;  %v1431_v17 = vld [vmem:[%s1723_s29 + $0x50] ss:$8 sps:$4 sm:$0xff]  }
  0x33   : > { %958 = vmatpush1.bf16.msra.mxu1 %v1420_v10  ;;  %916 = vmatprep.subr.bf16.mxu0 %v1421_v11  ;;  %v1426_v14 = vld [vmem:[%s1723_s29 + $0x160] ss:$8 sps:$4 sm:$0xff]   ;;  %v1429_v16 = vld [vmem:[%s1723_s29 + $0x154] ss:$8 sps:$4 sm:$0xff]   ;;  %v1432_v18 = vld [vmem:[%s1723_s29 + $0x150] ss:$8 sps:$4 sm:$0xff]  }
  0x34   : > { %959 = vmatprep.subr.bf16.mxu1 %v1423_v12  ;;  %v1433_v19 = vld [vmem:[%s1723_s29 + $0x44] ss:$8 sps:$4 sm:$0xff]   ;;  %v1437_v21 = vld [vmem:[%s1723_s29 + $0x40] ss:$8 sps:$4 sm:$0xff]   ;;  %v1439_v23 = vld [vmem:[%s1723_s29 + $0x34] ss:$8 sps:$4 sm:$0xff]  }
  0x35   : > { %v1435_v20 = vld [vmem:[%s1723_s29 + $0x144] ss:$8 sps:$4 sm:$0xff]   ;;  %v1438_v22 = vld [vmem:[%s1723_s29 + $0x140] ss:$8 sps:$4 sm:$0xff]   ;;  %v1441_v24 = vld [vmem:[%s1723_s29 + $0x134] ss:$8 sps:$4 sm:$0xff]  }
  0x36   : > { %917 = vmatpush1.bf16.msra.mxu0 %v1425_v13  ;;  %v1443_v25 = vld [vmem:[%s1723_s29 + $0x30] ss:$8 sps:$4 sm:$0xff]   ;;  %v1445_v27 = vld [vmem:[%s1723_s29 + $0x24] ss:$8 sps:$4 sm:$0xff]   ;;  %v1449_v29 = vld [vmem:[%s1723_s29 + $0x20] ss:$8 sps:$4 sm:$0xff]  }
  0x37   : > { %960 = vmatpush1.bf16.msra.mxu1 %v1426_v14  ;;  %918 = vmatprep.subr.bf16.mxu0 %v1427_v15  ;;  %v1444_v26 = vld [vmem:[%s1723_s29 + $0x130] ss:$8 sps:$4 sm:$0xff]   ;;  %v1447_v28 = vld [vmem:[%s1723_s29 + $0x124] ss:$8 sps:$4 sm:$0xff]   ;;  %v1450_v30 = vld [vmem:[%s1723_s29 + $0x120] ss:$8 sps:$4 sm:$0xff]  }
  0x38   : > { %961 = vmatprep.subr.bf16.mxu1 %v1429_v16  ;;  %v1451_v31 = vld [vmem:[%s1723_s29 + $0x14] ss:$8 sps:$4 sm:$0xff]   ;;  %v1455_v33 = vld [vmem:[%s1723_s29 + $0x10] ss:$8 sps:$4 sm:$0xff]   ;;  %v1457_v35 = vld [vmem:[%s1723_s29 + $0x4] ss:$8 sps:$4 sm:$0xff]  }
  0x39   : > { %v1453_v32 = vld [vmem:[%s1723_s29 + $0x114] ss:$8 sps:$4 sm:$0xff]   ;;  %v1456_v34 = vld [vmem:[%s1723_s29 + $0x110] ss:$8 sps:$4 sm:$0xff]   ;;  %v1459_v36 = vld [vmem:[%s1723_s29 + $0x104] ss:$8 sps:$4 sm:$0xff]  }
  0x3a   : > { %919 = vmatpush1.bf16.msra.mxu0 %v1431_v17  ;;  %v1461_v37 = vld [vmem:[%s1723_s29] ss:$8 sps:$4 sm:$0xff]   ;;  %v1463_v39 = vld [vmem:[%s1723_s29 + $0xf4] ss:$8 sps:$4 sm:$0xff]   ;;  %v1467_v41 = vld [vmem:[%s1723_s29 + $0xf0] ss:$8 sps:$4 sm:$0xff]  }
  0x3b   : > { %962 = vmatpush1.bf16.msra.mxu1 %v1432_v18  ;;  %920 = vmatprep.subr.bf16.mxu0 %v1433_v19  ;;  %v1462_v38 = vld [vmem:[%s1723_s29 + $0x100] ss:$8 sps:$4 sm:$0xff]   ;;  %v1465_v40 = vld [vmem:[%s1723_s29 + $0x1f4] ss:$8 sps:$4 sm:$0xff]   ;;  %v1468_v42 = vld [vmem:[%s1723_s29 + $0x1f0] ss:$8 sps:$4 sm:$0xff]  }
  0x3c   : > { %963 = vmatprep.subr.bf16.mxu1 %v1435_v20  ;;  %v1469_v43 = vld [vmem:[%s1723_s29 + $0xe4] ss:$8 sps:$4 sm:$0xff]   ;;  %v1473_v45 = vld [vmem:[%s1723_s29 + $0xe0] ss:$8 sps:$4 sm:$0xff]   ;;  %v1475_v47 = vld [vmem:[%s1723_s29 + $0xd4] ss:$8 sps:$4 sm:$0xff]  }
  0x3d   : > { %v1471_v44 = vld [vmem:[%s1723_s29 + $0x1e4] ss:$8 sps:$4 sm:$0xff]   ;;  %v1474_v46 = vld [vmem:[%s1723_s29 + $0x1e0] ss:$8 sps:$4 sm:$0xff]   ;;  %v1477_v48 = vld [vmem:[%s1723_s29 + $0x1d4] ss:$8 sps:$4 sm:$0xff]  }
  0x3e   : > { %921 = vmatpush1.bf16.msra.mxu0 %v1437_v21  ;;  %v1479_v49 = vld [vmem:[%s1723_s29 + $0xd0] ss:$8 sps:$4 sm:$0xff]   ;;  %v1481_v51 = vld [vmem:[%s1723_s29 + $0xc4] ss:$8 sps:$4 sm:$0xff]   ;;  %v1485_v53 = vld [vmem:[%s1723_s29 + $0xc0] ss:$8 sps:$4 sm:$0xff]  }
  0x3f   : > { %964 = vmatpush1.bf16.msra.mxu1 %v1438_v22  ;;  %922 = vmatprep.subr.bf16.mxu0 %v1439_v23  ;;  %v1480_v50 = vld [vmem:[%s1723_s29 + $0x1d0] ss:$8 sps:$4 sm:$0xff]   ;;  %v1483_v52 = vld [vmem:[%s1723_s29 + $0x1c4] ss:$8 sps:$4 sm:$0xff]   ;;  %v1486_v54 = vld [vmem:[%s1723_s29 + $0x1c0] ss:$8 sps:$4 sm:$0xff]  }
  0x40   : > { %965 = vmatprep.subr.bf16.mxu1 %v1441_v24  ;;  %v1487_v55 = vld [vmem:[%s1723_s29 + $0xb4] ss:$8 sps:$4 sm:$0xff]   ;;  %v1491_v59 = vld [vmem:[%s1723_s29 + $0xb0] ss:$8 sps:$4 sm:$0xff]   ;;  %v1493_v61 = vld [vmem:[%s1723_s29 + $0xa4] ss:$8 sps:$4 sm:$0xff]  }
  0x41   : > { %v1513_v56 = vld [vmem:[%s1735_s10 + $0x4] ss:$24 sps:$4 sm:$0xff]   ;;  %v1492_v60 = vld [vmem:[%s1723_s29 + $0x1b0] ss:$8 sps:$4 sm:$0xff]   ;;  %v1497_v63 = vld [vmem:[%s1723_s29 + $0xa0] ss:$8 sps:$4 sm:$0xff]  }
  0x42   : > { %923 = vmatpush1.bf16.msra.mxu0 %v1443_v25  ;;  %v1489_v57 = vld [vmem:[%s1723_s29 + $0x1b4] ss:$8 sps:$4 sm:$0xff]   ;;  %946 = vmatprep.mubr.bf16.mxu0 %v1513_v56  ;;  %v1495_v62 = vld [vmem:[%s1723_s29 + $0x1a4] ss:$8 sps:$4 sm:$0xff]   ;;  %v1498_v0 = vld [vmem:[%s1723_s29 + $0x1a0] ss:$8 sps:$4 sm:$0xff]  }
  0x43   : > { %966 = vmatpush1.bf16.msra.mxu1 %v1444_v26  ;;  %924 = vmatprep.subr.bf16.mxu0 %v1445_v27  ;;  %v1516_v58 = vld [vmem:[%s1735_s10 + $0xc] ss:$24 sps:$4 sm:$0xff]   ;;  %v1503_v3 = vld [vmem:[%s1723_s29 + $0x90] ss:$8 sps:$4 sm:$0xff]   ;;  %v1509_v7 = vld [vmem:[%s1723_s29 + $0x80] ss:$8 sps:$4 sm:$0xff]  }
  0x44   : > { %967 = vmatprep.subr.bf16.mxu1 %v1447_v28  ;;  %989 = vmatprep.mubr.bf16.mxu1 %v1516_v58  ;;  %v1499_v1 = vld [vmem:[%s1723_s29 + $0x94] ss:$8 sps:$4 sm:$0xff]   ;;  %v1504_v4 = vld [vmem:[%s1723_s29 + $0x190] ss:$8 sps:$4 sm:$0xff]   ;;  %v1505_v5 = vld [vmem:[%s1723_s29 + $0x84] ss:$8 sps:$4 sm:$0xff]  }
  0x45   : > { %v1501_v2 = vld [vmem:[%s1723_s29 + $0x194] ss:$8 sps:$4 sm:$0xff]   ;;  %v1507_v6 = vld [vmem:[%s1723_s29 + $0x184] ss:$8 sps:$4 sm:$0xff]   ;;  %v1510_v8 = vld [vmem:[%s1723_s29 + $0x180] ss:$8 sps:$4 sm:$0xff]  }
  0x46   : > { %925 = vmatpush1.bf16.msra.mxu0 %v1449_v29  ;;  %v1519_v9 = vld [vmem:[%s1723_s29 + $0x274] ss:$8 sps:$4 sm:$0xff]   ;;  %v1511_v10 = vld [vmem:[%s1735_s10] ss:$24 sps:$4 sm:$0xff]   ;;  %v1522_v13 = vld [vmem:[%s1723_s29 + $0x264] ss:$8 sps:$4 sm:$0xff]  }
  0x47   : > { %968 = vmatpush1.bf16.msra.mxu1 %v1450_v30  ;;  %926 = vmatprep.subr.bf16.mxu0 %v1451_v31  ;;  %v1514_v11 = vld [vmem:[%s1735_s10 + $0x8] ss:$24 sps:$4 sm:$0xff]   ;;  %v1567_v14 = vld [vmem:[%s1735_s10 + $0x14] ss:$24 sps:$4 sm:$0xff]   ;;  %p1349_p13 = scmp.ne.s32.totalorder %s1610_s17, 2 }
  0x48   : > { %969 = vmatprep.subr.bf16.mxu1 %v1453_v32  ;;  %v1517_v12 = vld [vmem:[%s1723_s29 + $0x270] ss:$8 sps:$4 sm:$0xff]   ;;  %v1520_v15 = vld [vmem:[%s1723_s29 + $0x260] ss:$8 sps:$4 sm:$0xff]   ;;  %v1525_v16 = vld [vmem:[%s1723_s29 + $0x254] ss:$8 sps:$4 sm:$0xff]  }
  0x49   : > { %v1523_v17 = vld [vmem:[%s1723_s29 + $0x250] ss:$8 sps:$4 sm:$0xff]   ;;  %v1528_v18 = vld [vmem:[%s1723_s29 + $0x244] ss:$8 sps:$4 sm:$0xff]   ;;  %v1526_v19 = vld [vmem:[%s1723_s29 + $0x240] ss:$8 sps:$4 sm:$0xff]  }
  0x4a   : > { %927 = vmatpush1.bf16.msra.mxu0 %v1455_v33  ;;  %v1531_v20 = vld [vmem:[%s1723_s29 + $0x234] ss:$8 sps:$4 sm:$0xff]   ;;  %v1529_v21 = vld [vmem:[%s1723_s29 + $0x230] ss:$8 sps:$4 sm:$0xff]   ;;  %v1534_v22 = vld [vmem:[%s1723_s29 + $0x224] ss:$8 sps:$4 sm:$0xff]  }
  0x4b   : > { %970 = vmatpush1.bf16.msra.mxu1 %v1456_v34  ;;  %928 = vmatprep.subr.bf16.mxu0 %v1457_v35  ;;  %v1532_v23 = vld [vmem:[%s1723_s29 + $0x220] ss:$8 sps:$4 sm:$0xff]   ;;  %v1537_v24 = vld [vmem:[%s1723_s29 + $0x214] ss:$8 sps:$4 sm:$0xff]   ;;  %v1535_v25 = vld [vmem:[%s1723_s29 + $0x210] ss:$8 sps:$4 sm:$0xff]  }
  0x4c   : > { %971 = vmatprep.subr.bf16.mxu1 %v1459_v36  ;;  %v1540_v26 = vld [vmem:[%s1723_s29 + $0x204] ss:$8 sps:$4 sm:$0xff]   ;;  %v1538_v27 = vld [vmem:[%s1723_s29 + $0x200] ss:$8 sps:$4 sm:$0xff]   ;;  %v1543_v28 = vld [vmem:[%s1723_s29 + $0x2f4] ss:$8 sps:$4 sm:$0xff]  }
  0x4d   : > { %v1541_v29 = vld [vmem:[%s1723_s29 + $0x2f0] ss:$8 sps:$4 sm:$0xff]   ;;  %v1546_v30 = vld [vmem:[%s1723_s29 + $0x2e4] ss:$8 sps:$4 sm:$0xff]   ;;  %v1544_v31 = vld [vmem:[%s1723_s29 + $0x2e0] ss:$8 sps:$4 sm:$0xff]  }
  0x4e   : > { %929 = vmatpush1.bf16.msra.mxu0 %v1461_v37  ;;  %v1549_v32 = vld [vmem:[%s1723_s29 + $0x2d4] ss:$8 sps:$4 sm:$0xff]   ;;  %v1547_v33 = vld [vmem:[%s1723_s29 + $0x2d0] ss:$8 sps:$4 sm:$0xff]   ;;  %v1552_v34 = vld [vmem:[%s1723_s29 + $0x2c4] ss:$8 sps:$4 sm:$0xff]  }
  0x4f   : > { %972 = vmatpush1.bf16.msra.mxu1 %v1462_v38  ;;  %930 = vmatprep.subr.bf16.mxu0 %v1463_v39  ;;  %v1550_v35 = vld [vmem:[%s1723_s29 + $0x2c0] ss:$8 sps:$4 sm:$0xff]   ;;  %v1555_v36 = vld [vmem:[%s1723_s29 + $0x2b4] ss:$8 sps:$4 sm:$0xff]   ;;  %v1553_v37 = vld [vmem:[%s1723_s29 + $0x2b0] ss:$8 sps:$4 sm:$0xff]  }
  0x50   : > { %973 = vmatprep.subr.bf16.mxu1 %v1465_v40  ;;  %v1558_v38 = vld [vmem:[%s1723_s29 + $0x2a4] ss:$8 sps:$4 sm:$0xff]   ;;  %v1556_v39 = vld [vmem:[%s1723_s29 + $0x2a0] ss:$8 sps:$4 sm:$0xff]   ;;  %v1561_v40 = vld [vmem:[%s1723_s29 + $0x294] ss:$8 sps:$4 sm:$0xff]  }
  0x51   : > { %v299_v58 = vld [vmem:[#allocation2] sm:$0xff] }
  0x52   : > { %931 = vmatpush2.bf16.msra.mxu0 %v1467_v41  ;;  %v1559_v41 = vld [vmem:[%s1723_s29 + $0x290] ss:$8 sps:$4 sm:$0xff]  }
  0x53   : > { %974 = vmatpush2.bf16.msra.mxu1 %v1468_v42  ;;  %932 = vmatprep.subr.bf16.mxu0 %v1469_v43  ;;  %v1564_v42 = vld [vmem:[%s1723_s29 + $0x284] ss:$8 sps:$4 sm:$0xff]   ;;  %v1562_v43 = vld [vmem:[%s1723_s29 + $0x280] ss:$8 sps:$4 sm:$0xff]  }
  0x54   : > { %975 = vmatprep.subr.bf16.mxu1 %v1471_v44  ;;  %v1565_v44 = vld [vmem:[%s1735_s10 + $0x10] ss:$24 sps:$4 sm:$0xff]  }
  0x56   : > { %933 = vmatpush2.bf16.msra.mxu0 %v1473_v45 }
  0x57   : > { %976 = vmatpush2.bf16.msra.mxu1 %v1474_v46  ;;  %934 = vmatprep.subr.bf16.mxu0 %v1475_v47 }
  0x58   : > { %977 = vmatprep.subr.bf16.mxu1 %v1477_v48 }
  0x5a   : > { %935 = vmatpush2.bf16.msra.mxu0 %v1479_v49 }
  0x5b   : > { %978 = vmatpush2.bf16.msra.mxu1 %v1480_v50  ;;  %936 = vmatprep.subr.bf16.mxu0 %v1481_v51 }
  0x5c   : > { %979 = vmatprep.subr.bf16.mxu1 %v1483_v52 }
  0x5e   : > { %937 = vmatpush2.bf16.msra.mxu0 %v1485_v53  ;;  %v298_v53 = vld [vmem:[#allocation2 + $0x10] sm:$0xff] }
  0x5f   : > { %980 = vmatpush2.bf16.msra.mxu1 %v1486_v54  ;;  %938 = vmatprep.subr.bf16.mxu0 %v1487_v55 }
  0x60   : > { %981 = vmatprep.subr.bf16.mxu1 %v1489_v57 }
  0x62   : > { %939 = vmatpush2.bf16.msra.mxu0 %v1491_v59 }
  0x63   : > { %982 = vmatpush2.bf16.msra.mxu1 %v1492_v60  ;;  %940 = vmatprep.subr.bf16.mxu0 %v1493_v61 }
  0x64   : > { %983 = vmatprep.subr.bf16.mxu1 %v1495_v62 }
  0x66   : > { %941 = vmatpush2.bf16.msra.mxu0 %v1497_v63  ;;  %v300_v63 = vld [vmem:[#allocation2 + $0x18] sm:$0xff] }
  0x67   : > { %984 = vmatpush2.bf16.msra.mxu1 %v1498_v0  ;;  %942 = vmatprep.subr.bf16.mxu0 %v1499_v1 }
  0x68   : > { %985 = vmatprep.subr.bf16.mxu1 %v1501_v2 }
  0x6a   : > { %943 = vmatpush2.bf16.msra.mxu0 %v1503_v3 }
  0x6b   : > { %986 = vmatpush2.bf16.msra.mxu1 %v1504_v4  ;;  %944 = vmatprep.subr.bf16.mxu0 %v1505_v5  ;;  %v301_v4 = vld [vmem:[#allocation2 + $0x8] sm:$0xff] }
  0x6c   : > { %987 = vmatprep.subr.bf16.mxu1 %v1507_v6 }
  0x6e   : > { %945 = vmatpush2.bf16.msra.mxu0 %v1509_v7 }
  0x6f   : > { %988 = vmatpush2.bf16.msra.mxu1 %v1510_v8  ;;  %1000 = vmatprep.subr.bf16.mxu0 %v1519_v9 }
  0x71   : > { %947 = vmatmul.mubr.bf16.vlgmr.msra.gmra.mxu0 %v1511_v10 }
  0x72   : > { %990 = vmatmul.mubr.bf16.vlgmr.msra.gmra.mxu1 %v1514_v11  ;;  %1001 = vmatpush1.bf16.msra.mxu0 %v1517_v12 }
  0x73   : > { %1002 = vmatprep.subr.bf16.mxu0 %v1522_v13  ;;  %1032 = vmatprep.mubr.bf16.mxu0 %v1567_v14 }
  0x76   : > { %1003 = vmatpush1.bf16.msra.mxu0 %v1520_v15 }
  0x77   : > { %1004 = vmatprep.subr.bf16.mxu0 %v1525_v16 }
  0x7a   : > { %1005 = vmatpush1.bf16.msra.mxu0 %v1523_v17 }
  0x7b   : > { %1006 = vmatprep.subr.bf16.mxu0 %v1528_v18 }
  0x7e   : > { %1007 = vmatpush1.bf16.msra.mxu0 %v1526_v19 }
  0x7f   : > { %1008 = vmatprep.subr.bf16.mxu0 %v1531_v20 }
  0x82   : > { %1009 = vmatpush1.bf16.msra.mxu0 %v1529_v21 }
  0x83   : > { %1010 = vmatprep.subr.bf16.mxu0 %v1534_v22 }
  0x86   : > { %1011 = vmatpush1.bf16.msra.mxu0 %v1532_v23 }
  0x87   : > { %1012 = vmatprep.subr.bf16.mxu0 %v1537_v24 }
  0x8a   : > { %1013 = vmatpush1.bf16.msra.mxu0 %v1535_v25 }
  0x8b   : > { %1014 = vmatprep.subr.bf16.mxu0 %v1540_v26 }
  0x8e   : > { %1015 = vmatpush1.bf16.msra.mxu0 %v1538_v27 }
  0x8f   : > { %1016 = vmatprep.subr.bf16.mxu0 %v1543_v28 }
  0x92   : > { %1017 = vmatpush2.bf16.msra.mxu0 %v1541_v29 }
  0x93   : > { %1018 = vmatprep.subr.bf16.mxu0 %v1546_v30 }
  0x96   : > { %1019 = vmatpush2.bf16.msra.mxu0 %v1544_v31 }
  0x97   : > { %1020 = vmatprep.subr.bf16.mxu0 %v1549_v32 }
  0x9a   : > { %1021 = vmatpush2.bf16.msra.mxu0 %v1547_v33 }
  0x9b   : > { %1022 = vmatprep.subr.bf16.mxu0 %v1552_v34 }
  0x9e   : > { %1023 = vmatpush2.bf16.msra.mxu0 %v1550_v35 }
  0x9f   : > { %1024 = vmatprep.subr.bf16.mxu0 %v1555_v36 }
  0xa2   : > { %1025 = vmatpush2.bf16.msra.mxu0 %v1553_v37 }
  0xa3   : > { %1026 = vmatprep.subr.bf16.mxu0 %v1558_v38 }
  0xa6   : > { %1027 = vmatpush2.bf16.msra.mxu0 %v1556_v39 }
  0xa7   : > { %1028 = vmatprep.subr.bf16.mxu0 %v1561_v40 }
  0xaa   : > { %1029 = vmatpush2.bf16.msra.mxu0 %v1559_v41 }
  0xab   : > { %1030 = vmatprep.subr.bf16.mxu0 %v1564_v42 }
  0xae   : > { %1031 = vmatpush2.bf16.msra.mxu0 %v1562_v43 }
  0xb1   : > { %1033 = vmatmul.mubr.bf16.vlgmr.msra.gmra.mxu0 %v1565_v44 }
 0x131   : > { %v948_v45 = vpop.f32.mrf.mxu0 }
 0x132   : > { %v991_v46 = vpop.f32.mrf.mxu1 }
 0x133   : > { %v950_v47 = vpop.f32.mrf.mxu0  ;;  %v992_v52 = vadd.f32 %v991_v46, %v948_v45 }
 0x134   : > { %v993_v48 = vpop.f32.mrf.mxu1 }
 0x135   : > { %v952_v49 = vpop.f32.mrf.mxu0  ;;  %v994_v55 = vadd.f32 %v993_v48, %v950_v47 }
 0x136   : > { %v995_v50 = vpop.f32.mrf.mxu1 }
 0x137   : > { %v954_v51 = vpop.f32.mrf.mxu0  ;;  %v996_v60 = vadd.f32 %v995_v50, %v952_v49 }
 0x138   : > { %v997_v57 = vpop.f32.mrf.mxu1 }
 0x139   : > { %v998_v1 = vadd.f32 %v997_v57, %v954_v51 }
 0x171   : > { %v1034_v54 = vpop.f32.mrf.mxu0 }
 0x172   : > { %v1035_v56 = vadd.f32 %v1034_v54, %v992_v52 }
 0x173   : > { %v1036_v59 = vpop.f32.mrf.mxu0 }
 0x174   : > { %v1043_v61 = vadd.f32 %v1035_v56, %v298_v53  ;;  %v1037_v62 = vadd.f32 %v1036_v59, %v994_v55 }
 0x175   : > { %v1038_v0 = vpop.f32.mrf.mxu0 }
 0x176   : > { %1047 = vst [vmem:[#allocation2 + $0x10] sm:$0xff] %v1043_v61  ;;  %v1044_v2 = vadd.f32 %v1037_v62, %v299_v58  ;;  %v1039_v3 = vadd.f32 %v1038_v0, %v996_v60 }
 0x177   : > { %v1040_v5 = vpop.f32.mrf.mxu0 }
 0x178   : > { %1048 = vst [vmem:[#allocation2] sm:$0xff] %v1044_v2  ;;  %v1045_v6 = vadd.f32 %v1039_v3, %v300_v63  ;;  %v1041_v7 = vadd.f32 %v1040_v5, %v998_v1  ;;  %1054 = sbr.rel (%p1349_p13) target bundleno = 449 (0x1c1), region = 67 }
 0x17a   : > { %1049 = vst [vmem:[#allocation2 + $0x18] sm:$0xff] %v1045_v6  ;;  %v1046_v8 = vadd.f32 %v1041_v7, %v301_v4 }
 0x17c   : > { %1050 = vst [vmem:[#allocation2 + $0x8] sm:$0xff] %v1046_v8 }
 0x17d   : > { %v1061_v9 = vlaneseq  ;;  %v1059_v11 = vld [vmem:[%s1875_s2] sm:$0x3]  ;;  %v1055_v12 = vld [vmem:[#allocation2 + $0x10] sm:$0xff]  ;;  %v1124_v7 = vld [vmem:[%s1728_s7 + $0x8] sm:$0xff] }
 0x17e   : > { %v1123_v3 = vld [vmem:[%s1728_s7] sm:$0xff]  ;;  %v1125_v4 = vld [vmem:[%s1728_s7 + $0x10] sm:$0xff] }
 0x17f   : > { %v1062_v10 = vshrl.u32 %v1061_v9, 7  ;;  %v1056_v16 = vld [vmem:[#allocation2] sm:$0xff]  ;;  %v1126_v9 = vld [vmem:[%s1728_s7 + $0x18] sm:$0xff] }
 0x181   : > { %v1063_v13 = vsub.s32 0, %v1062_v10  ;;  %v1067_v14 = vsub.s32 1, %v1062_v10  ;;  %v1057_v15 = vld [vmem:[#allocation2 + $0x18] sm:$0xff] }
 0x183   : > { %v1058_v17 = vld [vmem:[#allocation2 + $0x8] sm:$0xff]  ;;  %v1064_v18 = vrot.slane %v1059_v11, %v1063_v13  ;;  %v1068_v19 = vrot.slane %v1059_v11, %v1067_v14 }
 0x185   : > { %v1071_v20 = vadd.f32 %v1064_v18, %v1055_v12  ;;  %v1073_v21 = vadd.f32 %v1064_v18, %v1057_v15  ;;  %v1072_v22 = vadd.f32 %v1068_v19, %v1056_v16  ;;  %v1074_v23 = vadd.f32 %v1068_v19, %v1058_v17 }
 0x187   : > { %v1075_v24 = vadd.f32 %v1073_v21, %v1071_v20  ;;  %v1082_v25 = vadd.f32 %v1074_v23, %v1072_v22 }
 0x189   : > { %v1076_v26 = vrot.slane %v1075_v24, 4  ;;  %v1083_v27 = vrot.slane %v1082_v25, 4 }
 0x18b   : > { %v1077_v28 = vadd.f32 %v1076_v26, %v1075_v24  ;;  %v1084_v29 = vadd.f32 %v1083_v27, %v1082_v25 }
 0x18d   : > { %v1078_v30 = vrot.slane %v1077_v28, 2  ;;  %v1085_v31 = vrot.slane %v1084_v29, 2 }
 0x18f   : > { %v1079_v32 = vadd.f32 %v1078_v30, %v1077_v28  ;;  %v1086_v33 = vadd.f32 %v1085_v31, %v1084_v29 }
 0x191   : > { %v1080_v34 = vrot.slane %v1079_v32, 1  ;;  %v1087_v35 = vrot.slane %v1086_v33, 1 }
 0x193   : > { %v1081_v36 = vadd.f32 %v1080_v34, %v1079_v32  ;;  %v1088_v37 = vadd.f32 %v1087_v35, %v1086_v33 }
 0x195   : > { %v1089_v38 = vmul.f32 0.0625, %v1081_v36  ;;  %v1090_v39 = vmul.f32 0.0625, %v1088_v37 }
 0x197   : > { %v1091_v40 = vsub.f32 %v1071_v20, %v1089_v38  ;;  %v1093_v41 = vsub.f32 %v1073_v21, %v1089_v38  ;;  %v1092_v42 = vsub.f32 %v1072_v22, %v1090_v39  ;;  %v1094_v43 = vsub.f32 %v1074_v23, %v1090_v39 }
 0x199   : > { %v1095_v44 = vmul.f32 %v1091_v40, %v1091_v40  ;;  %v1097_v45 = vmul.f32 %v1093_v41, %v1093_v41  ;;  %v1096_v46 = vmul.f32 %v1092_v42, %v1092_v42  ;;  %v1098_v47 = vmul.f32 %v1094_v43, %v1094_v43 }
 0x19b   : > { %v1099_v48 = vadd.f32 %v1097_v45, %v1095_v44  ;;  %v1106_v49 = vadd.f32 %v1098_v47, %v1096_v46 }
 0x19d   : > { %v1100_v50 = vrot.slane %v1099_v48, 4  ;;  %v1107_v51 = vrot.slane %v1106_v49, 4 }
 0x19f   : > { %v1101_v52 = vadd.f32 %v1100_v50, %v1099_v48  ;;  %v1108_v53 = vadd.f32 %v1107_v51, %v1106_v49 }
 0x1a1   : > { %v1102_v54 = vrot.slane %v1101_v52, 2  ;;  %v1109_v55 = vrot.slane %v1108_v53, 2 }
 0x1a3   : > { %v1103_v56 = vadd.f32 %v1102_v54, %v1101_v52  ;;  %v1110_v57 = vadd.f32 %v1109_v55, %v1108_v53 }
 0x1a5   : > { %v1104_v58 = vrot.slane %v1103_v56, 1  ;;  %v1111_v59 = vrot.slane %v1110_v57, 1 }
 0x1a7   : > { %v1105_v60 = vadd.f32 %v1104_v58, %v1103_v56  ;;  %v1112_v61 = vadd.f32 %v1111_v59, %v1110_v57 }
 0x1a9   : > { %v1113_v62 = vmul.f32 0.0625, %v1105_v60  ;;  %v1114_v63 = vmul.f32 0.0625, %v1112_v61 }
 0x1ab   : > { %v1115_v0 = vadd.f32 1e-05, %v1113_v62  ;;  %v1116_v1 = vadd.f32 1e-05, %v1114_v63 }
 0x1ad   : > { %1568 = vrsqrt.f32 %v1115_v0 }
 0x1ae   : > { %1570 = vrsqrt.f32 %v1116_v1 }
 0x1ba   : > { %v1569_v2 = vpop.eup %1568 }
 0x1bb   : > { %v1571_v5 = vpop.eup %1570  ;;  %v1119_v6 = vmul.f32 %v1569_v2, %v1091_v40  ;;  %v1121_v8 = vmul.f32 %v1569_v2, %v1093_v41 }
 0x1bc   : > { %v1120_v10 = vmul.f32 %v1571_v5, %v1092_v42  ;;  %v1122_v11 = vmul.f32 %v1571_v5, %v1094_v43 }
 0x1bd   : > { %v1127_v12 = vadd.f32 %v1123_v3, %v1119_v6  ;;  %v1129_v13 = vadd.f32 %v1125_v4, %v1121_v8 }
 0x1be   : > { %v1128_v14 = vadd.f32 %v1124_v7, %v1120_v10  ;;  %v1130_v15 = vadd.f32 %v1126_v9, %v1122_v11 }
 0x1bf   : > { %1131 = vst [vmem:[%s1733_s9] sm:$0xff] %v1127_v12  ;;  %1133 = vst [vmem:[%s1733_s9 + $0x10] sm:$0xff] %v1129_v13 }
 0x1c0   : > { %1132 = vst [vmem:[%s1733_s9 + $0x8] sm:$0xff] %v1128_v14  ;;  %1134 = vst [vmem:[%s1733_s9 + $0x18] sm:$0xff] %v1130_v15 }
 0x1c1 PF: > { %s14_s21 = sadd.s32 1, %s1626_s21   ;;  %s1878_s15 = smov %s1606_s16 }
 0x1c2   : > { %p11_p0 = scmp.ge.s32.totalorder %s14_s21, 8   ;;  %s1879_s16 = smov %s1705_s28 }
 0x1c3   : > { %s1880_s17 = smov %s1618_s19  ;;  %s1881_s18 = smov %s1622_s20 }
 0x1c4   : > { %s1882_s19 = smov %s1885_s22  ;;  %s1883_s20 = smov %s1889_s23 }
 0x1c5   :  { %13 = sbr.rel (!%p11_p0) target bundleno = 4 (0x4), region = 108 }

// kernel: tile.13
= control target key start
LH: loop header
LB: loop body
LE: loop exit
PB: predicated region body
PF: predicated region fallthrough
CT: control target
= control target key end

     0   :  { %s22_s0 = inlined_call_operand.vmem [shape: f32[128], index: 0, kind: input, shape index: {}]   ;;  %s23_s1 = inlined_call_operand.vmem [shape: f32[4,128], index: 1, kind: output, shape index: {}]  }
   0x1   :  { %v4_v0 = vld [vmem:[%s22_s0] ss:$0 sm:$0xff] }
   0x2   :  { %5 = vst [vmem:[%s23_s1] sm:$0xf] %v4_v0 }

// kernel: line_drawing_forward.21
= control target key start
LH: loop header
LB: loop body
LE: loop exit
PB: predicated region body
PF: predicated region fallthrough
CT: control target
= control target key end

     0   :  { %s4084_s15 = smov 0   ;;  %s4086_s16 = smov 0   ;;  %s6834_s0 = inlined_call_operand.vmem [shape: bf16[2,16,1024], index: 0, kind: input, shape index: {}]   ;;  %s6835_s1 = inlined_call_operand.vmem [shape: bf16[1024,512], index: 1, kind: input, shape index: {}]   ;;  %s6836_s2 = inlined_call_operand.vmem [shape: f32[1,512], index: 2, kind: input, shape index: {}]   ;;  %s6837_s3 = inlined_call_operand.vmem [shape: f32[512,512], index: 3, kind: input, shape index: {}]   ;;  %s6838_s4 = inlined_call_operand.vmem [shape: f32[2,16,512], index: 4, kind: output, shape index: {}]  }
   0x1   :  { %s4088_s17 = smov 0  }
   0x2 LB: > { %s26_s18 = sadd.s32 1, %s4053_s16  ;;  %p3310_p0 = scmp.ge.s32.totalorder %s4057_s17, 1  ;;  %s4057_s17 = sphi %s4088_s17, %s14_s17   ;;  %s4053_s16 = sphi %s4086_s16, %s7243_s16   ;;  %s4049_s15 = sphi %s4084_s15, %s7242_s15  }
   0x3   : > { %p28_p1 = scmp.ge.s32.totalorder %s26_s18, 2  ;;  %p193_p2 = scmp.lt.s32.totalorder %s4057_s17, 3 }
   0x5   : > { %s7245_s18 = smov (%p28_p1, %s26_s18), 0  ;;  %p194_p3 = pnand %p3310_p0, %p193_p2 }
   0x7   : > { %197 = sbr.rel (%p194_p3) target bundleno = 1057 (0x421), region = 36 }
   0xc   : > { %v3607_v0 = vld [vmem:[%s6835_s1 + $0xe4] ss:$16 sps:$4 sm:$0xff]   ;;  %v3611_v2 = vld [vmem:[%s6835_s1 + $0xe0] ss:$16 sps:$4 sm:$0xff]   ;;  %p230_p4 = scmp.lt.s32.totalorder %s4049_s15, 1 }
   0xd   : > { %v3609_v1 = vld [vmem:[%s6835_s1 + $0x2e4] ss:$16 sps:$4 sm:$0xff]   ;;  %1855 = vmatprep.subr.bf16.mxu0 %v3607_v0  ;;  %v3612_v3 = vld [vmem:[%s6835_s1 + $0x2e0] ss:$16 sps:$4 sm:$0xff]  }
   0xe   : > { %1898 = vmatprep.subr.bf16.mxu1 %v3609_v1  ;;  %v3613_v4 = vld [vmem:[%s6835_s1 + $0xc4] ss:$16 sps:$4 sm:$0xff]   ;;  %1856 = vmatpush1.bf16.msra.mxu0 %v3611_v2  ;;  %v3617_v6 = vld [vmem:[%s6835_s1 + $0xc0] ss:$16 sps:$4 sm:$0xff]   ;;  %s7247_s15 = smov (!%p230_p4, %s4049_s15), 1 }
   0xf   : > { %1899 = vmatpush1.bf16.msra.mxu1 %v3612_v3  ;;  %v3615_v5 = vld [vmem:[%s6835_s1 + $0x2c4] ss:$16 sps:$4 sm:$0xff]   ;;  %1857 = vmatprep.subr.bf16.mxu0 %v3613_v4  ;;  %v3618_v7 = vld [vmem:[%s6835_s1 + $0x2c0] ss:$16 sps:$4 sm:$0xff]   ;;  %s3581_s9 = sshll.u32 %s7247_s15, 6 }
  0x10   : > { %1900 = vmatprep.subr.bf16.mxu1 %v3615_v5  ;;  %v3619_v8 = vld [vmem:[%s6835_s1 + $0xa4] ss:$16 sps:$4 sm:$0xff]   ;;  %v3623_v10 = vld [vmem:[%s6835_s1 + $0xa0] ss:$16 sps:$4 sm:$0xff]   ;;  %s4246_s22 = scalar_lea.vmem %s6834_s0, %s3581_s9  ;;  %s6807_s5 = scalar_lea.vmem %s6838_s4, %s3581_s9 }
  0x11   : > { %v3621_v9 = vld [vmem:[%s6835_s1 + $0x2a4] ss:$16 sps:$4 sm:$0xff]   ;;  %v3624_v11 = vld [vmem:[%s6835_s1 + $0x2a0] ss:$16 sps:$4 sm:$0xff]   ;;  %v272_v50 = vld [vmem:[%s4246_s22 + $0x8] sm:$0xff] }
  0x12   : > { %1858 = vmatpush1.bf16.msra.mxu0 %v3617_v6  ;;  %v3625_v12 = vld [vmem:[%s6835_s1 + $0x84] ss:$16 sps:$4 sm:$0xff]   ;;  %v3629_v14 = vld [vmem:[%s6835_s1 + $0x80] ss:$16 sps:$4 sm:$0xff]   ;;  %v276_v51 = vld [vmem:[%s4246_s22 + $0x28] sm:$0xff] }
  0x13   : > { %1901 = vmatpush1.bf16.msra.mxu1 %v3618_v7  ;;  %1859 = vmatprep.subr.bf16.mxu0 %v3619_v8  ;;  %v3627_v13 = vld [vmem:[%s6835_s1 + $0x284] ss:$16 sps:$4 sm:$0xff]   ;;  %v3630_v15 = vld [vmem:[%s6835_s1 + $0x280] ss:$16 sps:$4 sm:$0xff]   ;;  %v4272_v55 = vcombine.high %v272_v50, %v276_v51 }
  0x14   : > { %1902 = vmatprep.subr.bf16.mxu1 %v3621_v9  ;;  %v3631_v16 = vld [vmem:[%s6835_s1 + $0x64] ss:$16 sps:$4 sm:$0xff]   ;;  %v3635_v18 = vld [vmem:[%s6835_s1 + $0x60] ss:$16 sps:$4 sm:$0xff]   ;;  %v4326_v9 = vcombine.low %v272_v50, %v276_v51 }
  0x15   : > { %v3633_v17 = vld [vmem:[%s6835_s1 + $0x264] ss:$16 sps:$4 sm:$0xff]   ;;  %v3636_v19 = vld [vmem:[%s6835_s1 + $0x260] ss:$16 sps:$4 sm:$0xff]   ;;  %1930 = vmatprep.mubr.bf16.mxu1 %v4272_v55 }
  0x16   : > { %1860 = vmatpush1.bf16.msra.mxu0 %v3623_v10  ;;  %v3637_v20 = vld [vmem:[%s6835_s1 + $0x44] ss:$16 sps:$4 sm:$0xff]   ;;  %v3641_v22 = vld [vmem:[%s6835_s1 + $0x40] ss:$16 sps:$4 sm:$0xff]  }
  0x17   : > { %1903 = vmatpush1.bf16.msra.mxu1 %v3624_v11  ;;  %1861 = vmatprep.subr.bf16.mxu0 %v3625_v12  ;;  %v3639_v21 = vld [vmem:[%s6835_s1 + $0x244] ss:$16 sps:$4 sm:$0xff]   ;;  %v3642_v23 = vld [vmem:[%s6835_s1 + $0x240] ss:$16 sps:$4 sm:$0xff]  }
  0x18   : > { %1904 = vmatprep.subr.bf16.mxu1 %v3627_v13  ;;  %v3643_v24 = vld [vmem:[%s6835_s1 + $0x24] ss:$16 sps:$4 sm:$0xff]   ;;  %v3647_v26 = vld [vmem:[%s6835_s1 + $0x20] ss:$16 sps:$4 sm:$0xff]  }
  0x19   : > { %v3645_v25 = vld [vmem:[%s6835_s1 + $0x224] ss:$16 sps:$4 sm:$0xff]   ;;  %v3648_v27 = vld [vmem:[%s6835_s1 + $0x220] ss:$16 sps:$4 sm:$0xff]  }
  0x1a   : > { %1862 = vmatpush1.bf16.msra.mxu0 %v3629_v14  ;;  %v3649_v28 = vld [vmem:[%s6835_s1 + $0x4] ss:$16 sps:$4 sm:$0xff]   ;;  %v3653_v30 = vld [vmem:[%s6835_s1] ss:$16 sps:$4 sm:$0xff]  }
  0x1b   : > { %1905 = vmatpush1.bf16.msra.mxu1 %v3630_v15  ;;  %1863 = vmatprep.subr.bf16.mxu0 %v3631_v16  ;;  %v3651_v29 = vld [vmem:[%s6835_s1 + $0x204] ss:$16 sps:$4 sm:$0xff]   ;;  %v3654_v31 = vld [vmem:[%s6835_s1 + $0x200] ss:$16 sps:$4 sm:$0xff]  }
  0x1c   : > { %1906 = vmatprep.subr.bf16.mxu1 %v3633_v17  ;;  %v3655_v32 = vld [vmem:[%s6835_s1 + $0x1e4] ss:$16 sps:$4 sm:$0xff]   ;;  %v3659_v34 = vld [vmem:[%s6835_s1 + $0x1e0] ss:$16 sps:$4 sm:$0xff]  }
  0x1d   : > { %v3657_v33 = vld [vmem:[%s6835_s1 + $0x3e4] ss:$16 sps:$4 sm:$0xff]   ;;  %v3660_v35 = vld [vmem:[%s6835_s1 + $0x3e0] ss:$16 sps:$4 sm:$0xff]  }
  0x1e   : > { %1864 = vmatpush1.bf16.msra.mxu0 %v3635_v18  ;;  %v3661_v36 = vld [vmem:[%s6835_s1 + $0x1c4] ss:$16 sps:$4 sm:$0xff]   ;;  %v3665_v38 = vld [vmem:[%s6835_s1 + $0x1c0] ss:$16 sps:$4 sm:$0xff]  }
  0x1f   : > { %1907 = vmatpush1.bf16.msra.mxu1 %v3636_v19  ;;  %1865 = vmatprep.subr.bf16.mxu0 %v3637_v20  ;;  %v3663_v37 = vld [vmem:[%s6835_s1 + $0x3c4] ss:$16 sps:$4 sm:$0xff]   ;;  %v3666_v39 = vld [vmem:[%s6835_s1 + $0x3c0] ss:$16 sps:$4 sm:$0xff]  }
  0x20   : > { %1908 = vmatprep.subr.bf16.mxu1 %v3639_v21  ;;  %v3667_v40 = vld [vmem:[%s6835_s1 + $0x1a4] ss:$16 sps:$4 sm:$0xff]   ;;  %v3671_v42 = vld [vmem:[%s6835_s1 + $0x1a0] ss:$16 sps:$4 sm:$0xff]  }
  0x21   : > { %v3669_v41 = vld [vmem:[%s6835_s1 + $0x3a4] ss:$16 sps:$4 sm:$0xff]   ;;  %v3672_v43 = vld [vmem:[%s6835_s1 + $0x3a0] ss:$16 sps:$4 sm:$0xff]  }
  0x22   : > { %1866 = vmatpush1.bf16.msra.mxu0 %v3641_v22  ;;  %v3673_v44 = vld [vmem:[%s6835_s1 + $0x184] ss:$16 sps:$4 sm:$0xff]   ;;  %v3677_v46 = vld [vmem:[%s6835_s1 + $0x180] ss:$16 sps:$4 sm:$0xff]  }
  0x23   : > { %1909 = vmatpush1.bf16.msra.mxu1 %v3642_v23  ;;  %1867 = vmatprep.subr.bf16.mxu0 %v3643_v24  ;;  %v3675_v45 = vld [vmem:[%s6835_s1 + $0x384] ss:$16 sps:$4 sm:$0xff]   ;;  %v3678_v47 = vld [vmem:[%s6835_s1 + $0x380] ss:$16 sps:$4 sm:$0xff]  }
  0x24   : > { %1910 = vmatprep.subr.bf16.mxu1 %v3645_v25  ;;  %v271_v48 = vld [vmem:[%s4246_s22] sm:$0xff] }
  0x25   : > { %v275_v49 = vld [vmem:[%s4246_s22 + $0x20] sm:$0xff] }
  0x26   : > { %1868 = vmatpush1.bf16.msra.mxu0 %v3647_v26  ;;  %v3679_v52 = vld [vmem:[%s6835_s1 + $0x164] ss:$16 sps:$4 sm:$0xff]   ;;  %v4267_v53 = vcombine.high %v271_v48, %v275_v49  ;;  %v3683_v56 = vld [vmem:[%s6835_s1 + $0x160] ss:$16 sps:$4 sm:$0xff]   ;;  %v4324_v8 = vcombine.low %v271_v48, %v275_v49 }
  0x27   : > { %1911 = vmatpush1.bf16.msra.mxu1 %v3648_v27  ;;  %1869 = vmatprep.subr.bf16.mxu0 %v3649_v28  ;;  %v3681_v54 = vld [vmem:[%s6835_s1 + $0x364] ss:$16 sps:$4 sm:$0xff]   ;;  %v3684_v57 = vld [vmem:[%s6835_s1 + $0x360] ss:$16 sps:$4 sm:$0xff]  }
  0x28   : > { %1912 = vmatprep.subr.bf16.mxu1 %v3651_v29  ;;  %1887 = vmatprep.mubr.bf16.mxu0 %v4267_v53  ;;  %v3685_v58 = vld [vmem:[%s6835_s1 + $0x144] ss:$16 sps:$4 sm:$0xff]   ;;  %v3689_v60 = vld [vmem:[%s6835_s1 + $0x140] ss:$16 sps:$4 sm:$0xff]  }
  0x29   : > { %v3687_v59 = vld [vmem:[%s6835_s1 + $0x344] ss:$16 sps:$4 sm:$0xff]   ;;  %v3690_v61 = vld [vmem:[%s6835_s1 + $0x340] ss:$16 sps:$4 sm:$0xff]  }
  0x2a   : > { %1870 = vmatpush1.bf16.msra.mxu0 %v3653_v30  ;;  %v3691_v62 = vld [vmem:[%s6835_s1 + $0x124] ss:$16 sps:$4 sm:$0xff]   ;;  %v3695_v0 = vld [vmem:[%s6835_s1 + $0x120] ss:$16 sps:$4 sm:$0xff]  }
  0x2b   : > { %1913 = vmatpush1.bf16.msra.mxu1 %v3654_v31  ;;  %1871 = vmatprep.subr.bf16.mxu0 %v3655_v32  ;;  %v3693_v63 = vld [vmem:[%s6835_s1 + $0x324] ss:$16 sps:$4 sm:$0xff]   ;;  %v3696_v1 = vld [vmem:[%s6835_s1 + $0x320] ss:$16 sps:$4 sm:$0xff]  }
  0x2c   : > { %1914 = vmatprep.subr.bf16.mxu1 %v3657_v33  ;;  %v3697_v2 = vld [vmem:[%s6835_s1 + $0x104] ss:$16 sps:$4 sm:$0xff]   ;;  %v3701_v4 = vld [vmem:[%s6835_s1 + $0x100] ss:$16 sps:$4 sm:$0xff]  }
  0x2d   : > { %v3699_v3 = vld [vmem:[%s6835_s1 + $0x304] ss:$16 sps:$4 sm:$0xff]   ;;  %v3702_v5 = vld [vmem:[%s6835_s1 + $0x300] ss:$16 sps:$4 sm:$0xff]  }
  0x2e   : > { %1872 = vmatpush2.bf16.msra.mxu0 %v3659_v34  ;;  %v3705_v6 = vld [vmem:[%s6835_s1 + $0x4e4] ss:$16 sps:$4 sm:$0xff]   ;;  %v3703_v10 = vld [vmem:[%s6835_s1 + $0x4e0] ss:$16 sps:$4 sm:$0xff]  }
  0x2f   : > { %1915 = vmatpush2.bf16.msra.mxu1 %v3660_v35  ;;  %1873 = vmatprep.subr.bf16.mxu0 %v3661_v36  ;;  %v3708_v7 = vld [vmem:[%s6835_s1 + $0x6e4] ss:$16 sps:$4 sm:$0xff]   ;;  %v3706_v11 = vld [vmem:[%s6835_s1 + $0x6e0] ss:$16 sps:$4 sm:$0xff]  }
  0x30   : > { %1916 = vmatprep.subr.bf16.mxu1 %v3663_v37  ;;  %v3711_v12 = vld [vmem:[%s6835_s1 + $0x4c4] ss:$16 sps:$4 sm:$0xff]   ;;  %v3709_v14 = vld [vmem:[%s6835_s1 + $0x4c0] ss:$16 sps:$4 sm:$0xff]  }
  0x31   : > { %v3714_v13 = vld [vmem:[%s6835_s1 + $0x6c4] ss:$16 sps:$4 sm:$0xff]   ;;  %v3712_v15 = vld [vmem:[%s6835_s1 + $0x6c0] ss:$16 sps:$4 sm:$0xff]  }
  0x32   : > { %1874 = vmatpush2.bf16.msra.mxu0 %v3665_v38  ;;  %v3717_v16 = vld [vmem:[%s6835_s1 + $0x4a4] ss:$16 sps:$4 sm:$0xff]   ;;  %v3715_v18 = vld [vmem:[%s6835_s1 + $0x4a0] ss:$16 sps:$4 sm:$0xff]   ;;  %v4415_v38 = vld [vmem:[%s4246_s22 + $0x18] sm:$0xff] }
  0x33   : > { %1917 = vmatpush2.bf16.msra.mxu1 %v3666_v39  ;;  %1875 = vmatprep.subr.bf16.mxu0 %v3667_v40  ;;  %v3720_v17 = vld [vmem:[%s6835_s1 + $0x6a4] ss:$16 sps:$4 sm:$0xff]   ;;  %v3718_v19 = vld [vmem:[%s6835_s1 + $0x6a0] ss:$16 sps:$4 sm:$0xff]   ;;  %v4418_v39 = vld [vmem:[%s4246_s22 + $0x38] sm:$0xff] }
  0x34   : > { %1918 = vmatprep.subr.bf16.mxu1 %v3669_v41  ;;  %v3723_v20 = vld [vmem:[%s6835_s1 + $0x484] ss:$16 sps:$4 sm:$0xff]   ;;  %v3721_v22 = vld [vmem:[%s6835_s1 + $0x480] ss:$16 sps:$4 sm:$0xff]  }
  0x35   : > { %v3726_v21 = vld [vmem:[%s6835_s1 + $0x684] ss:$16 sps:$4 sm:$0xff]   ;;  %v3724_v23 = vld [vmem:[%s6835_s1 + $0x680] ss:$16 sps:$4 sm:$0xff]  }
  0x36   : > { %1876 = vmatpush2.bf16.msra.mxu0 %v3671_v42  ;;  %v3729_v24 = vld [vmem:[%s6835_s1 + $0x464] ss:$16 sps:$4 sm:$0xff]   ;;  %v3727_v26 = vld [vmem:[%s6835_s1 + $0x460] ss:$16 sps:$4 sm:$0xff]  }
  0x37   : > { %1919 = vmatpush2.bf16.msra.mxu1 %v3672_v43  ;;  %1877 = vmatprep.subr.bf16.mxu0 %v3673_v44  ;;  %v3732_v25 = vld [vmem:[%s6835_s1 + $0x664] ss:$16 sps:$4 sm:$0xff]   ;;  %v3730_v27 = vld [vmem:[%s6835_s1 + $0x660] ss:$16 sps:$4 sm:$0xff]   ;;  %v4432_v43 = vcombine.high %v4415_v38, %v4418_v39 }
  0x38   : > { %1920 = vmatprep.subr.bf16.mxu1 %v3675_v45  ;;  %v3735_v28 = vld [vmem:[%s6835_s1 + $0x444] ss:$16 sps:$4 sm:$0xff]   ;;  %v3733_v30 = vld [vmem:[%s6835_s1 + $0x440] ss:$16 sps:$4 sm:$0xff]  }
  0x39   : > { %v3738_v29 = vld [vmem:[%s6835_s1 + $0x644] ss:$16 sps:$4 sm:$0xff]   ;;  %v3736_v31 = vld [vmem:[%s6835_s1 + $0x640] ss:$16 sps:$4 sm:$0xff]  }
  0x3a   : > { %1878 = vmatpush2.bf16.msra.mxu0 %v3677_v46  ;;  %v3741_v32 = vld [vmem:[%s6835_s1 + $0x424] ss:$16 sps:$4 sm:$0xff]   ;;  %v3739_v34 = vld [vmem:[%s6835_s1 + $0x420] ss:$16 sps:$4 sm:$0xff]  }
  0x3b   : > { %1921 = vmatpush2.bf16.msra.mxu1 %v3678_v47  ;;  %1879 = vmatprep.subr.bf16.mxu0 %v3679_v52  ;;  %v3744_v33 = vld [vmem:[%s6835_s1 + $0x624] ss:$16 sps:$4 sm:$0xff]   ;;  %v3742_v35 = vld [vmem:[%s6835_s1 + $0x620] ss:$16 sps:$4 sm:$0xff]  }
  0x3c   : > { %1922 = vmatprep.subr.bf16.mxu1 %v3681_v54  ;;  %v4409_v36 = vld [vmem:[%s4246_s22 + $0x10] sm:$0xff] }
  0x3d   : > { %v4412_v37 = vld [vmem:[%s4246_s22 + $0x30] sm:$0xff] }
  0x3e   : > { %1880 = vmatpush2.bf16.msra.mxu0 %v3683_v56  ;;  %v3747_v40 = vld [vmem:[%s6835_s1 + $0x404] ss:$16 sps:$4 sm:$0xff]   ;;  %v4425_v41 = vcombine.high %v4409_v36, %v4412_v37  ;;  %v3745_v44 = vld [vmem:[%s6835_s1 + $0x400] ss:$16 sps:$4 sm:$0xff]  }
  0x3f   : > { %1923 = vmatpush2.bf16.msra.mxu1 %v3684_v57  ;;  %1881 = vmatprep.subr.bf16.mxu0 %v3685_v58  ;;  %v3750_v42 = vld [vmem:[%s6835_s1 + $0x604] ss:$16 sps:$4 sm:$0xff]   ;;  %v3748_v45 = vld [vmem:[%s6835_s1 + $0x600] ss:$16 sps:$4 sm:$0xff]  }
  0x40   : > { %1924 = vmatprep.subr.bf16.mxu1 %v3687_v59  ;;  %v3753_v46 = vld [vmem:[%s6835_s1 + $0x5e4] ss:$16 sps:$4 sm:$0xff]   ;;  %v3751_v48 = vld [vmem:[%s6835_s1 + $0x5e0] ss:$16 sps:$4 sm:$0xff]  }
  0x41   : > { %v3756_v47 = vld [vmem:[%s6835_s1 + $0x7e4] ss:$16 sps:$4 sm:$0xff]   ;;  %v3754_v49 = vld [vmem:[%s6835_s1 + $0x7e0] ss:$16 sps:$4 sm:$0xff]  }
  0x42   : > { %1882 = vmatpush2.bf16.msra.mxu0 %v3689_v60  ;;  %v3759_v50 = vld [vmem:[%s6835_s1 + $0x5c4] ss:$16 sps:$4 sm:$0xff]   ;;  %v3757_v52 = vld [vmem:[%s6835_s1 + $0x5c0] ss:$16 sps:$4 sm:$0xff]  }
  0x43   : > { %1925 = vmatpush2.bf16.msra.mxu1 %v3690_v61  ;;  %1883 = vmatprep.subr.bf16.mxu0 %v3691_v62  ;;  %v3762_v51 = vld [vmem:[%s6835_s1 + $0x7c4] ss:$16 sps:$4 sm:$0xff]   ;;  %v3760_v54 = vld [vmem:[%s6835_s1 + $0x7c0] ss:$16 sps:$4 sm:$0xff]  }
  0x44   : > { %1926 = vmatprep.subr.bf16.mxu1 %v3693_v63  ;;  %v3765_v56 = vld [vmem:[%s6835_s1 + $0x5a4] ss:$16 sps:$4 sm:$0xff]   ;;  %v3763_v58 = vld [vmem:[%s6835_s1 + $0x5a0] ss:$16 sps:$4 sm:$0xff]  }
  0x45   : > { %v3768_v57 = vld [vmem:[%s6835_s1 + $0x7a4] ss:$16 sps:$4 sm:$0xff]   ;;  %v3766_v59 = vld [vmem:[%s6835_s1 + $0x7a0] ss:$16 sps:$4 sm:$0xff]  }
  0x46   : > { %1884 = vmatpush2.bf16.msra.mxu0 %v3695_v0  ;;  %v3771_v60 = vld [vmem:[%s6835_s1 + $0x584] ss:$16 sps:$4 sm:$0xff]   ;;  %v3769_v62 = vld [vmem:[%s6835_s1 + $0x580] ss:$16 sps:$4 sm:$0xff]  }
  0x47   : > { %1927 = vmatpush2.bf16.msra.mxu1 %v3696_v1  ;;  %1885 = vmatprep.subr.bf16.mxu0 %v3697_v2  ;;  %v3774_v61 = vld [vmem:[%s6835_s1 + $0x784] ss:$16 sps:$4 sm:$0xff]   ;;  %v3772_v63 = vld [vmem:[%s6835_s1 + $0x780] ss:$16 sps:$4 sm:$0xff]  }
  0x48   : > { %1928 = vmatprep.subr.bf16.mxu1 %v3699_v3  ;;  %v3777_v0 = vld [vmem:[%s6835_s1 + $0x564] ss:$16 sps:$4 sm:$0xff]   ;;  %v3775_v2 = vld [vmem:[%s6835_s1 + $0x560] ss:$16 sps:$4 sm:$0xff]  }
  0x49   : > { %v3780_v1 = vld [vmem:[%s6835_s1 + $0x764] ss:$16 sps:$4 sm:$0xff]   ;;  %v3778_v3 = vld [vmem:[%s6835_s1 + $0x760] ss:$16 sps:$4 sm:$0xff]  }
  0x4a   : > { %1886 = vmatpush2.bf16.msra.mxu0 %v3701_v4  ;;  %v3783_v4 = vld [vmem:[%s6835_s1 + $0x544] ss:$16 sps:$4 sm:$0xff]  }
  0x4b   : > { %1929 = vmatpush2.bf16.msra.mxu1 %v3702_v5  ;;  %1941 = vmatprep.subr.bf16.mxu0 %v3705_v6  ;;  %v3786_v5 = vld [vmem:[%s6835_s1 + $0x744] ss:$16 sps:$4 sm:$0xff]   ;;  %v3781_v6 = vld [vmem:[%s6835_s1 + $0x540] ss:$16 sps:$4 sm:$0xff]  }
  0x4c   : > { %1984 = vmatprep.subr.bf16.mxu1 %v3708_v7  ;;  %v3784_v7 = vld [vmem:[%s6835_s1 + $0x740] ss:$16 sps:$4 sm:$0xff]  }
  0x4d   : > { %1888 = vmatmul.mubr.bf16.vlgmr.msra.gmra.mxu0 %v4324_v8 }
  0x4e   : > { %1931 = vmatmul.mubr.bf16.vlgmr.msra.gmra.mxu1 %v4326_v9  ;;  %1942 = vmatpush1.bf16.msra.mxu0 %v3703_v10  ;;  %v3789_v10 = vld [vmem:[%s6835_s1 + $0x524] ss:$16 sps:$4 sm:$0xff]  }
  0x4f   : > { %1985 = vmatpush1.bf16.msra.mxu1 %v3706_v11  ;;  %1943 = vmatprep.subr.bf16.mxu0 %v3711_v12  ;;  %v3792_v11 = vld [vmem:[%s6835_s1 + $0x724] ss:$16 sps:$4 sm:$0xff]   ;;  %v3787_v12 = vld [vmem:[%s6835_s1 + $0x520] ss:$16 sps:$4 sm:$0xff]  }
  0x50   : > { %1986 = vmatprep.subr.bf16.mxu1 %v3714_v13  ;;  %1973 = vmatprep.mubr.bf16.mxu0 %v4425_v41  ;;  %v3790_v13 = vld [vmem:[%s6835_s1 + $0x720] ss:$16 sps:$4 sm:$0xff]  }
  0x51   : > { %2016 = vmatprep.mubr.bf16.mxu1 %v4432_v43 }
  0x52   : > { %1944 = vmatpush1.bf16.msra.mxu0 %v3709_v14  ;;  %v3795_v14 = vld [vmem:[%s6835_s1 + $0x504] ss:$16 sps:$4 sm:$0xff]  }
  0x53   : > { %1987 = vmatpush1.bf16.msra.mxu1 %v3712_v15  ;;  %1945 = vmatprep.subr.bf16.mxu0 %v3717_v16  ;;  %v3798_v15 = vld [vmem:[%s6835_s1 + $0x704] ss:$16 sps:$4 sm:$0xff]   ;;  %v3793_v16 = vld [vmem:[%s6835_s1 + $0x500] ss:$16 sps:$4 sm:$0xff]  }
  0x54   : > { %1988 = vmatprep.subr.bf16.mxu1 %v3720_v17  ;;  %v3796_v17 = vld [vmem:[%s6835_s1 + $0x700] ss:$16 sps:$4 sm:$0xff]  }
  0x56   : > { %1946 = vmatpush1.bf16.msra.mxu0 %v3715_v18  ;;  %v3801_v18 = vld [vmem:[%s6835_s1 + $0xec] ss:$16 sps:$4 sm:$0xff]  }
  0x57   : > { %1989 = vmatpush1.bf16.msra.mxu1 %v3718_v19  ;;  %1947 = vmatprep.subr.bf16.mxu0 %v3723_v20  ;;  %v3804_v19 = vld [vmem:[%s6835_s1 + $0x2ec] ss:$16 sps:$4 sm:$0xff]   ;;  %v4546_v20 = vcombine.low %v4409_v36, %v4412_v37  ;;  %v3823_v36 = vld [vmem:[%s6835_s1 + $0x68] ss:$16 sps:$4 sm:$0xff]  }
  0x58   : > { %1990 = vmatprep.subr.bf16.mxu1 %v3726_v21  ;;  %v4550_v21 = vcombine.low %v4415_v38, %v4418_v39  ;;  %v3826_v37 = vld [vmem:[%s6835_s1 + $0x268] ss:$16 sps:$4 sm:$0xff]   ;;  %v3831_v38 = vld [vmem:[%s6835_s1 + $0x4c] ss:$16 sps:$4 sm:$0xff]  }
  0x59   : > { %v3834_v39 = vld [vmem:[%s6835_s1 + $0x24c] ss:$16 sps:$4 sm:$0xff]  }
  0x5a   : > { %1948 = vmatpush1.bf16.msra.mxu0 %v3721_v22  ;;  %v3799_v22 = vld [vmem:[%s6835_s1 + $0xe8] ss:$16 sps:$4 sm:$0xff]  }
  0x5b   : > { %1991 = vmatpush1.bf16.msra.mxu1 %v3724_v23  ;;  %1949 = vmatprep.subr.bf16.mxu0 %v3729_v24  ;;  %v3802_v23 = vld [vmem:[%s6835_s1 + $0x2e8] ss:$16 sps:$4 sm:$0xff]   ;;  %v3807_v24 = vld [vmem:[%s6835_s1 + $0xcc] ss:$16 sps:$4 sm:$0xff]  }
  0x5c   : > { %1992 = vmatprep.subr.bf16.mxu1 %v3732_v25  ;;  %v3810_v25 = vld [vmem:[%s6835_s1 + $0x2cc] ss:$16 sps:$4 sm:$0xff]  }
  0x5e   : > { %1950 = vmatpush1.bf16.msra.mxu0 %v3727_v26  ;;  %v3805_v26 = vld [vmem:[%s6835_s1 + $0xc8] ss:$16 sps:$4 sm:$0xff]  }
  0x5f   : > { %1993 = vmatpush1.bf16.msra.mxu1 %v3730_v27  ;;  %1951 = vmatprep.subr.bf16.mxu0 %v3735_v28  ;;  %v3808_v27 = vld [vmem:[%s6835_s1 + $0x2c8] ss:$16 sps:$4 sm:$0xff]   ;;  %v3813_v28 = vld [vmem:[%s6835_s1 + $0xac] ss:$16 sps:$4 sm:$0xff]  }
  0x60   : > { %1994 = vmatprep.subr.bf16.mxu1 %v3738_v29  ;;  %v3816_v29 = vld [vmem:[%s6835_s1 + $0x2ac] ss:$16 sps:$4 sm:$0xff]  }
  0x62   : > { %1952 = vmatpush1.bf16.msra.mxu0 %v3733_v30  ;;  %v3811_v30 = vld [vmem:[%s6835_s1 + $0xa8] ss:$16 sps:$4 sm:$0xff]  }
  0x63   : > { %1995 = vmatpush1.bf16.msra.mxu1 %v3736_v31  ;;  %1953 = vmatprep.subr.bf16.mxu0 %v3741_v32  ;;  %v3814_v31 = vld [vmem:[%s6835_s1 + $0x2a8] ss:$16 sps:$4 sm:$0xff]   ;;  %v3819_v32 = vld [vmem:[%s6835_s1 + $0x8c] ss:$16 sps:$4 sm:$0xff]  }
  0x64   : > { %1996 = vmatprep.subr.bf16.mxu1 %v3744_v33  ;;  %v3820_v33 = vld [vmem:[%s6835_s1 + $0x288] ss:$16 sps:$4 sm:$0xff]  }
  0x66   : > { %1954 = vmatpush1.bf16.msra.mxu0 %v3739_v34  ;;  %v3825_v34 = vld [vmem:[%s6835_s1 + $0x6c] ss:$16 sps:$4 sm:$0xff]  }
  0x67   : > { %1997 = vmatpush1.bf16.msra.mxu1 %v3742_v35  ;;  %1955 = vmatprep.subr.bf16.mxu0 %v3747_v40  ;;  %v3828_v35 = vld [vmem:[%s6835_s1 + $0x26c] ss:$16 sps:$4 sm:$0xff]   ;;  %v3829_v40 = vld [vmem:[%s6835_s1 + $0x48] ss:$16 sps:$4 sm:$0xff]  }
  0x68   : > { %1998 = vmatprep.subr.bf16.mxu1 %v3750_v42  ;;  %v3832_v42 = vld [vmem:[%s6835_s1 + $0x248] ss:$16 sps:$4 sm:$0xff]  }
  0x6a   : > { %1956 = vmatpush1.bf16.msra.mxu0 %v3745_v44  ;;  %v3837_v44 = vld [vmem:[%s6835_s1 + $0x2c] ss:$16 sps:$4 sm:$0xff]  }
  0x6b   : > { %1999 = vmatpush1.bf16.msra.mxu1 %v3748_v45  ;;  %1957 = vmatprep.subr.bf16.mxu0 %v3753_v46  ;;  %v3840_v45 = vld [vmem:[%s6835_s1 + $0x22c] ss:$16 sps:$4 sm:$0xff]   ;;  %v3835_v46 = vld [vmem:[%s6835_s1 + $0x28] ss:$16 sps:$4 sm:$0xff]  }
  0x6c   : > { %2000 = vmatprep.subr.bf16.mxu1 %v3756_v47  ;;  %v3838_v47 = vld [vmem:[%s6835_s1 + $0x228] ss:$16 sps:$4 sm:$0xff]  }
  0x6e   : > { %1958 = vmatpush2.bf16.msra.mxu0 %v3751_v48  ;;  %v3843_v48 = vld [vmem:[%s6835_s1 + $0xc] ss:$16 sps:$4 sm:$0xff]  }
  0x6f   : > { %2001 = vmatpush2.bf16.msra.mxu1 %v3754_v49  ;;  %1959 = vmatprep.subr.bf16.mxu0 %v3759_v50  ;;  %v3846_v49 = vld [vmem:[%s6835_s1 + $0x20c] ss:$16 sps:$4 sm:$0xff]   ;;  %v3841_v50 = vld [vmem:[%s6835_s1 + $0x8] ss:$16 sps:$4 sm:$0xff]  }
  0x70   : > { %2002 = vmatprep.subr.bf16.mxu1 %v3762_v51  ;;  %v3844_v51 = vld [vmem:[%s6835_s1 + $0x208] ss:$16 sps:$4 sm:$0xff]  }
  0x72   : > { %1960 = vmatpush2.bf16.msra.mxu0 %v3757_v52  ;;  %v3849_v52 = vld [vmem:[%s6835_s1 + $0x1ec] ss:$16 sps:$4 sm:$0xff]  }
  0x73   : > { %2003 = vmatpush2.bf16.msra.mxu1 %v3760_v54  ;;  %1961 = vmatprep.subr.bf16.mxu0 %v3765_v56  ;;  %v3852_v54 = vld [vmem:[%s6835_s1 + $0x3ec] ss:$16 sps:$4 sm:$0xff]   ;;  %v3847_v56 = vld [vmem:[%s6835_s1 + $0x1e8] ss:$16 sps:$4 sm:$0xff]  }
  0x74   : > { %2004 = vmatprep.subr.bf16.mxu1 %v3768_v57  ;;  %v3850_v57 = vld [vmem:[%s6835_s1 + $0x3e8] ss:$16 sps:$4 sm:$0xff]  }
  0x76   : > { %1962 = vmatpush2.bf16.msra.mxu0 %v3763_v58  ;;  %v3855_v58 = vld [vmem:[%s6835_s1 + $0x1cc] ss:$16 sps:$4 sm:$0xff]  }
  0x77   : > { %2005 = vmatpush2.bf16.msra.mxu1 %v3766_v59  ;;  %1963 = vmatprep.subr.bf16.mxu0 %v3771_v60  ;;  %v3858_v59 = vld [vmem:[%s6835_s1 + $0x3cc] ss:$16 sps:$4 sm:$0xff]   ;;  %v3853_v60 = vld [vmem:[%s6835_s1 + $0x1c8] ss:$16 sps:$4 sm:$0xff]  }
  0x78   : > { %2006 = vmatprep.subr.bf16.mxu1 %v3774_v61  ;;  %v3856_v61 = vld [vmem:[%s6835_s1 + $0x3c8] ss:$16 sps:$4 sm:$0xff]  }
  0x7a   : > { %1964 = vmatpush2.bf16.msra.mxu0 %v3769_v62  ;;  %v3861_v62 = vld [vmem:[%s6835_s1 + $0x1ac] ss:$16 sps:$4 sm:$0xff]  }
  0x7b   : > { %2007 = vmatpush2.bf16.msra.mxu1 %v3772_v63  ;;  %1965 = vmatprep.subr.bf16.mxu0 %v3777_v0  ;;  %v3864_v63 = vld [vmem:[%s6835_s1 + $0x3ac] ss:$16 sps:$4 sm:$0xff]   ;;  %v3859_v0 = vld [vmem:[%s6835_s1 + $0x1a8] ss:$16 sps:$4 sm:$0xff]  }
  0x7c   : > { %2008 = vmatprep.subr.bf16.mxu1 %v3780_v1  ;;  %v3862_v1 = vld [vmem:[%s6835_s1 + $0x3a8] ss:$16 sps:$4 sm:$0xff]  }
  0x7e   : > { %1966 = vmatpush2.bf16.msra.mxu0 %v3775_v2  ;;  %v3867_v2 = vld [vmem:[%s6835_s1 + $0x18c] ss:$16 sps:$4 sm:$0xff]  }
  0x7f   : > { %2009 = vmatpush2.bf16.msra.mxu1 %v3778_v3  ;;  %1967 = vmatprep.subr.bf16.mxu0 %v3783_v4  ;;  %v3870_v3 = vld [vmem:[%s6835_s1 + $0x38c] ss:$16 sps:$4 sm:$0xff]   ;;  %v3865_v4 = vld [vmem:[%s6835_s1 + $0x188] ss:$16 sps:$4 sm:$0xff]  }
  0x80   : > { %2010 = vmatprep.subr.bf16.mxu1 %v3786_v5  ;;  %v3868_v5 = vld [vmem:[%s6835_s1 + $0x388] ss:$16 sps:$4 sm:$0xff]  }
  0x82   : > { %1968 = vmatpush2.bf16.msra.mxu0 %v3781_v6  ;;  %v3873_v6 = vld [vmem:[%s6835_s1 + $0x16c] ss:$16 sps:$4 sm:$0xff]  }
  0x83   : > { %2011 = vmatpush2.bf16.msra.mxu1 %v3784_v7  ;;  %1969 = vmatprep.subr.bf16.mxu0 %v3789_v10  ;;  %v3876_v7 = vld [vmem:[%s6835_s1 + $0x36c] ss:$16 sps:$4 sm:$0xff]   ;;  %v3871_v10 = vld [vmem:[%s6835_s1 + $0x168] ss:$16 sps:$4 sm:$0xff]  }
  0x84   : > { %2012 = vmatprep.subr.bf16.mxu1 %v3792_v11  ;;  %v3874_v11 = vld [vmem:[%s6835_s1 + $0x368] ss:$16 sps:$4 sm:$0xff]  }
  0x86   : > { %1970 = vmatpush2.bf16.msra.mxu0 %v3787_v12  ;;  %v3879_v12 = vld [vmem:[%s6835_s1 + $0x14c] ss:$16 sps:$4 sm:$0xff]  }
  0x87   : > { %2013 = vmatpush2.bf16.msra.mxu1 %v3790_v13  ;;  %1971 = vmatprep.subr.bf16.mxu0 %v3795_v14  ;;  %v3882_v13 = vld [vmem:[%s6835_s1 + $0x34c] ss:$16 sps:$4 sm:$0xff]   ;;  %v3877_v14 = vld [vmem:[%s6835_s1 + $0x148] ss:$16 sps:$4 sm:$0xff]  }
  0x88   : > { %2014 = vmatprep.subr.bf16.mxu1 %v3798_v15  ;;  %v3880_v15 = vld [vmem:[%s6835_s1 + $0x348] ss:$16 sps:$4 sm:$0xff]  }
  0x8a   : > { %1972 = vmatpush2.bf16.msra.mxu0 %v3793_v16  ;;  %v3885_v16 = vld [vmem:[%s6835_s1 + $0x12c] ss:$16 sps:$4 sm:$0xff]  }
  0x8b   : > { %2015 = vmatpush2.bf16.msra.mxu1 %v3796_v17  ;;  %2027 = vmatprep.subr.bf16.mxu0 %v3801_v18  ;;  %v3888_v17 = vld [vmem:[%s6835_s1 + $0x32c] ss:$16 sps:$4 sm:$0xff]   ;;  %v3883_v18 = vld [vmem:[%s6835_s1 + $0x128] ss:$16 sps:$4 sm:$0xff]  }
  0x8c   : > { %2070 = vmatprep.subr.bf16.mxu1 %v3804_v19  ;;  %v3886_v19 = vld [vmem:[%s6835_s1 + $0x328] ss:$16 sps:$4 sm:$0xff]  }
  0x8d   : > { %1974 = vmatmul.mubr.bf16.vlgmr.msra.gmra.mxu0 %v4546_v20 }
  0x8e   : > { %2017 = vmatmul.mubr.bf16.vlgmr.msra.gmra.mxu1 %v4550_v21  ;;  %2028 = vmatpush1.bf16.msra.mxu0 %v3799_v22  ;;  %v3891_v22 = vld [vmem:[%s6835_s1 + $0x10c] ss:$16 sps:$4 sm:$0xff]  }
  0x8f   : > { %2071 = vmatpush1.bf16.msra.mxu1 %v3802_v23  ;;  %2029 = vmatprep.subr.bf16.mxu0 %v3807_v24  ;;  %v3894_v23 = vld [vmem:[%s6835_s1 + $0x30c] ss:$16 sps:$4 sm:$0xff]   ;;  %v3889_v24 = vld [vmem:[%s6835_s1 + $0x108] ss:$16 sps:$4 sm:$0xff]  }
  0x90   : > { %2072 = vmatprep.subr.bf16.mxu1 %v3810_v25  ;;  %2059 = vmatprep.mubr.bf16.mxu0 %v4267_v53  ;;  %v3822_v53 = vld [vmem:[%s6835_s1 + $0x28c] ss:$16 sps:$4 sm:$0xff]   ;;  %v3892_v25 = vld [vmem:[%s6835_s1 + $0x308] ss:$16 sps:$4 sm:$0xff]  }
  0x91   : > { %2102 = vmatprep.mubr.bf16.mxu1 %v4272_v55  ;;  %v3817_v55 = vld [vmem:[%s6835_s1 + $0x88] ss:$16 sps:$4 sm:$0xff]  }
  0x92   : > { %2030 = vmatpush1.bf16.msra.mxu0 %v3805_v26  ;;  %v3897_v26 = vld [vmem:[%s6835_s1 + $0x4ec] ss:$16 sps:$4 sm:$0xff]  }
  0x93   : > { %2073 = vmatpush1.bf16.msra.mxu1 %v3808_v27  ;;  %2031 = vmatprep.subr.bf16.mxu0 %v3813_v28  ;;  %v3900_v27 = vld [vmem:[%s6835_s1 + $0x6ec] ss:$16 sps:$4 sm:$0xff]   ;;  %v3895_v28 = vld [vmem:[%s6835_s1 + $0x4e8] ss:$16 sps:$4 sm:$0xff]  }
  0x94   : > { %2074 = vmatprep.subr.bf16.mxu1 %v3816_v29  ;;  %v3898_v29 = vld [vmem:[%s6835_s1 + $0x6e8] ss:$16 sps:$4 sm:$0xff]  }
  0x96   : > { %2032 = vmatpush1.bf16.msra.mxu0 %v3811_v30  ;;  %v3903_v30 = vld [vmem:[%s6835_s1 + $0x4cc] ss:$16 sps:$4 sm:$0xff]  }
  0x97   : > { %2075 = vmatpush1.bf16.msra.mxu1 %v3814_v31  ;;  %2033 = vmatprep.subr.bf16.mxu0 %v3819_v32  ;;  %v3906_v31 = vld [vmem:[%s6835_s1 + $0x6cc] ss:$16 sps:$4 sm:$0xff]   ;;  %v3901_v32 = vld [vmem:[%s6835_s1 + $0x4c8] ss:$16 sps:$4 sm:$0xff]  }
  0x98   : > { %2076 = vmatprep.subr.bf16.mxu1 %v3822_v53  ;;  %v3904_v53 = vld [vmem:[%s6835_s1 + $0x6c8] ss:$16 sps:$4 sm:$0xff]  }
  0x9a   : > { %2034 = vmatpush1.bf16.msra.mxu0 %v3817_v55  ;;  %v3909_v55 = vld [vmem:[%s6835_s1 + $0x4ac] ss:$16 sps:$4 sm:$0xff]  }
  0x9b   : > { %2077 = vmatpush1.bf16.msra.mxu1 %v3820_v33  ;;  %2035 = vmatprep.subr.bf16.mxu0 %v3825_v34  ;;  %v3910_v33 = vld [vmem:[%s6835_s1 + $0x6a8] ss:$16 sps:$4 sm:$0xff]   ;;  %v3915_v34 = vld [vmem:[%s6835_s1 + $0x48c] ss:$16 sps:$4 sm:$0xff]  }
  0x9c   : > { %2078 = vmatprep.subr.bf16.mxu1 %v3828_v35  ;;  %v3916_v35 = vld [vmem:[%s6835_s1 + $0x688] ss:$16 sps:$4 sm:$0xff]  }
  0x9e   : > { %2036 = vmatpush1.bf16.msra.mxu0 %v3823_v36  ;;  %v3921_v36 = vld [vmem:[%s6835_s1 + $0x46c] ss:$16 sps:$4 sm:$0xff]  }
  0x9f   : > { %2079 = vmatpush1.bf16.msra.mxu1 %v3826_v37  ;;  %2037 = vmatprep.subr.bf16.mxu0 %v3831_v38  ;;  %v3924_v37 = vld [vmem:[%s6835_s1 + $0x66c] ss:$16 sps:$4 sm:$0xff]   ;;  %v3919_v38 = vld [vmem:[%s6835_s1 + $0x468] ss:$16 sps:$4 sm:$0xff]  }
  0xa0   : > { %2080 = vmatprep.subr.bf16.mxu1 %v3834_v39  ;;  %v3922_v39 = vld [vmem:[%s6835_s1 + $0x668] ss:$16 sps:$4 sm:$0xff]  }
  0xa2   : > { %2038 = vmatpush1.bf16.msra.mxu0 %v3829_v40  ;;  %v3927_v40 = vld [vmem:[%s6835_s1 + $0x44c] ss:$16 sps:$4 sm:$0xff]  }
  0xa3   : > { %2081 = vmatpush1.bf16.msra.mxu1 %v3832_v42  ;;  %2039 = vmatprep.subr.bf16.mxu0 %v3837_v44  ;;  %v3930_v42 = vld [vmem:[%s6835_s1 + $0x64c] ss:$16 sps:$4 sm:$0xff]   ;;  %v3925_v44 = vld [vmem:[%s6835_s1 + $0x448] ss:$16 sps:$4 sm:$0xff]  }
  0xa4   : > { %2082 = vmatprep.subr.bf16.mxu1 %v3840_v45  ;;  %v3928_v45 = vld [vmem:[%s6835_s1 + $0x648] ss:$16 sps:$4 sm:$0xff]  }
  0xa6   : > { %2040 = vmatpush1.bf16.msra.mxu0 %v3835_v46  ;;  %v3933_v46 = vld [vmem:[%s6835_s1 + $0x42c] ss:$16 sps:$4 sm:$0xff]  }
  0xa7   : > { %2083 = vmatpush1.bf16.msra.mxu1 %v3838_v47  ;;  %2041 = vmatprep.subr.bf16.mxu0 %v3843_v48  ;;  %v3936_v47 = vld [vmem:[%s6835_s1 + $0x62c] ss:$16 sps:$4 sm:$0xff]   ;;  %v3931_v48 = vld [vmem:[%s6835_s1 + $0x428] ss:$16 sps:$4 sm:$0xff]  }
  0xa8   : > { %2084 = vmatprep.subr.bf16.mxu1 %v3846_v49  ;;  %v3934_v49 = vld [vmem:[%s6835_s1 + $0x628] ss:$16 sps:$4 sm:$0xff]  }
  0xaa   : > { %2042 = vmatpush1.bf16.msra.mxu0 %v3841_v50  ;;  %v3939_v50 = vld [vmem:[%s6835_s1 + $0x40c] ss:$16 sps:$4 sm:$0xff]  }
  0xab   : > { %2085 = vmatpush1.bf16.msra.mxu1 %v3844_v51  ;;  %2043 = vmatprep.subr.bf16.mxu0 %v3849_v52  ;;  %v3942_v51 = vld [vmem:[%s6835_s1 + $0x60c] ss:$16 sps:$4 sm:$0xff]   ;;  %v3937_v52 = vld [vmem:[%s6835_s1 + $0x408] ss:$16 sps:$4 sm:$0xff]  }
  0xac   : > { %2086 = vmatprep.subr.bf16.mxu1 %v3852_v54  ;;  %v3940_v54 = vld [vmem:[%s6835_s1 + $0x608] ss:$16 sps:$4 sm:$0xff]  }
  0xae   : > { %2044 = vmatpush2.bf16.msra.mxu0 %v3847_v56  ;;  %v3945_v56 = vld [vmem:[%s6835_s1 + $0x5ec] ss:$16 sps:$4 sm:$0xff]  }
  0xaf   : > { %2087 = vmatpush2.bf16.msra.mxu1 %v3850_v57  ;;  %2045 = vmatprep.subr.bf16.mxu0 %v3855_v58  ;;  %v3948_v57 = vld [vmem:[%s6835_s1 + $0x7ec] ss:$16 sps:$4 sm:$0xff]   ;;  %v3943_v58 = vld [vmem:[%s6835_s1 + $0x5e8] ss:$16 sps:$4 sm:$0xff]  }
  0xb0   : > { %2088 = vmatprep.subr.bf16.mxu1 %v3858_v59  ;;  %v3946_v59 = vld [vmem:[%s6835_s1 + $0x7e8] ss:$16 sps:$4 sm:$0xff]  }
  0xb2   : > { %2046 = vmatpush2.bf16.msra.mxu0 %v3853_v60  ;;  %v3951_v60 = vld [vmem:[%s6835_s1 + $0x5cc] ss:$16 sps:$4 sm:$0xff]  }
  0xb3   : > { %2089 = vmatpush2.bf16.msra.mxu1 %v3856_v61  ;;  %2047 = vmatprep.subr.bf16.mxu0 %v3861_v62  ;;  %v3954_v61 = vld [vmem:[%s6835_s1 + $0x7cc] ss:$16 sps:$4 sm:$0xff]   ;;  %v3949_v62 = vld [vmem:[%s6835_s1 + $0x5c8] ss:$16 sps:$4 sm:$0xff]  }
  0xb4   : > { %2090 = vmatprep.subr.bf16.mxu1 %v3864_v63  ;;  %v3952_v63 = vld [vmem:[%s6835_s1 + $0x7c8] ss:$16 sps:$4 sm:$0xff]  }
  0xb6   : > { %2048 = vmatpush2.bf16.msra.mxu0 %v3859_v0  ;;  %v3957_v0 = vld [vmem:[%s6835_s1 + $0x5ac] ss:$16 sps:$4 sm:$0xff]  }
  0xb7   : > { %2091 = vmatpush2.bf16.msra.mxu1 %v3862_v1  ;;  %2049 = vmatprep.subr.bf16.mxu0 %v3867_v2  ;;  %v3960_v1 = vld [vmem:[%s6835_s1 + $0x7ac] ss:$16 sps:$4 sm:$0xff]   ;;  %v3955_v2 = vld [vmem:[%s6835_s1 + $0x5a8] ss:$16 sps:$4 sm:$0xff]  }
  0xb8   : > { %2092 = vmatprep.subr.bf16.mxu1 %v3870_v3  ;;  %v3958_v3 = vld [vmem:[%s6835_s1 + $0x7a8] ss:$16 sps:$4 sm:$0xff]  }
  0xba   : > { %2050 = vmatpush2.bf16.msra.mxu0 %v3865_v4  ;;  %v3963_v4 = vld [vmem:[%s6835_s1 + $0x58c] ss:$16 sps:$4 sm:$0xff]  }
  0xbb   : > { %2093 = vmatpush2.bf16.msra.mxu1 %v3868_v5  ;;  %2051 = vmatprep.subr.bf16.mxu0 %v3873_v6  ;;  %v3966_v5 = vld [vmem:[%s6835_s1 + $0x78c] ss:$16 sps:$4 sm:$0xff]   ;;  %v3961_v6 = vld [vmem:[%s6835_s1 + $0x588] ss:$16 sps:$4 sm:$0xff]  }
  0xbc   : > { %2094 = vmatprep.subr.bf16.mxu1 %v3876_v7  ;;  %v3964_v7 = vld [vmem:[%s6835_s1 + $0x788] ss:$16 sps:$4 sm:$0xff]  }
  0xbe   : > { %2052 = vmatpush2.bf16.msra.mxu0 %v3871_v10  ;;  %v3969_v10 = vld [vmem:[%s6835_s1 + $0x56c] ss:$16 sps:$4 sm:$0xff]  }
  0xbf   : > { %2095 = vmatpush2.bf16.msra.mxu1 %v3874_v11  ;;  %2053 = vmatprep.subr.bf16.mxu0 %v3879_v12  ;;  %v3972_v11 = vld [vmem:[%s6835_s1 + $0x76c] ss:$16 sps:$4 sm:$0xff]   ;;  %v3967_v12 = vld [vmem:[%s6835_s1 + $0x568] ss:$16 sps:$4 sm:$0xff]  }
  0xc0   : > { %2096 = vmatprep.subr.bf16.mxu1 %v3882_v13  ;;  %v3970_v13 = vld [vmem:[%s6835_s1 + $0x768] ss:$16 sps:$4 sm:$0xff]  }
  0xc2   : > { %2054 = vmatpush2.bf16.msra.mxu0 %v3877_v14  ;;  %v3975_v14 = vld [vmem:[%s6835_s1 + $0x54c] ss:$16 sps:$4 sm:$0xff]  }
  0xc3   : > { %2097 = vmatpush2.bf16.msra.mxu1 %v3880_v15  ;;  %2055 = vmatprep.subr.bf16.mxu0 %v3885_v16  ;;  %v3978_v15 = vld [vmem:[%s6835_s1 + $0x74c] ss:$16 sps:$4 sm:$0xff]   ;;  %v3973_v16 = vld [vmem:[%s6835_s1 + $0x548] ss:$16 sps:$4 sm:$0xff]  }
  0xc4   : > { %2098 = vmatprep.subr.bf16.mxu1 %v3888_v17  ;;  %v3976_v17 = vld [vmem:[%s6835_s1 + $0x748] ss:$16 sps:$4 sm:$0xff]  }
  0xc6   : > { %2056 = vmatpush2.bf16.msra.mxu0 %v3883_v18  ;;  %v3981_v18 = vld [vmem:[%s6835_s1 + $0x52c] ss:$16 sps:$4 sm:$0xff]  }
  0xc7   : > { %2099 = vmatpush2.bf16.msra.mxu1 %v3886_v19  ;;  %2057 = vmatprep.subr.bf16.mxu0 %v3891_v22  ;;  %v3984_v19 = vld [vmem:[%s6835_s1 + $0x72c] ss:$16 sps:$4 sm:$0xff]   ;;  %v3979_v22 = vld [vmem:[%s6835_s1 + $0x528] ss:$16 sps:$4 sm:$0xff]  }
  0xc8   : > { %2100 = vmatprep.subr.bf16.mxu1 %v3894_v23  ;;  %v3982_v23 = vld [vmem:[%s6835_s1 + $0x728] ss:$16 sps:$4 sm:$0xff]  }
  0xca   : > { %2058 = vmatpush2.bf16.msra.mxu0 %v3889_v24  ;;  %v3987_v24 = vld [vmem:[%s6835_s1 + $0x50c] ss:$16 sps:$4 sm:$0xff]  }
  0xcb   : > { %2101 = vmatpush2.bf16.msra.mxu1 %v3892_v25  ;;  %2113 = vmatprep.subr.bf16.mxu0 %v3897_v26  ;;  %v3990_v25 = vld [vmem:[%s6835_s1 + $0x70c] ss:$16 sps:$4 sm:$0xff]   ;;  %v3985_v26 = vld [vmem:[%s6835_s1 + $0x508] ss:$16 sps:$4 sm:$0xff]  }
  0xcc   : > { %2156 = vmatprep.subr.bf16.mxu1 %v3900_v27  ;;  %v3988_v27 = vld [vmem:[%s6835_s1 + $0x708] ss:$16 sps:$4 sm:$0xff]  }
  0xcd   : > { %2060 = vmatmul.mubr.bf16.vlgmr.msra.gmra.mxu0 %v4324_v8  ;;  %v3912_v8 = vld [vmem:[%s6835_s1 + $0x6ac] ss:$16 sps:$4 sm:$0xff]  }
  0xce   : > { %2103 = vmatmul.mubr.bf16.vlgmr.msra.gmra.mxu1 %v4326_v9  ;;  %2114 = vmatpush1.bf16.msra.mxu0 %v3895_v28  ;;  %v3907_v9 = vld [vmem:[%s6835_s1 + $0x4a8] ss:$16 sps:$4 sm:$0xff]  }
  0xcf   : > { %2157 = vmatpush1.bf16.msra.mxu1 %v3898_v29  ;;  %2115 = vmatprep.subr.bf16.mxu0 %v3903_v30  ;;  %v4941_v28 = vld [vmem:[%s6837_s3 + $0x1e8] sm:$0xff]  ;;  %v4947_v29 = vld [vmem:[%s6837_s3 + $0x1e0] sm:$0xff] }
  0xd0   : > { %2158 = vmatprep.subr.bf16.mxu1 %v3906_v31  ;;  %2145 = vmatprep.mubr.bf16.mxu0 %v4425_v41  ;;  %v3918_v41 = vld [vmem:[%s6835_s1 + $0x68c] ss:$16 sps:$4 sm:$0xff]   ;;  %v4959_v31 = vld [vmem:[%s6837_s3 + $0x1c0] sm:$0xff] }
  0xd1   : > { %2188 = vmatprep.mubr.bf16.mxu1 %v4432_v43  ;;  %v3913_v43 = vld [vmem:[%s6835_s1 + $0x488] ss:$16 sps:$4 sm:$0xff]  }
  0xd2   : > { %2116 = vmatpush1.bf16.msra.mxu0 %v3901_v32  ;;  %v4952_v30 = vld [vmem:[%s6837_s3 + $0x1c8] sm:$0xff] }
  0xd3   : > { %2159 = vmatpush1.bf16.msra.mxu1 %v3904_v53  ;;  %2117 = vmatprep.subr.bf16.mxu0 %v3909_v55  ;;  %v4965_v32 = vld [vmem:[%s6837_s3 + $0x1a8] sm:$0xff]  ;;  %v4983_v53 = vld [vmem:[%s6837_s3 + $0x180] sm:$0xff] }
  0xd4   : > { %2160 = vmatprep.subr.bf16.mxu1 %v3912_v8  ;;  %v4989_v55 = vld [vmem:[%s6837_s3 + $0x168] sm:$0xff]  ;;  %v4995_v8 = vld [vmem:[%s6837_s3 + $0x160] sm:$0xff] }
  0xd6   : > { %2118 = vmatpush1.bf16.msra.mxu0 %v3907_v9  ;;  %v5001_v9 = vld [vmem:[%s6837_s3 + $0x148] sm:$0xff] }
  0xd7   : > { %2161 = vmatpush1.bf16.msra.mxu1 %v3910_v33  ;;  %2119 = vmatprep.subr.bf16.mxu0 %v3915_v34  ;;  %v5007_v33 = vld [vmem:[%s6837_s3 + $0x140] sm:$0xff]  ;;  %v5013_v34 = vld [vmem:[%s6837_s3 + $0x128] sm:$0xff] }
  0xd8   : > { %2162 = vmatprep.subr.bf16.mxu1 %v3918_v41  ;;  %v5019_v41 = vld [vmem:[%s6837_s3 + $0x120] sm:$0xff] }
  0xda   : > { %2120 = vmatpush1.bf16.msra.mxu0 %v3913_v43  ;;  %v5025_v43 = vld [vmem:[%s6837_s3 + $0x108] sm:$0xff] }
  0xdb   : > { %2163 = vmatpush1.bf16.msra.mxu1 %v3916_v35  ;;  %2121 = vmatprep.subr.bf16.mxu0 %v3921_v36  ;;  %v5031_v35 = vld [vmem:[%s6837_s3 + $0x100] sm:$0xff]  ;;  %v5037_v36 = vld [vmem:[%s6837_s3 + $0xe8] sm:$0xff] }
  0xdc   : > { %2164 = vmatprep.subr.bf16.mxu1 %v3924_v37  ;;  %v5043_v37 = vld [vmem:[%s6837_s3 + $0xe0] sm:$0xff] }
  0xde   : > { %2122 = vmatpush1.bf16.msra.mxu0 %v3919_v38  ;;  %v5049_v38 = vld [vmem:[%s6837_s3 + $0xc8] sm:$0xff] }
  0xdf   : > { %2165 = vmatpush1.bf16.msra.mxu1 %v3922_v39  ;;  %2123 = vmatprep.subr.bf16.mxu0 %v3927_v40  ;;  %v5055_v39 = vld [vmem:[%s6837_s3 + $0xc0] sm:$0xff]  ;;  %v5061_v40 = vld [vmem:[%s6837_s3 + $0xa8] sm:$0xff] }
  0xe0   : > { %2166 = vmatprep.subr.bf16.mxu1 %v3930_v42  ;;  %v5067_v42 = vld [vmem:[%s6837_s3 + $0xa0] sm:$0xff] }
  0xe2   : > { %2124 = vmatpush1.bf16.msra.mxu0 %v3925_v44  ;;  %v5073_v44 = vld [vmem:[%s6837_s3 + $0x88] sm:$0xff] }
  0xe3   : > { %2167 = vmatpush1.bf16.msra.mxu1 %v3928_v45  ;;  %2125 = vmatprep.subr.bf16.mxu0 %v3933_v46  ;;  %v5079_v45 = vld [vmem:[%s6837_s3 + $0x80] sm:$0xff]  ;;  %v5085_v46 = vld [vmem:[%s6837_s3 + $0x68] sm:$0xff] }
  0xe4   : > { %2168 = vmatprep.subr.bf16.mxu1 %v3936_v47  ;;  %v5091_v47 = vld [vmem:[%s6837_s3 + $0x60] sm:$0xff] }
  0xe6   : > { %2126 = vmatpush1.bf16.msra.mxu0 %v3931_v48  ;;  %v5097_v48 = vld [vmem:[%s6837_s3 + $0x48] sm:$0xff] }
  0xe7   : > { %2169 = vmatpush1.bf16.msra.mxu1 %v3934_v49  ;;  %2127 = vmatprep.subr.bf16.mxu0 %v3939_v50  ;;  %v5103_v49 = vld [vmem:[%s6837_s3 + $0x40] sm:$0xff]  ;;  %v5109_v50 = vld [vmem:[%s6837_s3 + $0x28] sm:$0xff] }
  0xe8   : > { %2170 = vmatprep.subr.bf16.mxu1 %v3942_v51  ;;  %v5115_v51 = vld [vmem:[%s6837_s3 + $0x20] sm:$0xff] }
  0xea   : > { %2128 = vmatpush1.bf16.msra.mxu0 %v3937_v52  ;;  %v5121_v52 = vld [vmem:[%s6837_s3 + $0x8] sm:$0xff] }
  0xeb   : > { %2171 = vmatpush1.bf16.msra.mxu1 %v3940_v54  ;;  %2129 = vmatprep.subr.bf16.mxu0 %v3945_v56  ;;  %v5127_v54 = vld [vmem:[%s6837_s3] sm:$0xff]  ;;  %v5133_v56 = vld [vmem:[%s6837_s3 + $0x3e8] sm:$0xff] }
  0xec   : > { %2172 = vmatprep.subr.bf16.mxu1 %v3948_v57  ;;  %v5138_v57 = vld [vmem:[%s6837_s3 + $0x3e0] sm:$0xff] }
  0xee   : > { %2130 = vmatpush2.bf16.msra.mxu0 %v3943_v58  ;;  %v2477_v58 = vld [vmem:[%s6837_s3 + $0x5e8] sm:$0xff] }
  0xef   : > { %2173 = vmatpush2.bf16.msra.mxu1 %v3946_v59  ;;  %2131 = vmatprep.subr.bf16.mxu0 %v3951_v60  ;;  %v2476_v59 = vld [vmem:[%s6837_s3 + $0x5e0] sm:$0xff]  ;;  %v2473_v60 = vld [vmem:[%s6837_s3 + $0x5c8] sm:$0xff] }
  0xf0   : > { %2174 = vmatprep.subr.bf16.mxu1 %v3954_v61  ;;  %v2472_v61 = vld [vmem:[%s6837_s3 + $0x5c0] sm:$0xff] }
  0xf2   : > { %2132 = vmatpush2.bf16.msra.mxu0 %v3949_v62  ;;  %v5157_v62 = vld [vmem:[%s6837_s3 + $0x3c8] sm:$0xff] }
  0xf3   : > { %2175 = vmatpush2.bf16.msra.mxu1 %v3952_v63  ;;  %2133 = vmatprep.subr.bf16.mxu0 %v3957_v0  ;;  %v2469_v63 = vld [vmem:[%s6837_s3 + $0x5a8] sm:$0xff]  ;;  %v5166_v0 = vld [vmem:[%s6837_s3 + $0x3c0] sm:$0xff] }
  0xf4   : > { %2176 = vmatprep.subr.bf16.mxu1 %v3960_v1  ;;  %v2468_v1 = vld [vmem:[%s6837_s3 + $0x5a0] sm:$0xff] }
  0xf6   : > { %2134 = vmatpush2.bf16.msra.mxu0 %v3955_v2  ;;  %v5175_v2 = vld [vmem:[%s6837_s3 + $0x3a8] sm:$0xff] }
  0xf7   : > { %2177 = vmatpush2.bf16.msra.mxu1 %v3958_v3  ;;  %2135 = vmatprep.subr.bf16.mxu0 %v3963_v4  ;;  %v2465_v3 = vld [vmem:[%s6837_s3 + $0x588] sm:$0xff]  ;;  %v5184_v4 = vld [vmem:[%s6837_s3 + $0x3a0] sm:$0xff] }
  0xf8   : > { %2178 = vmatprep.subr.bf16.mxu1 %v3966_v5  ;;  %v2464_v5 = vld [vmem:[%s6837_s3 + $0x580] sm:$0xff] }
  0xfa   : > { %2136 = vmatpush2.bf16.msra.mxu0 %v3961_v6  ;;  %v5193_v6 = vld [vmem:[%s6837_s3 + $0x388] sm:$0xff] }
  0xfb   : > { %2179 = vmatpush2.bf16.msra.mxu1 %v3964_v7  ;;  %2137 = vmatprep.subr.bf16.mxu0 %v3969_v10  ;;  %v2461_v7 = vld [vmem:[%s6837_s3 + $0x568] sm:$0xff]  ;;  %v5202_v10 = vld [vmem:[%s6837_s3 + $0x380] sm:$0xff] }
  0xfc   : > { %2180 = vmatprep.subr.bf16.mxu1 %v3972_v11  ;;  %v2460_v11 = vld [vmem:[%s6837_s3 + $0x560] sm:$0xff] }
  0xfe   : > { %2138 = vmatpush2.bf16.msra.mxu0 %v3967_v12  ;;  %v5211_v12 = vld [vmem:[%s6837_s3 + $0x368] sm:$0xff] }
  0xff   : > { %2181 = vmatpush2.bf16.msra.mxu1 %v3970_v13  ;;  %2139 = vmatprep.subr.bf16.mxu0 %v3975_v14  ;;  %v2457_v13 = vld [vmem:[%s6837_s3 + $0x548] sm:$0xff]  ;;  %v5220_v14 = vld [vmem:[%s6837_s3 + $0x360] sm:$0xff] }
 0x100   : > { %2182 = vmatprep.subr.bf16.mxu1 %v3978_v15  ;;  %v2456_v15 = vld [vmem:[%s6837_s3 + $0x540] sm:$0xff] }
 0x102   : > { %2140 = vmatpush2.bf16.msra.mxu0 %v3973_v16  ;;  %v5229_v16 = vld [vmem:[%s6837_s3 + $0x348] sm:$0xff] }
 0x103   : > { %2183 = vmatpush2.bf16.msra.mxu1 %v3976_v17  ;;  %2141 = vmatprep.subr.bf16.mxu0 %v3981_v18  ;;  %6974 = vst [vmem:[#allocation3_spill] sm:$0xff] %v5229_v16  ;;  %v2453_v17 = vld [vmem:[%s6837_s3 + $0x528] sm:$0xff]  ;;  %v5238_v18 = vld [vmem:[%s6837_s3 + $0x340] sm:$0xff] }
 0x104   : > { %2184 = vmatprep.subr.bf16.mxu1 %v3984_v19  ;;  %6975 = vst [vmem:[#allocation4_spill] sm:$0xff] %v5238_v18  ;;  %v2452_v19 = vld [vmem:[%s6837_s3 + $0x520] sm:$0xff] }
 0x106   : > { %2142 = vmatpush2.bf16.msra.mxu0 %v3979_v22  ;;  %v5247_v22 = vld [vmem:[%s6837_s3 + $0x328] sm:$0xff] }
 0x107   : > { %2185 = vmatpush2.bf16.msra.mxu1 %v3982_v23  ;;  %2143 = vmatprep.subr.bf16.mxu0 %v3987_v24  ;;  %6976 = vst [vmem:[#allocation5_spill] sm:$0xff] %v5247_v22  ;;  %v2449_v23 = vld [vmem:[%s6837_s3 + $0x508] sm:$0xff]  ;;  %v5256_v24 = vld [vmem:[%s6837_s3 + $0x320] sm:$0xff] }
 0x108   : > { %2186 = vmatprep.subr.bf16.mxu1 %v3990_v25  ;;  %6977 = vst [vmem:[#allocation6_spill] sm:$0xff] %v5256_v24  ;;  %v2448_v25 = vld [vmem:[%s6837_s3 + $0x500] sm:$0xff] }
 0x10a   : > { %2144 = vmatpush2.bf16.msra.mxu0 %v3985_v26  ;;  %v5265_v26 = vld [vmem:[%s6837_s3 + $0x308] sm:$0xff] }
 0x10b   : > { %2187 = vmatpush2.bf16.msra.mxu1 %v3988_v27  ;;  %2544 = vmatprep.subr.mxu0 %v4941_v28  ;;  %6978 = vst [vmem:[#allocation7_spill] sm:$0xff] %v5265_v26  ;;  %v2445_v27 = vld [vmem:[%s6837_s3 + $0x4e8] sm:$0xff] }
 0x10c   : > { %2615 = vmatprep.subr.mxu1 %v2477_v58  ;;  %v5274_v58 = vld [vmem:[%s6837_s3 + $0x300] sm:$0xff] }
 0x10d   : > { %2146 = vmatmul.mubr.bf16.vlgmr.msra.gmra.mxu0 %v4546_v20  ;;  %v4971_v20 = vld [vmem:[%s6837_s3 + $0x1a0] sm:$0xff]  ;;  %6979 = vst [vmem:[#allocation8_spill] sm:$0xff] %v5274_v58 }
 0x10e   : > { %2189 = vmatmul.mubr.bf16.vlgmr.msra.gmra.mxu1 %v4550_v21  ;;  %2545 = vmatpush1.msra.mxu0 %v4947_v29  ;;  %v4977_v21 = vld [vmem:[%s6837_s3 + $0x188] sm:$0xff] }
 0x10f   : > { %2546 = vmatprep.subr.mxu0 %v4952_v30  ;;  %2616 = vmatpush1.msra.mxu1 %v2476_v59  ;;  %v2444_v59 = vld [vmem:[%s6837_s3 + $0x4e0] sm:$0xff] }
 0x110   : > { %2547 = vmatpush1.msra.mxu0 %v4959_v31  ;;  %2617 = vmatprep.subr.mxu1 %v2473_v60  ;;  %v5283_v60 = vld [vmem:[%s6837_s3 + $0x2e8] sm:$0xff] }
 0x111   : > { %2548 = vmatprep.subr.mxu0 %v4965_v32  ;;  %2618 = vmatpush1.msra.mxu1 %v2472_v61  ;;  %6980 = vst [vmem:[#allocation9_spill] sm:$0xff] %v5283_v60  ;;  %v2441_v61 = vld [vmem:[%s6837_s3 + $0x4c8] sm:$0xff] }
 0x112   : > { %2549 = vmatpush1.msra.mxu0 %v4971_v20  ;;  %2619 = vmatprep.subr.mxu1 %v2469_v63  ;;  %v5292_v63 = vld [vmem:[%s6837_s3 + $0x2e0] sm:$0xff] }
 0x113   : > { %2550 = vmatprep.subr.mxu0 %v4977_v21  ;;  %2620 = vmatpush1.msra.mxu1 %v2468_v1  ;;  %6981 = vst [vmem:[#allocation10_spill] sm:$0xff] %v5292_v63  ;;  %v2440_v1 = vld [vmem:[%s6837_s3 + $0x4c0] sm:$0xff] }
 0x114   : > { %2551 = vmatpush1.msra.mxu0 %v4983_v53  ;;  %2621 = vmatprep.subr.mxu1 %v2465_v3  ;;  %v5301_v3 = vld [vmem:[%s6837_s3 + $0x2c8] sm:$0xff] }
 0x115   : > { %2552 = vmatprep.subr.mxu0 %v4989_v55  ;;  %2622 = vmatpush1.msra.mxu1 %v2464_v5  ;;  %6982 = vst [vmem:[#allocation11_spill] sm:$0xff] %v5301_v3  ;;  %v2437_v5 = vld [vmem:[%s6837_s3 + $0x4a8] sm:$0xff] }
 0x116   : > { %2553 = vmatpush1.msra.mxu0 %v4995_v8  ;;  %2623 = vmatprep.subr.mxu1 %v2461_v7  ;;  %v5310_v7 = vld [vmem:[%s6837_s3 + $0x2c0] sm:$0xff] }
 0x117   : > { %2554 = vmatprep.subr.mxu0 %v5001_v9  ;;  %2624 = vmatpush1.msra.mxu1 %v2460_v11  ;;  %6983 = vst [vmem:[#allocation12_spill] sm:$0xff] %v5310_v7  ;;  %v2436_v11 = vld [vmem:[%s6837_s3 + $0x4a0] sm:$0xff] }
 0x118   : > { %2555 = vmatpush1.msra.mxu0 %v5007_v33  ;;  %2625 = vmatprep.subr.mxu1 %v2457_v13  ;;  %v5319_v13 = vld [vmem:[%s6837_s3 + $0x2a8] sm:$0xff] }
 0x119   : > { %2556 = vmatprep.subr.mxu0 %v5013_v34  ;;  %2626 = vmatpush1.msra.mxu1 %v2456_v15  ;;  %6984 = vst [vmem:[#allocation13_spill] sm:$0xff] %v5319_v13  ;;  %v2433_v15 = vld [vmem:[%s6837_s3 + $0x488] sm:$0xff] }
 0x11a   : > { %2557 = vmatpush1.msra.mxu0 %v5019_v41  ;;  %2627 = vmatprep.subr.mxu1 %v2453_v17  ;;  %v1889_v17 = vpop.f32.mrf.mxu0 }
 0x11b   : > { %2558 = vmatprep.subr.mxu0 %v5025_v43  ;;  %2628 = vmatpush1.msra.mxu1 %v2452_v19  ;;  %v1932_v19 = vpop.f32.mrf.mxu1 }
 0x11c   : > { %2559 = vmatpush1.msra.mxu0 %v5031_v35  ;;  %2629 = vmatprep.subr.mxu1 %v2449_v23  ;;  %v5328_v23 = vld [vmem:[%s6837_s3 + $0x2a0] sm:$0xff] }
 0x11d   : > { %2560 = vmatprep.subr.mxu0 %v5037_v36  ;;  %2630 = vmatpush1.msra.mxu1 %v2448_v25  ;;  %6985 = vst [vmem:[#allocation14_spill] sm:$0xff] %v5328_v23  ;;  %v2432_v25 = vld [vmem:[%s6837_s3 + $0x480] sm:$0xff] }
 0x11e   : > { %2561 = vmatpush1.msra.mxu0 %v5043_v37  ;;  %2631 = vmatprep.subr.mxu1 %v2445_v27  ;;  %v5337_v27 = vld [vmem:[%s6837_s3 + $0x288] sm:$0xff] }
 0x11f   : > { %2562 = vmatprep.subr.mxu0 %v5049_v38  ;;  %2632 = vmatpush1.msra.mxu1 %v2444_v59  ;;  %6986 = vst [vmem:[#allocation15_spill] sm:$0xff] %v5337_v27  ;;  %v2429_v59 = vld [vmem:[%s6837_s3 + $0x468] sm:$0xff] }
 0x120   : > { %2563 = vmatpush1.msra.mxu0 %v5055_v39  ;;  %2633 = vmatprep.subr.mxu1 %v2441_v61  ;;  %v5346_v61 = vld [vmem:[%s6837_s3 + $0x280] sm:$0xff] }
 0x121   : > { %2564 = vmatprep.subr.mxu0 %v5061_v40  ;;  %2634 = vmatpush1.msra.mxu1 %v2440_v1  ;;  %6987 = vst [vmem:[#allocation16_spill] sm:$0xff] %v5346_v61  ;;  %v2428_v1 = vld [vmem:[%s6837_s3 + $0x460] sm:$0xff] }
 0x122   : > { %2565 = vmatpush1.msra.mxu0 %v5067_v42  ;;  %2635 = vmatprep.subr.mxu1 %v2437_v5  ;;  %v5355_v5 = vld [vmem:[%s6837_s3 + $0x268] sm:$0xff] }
 0x123   : > { %2566 = vmatprep.subr.mxu0 %v5073_v44  ;;  %2636 = vmatpush1.msra.mxu1 %v2436_v11  ;;  %6988 = vst [vmem:[#allocation17_spill] sm:$0xff] %v5355_v5  ;;  %v2425_v11 = vld [vmem:[%s6837_s3 + $0x448] sm:$0xff] }
 0x124   : > { %2567 = vmatpush1.msra.mxu0 %v5079_v45  ;;  %2637 = vmatprep.subr.mxu1 %v2433_v15  ;;  %v5364_v15 = vld [vmem:[%s6837_s3 + $0x260] sm:$0xff] }
 0x125   : > { %2568 = vmatprep.subr.mxu0 %v5085_v46  ;;  %2638 = vmatpush1.msra.mxu1 %v2432_v25  ;;  %6989 = vst [vmem:[#allocation18_spill] sm:$0xff] %v5364_v15  ;;  %v5373_v25 = vld [vmem:[%s6837_s3 + $0x248] sm:$0xff] }
 0x126   : > { %2569 = vmatpush1.msra.mxu0 %v5091_v47  ;;  %2639 = vmatprep.subr.mxu1 %v2429_v59  ;;  %6990 = vst [vmem:[#allocation19_spill] sm:$0xff] %v5373_v25  ;;  %v5382_v59 = vld [vmem:[%s6837_s3 + $0x240] sm:$0xff] }
 0x127   : > { %2570 = vmatprep.subr.mxu0 %v5097_v48  ;;  %2640 = vmatpush1.msra.mxu1 %v2428_v1  ;;  %6991 = vst [vmem:[#allocation20_spill] sm:$0xff] %v5382_v59  ;;  %v5391_v1 = vld [vmem:[%s6837_s3 + $0x228] sm:$0xff] }
 0x128   : > { %2571 = vmatpush1.msra.mxu0 %v5103_v49  ;;  %2641 = vmatprep.subr.mxu1 %v2425_v11  ;;  %6992 = vst [vmem:[#allocation21_spill] sm:$0xff] %v5391_v1  ;;  %v5400_v11 = vld [vmem:[%s6837_s3 + $0x220] sm:$0xff] }
 0x129   : > { %2572 = vmatprep.subr.mxu0 %v5109_v50  ;;  %6993 = vst [vmem:[#allocation22_spill] sm:$0xff] %v5400_v11 }
 0x12a   : > { %2573 = vmatpush1.msra.mxu0 %v5115_v51 }
 0x12b   : > { %2574 = vmatprep.subr.mxu0 %v5121_v52 }
 0x12c   : > { %2575 = vmatpush1.msra.mxu0 %v5127_v54 }
 0x12d   : > { %2576 = vmatprep.subr.mxu0 %v5133_v56 }
 0x12e   : > { %2577 = vmatpush2.msra.mxu0 %v5138_v57 }
 0x12f   : > { %2578 = vmatprep.subr.mxu0 %v5157_v62 }
 0x130   : > { %2579 = vmatpush2.msra.mxu0 %v5166_v0 }
 0x131   : > { %2580 = vmatprep.subr.mxu0 %v5175_v2 }
 0x132   : > { %2581 = vmatpush2.msra.mxu0 %v5184_v4 }
 0x133   : > { %2582 = vmatprep.subr.mxu0 %v5193_v6 }
 0x134   : > { %2583 = vmatpush2.msra.mxu0 %v5202_v10 }
 0x135   : > { %2584 = vmatprep.subr.mxu0 %v5211_v12 }
 0x136   : > { %2585 = vmatpush2.msra.mxu0 %v5220_v14 }
 0x137   : > { %2586 = vmatprep.subr.mxu0 %v5229_v16 }
 0x138   : > { %2587 = vmatpush2.msra.mxu0 %v5238_v18 }
 0x139   : > { %2588 = vmatprep.subr.mxu0 %v5247_v22 }
 0x13a   : > { %2589 = vmatpush2.msra.mxu0 %v5256_v24  ;;  %v1933_v24 = vadd.f32 %v1932_v19, %v1889_v17  ;;  %v5446_v17 = vld [vmem:[%s6837_s3 + $0x7a8] sm:$0xff]  ;;  %v5451_v19 = vld [vmem:[%s6836_s2] sm:$0xf] }
 0x13b   : > { %2590 = vmatprep.subr.mxu0 %v5265_v26  ;;  %6997 = vst [vmem:[#allocation26_spill] sm:$0xff] %v5446_v17 }
 0x13c   : > { %2591 = vmatpush2.msra.mxu0 %v5274_v58 }
 0x13d   : > { %2592 = vmatprep.subr.mxu0 %v5283_v60 }
 0x13e   : > { %2593 = vmatpush2.msra.mxu0 %v5292_v63 }
 0x13f   : > { %2594 = vmatprep.subr.mxu0 %v5301_v3  ;;  %v2228_v3 = vlaneseq }
 0x140   : > { %2595 = vmatpush2.msra.mxu0 %v5310_v7  ;;  %v1934_v7 = vpop.f32.mrf.mxu1 }
 0x141   : > { %2596 = vmatprep.subr.mxu0 %v5319_v13  ;;  %v1891_v13 = vpop.f32.mrf.mxu0  ;;  %v5423_v58 = vshrl.u32 %v2228_v3, 7 }
 0x142   : > { %2597 = vmatpush2.msra.mxu0 %v5328_v23  ;;  %v2424_v23 = vld [vmem:[%s6837_s3 + $0x440] sm:$0xff]  ;;  %v1936_v60 = vpop.f32.mrf.mxu1  ;;  %v1935_v22 = vadd.f32 %v1934_v7, %v1891_v13 }
 0x143   : > { %2598 = vmatprep.subr.mxu0 %v5337_v27  ;;  %v2421_v27 = vld [vmem:[%s6837_s3 + $0x428] sm:$0xff]  ;;  %2642 = vmatpush1.msra.mxu1 %v2424_v23  ;;  %v1893_v63 = vpop.f32.mrf.mxu0  ;;  %v5441_v16 = vsub.s32 0, %v5423_v58 }
 0x144   : > { %2599 = vmatpush2.msra.mxu0 %v5346_v61  ;;  %v2420_v61 = vld [vmem:[%s6837_s3 + $0x420] sm:$0xff]  ;;  %2643 = vmatprep.subr.mxu1 %v2421_v27  ;;  %v5409_v23 = vld [vmem:[%s6837_s3 + $0x208] sm:$0xff]  ;;  %v1937_v7 = vadd.f32 %v1936_v60, %v1893_v63 }
 0x145   : > { %2600 = vmatprep.subr.mxu0 %v5355_v5  ;;  %v2417_v5 = vld [vmem:[%s6837_s3 + $0x408] sm:$0xff]  ;;  %2644 = vmatpush1.msra.mxu1 %v2420_v61  ;;  %v5418_v27 = vld [vmem:[%s6837_s3 + $0x200] sm:$0xff]  ;;  %v5429_v61 = vld [vmem:[%s6837_s3 + $0x1f8] sm:$0xff]  ;;  %v1895_v26 = vpop.f32.mrf.mxu0  ;;  %6996 = vst [vmem:[#allocation25_spill] sm:$0xff] %v5441_v16  ;;  %v2231_v63 = vrot.slane %v5451_v19, %v5441_v16 }
 0x146   : > { %2601 = vmatpush2.msra.mxu0 %v5364_v15  ;;  %v2416_v15 = vld [vmem:[%s6837_s3 + $0x400] sm:$0xff]  ;;  %6994 = vst [vmem:[#allocation23_spill] sm:$0xff] %v5418_v27  ;;  %2645 = vmatprep.subr.mxu1 %v2417_v5  ;;  %6995 = vst [vmem:[#allocation24_spill] sm:$0xff] %v5429_v61  ;;  %v1938_v5 = vpop.f32.mrf.mxu1 }
 0x147   : > { %2602 = vmatprep.subr.mxu0 %v5373_v25  ;;  %v2541_v25 = vld [vmem:[%s6837_s3 + $0x7e8] sm:$0xff]  ;;  %2646 = vmatpush1.msra.mxu1 %v2416_v15  ;;  %v2536_v15 = vld [vmem:[%s6837_s3 + $0x7c0] sm:$0xff]  ;;  %v1939_v60 = vadd.f32 %v1938_v5, %v1895_v26 }
 0x148   : > { %2603 = vmatpush2.msra.mxu0 %v5382_v59  ;;  %v2540_v59 = vld [vmem:[%s6837_s3 + $0x7e0] sm:$0xff]  ;;  %2647 = vmatprep.subr.mxu1 %v2541_v25 }
 0x149   : > { %2604 = vmatprep.subr.mxu0 %v5391_v1  ;;  %v2537_v1 = vld [vmem:[%s6837_s3 + $0x7c8] sm:$0xff]  ;;  %2648 = vmatpush2.msra.mxu1 %v2540_v59  ;;  %v5497_v16 = vld [vmem:[%s6837_s3 + $0x740] sm:$0xff] }
 0x14a   : > { %2605 = vmatpush2.msra.mxu0 %v5400_v11  ;;  %2649 = vmatprep.subr.mxu1 %v2537_v1  ;;  %v2234_v1 = vsub.s32 1, %v5423_v58 }
 0x14b   : > { %2606 = vmatprep.subr.mxu0 %v5409_v23  ;;  %2650 = vmatpush2.msra.mxu1 %v2536_v15 }
 0x14c   : > { %2607 = vmatpush2.msra.mxu0 %v5418_v27  ;;  %2651 = vmatprep.subr.mxu1 %v5446_v17  ;;  %v5470_v17 = vld [vmem:[%s6837_s3 + $0x780] sm:$0xff]  ;;  %v2235_v26 = vrot.slane %v5451_v19, %v2234_v1 }
 0x14d   : > { %v1975_v3 = vpop.f32.mrf.mxu0  ;;  %2686 = vmatprep.subr.mxu0 %v5429_v61  ;;  %v5513_v1 = vld [vmem:[%s6837_s3 + $0x720] sm:$0xff] }
 0x14e   : > { %v2018_v11 = vpop.f32.mrf.mxu1  ;;  %v1976_v18 = vadd.f32 %v1975_v3, %v1933_v24  ;;  %v5457_v24 = vld [vmem:[%s6837_s3 + $0x7a0] sm:$0xff]  ;;  %v5464_v3 = vld [vmem:[%s6837_s3 + $0x788] sm:$0xff] }
 0x14f   : > { %v1977_v25 = vpop.f32.mrf.mxu0  ;;  %6998 = vst [vmem:[#allocation27_spill] sm:$0xff] %v5457_v24  ;;  %2652 = vmatpush2.msra.mxu1 %v5457_v24  ;;  %6999 = vst [vmem:[#allocation28_spill] sm:$0xff] %v5464_v3  ;;  %v5478_v24 = vld [vmem:[%s6837_s3 + $0x768] sm:$0xff] }
 0x150   : > { %v2020_v59 = vpop.f32.mrf.mxu1  ;;  %v1978_v13 = vadd.f32 %v1977_v25, %v1935_v22  ;;  %2653 = vmatprep.subr.mxu1 %v5464_v3  ;;  %v2019_v22 = vadd.f32 %v2018_v11, %v1976_v18  ;;  %v5484_v3 = vld [vmem:[%s6837_s3 + $0x760] sm:$0xff] }
 0x151   : > { %v1979_v15 = vpop.f32.mrf.mxu0  ;;  %2654 = vmatpush2.msra.mxu1 %v5470_v17 }
 0x152   : > { %v2022_v61 = vpop.f32.mrf.mxu1  ;;  %v1980_v25 = vadd.f32 %v1979_v15, %v1937_v7  ;;  %2655 = vmatprep.subr.mxu1 %v5478_v24  ;;  %v2021_v18 = vadd.f32 %v2020_v59, %v1978_v13  ;;  %v5491_v7 = vld [vmem:[%s6837_s3 + $0x748] sm:$0xff]  ;;  %v5499_v59 = vadd.f32 %v2231_v63, %v2019_v22 }
 0x153   : > { %v1981_v27 = vpop.f32.mrf.mxu0  ;;  %2656 = vmatpush2.msra.mxu1 %v5484_v3 }
 0x154   : > { %v2023_v11 = vadd.f32 %v2022_v61, %v1980_v25  ;;  %v1982_v5 = vadd.f32 %v1981_v27, %v1939_v60  ;;  %v2024_v15 = vpop.f32.mrf.mxu1  ;;  %2657 = vmatprep.subr.mxu1 %v5491_v7  ;;  %7000 = vst [vmem:[#allocation29_spill] sm:$0xff] %v5499_v59  ;;  %v5507_v61 = vld [vmem:[%s6837_s3 + $0x728] sm:$0xff]  ;;  %v5515_v60 = vadd.f32 %v2235_v26, %v2021_v18 }
 0x155   : > { %2658 = vmatpush2.msra.mxu1 %v5497_v16  ;;  %v5525_v25 = vld [vmem:[%s6837_s3 + $0x708] sm:$0xff] }
 0x156   : > { %v5501_v13 = vadd.f32 %v2231_v63, %v2023_v11  ;;  %v2025_v27 = vadd.f32 %v2024_v15, %v1982_v5  ;;  %2659 = vmatprep.subr.mxu1 %v5507_v61  ;;  %7002 = vst [vmem:[#allocation31_spill] sm:$0xff] %v5515_v60  ;;  %v5531_v11 = vld [vmem:[%s6837_s3 + $0x700] sm:$0xff] }
 0x157   : > { %2660 = vmatpush2.msra.mxu1 %v5513_v1  ;;  %7004 = vst [vmem:[#allocation33_spill] sm:$0xff] %v5531_v11  ;;  %v5545_v15 = vld [vmem:[%s6837_s3 + $0x6e0] sm:$0xff] }
 0x158   : > { %7001 = vst [vmem:[#allocation30_spill] sm:$0xff] %v5501_v13  ;;  %v2256_v22 = vadd.f32 %v5501_v13, %v5499_v59  ;;  %v5519_v63 = vadd.f32 %v2235_v26, %v2025_v27  ;;  %2661 = vmatprep.subr.mxu1 %v5525_v25  ;;  %v5539_v26 = vld [vmem:[%s6837_s3 + $0x6e8] sm:$0xff]  ;;  %7006 = vst [vmem:[#allocation35_spill] sm:$0xff] %v5545_v15 }
 0x159   : > { %2662 = vmatpush2.msra.mxu1 %v5531_v11  ;;  %7005 = vst [vmem:[#allocation34_spill] sm:$0xff] %v5539_v26 }
 0x15a   : > { %7003 = vst [vmem:[#allocation32_spill] sm:$0xff] %v5519_v63  ;;  %v2257_v18 = vrot.slane %v2256_v22, 4  ;;  %v2263_v5 = vadd.f32 %v5519_v63, %v5515_v60  ;;  %2663 = vmatprep.subr.mxu1 %v5539_v26  ;;  %v5551_v63 = vld [vmem:[%s6837_s3 + $0x6c8] sm:$0xff]  ;;  %v5557_v60 = vld [vmem:[%s6837_s3 + $0x6c0] sm:$0xff] }
 0x15b   : > { %2664 = vmatpush2.msra.mxu1 %v5545_v15  ;;  %7007 = vst [vmem:[#allocation36_spill] sm:$0xff] %v5551_v63  ;;  %7008 = vst [vmem:[#allocation37_spill] sm:$0xff] %v5557_v60 }
 0x15c   : > { %v2258_v27 = vadd.f32 %v2257_v18, %v2256_v22  ;;  %v2264_v13 = vrot.slane %v2263_v5, 4  ;;  %2665 = vmatprep.subr.mxu1 %v5551_v63  ;;  %v5563_v22 = vld [vmem:[%s6837_s3 + $0x6a8] sm:$0xff]  ;;  %v5569_v18 = vld [vmem:[%s6837_s3 + $0x6a0] sm:$0xff] }
 0x15d   : > { %2666 = vmatpush2.msra.mxu1 %v5557_v60  ;;  %7009 = vst [vmem:[#allocation38_spill] sm:$0xff] %v5563_v22  ;;  %7010 = vst [vmem:[#allocation39_spill] sm:$0xff] %v5569_v18  ;;  %v5597_v60 = vld [vmem:[%s6837_s3 + $0x648] sm:$0xff] }
 0x15e   : > { %v2259_v59 = vrot.slane %v2258_v27, 2  ;;  %v2265_v26 = vadd.f32 %v2264_v13, %v2263_v5  ;;  %2667 = vmatprep.subr.mxu1 %v5563_v22  ;;  %v5575_v13 = vld [vmem:[%s6837_s3 + $0x688] sm:$0xff]  ;;  %v5580_v5 = vld [vmem:[%s6837_s3 + $0x680] sm:$0xff]  ;;  %7015 = vst [vmem:[#allocation44_spill] sm:$0xff] %v5597_v60 }
 0x15f   : > { %2668 = vmatpush2.msra.mxu1 %v5569_v18  ;;  %7011 = vst [vmem:[#allocation40_spill] sm:$0xff] %v5575_v13  ;;  %7012 = vst [vmem:[#allocation41_spill] sm:$0xff] %v5580_v5  ;;  %v5585_v22 = vld [vmem:[%s6837_s3 + $0x668] sm:$0xff] }
 0x160   : > { %v2260_v63 = vadd.f32 %v2259_v59, %v2258_v27  ;;  %v2266_v15 = vrot.slane %v2265_v26, 2  ;;  %7013 = vst [vmem:[#allocation42_spill] sm:$0xff] %v5585_v22  ;;  %2669 = vmatprep.subr.mxu1 %v5575_v13  ;;  %v5591_v59 = vld [vmem:[%s6837_s3 + $0x660] sm:$0xff] }
 0x161   : > { %7014 = vst [vmem:[#allocation43_spill] sm:$0xff] %v5591_v59  ;;  %2670 = vmatpush2.msra.mxu1 %v5580_v5  ;;  %v5603_v13 = vld [vmem:[%s6837_s3 + $0x640] sm:$0xff] }
 0x162   : > { %v2267_v27 = vadd.f32 %v2266_v15, %v2265_v26  ;;  %v2261_v18 = vrot.slane %v2260_v63, 1  ;;  %2671 = vmatprep.subr.mxu1 %v5585_v22  ;;  %v5609_v26 = vld [vmem:[%s6837_s3 + $0x628] sm:$0xff]  ;;  %v5615_v22 = vld [vmem:[%s6837_s3 + $0x620] sm:$0xff] }
 0x163   : > { %2672 = vmatpush2.msra.mxu1 %v5591_v59  ;;  %v5621_v59 = vld [vmem:[%s6837_s3 + $0x608] sm:$0xff] }
 0x164   : > { %v2268_v11 = vrot.slane %v2267_v27, 1  ;;  %v2262_v15 = vadd.f32 %v2261_v18, %v2260_v63  ;;  %2673 = vmatprep.subr.mxu1 %v5597_v60  ;;  %7016 = vst [vmem:[#allocation45_spill] sm:$0xff] %v5621_v59  ;;  %v5627_v63 = vld [vmem:[%s6837_s3 + $0x600] sm:$0xff] }
 0x165   : > { %2674 = vmatpush2.msra.mxu1 %v5603_v13  ;;  %7017 = vst [vmem:[#allocation46_spill] sm:$0xff] %v5627_v63 }
 0x166   : > { %v2269_v5 = vadd.f32 %v2268_v11, %v2267_v27  ;;  %2675 = vmatprep.subr.mxu1 %v5609_v26  ;;  %v5630_v60 = vmul.f32 0.015625, %v2262_v15  ;;  %v5635_v11 = vld [vmem:[%s6837_s3 + $0x1f0] sm:$0xff]  ;;  %v5641_v27 = vld [vmem:[%s6837_s3 + $0x1d8] sm:$0xff] }
 0x167   : > { %2676 = vmatpush2.msra.mxu1 %v5615_v22  ;;  %7018 = vst [vmem:[#allocation47_spill] sm:$0xff] %v5641_v27  ;;  %v5653_v15 = vld [vmem:[%s6837_s3 + $0x1d0] sm:$0xff] }
 0x168   : > { %v2285_v18 = vmul.f32 0.015625, %v2269_v5  ;;  %2677 = vmatprep.subr.mxu1 %v5621_v59  ;;  %v5647_v5 = vld [vmem:[%s6837_s3 + $0x5f8] sm:$0xff]  ;;  %7020 = vst [vmem:[#allocation49_spill] sm:$0xff] %v5653_v15  ;;  %v5666_v59 = vld [vmem:[%s6837_s3 + $0x1b0] sm:$0xff] }
 0x169   : > { %2678 = vmatpush2.msra.mxu1 %v5627_v63  ;;  %7019 = vst [vmem:[#allocation48_spill] sm:$0xff] %v5647_v5  ;;  %v5660_v63 = vld [vmem:[%s6837_s3 + $0x1b8] sm:$0xff]  ;;  %7022 = vst [vmem:[#allocation51_spill] sm:$0xff] %v5666_v59 }
 0x16a   : > { %2608 = vmatprep.mubr.f32.mxu0 %v2285_v18  ;;  %2757 = vmatprep.subr.mxu1 %v5647_v5  ;;  %7021 = vst [vmem:[#allocation50_spill] sm:$0xff] %v5660_v63  ;;  %v5672_v5 = vld [vmem:[%s6837_s3 + $0x198] sm:$0xff] }
 0x16b   : > { %2609 = vmatmul.mubr.f32.vlgmr.msra.gmra.mxu0 %v5630_v60  ;;  %7023 = vst [vmem:[#allocation52_spill] sm:$0xff] %v5672_v5 }
 0x16c   : > { %2687 = vmatpush1.msra.mxu0 %v5635_v11  ;;  %2750 = vmatprep.mubr.f32.mxu0 %v2285_v18  ;;  %v5678_v18 = vld [vmem:[%s6837_s3 + $0x190] sm:$0xff] }
 0x16d   : > { %2688 = vmatprep.subr.mxu0 %v5641_v27  ;;  %7024 = vst [vmem:[#allocation53_spill] sm:$0xff] %v5678_v18  ;;  %v5684_v27 = vld [vmem:[%s6837_s3 + $0x178] sm:$0xff] }
 0x16e   : > { %2689 = vmatpush1.msra.mxu0 %v5653_v15  ;;  %7025 = vst [vmem:[#allocation54_spill] sm:$0xff] %v5684_v27  ;;  %v5690_v15 = vld [vmem:[%s6837_s3 + $0x170] sm:$0xff] }
 0x16f   : > { %2690 = vmatprep.subr.mxu0 %v5660_v63  ;;  %7026 = vst [vmem:[#allocation55_spill] sm:$0xff] %v5690_v15  ;;  %v5696_v63 = vld [vmem:[%s6837_s3 + $0x158] sm:$0xff] }
 0x170   : > { %2691 = vmatpush1.msra.mxu0 %v5666_v59  ;;  %7027 = vst [vmem:[#allocation56_spill] sm:$0xff] %v5696_v63  ;;  %v5702_v59 = vld [vmem:[%s6837_s3 + $0x150] sm:$0xff] }
 0x171   : > { %2692 = vmatprep.subr.mxu0 %v5672_v5  ;;  %7028 = vst [vmem:[#allocation57_spill] sm:$0xff] %v5702_v59  ;;  %v5708_v5 = vld [vmem:[%s6837_s3 + $0x138] sm:$0xff] }
 0x172   : > { %2693 = vmatpush1.msra.mxu0 %v5678_v18  ;;  %7029 = vst [vmem:[#allocation58_spill] sm:$0xff] %v5708_v5  ;;  %v5714_v18 = vld [vmem:[%s6837_s3 + $0x130] sm:$0xff] }
 0x173   : > { %2694 = vmatprep.subr.mxu0 %v5684_v27  ;;  %7030 = vst [vmem:[#allocation59_spill] sm:$0xff] %v5714_v18  ;;  %v5720_v27 = vld [vmem:[%s6837_s3 + $0x118] sm:$0xff] }
 0x174   : > { %2695 = vmatpush1.msra.mxu0 %v5690_v15  ;;  %7031 = vst [vmem:[#allocation60_spill] sm:$0xff] %v5720_v27  ;;  %v5726_v15 = vld [vmem:[%s6837_s3 + $0x110] sm:$0xff] }
 0x175   : > { %2696 = vmatprep.subr.mxu0 %v5696_v63  ;;  %7032 = vst [vmem:[#allocation61_spill] sm:$0xff] %v5726_v15  ;;  %v5732_v63 = vld [vmem:[%s6837_s3 + $0xf8] sm:$0xff] }
 0x176   : > { %2697 = vmatpush1.msra.mxu0 %v5702_v59  ;;  %7033 = vst [vmem:[#allocation62_spill] sm:$0xff] %v5732_v63  ;;  %v5738_v59 = vld [vmem:[%s6837_s3 + $0xf0] sm:$0xff] }
 0x177   : > { %2698 = vmatprep.subr.mxu0 %v5708_v5  ;;  %7034 = vst [vmem:[#allocation63_spill] sm:$0xff] %v5738_v59  ;;  %v5744_v5 = vld [vmem:[%s6837_s3 + $0xd8] sm:$0xff] }
 0x178   : > { %2699 = vmatpush1.msra.mxu0 %v5714_v18  ;;  %7035 = vst [vmem:[#allocation64_spill] sm:$0xff] %v5744_v5  ;;  %v5750_v18 = vld [vmem:[%s6837_s3 + $0xd0] sm:$0xff] }
 0x179   : > { %2700 = vmatprep.subr.mxu0 %v5720_v27  ;;  %7036 = vst [vmem:[#allocation65_spill] sm:$0xff] %v5750_v18  ;;  %v5756_v27 = vld [vmem:[%s6837_s3 + $0xb8] sm:$0xff] }
 0x17a   : > { %2701 = vmatpush1.msra.mxu0 %v5726_v15  ;;  %7037 = vst [vmem:[#allocation66_spill] sm:$0xff] %v5756_v27  ;;  %v5762_v15 = vld [vmem:[%s6837_s3 + $0xb0] sm:$0xff] }
 0x17b   : > { %2702 = vmatprep.subr.mxu0 %v5732_v63  ;;  %7038 = vst [vmem:[#allocation67_spill] sm:$0xff] %v5762_v15  ;;  %v5768_v63 = vld [vmem:[%s6837_s3 + $0x98] sm:$0xff] }
 0x17c   : > { %2703 = vmatpush1.msra.mxu0 %v5738_v59  ;;  %7039 = vst [vmem:[#allocation68_spill] sm:$0xff] %v5768_v63  ;;  %v5774_v59 = vld [vmem:[%s6837_s3 + $0x90] sm:$0xff] }
 0x17d   : > { %2704 = vmatprep.subr.mxu0 %v5744_v5  ;;  %7040 = vst [vmem:[#allocation69_spill] sm:$0xff] %v5774_v59  ;;  %v5780_v5 = vld [vmem:[%s6837_s3 + $0x78] sm:$0xff] }
 0x17e   : > { %2705 = vmatpush1.msra.mxu0 %v5750_v18  ;;  %7041 = vst [vmem:[#allocation70_spill] sm:$0xff] %v5780_v5  ;;  %v5786_v18 = vld [vmem:[%s6837_s3 + $0x70] sm:$0xff] }
 0x17f   : > { %2706 = vmatprep.subr.mxu0 %v5756_v27  ;;  %7042 = vst [vmem:[#allocation71_spill] sm:$0xff] %v5786_v18  ;;  %v5792_v27 = vld [vmem:[%s6837_s3 + $0x58] sm:$0xff] }
 0x180   : > { %2707 = vmatpush1.msra.mxu0 %v5762_v15  ;;  %7043 = vst [vmem:[#allocation72_spill] sm:$0xff] %v5792_v27  ;;  %v5798_v15 = vld [vmem:[%s6837_s3 + $0x50] sm:$0xff] }
 0x181   : > { %2708 = vmatprep.subr.mxu0 %v5768_v63  ;;  %7044 = vst [vmem:[#allocation73_spill] sm:$0xff] %v5798_v15  ;;  %v5804_v63 = vld [vmem:[%s6837_s3 + $0x38] sm:$0xff] }
 0x182   : > { %2709 = vmatpush1.msra.mxu0 %v5774_v59  ;;  %7045 = vst [vmem:[#allocation74_spill] sm:$0xff] %v5804_v63  ;;  %v5810_v59 = vld [vmem:[%s6837_s3 + $0x30] sm:$0xff] }
 0x183   : > { %2710 = vmatprep.subr.mxu0 %v5780_v5  ;;  %7046 = vst [vmem:[#allocation75_spill] sm:$0xff] %v5810_v59  ;;  %v5816_v5 = vld [vmem:[%s6837_s3 + $0x18] sm:$0xff] }
 0x184   : > { %2711 = vmatpush1.msra.mxu0 %v5786_v18  ;;  %7047 = vst [vmem:[#allocation76_spill] sm:$0xff] %v5816_v5  ;;  %v5822_v18 = vld [vmem:[%s6837_s3 + $0x10] sm:$0xff] }
 0x185   : > { %2712 = vmatprep.subr.mxu0 %v5792_v27  ;;  %7048 = vst [vmem:[#allocation77_spill] sm:$0xff] %v5822_v18  ;;  %v5828_v27 = vld [vmem:[%s6837_s3 + $0x3f8] sm:$0xff] }
 0x186   : > { %2713 = vmatpush1.msra.mxu0 %v5798_v15  ;;  %7049 = vst [vmem:[#allocation78_spill] sm:$0xff] %v5828_v27  ;;  %v5834_v15 = vld [vmem:[%s6837_s3 + $0x3f0] sm:$0xff] }
 0x187   : > { %2714 = vmatprep.subr.mxu0 %v5804_v63  ;;  %7050 = vst [vmem:[#allocation79_spill] sm:$0xff] %v5834_v15  ;;  %v5840_v63 = vld [vmem:[%s6837_s3 + $0x3d8] sm:$0xff] }
 0x188   : > { %2715 = vmatpush1.msra.mxu0 %v5810_v59  ;;  %7051 = vst [vmem:[#allocation80_spill] sm:$0xff] %v5840_v63  ;;  %v5846_v59 = vld [vmem:[%s6837_s3 + $0x3d0] sm:$0xff] }
 0x189   : > { %2716 = vmatprep.subr.mxu0 %v5816_v5  ;;  %7052 = vst [vmem:[#allocation81_spill] sm:$0xff] %v5846_v59  ;;  %v5852_v5 = vld [vmem:[%s6837_s3 + $0x3b8] sm:$0xff] }
 0x18a   : > { %2717 = vmatpush1.msra.mxu0 %v5822_v18  ;;  %7053 = vst [vmem:[#allocation82_spill] sm:$0xff] %v5852_v5  ;;  %v5858_v18 = vld [vmem:[%s6837_s3 + $0x3b0] sm:$0xff] }
 0x18b   : > { %2718 = vmatprep.subr.mxu0 %v5828_v27  ;;  %7054 = vst [vmem:[#allocation83_spill] sm:$0xff] %v5858_v18  ;;  %v5864_v27 = vld [vmem:[%s6837_s3 + $0x398] sm:$0xff] }
 0x18c   : > { %2719 = vmatpush2.msra.mxu0 %v5834_v15  ;;  %7055 = vst [vmem:[#allocation84_spill] sm:$0xff] %v5864_v27  ;;  %v5870_v15 = vld [vmem:[%s6837_s3 + $0x390] sm:$0xff] }
 0x18d   : > { %2720 = vmatprep.subr.mxu0 %v5840_v63  ;;  %7056 = vst [vmem:[#allocation85_spill] sm:$0xff] %v5870_v15  ;;  %v5876_v63 = vld [vmem:[%s6837_s3 + $0x378] sm:$0xff] }
 0x18e   : > { %2721 = vmatpush2.msra.mxu0 %v5846_v59  ;;  %7057 = vst [vmem:[#allocation86_spill] sm:$0xff] %v5876_v63  ;;  %v5882_v59 = vld [vmem:[%s6837_s3 + $0x370] sm:$0xff] }
 0x18f   : > { %2722 = vmatprep.subr.mxu0 %v5852_v5  ;;  %7058 = vst [vmem:[#allocation87_spill] sm:$0xff] %v5882_v59  ;;  %v5888_v5 = vld [vmem:[%s6837_s3 + $0x358] sm:$0xff] }
 0x190   : > { %2723 = vmatpush2.msra.mxu0 %v5858_v18  ;;  %7059 = vst [vmem:[#allocation88_spill] sm:$0xff] %v5888_v5  ;;  %v5894_v18 = vld [vmem:[%s6837_s3 + $0x350] sm:$0xff] }
 0x191   : > { %2724 = vmatprep.subr.mxu0 %v5864_v27  ;;  %7060 = vst [vmem:[#allocation89_spill] sm:$0xff] %v5894_v18  ;;  %v5900_v27 = vld [vmem:[%s6837_s3 + $0x338] sm:$0xff] }
 0x192   : > { %2725 = vmatpush2.msra.mxu0 %v5870_v15  ;;  %7061 = vst [vmem:[#allocation90_spill] sm:$0xff] %v5900_v27  ;;  %v5906_v15 = vld [vmem:[%s6837_s3 + $0x330] sm:$0xff] }
 0x193   : > { %2726 = vmatprep.subr.mxu0 %v5876_v63  ;;  %7062 = vst [vmem:[#allocation91_spill] sm:$0xff] %v5906_v15  ;;  %v5912_v63 = vld [vmem:[%s6837_s3 + $0x318] sm:$0xff] }
 0x194   : > { %2727 = vmatpush2.msra.mxu0 %v5882_v59  ;;  %7063 = vst [vmem:[#allocation92_spill] sm:$0xff] %v5912_v63  ;;  %v5918_v59 = vld [vmem:[%s6837_s3 + $0x310] sm:$0xff] }
 0x195   : > { %2728 = vmatprep.subr.mxu0 %v5888_v5  ;;  %7064 = vst [vmem:[#allocation93_spill] sm:$0xff] %v5918_v59  ;;  %v5924_v5 = vld [vmem:[%s6837_s3 + $0x2f8] sm:$0xff] }
 0x196   : > { %2729 = vmatpush2.msra.mxu0 %v5894_v18  ;;  %7065 = vst [vmem:[#allocation94_spill] sm:$0xff] %v5924_v5  ;;  %v5930_v18 = vld [vmem:[%s6837_s3 + $0x2f0] sm:$0xff] }
 0x197   : > { %2730 = vmatprep.subr.mxu0 %v5900_v27  ;;  %7066 = vst [vmem:[#allocation95_spill] sm:$0xff] %v5930_v18  ;;  %v5936_v27 = vld [vmem:[%s6837_s3 + $0x2d8] sm:$0xff] }
 0x198   : > { %2731 = vmatpush2.msra.mxu0 %v5906_v15  ;;  %7067 = vst [vmem:[#allocation96_spill] sm:$0xff] %v5936_v27  ;;  %v5942_v15 = vld [vmem:[%s6837_s3 + $0x2d0] sm:$0xff] }
 0x199   : > { %2732 = vmatprep.subr.mxu0 %v5912_v63  ;;  %7068 = vst [vmem:[#allocation97_spill] sm:$0xff] %v5942_v15  ;;  %v5948_v63 = vld [vmem:[%s6837_s3 + $0x2b8] sm:$0xff] }
 0x19a   : > { %2733 = vmatpush2.msra.mxu0 %v5918_v59  ;;  %7069 = vst [vmem:[#allocation98_spill] sm:$0xff] %v5948_v63  ;;  %v5954_v59 = vld [vmem:[%s6837_s3 + $0x2b0] sm:$0xff] }
 0x19b   : > { %2734 = vmatprep.subr.mxu0 %v5924_v5  ;;  %7070 = vst [vmem:[#allocation99_spill] sm:$0xff] %v5954_v59  ;;  %v5960_v5 = vld [vmem:[%s6837_s3 + $0x298] sm:$0xff] }
 0x19c   : > { %2735 = vmatpush2.msra.mxu0 %v5930_v18  ;;  %7071 = vst [vmem:[#allocation100_spill] sm:$0xff] %v5960_v5  ;;  %v5966_v18 = vld [vmem:[%s6837_s3 + $0x290] sm:$0xff] }
 0x19d   : > { %2736 = vmatprep.subr.mxu0 %v5936_v27  ;;  %7072 = vst [vmem:[#allocation101_spill] sm:$0xff] %v5966_v18  ;;  %v5972_v27 = vld [vmem:[%s6837_s3 + $0x278] sm:$0xff] }
 0x19e   : > { %2737 = vmatpush2.msra.mxu0 %v5942_v15  ;;  %7073 = vst [vmem:[#allocation102_spill] sm:$0xff] %v5972_v27  ;;  %v5978_v15 = vld [vmem:[%s6837_s3 + $0x270] sm:$0xff] }
 0x19f   : > { %2738 = vmatprep.subr.mxu0 %v5948_v63  ;;  %7074 = vst [vmem:[#allocation103_spill] sm:$0xff] %v5978_v15  ;;  %v5984_v63 = vld [vmem:[%s6837_s3 + $0x258] sm:$0xff] }
 0x1a0   : > { %2739 = vmatpush2.msra.mxu0 %v5954_v59  ;;  %v5990_v59 = vld [vmem:[%s6837_s3 + $0x250] sm:$0xff] }
 0x1a1   : > { %2740 = vmatprep.subr.mxu0 %v5960_v5  ;;  %v5996_v5 = vld [vmem:[%s6837_s3 + $0x238] sm:$0xff] }
 0x1a2   : > { %2741 = vmatpush2.msra.mxu0 %v5966_v18  ;;  %v6002_v18 = vld [vmem:[%s6837_s3 + $0x230] sm:$0xff] }
 0x1a3   : > { %2742 = vmatprep.subr.mxu0 %v5972_v27  ;;  %v6008_v27 = vld [vmem:[%s6837_s3 + $0x218] sm:$0xff] }
 0x1a4   : > { %2743 = vmatpush2.msra.mxu0 %v5978_v15  ;;  %v6014_v15 = vld [vmem:[%s6837_s3 + $0x210] sm:$0xff] }
 0x1a5   : > { %2744 = vmatprep.subr.mxu0 %v5984_v63 }
 0x1a6   : > { %2745 = vmatpush2.msra.mxu0 %v5990_v59 }
 0x1a7   : > { %2746 = vmatprep.subr.mxu0 %v5996_v5 }
 0x1a8   : > { %2747 = vmatpush2.msra.mxu0 %v6002_v18 }
 0x1a9   : > { %2748 = vmatprep.subr.mxu0 %v6008_v27 }
 0x1aa   : > { %2749 = vmatpush2.msra.mxu0 %v6014_v15 }
 0x1ab   : > { %2751 = vmatmul.mubr.f32.vlgmr.msra.gmra.mxu0 %v5630_v60  ;;  %2892 = vmatprep.subr.mxu0 %v4941_v28  ;;  %v2061_v28 = vpop.f32.mrf.mxu0  ;;  %v7080_v60 = vld [vmem:[#allocation8_spill] sm:$0xff] }
 0x1ac   : > { %2893 = vmatpush1.msra.mxu0 %v4947_v29  ;;  %v2104_v29 = vpop.f32.mrf.mxu1 }
 0x1ad   : > { %2894 = vmatprep.subr.mxu0 %v4952_v30  ;;  %v2063_v30 = vpop.f32.mrf.mxu0 }
 0x1ae   : > { %2895 = vmatpush1.msra.mxu0 %v4959_v31  ;;  %v2106_v31 = vpop.f32.mrf.mxu1 }
 0x1af   : > { %2896 = vmatprep.subr.mxu0 %v4965_v32  ;;  %v2065_v32 = vpop.f32.mrf.mxu0 }
 0x1b0   : > { %2897 = vmatpush1.msra.mxu0 %v4971_v20  ;;  %v2108_v20 = vpop.f32.mrf.mxu1 }
 0x1b1   : > { %2898 = vmatprep.subr.mxu0 %v4977_v21  ;;  %v2067_v21 = vpop.f32.mrf.mxu0 }
 0x1b2   : > { %2899 = vmatpush1.msra.mxu0 %v4983_v53  ;;  %v2110_v53 = vpop.f32.mrf.mxu1 }
 0x1b3   : > { %2900 = vmatprep.subr.mxu0 %v4989_v55  ;;  %v2105_v55 = vadd.f32 %v2104_v29, %v2061_v28  ;;  %v7081_v28 = vld [vmem:[#allocation9_spill] sm:$0xff] }
 0x1b4   : > { %2901 = vmatpush1.msra.mxu0 %v4995_v8 }
 0x1b5   : > { %2902 = vmatprep.subr.mxu0 %v5001_v9 }
 0x1b6   : > { %2903 = vmatpush1.msra.mxu0 %v5007_v33  ;;  %v2107_v33 = vadd.f32 %v2106_v31, %v2063_v30  ;;  %v7082_v31 = vld [vmem:[#allocation10_spill] sm:$0xff] }
 0x1b7   : > { %2904 = vmatprep.subr.mxu0 %v5013_v34 }
 0x1b8   : > { %2905 = vmatpush1.msra.mxu0 %v5019_v41  ;;  %v2238_v41 = vsub.s32 2, %v5423_v58 }
 0x1b9   : > { %2906 = vmatprep.subr.mxu0 %v5025_v43 }
 0x1ba   : > { %2907 = vmatpush1.msra.mxu0 %v5031_v35 }
 0x1bb   : > { %2908 = vmatprep.subr.mxu0 %v5037_v36  ;;  %v2109_v36 = vadd.f32 %v2108_v20, %v2065_v32  ;;  %v7083_v32 = vld [vmem:[#allocation11_spill] sm:$0xff] }
 0x1bc   : > { %2909 = vmatpush1.msra.mxu0 %v5043_v37 }
 0x1bd   : > { %2910 = vmatprep.subr.mxu0 %v5049_v38  ;;  %v2242_v38 = vsub.s32 3, %v5423_v58 }
 0x1be   : > { %2911 = vmatpush1.msra.mxu0 %v5055_v39 }
 0x1bf   : > { %2912 = vmatprep.subr.mxu0 %v5061_v40 }
 0x1c0   : > { %2913 = vmatpush1.msra.mxu0 %v5067_v42  ;;  %v2111_v42 = vadd.f32 %v2110_v53, %v2067_v21  ;;  %v7084_v53 = vld [vmem:[#allocation12_spill] sm:$0xff] }
 0x1c1   : > { %2914 = vmatprep.subr.mxu0 %v5073_v44 }
 0x1c2   : > { %2915 = vmatpush1.msra.mxu0 %v5079_v45  ;;  %v2239_v45 = vrot.slane %v5451_v19, %v2238_v41 }
 0x1c3   : > { %2916 = vmatprep.subr.mxu0 %v5085_v46 }
 0x1c4   : > { %2917 = vmatpush1.msra.mxu0 %v5091_v47 }
 0x1c5   : > { %2918 = vmatprep.subr.mxu0 %v5097_v48 }
 0x1c6   : > { %2919 = vmatpush1.msra.mxu0 %v5103_v49  ;;  %v2243_v49 = vrot.slane %v5451_v19, %v2242_v38  ;;  %v7090_v38 = vld [vmem:[#allocation18_spill] sm:$0xff] }
 0x1c7   : > { %2920 = vmatprep.subr.mxu0 %v5109_v50 }
 0x1c8   : > { %2921 = vmatpush1.msra.mxu0 %v5115_v51 }
 0x1c9   : > { %2922 = vmatprep.subr.mxu0 %v5121_v52 }
 0x1ca   : > { %2923 = vmatpush1.msra.mxu0 %v5127_v54  ;;  %v7075_v54 = vld [vmem:[#allocation3_spill] sm:$0xff] }
 0x1cb   : > { %2924 = vmatprep.subr.mxu0 %v5133_v56 }
 0x1cc   : > { %2925 = vmatpush2.msra.mxu0 %v5138_v57 }
 0x1cd   : > { %v2147_v8 = vpop.f32.mrf.mxu0  ;;  %2926 = vmatprep.subr.mxu0 %v5157_v62 }
 0x1ce   : > { %v2190_v9 = vpop.f32.mrf.mxu1  ;;  %v2148_v34 = vadd.f32 %v2147_v8, %v2105_v55  ;;  %2927 = vmatpush2.msra.mxu0 %v5166_v0  ;;  %v7076_v0 = vld [vmem:[#allocation4_spill] sm:$0xff]  ;;  %v7085_v55 = vld [vmem:[#allocation13_spill] sm:$0xff] }
 0x1cf   : > { %v2149_v43 = vpop.f32.mrf.mxu0  ;;  %2928 = vmatprep.subr.mxu0 %v5175_v2  ;;  %v7077_v2 = vld [vmem:[#allocation5_spill] sm:$0xff] }
 0x1d0   : > { %v2192_v35 = vpop.f32.mrf.mxu1  ;;  %v2150_v37 = vadd.f32 %v2149_v43, %v2107_v33  ;;  %2929 = vmatpush2.msra.mxu0 %v5184_v4  ;;  %v2191_v44 = vadd.f32 %v2190_v9, %v2148_v34  ;;  %v7086_v33 = vld [vmem:[#allocation14_spill] sm:$0xff]  ;;  %v7087_v34 = vld [vmem:[#allocation15_spill] sm:$0xff] }
 0x1d1   : > { %v2151_v39 = vpop.f32.mrf.mxu0  ;;  %2930 = vmatprep.subr.mxu0 %v5193_v6 }
 0x1d2   : > { %v2194_v40 = vpop.f32.mrf.mxu1  ;;  %v2152_v46 = vadd.f32 %v2151_v39, %v2109_v36  ;;  %2931 = vmatpush2.msra.mxu0 %v5202_v10  ;;  %v2193_v48 = vadd.f32 %v2192_v35, %v2150_v37  ;;  %v6067_v56 = vadd.f32 %v2239_v45, %v2191_v44  ;;  %v7088_v35 = vld [vmem:[#allocation16_spill] sm:$0xff]  ;;  %v7089_v36 = vld [vmem:[#allocation17_spill] sm:$0xff] }
 0x1d3   : > { %v2153_v47 = vpop.f32.mrf.mxu0  ;;  %2932 = vmatprep.subr.mxu0 %v5211_v12  ;;  %v7078_v12 = vld [vmem:[#allocation6_spill] sm:$0xff]  ;;  %v7092_v44 = vld [vmem:[#allocation20_spill] sm:$0xff] }
 0x1d4   : > { %v2195_v50 = vadd.f32 %v2194_v40, %v2152_v46  ;;  %v2154_v51 = vadd.f32 %v2153_v47, %v2111_v42  ;;  %2933 = vmatpush2.msra.mxu0 %v5220_v14  ;;  %v2196_v52 = vpop.f32.mrf.mxu1  ;;  %v6073_v4 = vadd.f32 %v2243_v49, %v2193_v48  ;;  %v7079_v14 = vld [vmem:[#allocation7_spill] sm:$0xff]  ;;  %v7094_v47 = vld [vmem:[#allocation22_spill] sm:$0xff] }
 0x1d5   : > { %2934 = vmatprep.subr.mxu0 %v7075_v54  ;;  %v7091_v40 = vld [vmem:[#allocation19_spill] sm:$0xff]  ;;  %v7096_v54 = vld [vmem:[#allocation24_spill] sm:$0xff] }
 0x1d6   : > { %v6069_v57 = vadd.f32 %v2239_v45, %v2195_v50  ;;  %v2197_v62 = vadd.f32 %v2196_v52, %v2154_v51  ;;  %2935 = vmatpush2.msra.mxu0 %v7076_v0  ;;  %v7093_v45 = vld [vmem:[#allocation21_spill] sm:$0xff]  ;;  %v6109_v50 = vld [vmem:[%s6837_s3 + $0x5d8] sm:$0xff]  ;;  %v7095_v51 = vld [vmem:[#allocation23_spill] sm:$0xff] }
 0x1d7   : > { %2936 = vmatprep.subr.mxu0 %v7077_v2  ;;  %v6116_v52 = vld [vmem:[%s6837_s3 + $0x5d0] sm:$0xff]  ;;  %v6135_v0 = vld [vmem:[%s6837_s3 + $0x598] sm:$0xff] }
 0x1d8   : > { %v2270_v6 = vadd.f32 %v6069_v57, %v6067_v56  ;;  %v6077_v10 = vadd.f32 %v2243_v49, %v2197_v62  ;;  %2937 = vmatpush2.msra.mxu0 %v7078_v12  ;;  %v6103_v49 = vld [vmem:[%s6837_s3 + $0x5f0] sm:$0xff] }
 0x1d9   : > { %2938 = vmatprep.subr.mxu0 %v7079_v14  ;;  %v6129_v62 = vld [vmem:[%s6837_s3 + $0x5b0] sm:$0xff]  ;;  %v6159_v14 = vld [vmem:[%s6837_s3 + $0x558] sm:$0xff] }
 0x1da   : > { %v2271_v58 = vrot.slane %v2270_v6, 4  ;;  %v2277_v19 = vadd.f32 %v6077_v10, %v6073_v4  ;;  %2939 = vmatpush2.msra.mxu0 %v7080_v60  ;;  %v6141_v2 = vld [vmem:[%s6837_s3 + $0x590] sm:$0xff] }
 0x1db   : > { %2940 = vmatprep.subr.mxu0 %v7081_v28  ;;  %v6153_v12 = vld [vmem:[%s6837_s3 + $0x570] sm:$0xff]  ;;  %v6183_v28 = vld [vmem:[%s6837_s3 + $0x518] sm:$0xff] }
 0x1dc   : > { %v2272_v29 = vadd.f32 %v2271_v58, %v2270_v6  ;;  %v2278_v30 = vrot.slane %v2277_v19, 4  ;;  %2941 = vmatpush2.msra.mxu0 %v7082_v31  ;;  %v6147_v6 = vld [vmem:[%s6837_s3 + $0x578] sm:$0xff]  ;;  %v6165_v58 = vld [vmem:[%s6837_s3 + $0x550] sm:$0xff] }
 0x1dd   : > { %2942 = vmatprep.subr.mxu0 %v7083_v32  ;;  %v6177_v60 = vld [vmem:[%s6837_s3 + $0x530] sm:$0xff]  ;;  %v6207_v32 = vld [vmem:[%s6837_s3 + $0x4d8] sm:$0xff] }
 0x1de   : > { %v2273_v20 = vrot.slane %v2272_v29, 2  ;;  %v2279_v21 = vadd.f32 %v2278_v30, %v2277_v19  ;;  %2943 = vmatpush2.msra.mxu0 %v7084_v53  ;;  %v6171_v19 = vld [vmem:[%s6837_s3 + $0x538] sm:$0xff]  ;;  %v6201_v31 = vld [vmem:[%s6837_s3 + $0x4f0] sm:$0xff] }
 0x1df   : > { %2944 = vmatprep.subr.mxu0 %v7085_v55  ;;  %v6195_v30 = vld [vmem:[%s6837_s3 + $0x4f8] sm:$0xff]  ;;  %v6225_v53 = vld [vmem:[%s6837_s3 + $0x4b0] sm:$0xff] }
 0x1e0   : > { %v2274_v8 = vadd.f32 %v2273_v20, %v2272_v29  ;;  %v2280_v9 = vrot.slane %v2279_v21, 2  ;;  %2945 = vmatpush2.msra.mxu0 %v7086_v33  ;;  %v6189_v29 = vld [vmem:[%s6837_s3 + $0x510] sm:$0xff]  ;;  %v6231_v55 = vld [vmem:[%s6837_s3 + $0x498] sm:$0xff] }
 0x1e1   : > { %2946 = vmatprep.subr.mxu0 %v7087_v34  ;;  %v6213_v20 = vld [vmem:[%s6837_s3 + $0x4d0] sm:$0xff]  ;;  %v6255_v34 = vld [vmem:[%s6837_s3 + $0x458] sm:$0xff] }
 0x1e2   : > { %v2281_v41 = vadd.f32 %v2280_v9, %v2279_v21  ;;  %v2275_v43 = vrot.slane %v2274_v8, 1  ;;  %2947 = vmatpush2.msra.mxu0 %v7088_v35  ;;  %v6219_v21 = vld [vmem:[%s6837_s3 + $0x4b8] sm:$0xff]  ;;  %v6249_v33 = vld [vmem:[%s6837_s3 + $0x470] sm:$0xff] }
 0x1e3   : > { %2948 = vmatprep.subr.mxu0 %v7089_v36  ;;  %v6243_v9 = vld [vmem:[%s6837_s3 + $0x478] sm:$0xff]  ;;  %v6273_v35 = vld [vmem:[%s6837_s3 + $0x430] sm:$0xff] }
 0x1e4   : > { %v2282_v37 = vrot.slane %v2281_v41, 1  ;;  %2949 = vmatpush2.msra.mxu0 %v7090_v38  ;;  %v2276_v39 = vadd.f32 %v2275_v43, %v2274_v8  ;;  %v6237_v8 = vld [vmem:[%s6837_s3 + $0x490] sm:$0xff]  ;;  %v6267_v43 = vld [vmem:[%s6837_s3 + $0x438] sm:$0xff] }
 0x1e5   : > { %2950 = vmatprep.subr.mxu0 %v7091_v40  ;;  %v6279_v36 = vld [vmem:[%s6837_s3 + $0x418] sm:$0xff] }
 0x1e6   : > { %v2283_v42 = vadd.f32 %v2282_v37, %v2281_v41  ;;  %2951 = vmatpush2.msra.mxu0 %v7092_v44  ;;  %v6098_v48 = vmul.f32 0.015625, %v2276_v39  ;;  %v6261_v41 = vld [vmem:[%s6837_s3 + $0x450] sm:$0xff]  ;;  %v6291_v38 = vld [vmem:[%s6837_s3 + $0x7f8] sm:$0xff] }
 0x1e7   : > { %2952 = vmatprep.subr.mxu0 %v7093_v45  ;;  %v6285_v37 = vld [vmem:[%s6837_s3 + $0x410] sm:$0xff]  ;;  %v6303_v40 = vld [vmem:[%s6837_s3 + $0x7d8] sm:$0xff] }
 0x1e8   : > { %v2287_v46 = vmul.f32 0.015625, %v2283_v42  ;;  %2953 = vmatpush2.msra.mxu0 %v7094_v47  ;;  %v6297_v39 = vld [vmem:[%s6837_s3 + $0x7f0] sm:$0xff]  ;;  %7098 = vst [vmem:[#allocation4_spill] sm:$0xff] %v6303_v40  ;;  %v6315_v44 = vld [vmem:[%s6837_s3 + $0x7b8] sm:$0xff] }
 0x1e9   : > { %2954 = vmatprep.subr.mxu0 %v5409_v23  ;;  %v6123_v23 = vld [vmem:[%s6837_s3 + $0x5b8] sm:$0xff]  ;;  %7097 = vst [vmem:[#allocation3_spill] sm:$0xff] %v6297_v39  ;;  %v6309_v42 = vld [vmem:[%s6837_s3 + $0x7d0] sm:$0xff]  ;;  %7100 = vst [vmem:[#allocation6_spill] sm:$0xff] %v6315_v44 }
 0x1ea   : > { %2679 = vmatprep.mubr.f32.mxu1 %v2287_v46  ;;  %2955 = vmatpush2.msra.mxu0 %v7095_v51  ;;  %7099 = vst [vmem:[#allocation5_spill] sm:$0xff] %v6309_v42  ;;  %v6321_v45 = vld [vmem:[%s6837_s3 + $0x7b0] sm:$0xff]  ;;  %v6339_v51 = vld [vmem:[%s6837_s3 + $0x778] sm:$0xff] }
 0x1eb   : > { %2680 = vmatmul.mubr.f32.vlgmr.msra.gmra.mxu1 %v6098_v48  ;;  %3034 = vmatprep.subr.mxu0 %v7096_v54  ;;  %7101 = vst [vmem:[#allocation7_spill] sm:$0xff] %v6321_v45  ;;  %v6333_v47 = vld [vmem:[%s6837_s3 + $0x790] sm:$0xff]  ;;  %7104 = vst [vmem:[#allocation10_spill] sm:$0xff] %v6339_v51 }
 0x1ec   : > { %2758 = vmatpush1.msra.mxu1 %v6103_v49  ;;  %2821 = vmatprep.mubr.f32.mxu1 %v2287_v46  ;;  %v6327_v46 = vld [vmem:[%s6837_s3 + $0x798] sm:$0xff]  ;;  %7103 = vst [vmem:[#allocation9_spill] sm:$0xff] %v6333_v47  ;;  %v6345_v54 = vld [vmem:[%s6837_s3 + $0x770] sm:$0xff] }
 0x1ed   : > { %2759 = vmatprep.subr.mxu1 %v6109_v50  ;;  %7102 = vst [vmem:[#allocation8_spill] sm:$0xff] %v6327_v46  ;;  %7105 = vst [vmem:[#allocation11_spill] sm:$0xff] %v6345_v54 }
 0x1ee   : > { %2760 = vmatpush1.msra.mxu1 %v6116_v52 }
 0x1ef   : > { %2761 = vmatprep.subr.mxu1 %v6123_v23 }
 0x1f0   : > { %2762 = vmatpush1.msra.mxu1 %v6129_v62 }
 0x1f1   : > { %2763 = vmatprep.subr.mxu1 %v6135_v0 }
 0x1f2   : > { %2764 = vmatpush1.msra.mxu1 %v6141_v2 }
 0x1f3   : > { %2765 = vmatprep.subr.mxu1 %v6147_v6 }
 0x1f4   : > { %2766 = vmatpush1.msra.mxu1 %v6153_v12 }
 0x1f5   : > { %2767 = vmatprep.subr.mxu1 %v6159_v14 }
 0x1f6   : > { %2768 = vmatpush1.msra.mxu1 %v6165_v58 }
 0x1f7   : > { %2769 = vmatprep.subr.mxu1 %v6171_v19 }
 0x1f8   : > { %2770 = vmatpush1.msra.mxu1 %v6177_v60 }
 0x1f9   : > { %2771 = vmatprep.subr.mxu1 %v6183_v28 }
 0x1fa   : > { %2772 = vmatpush1.msra.mxu1 %v6189_v29 }
 0x1fb   : > { %2773 = vmatprep.subr.mxu1 %v6195_v30 }
 0x1fc   : > { %2774 = vmatpush1.msra.mxu1 %v6201_v31 }
 0x1fd   : > { %2775 = vmatprep.subr.mxu1 %v6207_v32 }
 0x1fe   : > { %2776 = vmatpush1.msra.mxu1 %v6213_v20 }
 0x1ff   : > { %2777 = vmatprep.subr.mxu1 %v6219_v21 }
 0x200   : > { %2778 = vmatpush1.msra.mxu1 %v6225_v53 }
 0x201   : > { %2779 = vmatprep.subr.mxu1 %v6231_v55 }
 0x202   : > { %2780 = vmatpush1.msra.mxu1 %v6237_v8 }
 0x203   : > { %2781 = vmatprep.subr.mxu1 %v6243_v9 }
 0x204   : > { %2782 = vmatpush1.msra.mxu1 %v6249_v33 }
 0x205   : > { %2783 = vmatprep.subr.mxu1 %v6255_v34 }
 0x206   : > { %2784 = vmatpush1.msra.mxu1 %v6261_v41 }
 0x207   : > { %2785 = vmatprep.subr.mxu1 %v6267_v43 }
 0x208   : > { %2786 = vmatpush1.msra.mxu1 %v6273_v35 }
 0x209   : > { %2787 = vmatprep.subr.mxu1 %v6279_v36 }
 0x20a   : > { %2788 = vmatpush1.msra.mxu1 %v6285_v37 }
 0x20b   : > { %2789 = vmatprep.subr.mxu1 %v6291_v38 }
 0x20c   : > { %2790 = vmatpush2.msra.mxu1 %v6297_v39 }
 0x20d   : > { %2791 = vmatprep.subr.mxu1 %v6303_v40 }
 0x20e   : > { %2792 = vmatpush2.msra.mxu1 %v6309_v42 }
 0x20f   : > { %2793 = vmatprep.subr.mxu1 %v6315_v44  ;;  %v6351_v44 = vld [vmem:[%s6837_s3 + $0x758] sm:$0xff] }
 0x210   : > { %2794 = vmatpush2.msra.mxu1 %v6321_v45  ;;  %7106 = vst [vmem:[#allocation12_spill] sm:$0xff] %v6351_v44  ;;  %v6357_v45 = vld [vmem:[%s6837_s3 + $0x750] sm:$0xff] }
 0x211   : > { %2795 = vmatprep.subr.mxu1 %v6327_v46  ;;  %7107 = vst [vmem:[#allocation13_spill] sm:$0xff] %v6357_v45  ;;  %v6363_v46 = vld [vmem:[%s6837_s3 + $0x738] sm:$0xff] }
 0x212   : > { %2796 = vmatpush2.msra.mxu1 %v6333_v47  ;;  %7108 = vst [vmem:[#allocation14_spill] sm:$0xff] %v6363_v46  ;;  %v6369_v47 = vld [vmem:[%s6837_s3 + $0x730] sm:$0xff] }
 0x213   : > { %2797 = vmatprep.subr.mxu1 %v6339_v51  ;;  %7109 = vst [vmem:[#allocation15_spill] sm:$0xff] %v6369_v47  ;;  %v6375_v51 = vld [vmem:[%s6837_s3 + $0x718] sm:$0xff] }
 0x214   : > { %2798 = vmatpush2.msra.mxu1 %v6345_v54  ;;  %7110 = vst [vmem:[#allocation16_spill] sm:$0xff] %v6375_v51  ;;  %v6381_v54 = vld [vmem:[%s6837_s3 + $0x710] sm:$0xff] }
 0x215   : > { %2799 = vmatprep.subr.mxu1 %v6351_v44  ;;  %7111 = vst [vmem:[#allocation17_spill] sm:$0xff] %v6381_v54  ;;  %v6387_v44 = vld [vmem:[%s6837_s3 + $0x6f8] sm:$0xff] }
 0x216   : > { %2800 = vmatpush2.msra.mxu1 %v6357_v45  ;;  %7112 = vst [vmem:[#allocation18_spill] sm:$0xff] %v6387_v44  ;;  %v6393_v45 = vld [vmem:[%s6837_s3 + $0x6f0] sm:$0xff] }
 0x217   : > { %2801 = vmatprep.subr.mxu1 %v6363_v46  ;;  %7113 = vst [vmem:[#allocation19_spill] sm:$0xff] %v6393_v45  ;;  %v6399_v46 = vld [vmem:[%s6837_s3 + $0x6d8] sm:$0xff] }
 0x218   : > { %2802 = vmatpush2.msra.mxu1 %v6369_v47  ;;  %7114 = vst [vmem:[#allocation20_spill] sm:$0xff] %v6399_v46  ;;  %v6405_v47 = vld [vmem:[%s6837_s3 + $0x6d0] sm:$0xff] }
 0x219   : > { %2803 = vmatprep.subr.mxu1 %v6375_v51  ;;  %7115 = vst [vmem:[#allocation21_spill] sm:$0xff] %v6405_v47  ;;  %v6411_v51 = vld [vmem:[%s6837_s3 + $0x6b8] sm:$0xff] }
 0x21a   : > { %2804 = vmatpush2.msra.mxu1 %v6381_v54  ;;  %7116 = vst [vmem:[#allocation22_spill] sm:$0xff] %v6411_v51  ;;  %v6417_v54 = vld [vmem:[%s6837_s3 + $0x6b0] sm:$0xff] }
 0x21b   : > { %2805 = vmatprep.subr.mxu1 %v6387_v44  ;;  %7117 = vst [vmem:[#allocation23_spill] sm:$0xff] %v6417_v54  ;;  %v6423_v44 = vld [vmem:[%s6837_s3 + $0x698] sm:$0xff] }
 0x21c   : > { %2806 = vmatpush2.msra.mxu1 %v6393_v45  ;;  %7118 = vst [vmem:[#allocation24_spill] sm:$0xff] %v6423_v44  ;;  %v6429_v45 = vld [vmem:[%s6837_s3 + $0x690] sm:$0xff] }
 0x21d   : > { %2807 = vmatprep.subr.mxu1 %v6399_v46  ;;  %7119 = vst [vmem:[#allocation104_spill] sm:$0xff] %v6429_v45  ;;  %v6435_v46 = vld [vmem:[%s6837_s3 + $0x678] sm:$0xff] }
 0x21e   : > { %2808 = vmatpush2.msra.mxu1 %v6405_v47  ;;  %7120 = vst [vmem:[#allocation105_spill] sm:$0xff] %v6435_v46  ;;  %v6441_v47 = vld [vmem:[%s6837_s3 + $0x670] sm:$0xff] }
 0x21f   : > { %2809 = vmatprep.subr.mxu1 %v6411_v51  ;;  %7121 = vst [vmem:[#allocation106_spill] sm:$0xff] %v6441_v47  ;;  %v6447_v51 = vld [vmem:[%s6837_s3 + $0x658] sm:$0xff] }
 0x220   : > { %2810 = vmatpush2.msra.mxu1 %v6417_v54  ;;  %7122 = vst [vmem:[#allocation107_spill] sm:$0xff] %v6447_v51  ;;  %v6453_v54 = vld [vmem:[%s6837_s3 + $0x650] sm:$0xff] }
 0x221   : > { %2811 = vmatprep.subr.mxu1 %v6423_v44  ;;  %7123 = vst [vmem:[#allocation108_spill] sm:$0xff] %v6453_v54  ;;  %v6459_v44 = vld [vmem:[%s6837_s3 + $0x638] sm:$0xff] }
 0x222   : > { %2812 = vmatpush2.msra.mxu1 %v6429_v45  ;;  %7124 = vst [vmem:[#allocation109_spill] sm:$0xff] %v6459_v44  ;;  %v6465_v45 = vld [vmem:[%s6837_s3 + $0x630] sm:$0xff] }
 0x223   : > { %2813 = vmatprep.subr.mxu1 %v6435_v46  ;;  %7125 = vst [vmem:[#allocation110_spill] sm:$0xff] %v6465_v45  ;;  %v6471_v46 = vld [vmem:[%s6837_s3 + $0x618] sm:$0xff] }
 0x224   : > { %2814 = vmatpush2.msra.mxu1 %v6441_v47  ;;  %7126 = vst [vmem:[#allocation111_spill] sm:$0xff] %v6471_v46  ;;  %v6477_v47 = vld [vmem:[%s6837_s3 + $0x610] sm:$0xff] }
 0x225   : > { %2815 = vmatprep.subr.mxu1 %v6447_v51  ;;  %7127 = vst [vmem:[#allocation112_spill] sm:$0xff] %v6477_v47 }
 0x226   : > { %2816 = vmatpush2.msra.mxu1 %v6453_v54  ;;  %v3999_v54 = vld [vmem:[%s6837_s3 + $0x5e8] sm:$0xff] }
 0x227   : > { %2817 = vmatprep.subr.mxu1 %v6459_v44  ;;  %v4000_v44 = vld [vmem:[%s6837_s3 + $0x5e0] sm:$0xff] }
 0x228   : > { %2818 = vmatpush2.msra.mxu1 %v6465_v45  ;;  %v4001_v45 = vld [vmem:[%s6837_s3 + $0x5c8] sm:$0xff] }
 0x229   : > { %2819 = vmatprep.subr.mxu1 %v6471_v46  ;;  %v7129_v46 = vld [vmem:[#allocation27_spill] sm:$0xff] }
 0x22a   : > { %2820 = vmatpush2.msra.mxu1 %v6477_v47  ;;  %v4002_v47 = vld [vmem:[%s6837_s3 + $0x5c0] sm:$0xff] }
 0x22b   : > { %2822 = vmatmul.mubr.f32.vlgmr.msra.gmra.mxu1 %v6098_v48  ;;  %2963 = vmatprep.subr.mxu1 %v3999_v54  ;;  %v4003_v48 = vld [vmem:[%s6837_s3 + $0x5a8] sm:$0xff]  ;;  %v4004_v54 = vld [vmem:[%s6837_s3 + $0x5a0] sm:$0xff] }
 0x22c   : > { %2964 = vmatpush1.msra.mxu1 %v4000_v44  ;;  %v4005_v44 = vld [vmem:[%s6837_s3 + $0x588] sm:$0xff] }
 0x22d   : > { %2965 = vmatprep.subr.mxu1 %v4001_v45  ;;  %v4006_v45 = vld [vmem:[%s6837_s3 + $0x580] sm:$0xff] }
 0x22e   : > { %2966 = vmatpush1.msra.mxu1 %v4002_v47  ;;  %v4007_v47 = vld [vmem:[%s6837_s3 + $0x568] sm:$0xff] }
 0x22f   : > { %2967 = vmatprep.subr.mxu1 %v4003_v48  ;;  %v4008_v48 = vld [vmem:[%s6837_s3 + $0x560] sm:$0xff] }
 0x230   : > { %2968 = vmatpush1.msra.mxu1 %v4004_v54  ;;  %v4009_v54 = vld [vmem:[%s6837_s3 + $0x548] sm:$0xff] }
 0x231   : > { %2969 = vmatprep.subr.mxu1 %v4005_v44  ;;  %v4010_v44 = vld [vmem:[%s6837_s3 + $0x540] sm:$0xff] }
 0x232   : > { %2970 = vmatpush1.msra.mxu1 %v4006_v45  ;;  %v4011_v45 = vld [vmem:[%s6837_s3 + $0x528] sm:$0xff] }
 0x233   : > { %2971 = vmatprep.subr.mxu1 %v4007_v47  ;;  %v4012_v47 = vld [vmem:[%s6837_s3 + $0x520] sm:$0xff] }
 0x234   : > { %2972 = vmatpush1.msra.mxu1 %v4008_v48  ;;  %v4013_v48 = vld [vmem:[%s6837_s3 + $0x508] sm:$0xff] }
 0x235   : > { %2973 = vmatprep.subr.mxu1 %v4009_v54  ;;  %v4014_v54 = vld [vmem:[%s6837_s3 + $0x500] sm:$0xff] }
 0x236   : > { %2974 = vmatpush1.msra.mxu1 %v4010_v44  ;;  %v4015_v44 = vld [vmem:[%s6837_s3 + $0x4e8] sm:$0xff] }
 0x237   : > { %2975 = vmatprep.subr.mxu1 %v4011_v45  ;;  %v4016_v45 = vld [vmem:[%s6837_s3 + $0x4e0] sm:$0xff] }
 0x238   : > { %2976 = vmatpush1.msra.mxu1 %v4012_v47  ;;  %v4017_v47 = vld [vmem:[%s6837_s3 + $0x4c8] sm:$0xff] }
 0x239   : > { %2977 = vmatprep.subr.mxu1 %v4013_v48  ;;  %v4018_v48 = vld [vmem:[%s6837_s3 + $0x4c0] sm:$0xff] }
 0x23a   : > { %2978 = vmatpush1.msra.mxu1 %v4014_v54  ;;  %v4019_v54 = vld [vmem:[%s6837_s3 + $0x4a8] sm:$0xff] }
 0x23b   : > { %2979 = vmatprep.subr.mxu1 %v4015_v44  ;;  %v4020_v44 = vld [vmem:[%s6837_s3 + $0x4a0] sm:$0xff] }
 0x23c   : > { %2980 = vmatpush1.msra.mxu1 %v4016_v45  ;;  %v4021_v45 = vld [vmem:[%s6837_s3 + $0x488] sm:$0xff] }
 0x23d   : > { %2981 = vmatprep.subr.mxu1 %v4017_v47  ;;  %v4022_v47 = vld [vmem:[%s6837_s3 + $0x480] sm:$0xff] }
 0x23e   : > { %2982 = vmatpush1.msra.mxu1 %v4018_v48  ;;  %v4023_v48 = vld [vmem:[%s6837_s3 + $0x468] sm:$0xff] }
 0x23f   : > { %2983 = vmatprep.subr.mxu1 %v4019_v54  ;;  %v4024_v54 = vld [vmem:[%s6837_s3 + $0x460] sm:$0xff] }
 0x240   : > { %2984 = vmatpush1.msra.mxu1 %v4020_v44  ;;  %v4025_v44 = vld [vmem:[%s6837_s3 + $0x448] sm:$0xff] }
 0x241   : > { %2985 = vmatprep.subr.mxu1 %v4021_v45  ;;  %v4026_v45 = vld [vmem:[%s6837_s3 + $0x440] sm:$0xff] }
 0x242   : > { %2986 = vmatpush1.msra.mxu1 %v4022_v47  ;;  %v4027_v47 = vld [vmem:[%s6837_s3 + $0x428] sm:$0xff] }
 0x243   : > { %2987 = vmatprep.subr.mxu1 %v4023_v48  ;;  %v4028_v48 = vld [vmem:[%s6837_s3 + $0x420] sm:$0xff] }
 0x244   : > { %2988 = vmatpush1.msra.mxu1 %v4024_v54  ;;  %v4029_v54 = vld [vmem:[%s6837_s3 + $0x408] sm:$0xff] }
 0x245   : > { %2989 = vmatprep.subr.mxu1 %v4025_v44  ;;  %v4030_v44 = vld [vmem:[%s6837_s3 + $0x400] sm:$0xff] }
 0x246   : > { %2990 = vmatpush1.msra.mxu1 %v4026_v45  ;;  %v4031_v45 = vld [vmem:[%s6837_s3 + $0x7e8] sm:$0xff] }
 0x247   : > { %2991 = vmatprep.subr.mxu1 %v4027_v47  ;;  %v4032_v47 = vld [vmem:[%s6837_s3 + $0x7e0] sm:$0xff] }
 0x248   : > { %2992 = vmatpush1.msra.mxu1 %v4028_v48  ;;  %v4033_v48 = vld [vmem:[%s6837_s3 + $0x7c8] sm:$0xff] }
 0x249   : > { %2993 = vmatprep.subr.mxu1 %v4029_v54  ;;  %v4034_v54 = vld [vmem:[%s6837_s3 + $0x7c0] sm:$0xff] }
 0x24a   : > { %2994 = vmatpush1.msra.mxu1 %v4030_v44  ;;  %v7128_v44 = vld [vmem:[#allocation26_spill] sm:$0xff] }
 0x24b   : > { %2995 = vmatprep.subr.mxu1 %v4031_v45  ;;  %v7130_v45 = vld [vmem:[#allocation28_spill] sm:$0xff] }
 0x24c   : > { %2996 = vmatpush2.msra.mxu1 %v4032_v47  ;;  %v7131_v47 = vld [vmem:[#allocation33_spill] sm:$0xff] }
 0x24d   : > { %2997 = vmatprep.subr.mxu1 %v4033_v48  ;;  %v7133_v48 = vld [vmem:[#allocation35_spill] sm:$0xff] }
 0x24e   : > { %2998 = vmatpush2.msra.mxu1 %v4034_v54  ;;  %v7142_v54 = vld [vmem:[#allocation44_spill] sm:$0xff] }
 0x24f   : > { %2999 = vmatprep.subr.mxu1 %v7128_v44  ;;  %v7143_v44 = vld [vmem:[#allocation45_spill] sm:$0xff] }
 0x250   : > { %3000 = vmatpush2.msra.mxu1 %v7129_v46  ;;  %v7132_v46 = vld [vmem:[#allocation34_spill] sm:$0xff] }
 0x251   : > { %3001 = vmatprep.subr.mxu1 %v7130_v45  ;;  %v7144_v45 = vld [vmem:[#allocation46_spill] sm:$0xff] }
 0x252   : > { %3002 = vmatpush2.msra.mxu1 %v5470_v17  ;;  %v7134_v17 = vld [vmem:[#allocation36_spill] sm:$0xff] }
 0x253   : > { %3003 = vmatprep.subr.mxu1 %v5478_v24  ;;  %v7135_v24 = vld [vmem:[#allocation37_spill] sm:$0xff] }
 0x254   : > { %3004 = vmatpush2.msra.mxu1 %v5484_v3  ;;  %v7136_v3 = vld [vmem:[#allocation38_spill] sm:$0xff] }
 0x255   : > { %3005 = vmatprep.subr.mxu1 %v5491_v7  ;;  %v7137_v7 = vld [vmem:[#allocation39_spill] sm:$0xff] }
 0x256   : > { %3006 = vmatpush2.msra.mxu1 %v5497_v16  ;;  %v7138_v16 = vld [vmem:[#allocation40_spill] sm:$0xff] }
 0x257   : > { %3007 = vmatprep.subr.mxu1 %v5507_v61  ;;  %v7139_v61 = vld [vmem:[#allocation41_spill] sm:$0xff] }
 0x258   : > { %3008 = vmatpush2.msra.mxu1 %v5513_v1  ;;  %v7140_v1 = vld [vmem:[#allocation42_spill] sm:$0xff] }
 0x259   : > { %3009 = vmatprep.subr.mxu1 %v5525_v25  ;;  %v7141_v25 = vld [vmem:[#allocation43_spill] sm:$0xff] }
 0x25a   : > { %3010 = vmatpush2.msra.mxu1 %v7131_v47  ;;  %v7145_v47 = vld [vmem:[#allocation48_spill] sm:$0xff] }
 0x25b   : > { %3011 = vmatprep.subr.mxu1 %v7132_v46  ;;  %v2610_v46 = vpop.f32.mrf.mxu0 }
 0x25c   : > { %3012 = vmatpush2.msra.mxu1 %v7133_v48 }
 0x25d   : > { %3013 = vmatprep.subr.mxu1 %v7134_v17 }
 0x25e   : > { %3014 = vmatpush2.msra.mxu1 %v7135_v24  ;;  %v2612_v24 = vpop.f32.mrf.mxu0 }
 0x25f   : > { %3015 = vmatprep.subr.mxu1 %v7136_v3 }
 0x260   : > { %3016 = vmatpush2.msra.mxu1 %v7137_v7  ;;  %v7146_v7 = vld [vmem:[#allocation25_spill] sm:$0xff] }
 0x261   : > { %3017 = vmatprep.subr.mxu1 %v7138_v16 }
 0x262   : > { %3018 = vmatpush2.msra.mxu1 %v7139_v61 }
 0x263   : > { %3019 = vmatprep.subr.mxu1 %v7140_v1  ;;  %v7147_v1 = vld [vmem:[#allocation29_spill] sm:$0xff] }
 0x264   : > { %3020 = vmatpush2.msra.mxu1 %v7141_v25 }
 0x265   : > { %3021 = vmatprep.subr.mxu1 %v7142_v54 }
 0x266   : > { %3022 = vmatpush2.msra.mxu1 %v5603_v13 }
 0x267   : > { %3023 = vmatprep.subr.mxu1 %v5609_v26  ;;  %v7149_v26 = vld [vmem:[#allocation30_spill] sm:$0xff] }
 0x268   : > { %3024 = vmatpush2.msra.mxu1 %v5615_v22 }
 0x269   : > { %3025 = vmatprep.subr.mxu1 %v7143_v44 }
 0x26a   : > { %3026 = vmatpush2.msra.mxu1 %v7144_v45  ;;  %v7151_v45 = vld [vmem:[#allocation31_spill] sm:$0xff] }
 0x26b   : > { %3105 = vmatprep.subr.mxu1 %v7145_v47 }
 0x2ab   : > { %v2681_v48 = vpop.f32.mrf.mxu1 }
 0x2ac   : > { %v2682_v17 = vadd.f32 %v2681_v48, %v2610_v46  ;;  %v7152_v46 = vld [vmem:[#allocation32_spill] sm:$0xff] }
 0x2ad   : > { %v2683_v3 = vpop.f32.mrf.mxu1 }
 0x2ae   : > { %v2831_v16 = vrot.slane %v2682_v17, %v7146_v7  ;;  %v2684_v61 = vadd.f32 %v2683_v3, %v2612_v24 }
 0x2b0   : > { %v6622_v13 = vsub.f32 %v7147_v1, %v2831_v16  ;;  %v6625_v25 = vsub.f32 %v7149_v26, %v2831_v16  ;;  %v2835_v22 = vrot.slane %v2684_v61, %v7146_v7 }
 0x2b2   : > { %7148 = vst [vmem:[#allocation26_spill] sm:$0xff] %v6622_v13  ;;  %7150 = vst [vmem:[#allocation27_spill] sm:$0xff] %v6625_v25  ;;  %v2852_v54 = vmul.f32 %v6622_v13, %v6622_v13  ;;  %v2856_v44 = vmul.f32 %v6625_v25, %v6625_v25  ;;  %v6633_v47 = vsub.f32 %v7151_v45, %v2835_v22 }
 0x2b3   : > { %v6636_v48 = vsub.f32 %v7152_v46, %v2835_v22 }
 0x2b4   : > { %v2860_v17 = vadd.f32 %v2856_v44, %v2852_v54  ;;  %v2853_v24 = vmul.f32 %v6633_v47, %v6633_v47 }
 0x2b5   : > { %v2857_v3 = vmul.f32 %v6636_v48, %v6636_v48 }
 0x2b6   : > { %v2861_v16 = vrot.slane %v2860_v17, 4 }
 0x2b7   : > { %v2867_v61 = vadd.f32 %v2857_v3, %v2853_v24  ;;  %v7154_v24 = vld [vmem:[#allocation49_spill] sm:$0xff]  ;;  %v7155_v3 = vld [vmem:[#allocation50_spill] sm:$0xff] }
 0x2b8   : > { %v2862_v1 = vadd.f32 %v2861_v16, %v2860_v17  ;;  %v7153_v17 = vld [vmem:[#allocation47_spill] sm:$0xff]  ;;  %v7163_v16 = vld [vmem:[#allocation58_spill] sm:$0xff] }
 0x2b9   : > { %v2868_v26 = vrot.slane %v2867_v61, 4 }
 0x2ba   : > { %v2863_v51 = vrot.slane %v2862_v1, 2 }
 0x2bb   : > { %v2869_v13 = vadd.f32 %v2868_v26, %v2867_v61  ;;  %v7164_v61 = vld [vmem:[#allocation59_spill] sm:$0xff]  ;;  %v7166_v26 = vld [vmem:[#allocation61_spill] sm:$0xff] }
 0x2bc   : > { %v2864_v42 = vadd.f32 %v2863_v51, %v2862_v1  ;;  %v7156_v51 = vld [vmem:[#allocation51_spill] sm:$0xff]  ;;  %v7165_v1 = vld [vmem:[#allocation60_spill] sm:$0xff] }
 0x2bd   : > { %v2870_v25 = vrot.slane %v2869_v13, 2 }
 0x2be   : > { %v2865_v40 = vrot.slane %v2864_v42, 1 }
 0x2bf   : > { %v2871_v45 = vadd.f32 %v2870_v25, %v2869_v13  ;;  %v7157_v13 = vld [vmem:[#allocation52_spill] sm:$0xff] }
 0x2c0   : > { %v2866_v22 = vadd.f32 %v2865_v40, %v2864_v42  ;;  %v7159_v40 = vld [vmem:[#allocation54_spill] sm:$0xff]  ;;  %v7160_v42 = vld [vmem:[#allocation55_spill] sm:$0xff]  ;;  %v7161_v25 = vld [vmem:[#allocation56_spill] sm:$0xff] }
 0x2c1   : > { %v2872_v39 = vrot.slane %v2871_v45, 1 }
 0x2c2   : > { %v6642_v44 = vmul.f32 0.015625, %v2866_v22  ;;  %v7168_v22 = vld [vmem:[#allocation63_spill] sm:$0xff] }
 0x2c3   : > { %v2873_v46 = vadd.f32 %v2872_v39, %v2871_v45  ;;  %v7158_v39 = vld [vmem:[#allocation53_spill] sm:$0xff]  ;;  %v7167_v45 = vld [vmem:[#allocation62_spill] sm:$0xff] }
 0x2c5   : > { %v2889_v54 = vmul.f32 0.015625, %v2873_v46  ;;  %v7169_v46 = vld [vmem:[#allocation64_spill] sm:$0xff] }
 0x2c7   : > { %2956 = vmatprep.mubr.f32.mxu0 %v2889_v54 }
 0x2c8   : > { %2957 = vmatmul.mubr.f32.vlgmr.msra.gmra.mxu0 %v6642_v44 }
 0x2c9   : > { %3035 = vmatpush1.msra.mxu0 %v5635_v11  ;;  %3098 = vmatprep.mubr.f32.mxu0 %v2889_v54  ;;  %v7162_v11 = vld [vmem:[#allocation57_spill] sm:$0xff] }
 0x2ca   : > { %3036 = vmatprep.subr.mxu0 %v7153_v17  ;;  %v7170_v54 = vld [vmem:[#allocation65_spill] sm:$0xff]  ;;  %v7171_v17 = vld [vmem:[#allocation66_spill] sm:$0xff] }
 0x2cb   : > { %3037 = vmatpush1.msra.mxu0 %v7154_v24  ;;  %v7172_v24 = vld [vmem:[#allocation67_spill] sm:$0xff] }
 0x2cc   : > { %3038 = vmatprep.subr.mxu0 %v7155_v3  ;;  %v7173_v3 = vld [vmem:[#allocation68_spill] sm:$0xff] }
 0x2cd   : > { %3039 = vmatpush1.msra.mxu0 %v7156_v51  ;;  %v7174_v51 = vld [vmem:[#allocation69_spill] sm:$0xff] }
 0x2ce   : > { %3040 = vmatprep.subr.mxu0 %v7157_v13  ;;  %v7175_v13 = vld [vmem:[#allocation70_spill] sm:$0xff] }
 0x2cf   : > { %3041 = vmatpush1.msra.mxu0 %v7158_v39  ;;  %v7176_v39 = vld [vmem:[#allocation71_spill] sm:$0xff] }
 0x2d0   : > { %3042 = vmatprep.subr.mxu0 %v7159_v40  ;;  %v7177_v40 = vld [vmem:[#allocation72_spill] sm:$0xff] }
 0x2d1   : > { %3043 = vmatpush1.msra.mxu0 %v7160_v42  ;;  %v7178_v42 = vld [vmem:[#allocation73_spill] sm:$0xff] }
 0x2d2   : > { %3044 = vmatprep.subr.mxu0 %v7161_v25  ;;  %v7179_v25 = vld [vmem:[#allocation74_spill] sm:$0xff] }
 0x2d3   : > { %3045 = vmatpush1.msra.mxu0 %v7162_v11  ;;  %v7180_v11 = vld [vmem:[#allocation75_spill] sm:$0xff] }
 0x2d4   : > { %3046 = vmatprep.subr.mxu0 %v7163_v16  ;;  %v7181_v16 = vld [vmem:[#allocation76_spill] sm:$0xff] }
 0x2d5   : > { %3047 = vmatpush1.msra.mxu0 %v7164_v61  ;;  %v7182_v61 = vld [vmem:[#allocation77_spill] sm:$0xff] }
 0x2d6   : > { %3048 = vmatprep.subr.mxu0 %v7165_v1  ;;  %v7183_v1 = vld [vmem:[#allocation78_spill] sm:$0xff] }
 0x2d7   : > { %3049 = vmatpush1.msra.mxu0 %v7166_v26  ;;  %v7184_v26 = vld [vmem:[#allocation79_spill] sm:$0xff] }
 0x2d8   : > { %3050 = vmatprep.subr.mxu0 %v7167_v45  ;;  %v2752_v45 = vpop.f32.mrf.mxu0 }
 0x2d9   : > { %3051 = vmatpush1.msra.mxu0 %v7168_v22  ;;  %v7185_v22 = vld [vmem:[#allocation80_spill] sm:$0xff] }
 0x2da   : > { %3052 = vmatprep.subr.mxu0 %v7169_v46  ;;  %v7186_v46 = vld [vmem:[#allocation81_spill] sm:$0xff] }
 0x2db   : > { %3053 = vmatpush1.msra.mxu0 %v7170_v54 }
 0x2dc   : > { %3054 = vmatprep.subr.mxu0 %v7171_v17  ;;  %v7187_v17 = vld [vmem:[#allocation82_spill] sm:$0xff] }
 0x2dd   : > { %3055 = vmatpush1.msra.mxu0 %v7172_v24 }
 0x2de   : > { %3056 = vmatprep.subr.mxu0 %v7173_v3  ;;  %v7188_v3 = vld [vmem:[#allocation83_spill] sm:$0xff] }
 0x2df   : > { %3057 = vmatpush1.msra.mxu0 %v7174_v51  ;;  %v2754_v51 = vpop.f32.mrf.mxu0 }
 0x2e0   : > { %3058 = vmatprep.subr.mxu0 %v7175_v13 }
 0x2e1   : > { %3059 = vmatpush1.msra.mxu0 %v7176_v39  ;;  %v7189_v39 = vld [vmem:[#allocation84_spill] sm:$0xff] }
 0x2e2   : > { %3060 = vmatprep.subr.mxu0 %v7177_v40 }
 0x2e3   : > { %3061 = vmatpush1.msra.mxu0 %v7178_v42 }
 0x2e4   : > { %3062 = vmatprep.subr.mxu0 %v7179_v25  ;;  %v7190_v25 = vld [vmem:[#allocation85_spill] sm:$0xff] }
 0x2e5   : > { %3063 = vmatpush1.msra.mxu0 %v7180_v11  ;;  %v7191_v11 = vld [vmem:[#allocation86_spill] sm:$0xff] }
 0x2e6   : > { %3064 = vmatprep.subr.mxu0 %v7181_v16 }
 0x2e7   : > { %3065 = vmatpush1.msra.mxu0 %v7182_v61 }
 0x2e8   : > { %3066 = vmatprep.subr.mxu0 %v7183_v1 }
 0x2e9   : > { %3067 = vmatpush2.msra.mxu0 %v7184_v26  ;;  %v7192_v26 = vld [vmem:[#allocation87_spill] sm:$0xff] }
 0x2ea   : > { %3068 = vmatprep.subr.mxu0 %v7185_v22 }
 0x2eb   : > { %3069 = vmatpush2.msra.mxu0 %v7186_v46  ;;  %v2823_v54 = vpop.f32.mrf.mxu1 }
 0x2ec   : > { %3070 = vmatprep.subr.mxu0 %v7187_v17  ;;  %v2824_v24 = vadd.f32 %v2823_v54, %v2752_v45  ;;  %v7193_v45 = vld [vmem:[#allocation88_spill] sm:$0xff]  ;;  %v7195_v17 = vld [vmem:[#allocation90_spill] sm:$0xff] }
 0x2ed   : > { %3071 = vmatpush2.msra.mxu0 %v7188_v3  ;;  %v2825_v13 = vpop.f32.mrf.mxu1 }
 0x2ee   : > { %3072 = vmatprep.subr.mxu0 %v7189_v39  ;;  %v2839_v40 = vrot.slane %v2824_v24, %v7146_v7  ;;  %v2826_v42 = vadd.f32 %v2825_v13, %v2754_v51  ;;  %v7196_v13 = vld [vmem:[#allocation91_spill] sm:$0xff]  ;;  %v7197_v39 = vld [vmem:[#allocation92_spill] sm:$0xff] }
 0x2ef   : > { %3073 = vmatpush2.msra.mxu0 %v7190_v25 }
 0x2f0   : > { %3074 = vmatprep.subr.mxu0 %v7191_v11  ;;  %v6687_v16 = vsub.f32 %v6067_v56, %v2839_v40  ;;  %v6690_v61 = vsub.f32 %v6069_v57, %v2839_v40  ;;  %v2843_v1 = vrot.slane %v2826_v42, %v7146_v7  ;;  %v7194_v57 = vld [vmem:[#allocation89_spill] sm:$0xff]  ;;  %v7200_v11 = vld [vmem:[#allocation95_spill] sm:$0xff] }
 0x2f1   : > { %3075 = vmatpush2.msra.mxu0 %v7192_v26  ;;  %v7198_v42 = vld [vmem:[#allocation93_spill] sm:$0xff]  ;;  %v7201_v26 = vld [vmem:[#allocation96_spill] sm:$0xff] }
 0x2f2   : > { %3076 = vmatprep.subr.mxu0 %v7193_v45  ;;  %v2854_v22 = vmul.f32 %v6687_v16, %v6687_v16  ;;  %v2858_v46 = vmul.f32 %v6690_v61, %v6690_v61  ;;  %v6700_v54 = vsub.f32 %v6073_v4, %v2843_v1  ;;  %v6703_v56 = vsub.f32 %v6077_v10, %v2843_v1  ;;  %v7199_v10 = vld [vmem:[#allocation94_spill] sm:$0xff]  ;;  %v7202_v45 = vld [vmem:[#allocation97_spill] sm:$0xff] }
 0x2f3   : > { %3077 = vmatpush2.msra.mxu0 %v7194_v57  ;;  %v7203_v57 = vld [vmem:[#allocation98_spill] sm:$0xff] }
 0x2f4   : > { %3078 = vmatprep.subr.mxu0 %v7195_v17  ;;  %v2874_v24 = vadd.f32 %v2858_v46, %v2854_v22  ;;  %v2855_v3 = vmul.f32 %v6700_v54, %v6700_v54  ;;  %v2859_v51 = vmul.f32 %v6703_v56, %v6703_v56  ;;  %v7204_v17 = vld [vmem:[#allocation99_spill] sm:$0xff] }
 0x2f5   : > { %3079 = vmatpush2.msra.mxu0 %v7196_v13 }
 0x2f6   : > { %3080 = vmatprep.subr.mxu0 %v7197_v39  ;;  %v2875_v4 = vrot.slane %v2874_v24, 4  ;;  %v2881_v40 = vadd.f32 %v2859_v51, %v2855_v3  ;;  %v7205_v51 = vld [vmem:[#allocation100_spill] sm:$0xff]  ;;  %v7206_v39 = vld [vmem:[#allocation101_spill] sm:$0xff] }
 0x2f7   : > { %3081 = vmatpush2.msra.mxu0 %v7198_v42  ;;  %v7207_v42 = vld [vmem:[#allocation102_spill] sm:$0xff] }
 0x2f8   : > { %3082 = vmatprep.subr.mxu0 %v7199_v10  ;;  %v2876_v25 = vadd.f32 %v2875_v4, %v2874_v24  ;;  %v2882_v1 = vrot.slane %v2881_v40, 4  ;;  %v7208_v10 = vld [vmem:[#allocation103_spill] sm:$0xff] }
 0x2f9   : > { %3083 = vmatpush2.msra.mxu0 %v7200_v11 }
 0x2fa   : > { %3084 = vmatprep.subr.mxu0 %v7201_v26  ;;  %v2883_v22 = vadd.f32 %v2882_v1, %v2881_v40  ;;  %v2877_v46 = vrot.slane %v2876_v25, 2 }
 0x2fb   : > { %3085 = vmatpush2.msra.mxu0 %v7202_v45 }
 0x2fc   : > { %3086 = vmatprep.subr.mxu0 %v7203_v57  ;;  %v2884_v13 = vrot.slane %v2883_v22, 2  ;;  %v2878_v3 = vadd.f32 %v2877_v46, %v2876_v25  ;;  %v7240_v57 = vld [vmem:[#allocation26_spill] sm:$0xff] }
 0x2fd   : > { %3087 = vmatpush2.msra.mxu0 %v7204_v17 }
 0x2fe   : > { %3088 = vmatprep.subr.mxu0 %v7205_v51  ;;  %v2885_v24 = vadd.f32 %v2884_v13, %v2883_v22  ;;  %v2879_v4 = vrot.slane %v2878_v3, 1  ;;  %v7241_v13 = vld [vmem:[#allocation27_spill] sm:$0xff] }
 0x2ff   : > { %3089 = vmatpush2.msra.mxu0 %v7206_v39 }
 0x300   : > { %3090 = vmatprep.subr.mxu0 %v7207_v42  ;;  %v2886_v11 = vrot.slane %v2885_v24, 1  ;;  %v2880_v40 = vadd.f32 %v2879_v4, %v2878_v3 }
 0x301   : > { %3091 = vmatpush2.msra.mxu0 %v7208_v10 }
 0x302   : > { %3092 = vmatprep.subr.mxu0 %v5984_v63  ;;  %v2887_v1 = vadd.f32 %v2886_v11, %v2885_v24  ;;  %v6729_v26 = vmul.f32 0.015625, %v2880_v40  ;;  %v7210_v63 = vld [vmem:[#allocation4_spill] sm:$0xff] }
 0x303   : > { %3093 = vmatpush2.msra.mxu0 %v5990_v59  ;;  %v7209_v59 = vld [vmem:[#allocation3_spill] sm:$0xff] }
 0x304   : > { %3094 = vmatprep.subr.mxu0 %v5996_v5  ;;  %v2891_v25 = vmul.f32 0.015625, %v2887_v1  ;;  %v7212_v5 = vld [vmem:[#allocation6_spill] sm:$0xff] }
 0x305   : > { %3095 = vmatpush2.msra.mxu0 %v6002_v18  ;;  %v7214_v18 = vld [vmem:[#allocation8_spill] sm:$0xff] }
 0x306   : > { %3096 = vmatprep.subr.mxu0 %v6008_v27  ;;  %3027 = vmatprep.mubr.f32.mxu1 %v2891_v25  ;;  %v7211_v27 = vld [vmem:[#allocation5_spill] sm:$0xff] }
 0x307   : > { %3097 = vmatpush2.msra.mxu0 %v6014_v15  ;;  %3028 = vmatmul.mubr.f32.vlgmr.msra.gmra.mxu1 %v6729_v26  ;;  %v7213_v15 = vld [vmem:[#allocation7_spill] sm:$0xff] }
 0x308   : > { %3099 = vmatmul.mubr.f32.vlgmr.msra.gmra.mxu0 %v6642_v44  ;;  %3106 = vmatpush1.msra.mxu1 %v6103_v49  ;;  %v7215_v49 = vld [vmem:[#allocation9_spill] sm:$0xff] }
 0x309   : > { %3169 = vmatprep.mubr.f32.mxu1 %v2891_v25  ;;  %3107 = vmatprep.subr.mxu1 %v6109_v50  ;;  %v7216_v50 = vld [vmem:[#allocation10_spill] sm:$0xff] }
 0x30a   : > { %3108 = vmatpush1.msra.mxu1 %v6116_v52  ;;  %v7217_v52 = vld [vmem:[#allocation11_spill] sm:$0xff] }
 0x30b   : > { %3109 = vmatprep.subr.mxu1 %v6123_v23  ;;  %v7218_v23 = vld [vmem:[#allocation12_spill] sm:$0xff] }
 0x30c   : > { %3110 = vmatpush1.msra.mxu1 %v6129_v62  ;;  %v7219_v62 = vld [vmem:[#allocation13_spill] sm:$0xff] }
 0x30d   : > { %3111 = vmatprep.subr.mxu1 %v6135_v0  ;;  %v7220_v0 = vld [vmem:[#allocation14_spill] sm:$0xff] }
 0x30e   : > { %3112 = vmatpush1.msra.mxu1 %v6141_v2  ;;  %v7221_v2 = vld [vmem:[#allocation15_spill] sm:$0xff] }
 0x30f   : > { %3113 = vmatprep.subr.mxu1 %v6147_v6  ;;  %v7222_v6 = vld [vmem:[#allocation16_spill] sm:$0xff] }
 0x310   : > { %3114 = vmatpush1.msra.mxu1 %v6153_v12  ;;  %v7223_v12 = vld [vmem:[#allocation17_spill] sm:$0xff] }
 0x311   : > { %3115 = vmatprep.subr.mxu1 %v6159_v14  ;;  %v7224_v14 = vld [vmem:[#allocation18_spill] sm:$0xff] }
 0x312   : > { %3116 = vmatpush1.msra.mxu1 %v6165_v58  ;;  %v7225_v58 = vld [vmem:[#allocation19_spill] sm:$0xff] }
 0x313   : > { %3117 = vmatprep.subr.mxu1 %v6171_v19  ;;  %v7226_v19 = vld [vmem:[#allocation20_spill] sm:$0xff] }
 0x314   : > { %3118 = vmatpush1.msra.mxu1 %v6177_v60  ;;  %v7227_v60 = vld [vmem:[#allocation21_spill] sm:$0xff] }
 0x315   : > { %3119 = vmatprep.subr.mxu1 %v6183_v28  ;;  %v7228_v28 = vld [vmem:[#allocation22_spill] sm:$0xff] }
 0x316   : > { %3120 = vmatpush1.msra.mxu1 %v6189_v29  ;;  %v7229_v29 = vld [vmem:[#allocation23_spill] sm:$0xff] }
 0x317   : > { %3121 = vmatprep.subr.mxu1 %v6195_v30  ;;  %v7230_v30 = vld [vmem:[#allocation24_spill] sm:$0xff] }
 0x318   : > { %3122 = vmatpush1.msra.mxu1 %v6201_v31  ;;  %v7231_v31 = vld [vmem:[#allocation104_spill] sm:$0xff] }
 0x319   : > { %3123 = vmatprep.subr.mxu1 %v6207_v32  ;;  %v7232_v32 = vld [vmem:[#allocation105_spill] sm:$0xff] }
 0x31a   : > { %3124 = vmatpush1.msra.mxu1 %v6213_v20  ;;  %v7233_v20 = vld [vmem:[#allocation106_spill] sm:$0xff] }
 0x31b   : > { %3125 = vmatprep.subr.mxu1 %v6219_v21  ;;  %v7234_v21 = vld [vmem:[#allocation107_spill] sm:$0xff] }
 0x31c   : > { %3126 = vmatpush1.msra.mxu1 %v6225_v53  ;;  %v7235_v53 = vld [vmem:[#allocation108_spill] sm:$0xff] }
 0x31d   : > { %3127 = vmatprep.subr.mxu1 %v6231_v55  ;;  %v7236_v55 = vld [vmem:[#allocation109_spill] sm:$0xff] }
 0x31e   : > { %3128 = vmatpush1.msra.mxu1 %v6237_v8  ;;  %v7237_v8 = vld [vmem:[#allocation110_spill] sm:$0xff] }
 0x31f   : > { %3129 = vmatprep.subr.mxu1 %v6243_v9  ;;  %v7238_v9 = vld [vmem:[#allocation111_spill] sm:$0xff] }
 0x320   : > { %3130 = vmatpush1.msra.mxu1 %v6249_v33  ;;  %v7239_v33 = vld [vmem:[#allocation112_spill] sm:$0xff] }
 0x321   : > { %3131 = vmatprep.subr.mxu1 %v6255_v34 }
 0x322   : > { %3132 = vmatpush1.msra.mxu1 %v6261_v41 }
 0x323   : > { %3133 = vmatprep.subr.mxu1 %v6267_v43 }
 0x324   : > { %3134 = vmatpush1.msra.mxu1 %v6273_v35 }
 0x325   : > { %3135 = vmatprep.subr.mxu1 %v6279_v36 }
 0x326   : > { %3136 = vmatpush1.msra.mxu1 %v6285_v37 }
 0x327   : > { %3137 = vmatprep.subr.mxu1 %v6291_v38 }
 0x328   : > { %3138 = vmatpush2.msra.mxu1 %v7209_v59 }
 0x329   : > { %3139 = vmatprep.subr.mxu1 %v7210_v63 }
 0x32a   : > { %3140 = vmatpush2.msra.mxu1 %v7211_v27 }
 0x32b   : > { %3141 = vmatprep.subr.mxu1 %v7212_v5 }
 0x32c   : > { %3142 = vmatpush2.msra.mxu1 %v7213_v15 }
 0x32d   : > { %3143 = vmatprep.subr.mxu1 %v7214_v18 }
 0x32e   : > { %3144 = vmatpush2.msra.mxu1 %v7215_v49 }
 0x32f   : > { %3145 = vmatprep.subr.mxu1 %v7216_v50 }
 0x330   : > { %3146 = vmatpush2.msra.mxu1 %v7217_v52 }
 0x331   : > { %3147 = vmatprep.subr.mxu1 %v7218_v23 }
 0x332   : > { %3148 = vmatpush2.msra.mxu1 %v7219_v62 }
 0x333   : > { %3149 = vmatprep.subr.mxu1 %v7220_v0 }
 0x334   : > { %3150 = vmatpush2.msra.mxu1 %v7221_v2 }
 0x335   : > { %3151 = vmatprep.subr.mxu1 %v7222_v6 }
 0x336   : > { %3152 = vmatpush2.msra.mxu1 %v7223_v12 }
 0x337   : > { %3153 = vmatprep.subr.mxu1 %v7224_v14 }
 0x338   : > { %3154 = vmatpush2.msra.mxu1 %v7225_v58 }
 0x339   : > { %3155 = vmatprep.subr.mxu1 %v7226_v19 }
 0x33a   : > { %3156 = vmatpush2.msra.mxu1 %v7227_v60 }
 0x33b   : > { %3157 = vmatprep.subr.mxu1 %v7228_v28 }
 0x33c   : > { %3158 = vmatpush2.msra.mxu1 %v7229_v29 }
 0x33d   : > { %3159 = vmatprep.subr.mxu1 %v7230_v30 }
 0x33e   : > { %3160 = vmatpush2.msra.mxu1 %v7231_v31 }
 0x33f   : > { %3161 = vmatprep.subr.mxu1 %v7232_v32 }
 0x340   : > { %3162 = vmatpush2.msra.mxu1 %v7233_v20 }
 0x341   : > { %3163 = vmatprep.subr.mxu1 %v7234_v21 }
 0x342   : > { %3164 = vmatpush2.msra.mxu1 %v7235_v53 }
 0x343   : > { %3165 = vmatprep.subr.mxu1 %v7236_v55 }
 0x344   : > { %3166 = vmatpush2.msra.mxu1 %v7237_v8 }
 0x345   : > { %3167 = vmatprep.subr.mxu1 %v7238_v9 }
 0x346   : > { %3168 = vmatpush2.msra.mxu1 %v7239_v33 }
 0x347   : > { %3170 = vmatmul.mubr.f32.vlgmr.msra.gmra.mxu1 %v6729_v26 }
 0x388   : > { %v2958_v34 = vpop.f32.mrf.mxu0 }
 0x389   : > { %v2959_v43 = vadd.f32 1e-05, %v2958_v34 }
 0x38a   : > { %v2960_v41 = vpop.f32.mrf.mxu0 }
 0x38b   : > { %v2961_v36 = vadd.f32 1e-05, %v2960_v41 }
 0x3c7   : > { %v3029_v35 = vpop.f32.mrf.mxu1 }
 0x3c8   : > { %v3030_v37 = vadd.f32 %v3029_v35, %v2959_v43  ;;  %v3100_v40 = vpop.f32.mrf.mxu0 }
 0x3c9   : > { %v3031_v38 = vpop.f32.mrf.mxu1  ;;  %v3101_v25 = vadd.f32 1e-05, %v3100_v40 }
 0x3ca   : > { %3991 = vrsqrt.f32 %v3030_v37  ;;  %v3032_v44 = vadd.f32 %v3031_v38, %v2961_v36  ;;  %v3102_v1 = vpop.f32.mrf.mxu0 }
 0x3cb   : > { %v3103_v59 = vadd.f32 1e-05, %v3102_v1 }
 0x3cc   : > { %3993 = vrsqrt.f32 %v3032_v44 }
 0x3d7   : > { %v3992_v45 = vpop.eup %3991 }
 0x3d8   : > { %v3183_v22 = vrot.slane %v3992_v45, %v7146_v7 }
 0x3d9   : > { %v3994_v46 = vpop.eup %3993 }
 0x3da   : > { %v3196_v17 = vmul.f32 %v3183_v22, %v7240_v57  ;;  %v3200_v3 = vmul.f32 %v3183_v22, %v7241_v13  ;;  %v3187_v51 = vrot.slane %v3994_v46, %v7146_v7 }
 0x3dc   : > { %v3204_v39 = vmax.f32 %v3196_v17, 0.0  ;;  %v3208_v24 = vmax.f32 %v3200_v3, 0.0  ;;  %v3197_v4 = vmul.f32 %v3187_v51, %v6633_v47  ;;  %v3201_v42 = vmul.f32 %v3187_v51, %v6636_v48 }
 0x3de   : > { %3212 = vst [vmem:[%s6807_s5] sm:$0xff] %v3204_v39  ;;  %3216 = vst [vmem:[%s6807_s5 + $0x20] sm:$0xff] %v3208_v24  ;;  %v3205_v10 = vmax.f32 %v3197_v4, 0.0  ;;  %v3209_v11 = vmax.f32 %v3201_v42, 0.0 }
 0x3e0   : > { %3213 = vst [vmem:[%s6807_s5 + $0x8] sm:$0xff] %v3205_v10  ;;  %3217 = vst [vmem:[%s6807_s5 + $0x28] sm:$0xff] %v3209_v11 }
 0x407   : > { %v3171_v26 = vpop.f32.mrf.mxu1 }
 0x408   : > { %v3172_v63 = vadd.f32 %v3171_v26, %v3101_v25 }
 0x409   : > { %v3173_v27 = vpop.f32.mrf.mxu1 }
 0x40a   : > { %3995 = vrsqrt.f32 %v3172_v63  ;;  %v3174_v5 = vadd.f32 %v3173_v27, %v3103_v59 }
 0x40c   : > { %3997 = vrsqrt.f32 %v3174_v5 }
 0x417   : > { %v3996_v47 = vpop.eup %3995 }
 0x418   : > { %v3191_v48 = vrot.slane %v3996_v47, %v7146_v7 }
 0x419   : > { %v3998_v15 = vpop.eup %3997 }
 0x41a   : > { %v3198_v18 = vmul.f32 %v3191_v48, %v6687_v16  ;;  %v3202_v49 = vmul.f32 %v3191_v48, %v6690_v61  ;;  %v3195_v50 = vrot.slane %v3998_v15, %v7146_v7 }
 0x41c   : > { %v3206_v52 = vmax.f32 %v3198_v18, 0.0  ;;  %v3210_v23 = vmax.f32 %v3202_v49, 0.0  ;;  %v3199_v62 = vmul.f32 %v3195_v50, %v6700_v54  ;;  %v3203_v0 = vmul.f32 %v3195_v50, %v6703_v56 }
 0x41e   : > { %3214 = vst [vmem:[%s6807_s5 + $0x10] sm:$0xff] %v3206_v52  ;;  %3218 = vst [vmem:[%s6807_s5 + $0x30] sm:$0xff] %v3210_v23  ;;  %v3207_v2 = vmax.f32 %v3199_v62, 0.0  ;;  %v3211_v6 = vmax.f32 %v3203_v0, 0.0 }
 0x420   : > { %3215 = vst [vmem:[%s6807_s5 + $0x18] sm:$0xff] %v3207_v2  ;;  %3219 = vst [vmem:[%s6807_s5 + $0x38] sm:$0xff] %v3211_v6 }
 0x421 PF: > { %s14_s17 = sadd.s32 1, %s4057_s17   ;;  %s7242_s15 = smov %s4053_s16 }
 0x422   : > { %p11_p5 = scmp.ge.s32.totalorder %s14_s17, 4   ;;  %s7243_s16 = smov %s7245_s18 }
 0x424   :  { %13 = sbr.rel (!%p11_p5) target bundleno = 2 (0x2), region = 77 }

// kernel: tile.18
= control target key start
LH: loop header
LB: loop body
LE: loop exit
PB: predicated region body
PF: predicated region fallthrough
CT: control target
= control target key end

     0   :  { %s22_s0 = inlined_call_operand.vmem [shape: f32[64], index: 0, kind: input, shape index: {}]   ;;  %s23_s1 = inlined_call_operand.vmem [shape: f32[4,64], index: 1, kind: output, shape index: {}]  }
   0x1   :  { %v4_v0 = vld [vmem:[%s22_s0] ss:$0 sm:$0xff] }
   0x2   :  { %5 = vst [vmem:[%s23_s1] sm:$0xf] %v4_v0 }

// kernel: tile.19
= control target key start
LH: loop header
LB: loop body
LE: loop exit
PB: predicated region body
PF: predicated region fallthrough
CT: control target
= control target key end

     0   :  { %s7_s8 = smov 3  ;;  %vm9_vm0 = vcmask 523264   ;;  %s34_s9 = smov 64   ;;  %vm16_vm1 = vcmask 1048064   ;;  %s54_s0 = inlined_call_operand.vmem [shape: f32[4,64], index: 0, kind: input, shape index: {}]   ;;  %s55_s1 = inlined_call_operand.vmem [shape: f32[1,256], index: 1, kind: output, shape index: {}]  }
   0x1   :  { %v5_v0 = vld [vmem:[%s54_s0] sm:$0xf]  ;;  %s12_s0 = smov 3 }
   0x2   :  { %6 = vst [vmem:[#allocation1] sm:$0xf] %v5_v0 }
   0x9   :  { %v13_v1 = vld [vmem:[#allocation1 + $0x1] ss:$2 sm:%s12_s0]   ;;  %v8_v2 = vld [vmem:[#allocation1] ss:$2 sm:%s7_s8]  }
   0xa   :  { %14 = vrot.lane.b32.xlu0 %v13_v1, %s34_s9  ;;  %10 = vst.msk [vmem:[#allocation0] ss:$8 sm:$0x3] %vm9_vm0, %v8_v2  }
  0x7c   :  { %v15_v3 = vpop.permute.xlu0 %14  }
  0x7d   :  { %17 = vst.msk [vmem:[#allocation0] ss:$8 sm:$0x3] %vm16_vm1, %v15_v3  }
  0x84   :  { %v22_v4 = vld [vmem:[#allocation0] sm:$0x1]  ;;  %v27_v5 = vld [vmem:[#allocation0 + $0x8] sm:$0x1] }
  0x85   :  { %25 = vst [vmem:[%s55_s1] sm:$0x1] %v22_v4  ;;  %32 = vst [vmem:[%s55_s1 + $0x1] sm:$0x1] %v27_v5 }

// kernel: line_drawing_forward.22
= control target key start
LH: loop header
LB: loop body
LE: loop exit
PB: predicated region body
PF: predicated region fallthrough
CT: control target
= control target key end

     0   :  { %s1728_s15 = smov 0   ;;  %s1730_s16 = smov 0   ;;  %s2302_s0 = inlined_call_operand.vmem [shape: bf16[2,64,512], index: 0, kind: input, shape index: {}]   ;;  %s2303_s1 = inlined_call_operand.vmem [shape: bf16[512,256], index: 1, kind: input, shape index: {}]   ;;  %s2304_s2 = inlined_call_operand.vmem [shape: f32[1,256], index: 2, kind: input, shape index: {}]   ;;  %s2305_s3 = inlined_call_operand.vmem [shape: f32[256,256], index: 3, kind: input, shape index: {}]   ;;  %s2306_s4 = inlined_call_operand.vmem [shape: f32[2,64,256], index: 4, kind: output, shape index: {}]  }
   0x1   :  { %s1732_s17 = smov 0  }
   0x2 LB: > { %s26_s18 = sadd.s32 1, %s1697_s16  ;;  %p1442_p0 = scmp.ge.s32.totalorder %s1701_s17, 1  ;;  %s1701_s17 = sphi %s1732_s17, %s14_s17   ;;  %s1697_s16 = sphi %s1730_s16, %s2308_s16   ;;  %s1693_s15 = sphi %s1728_s15, %s2307_s15  }
   0x3   : > { %p28_p1 = scmp.ge.s32.totalorder %s26_s18, 2  ;;  %p193_p2 = scmp.lt.s32.totalorder %s1701_s17, 3 }
   0x5   : > { %s2310_s18 = smov (%p28_p1, %s26_s18), 0  ;;  %p194_p3 = pnand %p1442_p0, %p193_p2 }
   0x6   : > { %p230_p4 = scmp.lt.s32.totalorder (!%p194_p3), %s1693_s15, 1 }
   0x7   : > { %197 = sbr.rel (%p194_p3) target bundleno = 777 (0x309), region = 36 }
   0xc   : > { %v1555_v0 = vld [vmem:[%s2303_s1 + $0x74] ss:$8 sps:$4 sm:$0xff]   ;;  %v1559_v2 = vld [vmem:[%s2303_s1 + $0x70] ss:$8 sps:$4 sm:$0xff]   ;;  %v1561_v4 = vld [vmem:[%s2303_s1 + $0x64] ss:$8 sps:$4 sm:$0xff]  }
   0xd   : > { %v1557_v1 = vld [vmem:[%s2303_s1 + $0x174] ss:$8 sps:$4 sm:$0xff]   ;;  %767 = vmatprep.subr.bf16.mxu0 %v1555_v0  ;;  %v1560_v3 = vld [vmem:[%s2303_s1 + $0x170] ss:$8 sps:$4 sm:$0xff]   ;;  %v1563_v5 = vld [vmem:[%s2303_s1 + $0x164] ss:$8 sps:$4 sm:$0xff]  }
   0xe   : > { %840 = vmatprep.subr.bf16.mxu1 %v1557_v1  ;;  %768 = vmatpush1.bf16.msra.mxu0 %v1559_v2  ;;  %v1565_v6 = vld [vmem:[%s2303_s1 + $0x60] ss:$8 sps:$4 sm:$0xff]   ;;  %v1567_v8 = vld [vmem:[%s2303_s1 + $0x54] ss:$8 sps:$4 sm:$0xff]   ;;  %v1571_v10 = vld [vmem:[%s2303_s1 + $0x50] ss:$8 sps:$4 sm:$0xff]  }
   0xf   : > { %841 = vmatpush1.bf16.msra.mxu1 %v1560_v3  ;;  %769 = vmatprep.subr.bf16.mxu0 %v1561_v4  ;;  %v1566_v7 = vld [vmem:[%s2303_s1 + $0x160] ss:$8 sps:$4 sm:$0xff]   ;;  %v1569_v9 = vld [vmem:[%s2303_s1 + $0x154] ss:$8 sps:$4 sm:$0xff]   ;;  %v1572_v11 = vld [vmem:[%s2303_s1 + $0x150] ss:$8 sps:$4 sm:$0xff]  }
  0x10   : > { %842 = vmatprep.subr.bf16.mxu1 %v1563_v5  ;;  %v1573_v12 = vld [vmem:[%s2303_s1 + $0x44] ss:$8 sps:$4 sm:$0xff]   ;;  %v1577_v14 = vld [vmem:[%s2303_s1 + $0x40] ss:$8 sps:$4 sm:$0xff]   ;;  %v1579_v16 = vld [vmem:[%s2303_s1 + $0x34] ss:$8 sps:$4 sm:$0xff]  }
  0x11   : > { %v1575_v13 = vld [vmem:[%s2303_s1 + $0x144] ss:$8 sps:$4 sm:$0xff]   ;;  %v1578_v15 = vld [vmem:[%s2303_s1 + $0x140] ss:$8 sps:$4 sm:$0xff]   ;;  %v1581_v17 = vld [vmem:[%s2303_s1 + $0x134] ss:$8 sps:$4 sm:$0xff]  }
  0x12   : > { %770 = vmatpush1.bf16.msra.mxu0 %v1565_v6  ;;  %v1583_v18 = vld [vmem:[%s2303_s1 + $0x30] ss:$8 sps:$4 sm:$0xff]   ;;  %v1585_v20 = vld [vmem:[%s2303_s1 + $0x24] ss:$8 sps:$4 sm:$0xff]   ;;  %v1589_v22 = vld [vmem:[%s2303_s1 + $0x20] ss:$8 sps:$4 sm:$0xff]  }
  0x13   : > { %843 = vmatpush1.bf16.msra.mxu1 %v1566_v7  ;;  %771 = vmatprep.subr.bf16.mxu0 %v1567_v8  ;;  %v1584_v19 = vld [vmem:[%s2303_s1 + $0x130] ss:$8 sps:$4 sm:$0xff]   ;;  %v1587_v21 = vld [vmem:[%s2303_s1 + $0x124] ss:$8 sps:$4 sm:$0xff]   ;;  %v1590_v23 = vld [vmem:[%s2303_s1 + $0x120] ss:$8 sps:$4 sm:$0xff]  }
  0x14   : > { %844 = vmatprep.subr.bf16.mxu1 %v1569_v9  ;;  %v1591_v24 = vld [vmem:[%s2303_s1 + $0x14] ss:$8 sps:$4 sm:$0xff]   ;;  %v1595_v26 = vld [vmem:[%s2303_s1 + $0x10] ss:$8 sps:$4 sm:$0xff]   ;;  %v1597_v28 = vld [vmem:[%s2303_s1 + $0x4] ss:$8 sps:$4 sm:$0xff]  }
  0x15   : > { %v1593_v25 = vld [vmem:[%s2303_s1 + $0x114] ss:$8 sps:$4 sm:$0xff]   ;;  %v1596_v27 = vld [vmem:[%s2303_s1 + $0x110] ss:$8 sps:$4 sm:$0xff]   ;;  %v1599_v29 = vld [vmem:[%s2303_s1 + $0x104] ss:$8 sps:$4 sm:$0xff]  }
  0x16   : > { %772 = vmatpush1.bf16.msra.mxu0 %v1571_v10  ;;  %v1601_v30 = vld [vmem:[%s2303_s1] ss:$8 sps:$4 sm:$0xff]   ;;  %v1603_v32 = vld [vmem:[%s2303_s1 + $0xf4] ss:$8 sps:$4 sm:$0xff]   ;;  %v1607_v34 = vld [vmem:[%s2303_s1 + $0xf0] ss:$8 sps:$4 sm:$0xff]  }
  0x17   : > { %845 = vmatpush1.bf16.msra.mxu1 %v1572_v11  ;;  %773 = vmatprep.subr.bf16.mxu0 %v1573_v12  ;;  %v1602_v31 = vld [vmem:[%s2303_s1 + $0x100] ss:$8 sps:$4 sm:$0xff]   ;;  %v1605_v33 = vld [vmem:[%s2303_s1 + $0x1f4] ss:$8 sps:$4 sm:$0xff]   ;;  %v1608_v35 = vld [vmem:[%s2303_s1 + $0x1f0] ss:$8 sps:$4 sm:$0xff]  }
  0x18   : > { %846 = vmatprep.subr.bf16.mxu1 %v1575_v13  ;;  %v1609_v36 = vld [vmem:[%s2303_s1 + $0xe4] ss:$8 sps:$4 sm:$0xff]   ;;  %s2312_s15 = smov (!%p230_p4, %s1693_s15), 1  ;;  %v1613_v38 = vld [vmem:[%s2303_s1 + $0xe0] ss:$8 sps:$4 sm:$0xff]   ;;  %v1051_v2 = vld [vmem:[%s2305_s3 + $0xf8] sm:$0xff] }
  0x19   : > { %v1611_v37 = vld [vmem:[%s2303_s1 + $0x1e4] ss:$8 sps:$4 sm:$0xff]   ;;  %v1614_v39 = vld [vmem:[%s2303_s1 + $0x1e0] ss:$8 sps:$4 sm:$0xff]   ;;  %v1615_v40 = vld [vmem:[%s2303_s1 + $0xd4] ss:$8 sps:$4 sm:$0xff]  }
  0x1a   : > { %774 = vmatpush1.bf16.msra.mxu0 %v1577_v14  ;;  %v1617_v41 = vld [vmem:[%s2303_s1 + $0x1d4] ss:$8 sps:$4 sm:$0xff]   ;;  %s1529_s11 = sshll.u32 %s2312_s15, 7  ;;  %v1619_v42 = vld [vmem:[%s2303_s1 + $0xd0] ss:$8 sps:$4 sm:$0xff]   ;;  %v1049_v8 = vld [vmem:[%s2305_s3 + $0xe8] sm:$0xff] }
  0x1b   : > { %847 = vmatpush1.bf16.msra.mxu1 %v1578_v15  ;;  %775 = vmatprep.subr.bf16.mxu0 %v1579_v16  ;;  %v1620_v43 = vld [vmem:[%s2303_s1 + $0x1d0] ss:$8 sps:$4 sm:$0xff]   ;;  %v1621_v44 = vld [vmem:[%s2303_s1 + $0xc4] ss:$8 sps:$4 sm:$0xff]   ;;  %s1893_s24 = scalar_lea.vmem %s2302_s0, %s1529_s11  ;;  %v1625_v46 = vld [vmem:[%s2303_s1 + $0xc0] ss:$8 sps:$4 sm:$0xff]   ;;  %s2266_s30 = scalar_lea.vmem %s2306_s4, %s1529_s11 }
  0x1c   : > { %848 = vmatprep.subr.bf16.mxu1 %v1581_v17  ;;  %v1623_v45 = vld [vmem:[%s2303_s1 + $0x1c4] ss:$8 sps:$4 sm:$0xff]   ;;  %v1626_v47 = vld [vmem:[%s2303_s1 + $0x1c0] ss:$8 sps:$4 sm:$0xff]   ;;  %v1627_v48 = vld [vmem:[%s2303_s1 + $0xb4] ss:$8 sps:$4 sm:$0xff]  }
  0x1d   : > { %v1653_v49 = vld [vmem:[%s1893_s24 + $0x4] ss:$16 sps:$4 sm:$0xff]   ;;  %v1656_v51 = vld [vmem:[%s1893_s24 + $0xc] ss:$16 sps:$4 sm:$0xff]   ;;  %v1631_v52 = vld [vmem:[%s2303_s1 + $0xb0] ss:$8 sps:$4 sm:$0xff]  }
  0x1e   : > { %776 = vmatpush1.bf16.msra.mxu0 %v1583_v18  ;;  %v1629_v50 = vld [vmem:[%s2303_s1 + $0x1b4] ss:$8 sps:$4 sm:$0xff]   ;;  %799 = vmatprep.mubr.bf16.mxu0 %v1653_v49  ;;  %v1632_v53 = vld [vmem:[%s2303_s1 + $0x1b0] ss:$8 sps:$4 sm:$0xff]   ;;  %v1633_v54 = vld [vmem:[%s2303_s1 + $0xa4] ss:$8 sps:$4 sm:$0xff]  }
  0x1f   : > { %849 = vmatpush1.bf16.msra.mxu1 %v1584_v19  ;;  %777 = vmatprep.subr.bf16.mxu0 %v1585_v20  ;;  %v1635_v55 = vld [vmem:[%s2303_s1 + $0x1a4] ss:$8 sps:$4 sm:$0xff]   ;;  %v1637_v56 = vld [vmem:[%s2303_s1 + $0xa0] ss:$8 sps:$4 sm:$0xff]   ;;  %v1639_v58 = vld [vmem:[%s2303_s1 + $0x94] ss:$8 sps:$4 sm:$0xff]  }
  0x20   : > { %850 = vmatprep.subr.bf16.mxu1 %v1587_v21  ;;  %872 = vmatprep.mubr.bf16.mxu1 %v1656_v51  ;;  %v1638_v57 = vld [vmem:[%s2303_s1 + $0x1a0] ss:$8 sps:$4 sm:$0xff]   ;;  %v1641_v59 = vld [vmem:[%s2303_s1 + $0x194] ss:$8 sps:$4 sm:$0xff]   ;;  %v1643_v60 = vld [vmem:[%s2303_s1 + $0x90] ss:$8 sps:$4 sm:$0xff]  }
  0x21   : > { %v1644_v61 = vld [vmem:[%s2303_s1 + $0x190] ss:$8 sps:$4 sm:$0xff]   ;;  %v1645_v62 = vld [vmem:[%s2303_s1 + $0x84] ss:$8 sps:$4 sm:$0xff]   ;;  %v1649_v0 = vld [vmem:[%s2303_s1 + $0x80] ss:$8 sps:$4 sm:$0xff]  }
  0x22   : > { %778 = vmatpush1.bf16.msra.mxu0 %v1589_v22  ;;  %v1647_v63 = vld [vmem:[%s2303_s1 + $0x184] ss:$8 sps:$4 sm:$0xff]   ;;  %v1650_v1 = vld [vmem:[%s2303_s1 + $0x180] ss:$8 sps:$4 sm:$0xff]   ;;  %v1050_v7 = vld [vmem:[%s2305_s3 + $0xf0] sm:$0xff] }
  0x23   : > { %851 = vmatpush1.bf16.msra.mxu1 %v1590_v23  ;;  %779 = vmatprep.subr.bf16.mxu0 %v1591_v24  ;;  %v1651_v3 = vld [vmem:[%s1893_s24] ss:$16 sps:$4 sm:$0xff]   ;;  %v1654_v4 = vld [vmem:[%s1893_s24 + $0x8] ss:$16 sps:$4 sm:$0xff]   ;;  %v1657_v5 = vld [vmem:[%s1893_s24 + $0x24] ss:$16 sps:$4 sm:$0xff]  }
  0x24   : > { %852 = vmatprep.subr.bf16.mxu1 %v1593_v25  ;;  %v1659_v6 = vld [vmem:[%s1893_s24 + $0x2c] ss:$16 sps:$4 sm:$0xff]   ;;  %v1048_v9 = vld [vmem:[%s2305_s3 + $0xe0] sm:$0xff]  ;;  %v1046_v11 = vld [vmem:[%s2305_s3 + $0xd0] sm:$0xff] }
  0x25   : > { %v1047_v10 = vld [vmem:[%s2305_s3 + $0xd8] sm:$0xff]  ;;  %v1661_v12 = vld [vmem:[%s1893_s24 + $0x20] ss:$16 sps:$4 sm:$0xff]   ;;  %v1045_v14 = vld [vmem:[%s2305_s3 + $0xc8] sm:$0xff] }
  0x26   : > { %780 = vmatpush1.bf16.msra.mxu0 %v1595_v26  ;;  %v1662_v13 = vld [vmem:[%s1893_s24 + $0x28] ss:$16 sps:$4 sm:$0xff]   ;;  %v1663_v15 = vld [vmem:[%s1893_s24 + $0x44] ss:$16 sps:$4 sm:$0xff]   ;;  %v1665_v16 = vld [vmem:[%s1893_s24 + $0x4c] ss:$16 sps:$4 sm:$0xff]  }
  0x27   : > { %853 = vmatpush1.bf16.msra.mxu1 %v1596_v27  ;;  %781 = vmatprep.subr.bf16.mxu0 %v1597_v28  ;;  %v1044_v17 = vld [vmem:[%s2305_s3 + $0xc0] sm:$0xff]  ;;  %v1043_v18 = vld [vmem:[%s2305_s3 + $0xb8] sm:$0xff]  ;;  %v1042_v19 = vld [vmem:[%s2305_s3 + $0xb0] sm:$0xff] }
  0x28   : > { %854 = vmatprep.subr.bf16.mxu1 %v1599_v29  ;;  %v1041_v20 = vld [vmem:[%s2305_s3 + $0xa8] sm:$0xff]  ;;  %v1040_v21 = vld [vmem:[%s2305_s3 + $0xa0] sm:$0xff]  ;;  %v1039_v28 = vld [vmem:[%s2305_s3 + $0x98] sm:$0xff] }
  0x29   : > { %v1667_v22 = vld [vmem:[%s1893_s24 + $0x40] ss:$16 sps:$4 sm:$0xff]   ;;  %v1668_v23 = vld [vmem:[%s1893_s24 + $0x48] ss:$16 sps:$4 sm:$0xff]   ;;  %v1669_v24 = vld [vmem:[%s1893_s24 + $0x64] ss:$16 sps:$4 sm:$0xff]  }
  0x2a   : > { %782 = vmatpush1.bf16.msra.mxu0 %v1601_v30  ;;  %v1671_v25 = vld [vmem:[%s1893_s24 + $0x6c] ss:$16 sps:$4 sm:$0xff]   ;;  %v1673_v26 = vld [vmem:[%s1893_s24 + $0x60] ss:$16 sps:$4 sm:$0xff]   ;;  %v1674_v27 = vld [vmem:[%s1893_s24 + $0x68] ss:$16 sps:$4 sm:$0xff]  }
  0x2b   : > { %855 = vmatpush1.bf16.msra.mxu1 %v1602_v31  ;;  %783 = vmatprep.subr.bf16.mxu0 %v1603_v32  ;;  %v1038_v29 = vld [vmem:[%s2305_s3 + $0x90] sm:$0xff]  ;;  %v1037_v30 = vld [vmem:[%s2305_s3 + $0x88] sm:$0xff]  ;;  %v1036_v31 = vld [vmem:[%s2305_s3 + $0x80] sm:$0xff] }
  0x2c   : > { %856 = vmatprep.subr.bf16.mxu1 %v1605_v33  ;;  %v1035_v32 = vld [vmem:[%s2305_s3 + $0x78] sm:$0xff]  ;;  %v1034_v33 = vld [vmem:[%s2305_s3 + $0x70] sm:$0xff]  ;;  %v1080_v51 = vld [vmem:[%s2305_s3 + $0x1e0] sm:$0xff] }
  0x2d   : > { %v1082_v49 = vld [vmem:[%s2305_s3 + $0x1f0] sm:$0xff] }
  0x2e   : > { %784 = vmatpush2.bf16.msra.mxu0 %v1607_v34  ;;  %v1033_v34 = vld [vmem:[%s2305_s3 + $0x68] sm:$0xff] }
  0x2f   : > { %857 = vmatpush2.bf16.msra.mxu1 %v1608_v35  ;;  %785 = vmatprep.subr.bf16.mxu0 %v1609_v36  ;;  %v1032_v35 = vld [vmem:[%s2305_s3 + $0x60] sm:$0xff]  ;;  %v1031_v36 = vld [vmem:[%s2305_s3 + $0x58] sm:$0xff] }
  0x30   : > { %858 = vmatprep.subr.bf16.mxu1 %v1611_v37  ;;  %v1030_v37 = vld [vmem:[%s2305_s3 + $0x50] sm:$0xff] }
  0x32   : > { %786 = vmatpush2.bf16.msra.mxu0 %v1613_v38  ;;  %v1029_v38 = vld [vmem:[%s2305_s3 + $0x48] sm:$0xff] }
  0x33   : > { %859 = vmatpush2.bf16.msra.mxu1 %v1614_v39  ;;  %787 = vmatprep.subr.bf16.mxu0 %v1615_v40  ;;  %v1028_v39 = vld [vmem:[%s2305_s3 + $0x40] sm:$0xff]  ;;  %v1027_v40 = vld [vmem:[%s2305_s3 + $0x38] sm:$0xff] }
  0x34   : > { %860 = vmatprep.subr.bf16.mxu1 %v1617_v41  ;;  %v1026_v41 = vld [vmem:[%s2305_s3 + $0x30] sm:$0xff] }
  0x36   : > { %788 = vmatpush2.bf16.msra.mxu0 %v1619_v42  ;;  %v1025_v42 = vld [vmem:[%s2305_s3 + $0x28] sm:$0xff] }
  0x37   : > { %861 = vmatpush2.bf16.msra.mxu1 %v1620_v43  ;;  %789 = vmatprep.subr.bf16.mxu0 %v1621_v44  ;;  %v1024_v43 = vld [vmem:[%s2305_s3 + $0x20] sm:$0xff]  ;;  %v1023_v44 = vld [vmem:[%s2305_s3 + $0x18] sm:$0xff] }
  0x38   : > { %862 = vmatprep.subr.bf16.mxu1 %v1623_v45  ;;  %v1022_v45 = vld [vmem:[%s2305_s3 + $0x10] sm:$0xff] }
  0x3a   : > { %790 = vmatpush2.bf16.msra.mxu0 %v1625_v46  ;;  %v1021_v46 = vld [vmem:[%s2305_s3 + $0x8] sm:$0xff] }
  0x3b   : > { %863 = vmatpush2.bf16.msra.mxu1 %v1626_v47  ;;  %791 = vmatprep.subr.bf16.mxu0 %v1627_v48  ;;  %v1020_v47 = vld [vmem:[%s2305_s3] sm:$0xff]  ;;  %v1083_v48 = vld [vmem:[%s2305_s3 + $0x1f8] sm:$0xff] }
  0x3c   : > { %864 = vmatprep.subr.bf16.mxu1 %v1629_v50  ;;  %v1081_v50 = vld [vmem:[%s2305_s3 + $0x1e8] sm:$0xff] }
  0x3e   : > { %792 = vmatpush2.bf16.msra.mxu0 %v1631_v52  ;;  %v1079_v52 = vld [vmem:[%s2305_s3 + $0x1d8] sm:$0xff] }
  0x3f   : > { %865 = vmatpush2.bf16.msra.mxu1 %v1632_v53  ;;  %793 = vmatprep.subr.bf16.mxu0 %v1633_v54  ;;  %v1078_v53 = vld [vmem:[%s2305_s3 + $0x1d0] sm:$0xff]  ;;  %v1077_v54 = vld [vmem:[%s2305_s3 + $0x1c8] sm:$0xff] }
  0x40   : > { %866 = vmatprep.subr.bf16.mxu1 %v1635_v55  ;;  %v1076_v55 = vld [vmem:[%s2305_s3 + $0x1c0] sm:$0xff] }
  0x42   : > { %794 = vmatpush2.bf16.msra.mxu0 %v1637_v56  ;;  %v1075_v56 = vld [vmem:[%s2305_s3 + $0x1b8] sm:$0xff] }
  0x43   : > { %867 = vmatpush2.bf16.msra.mxu1 %v1638_v57  ;;  %795 = vmatprep.subr.bf16.mxu0 %v1639_v58  ;;  %v1074_v57 = vld [vmem:[%s2305_s3 + $0x1b0] sm:$0xff]  ;;  %v1073_v58 = vld [vmem:[%s2305_s3 + $0x1a8] sm:$0xff] }
  0x44   : > { %868 = vmatprep.subr.bf16.mxu1 %v1641_v59  ;;  %v1072_v59 = vld [vmem:[%s2305_s3 + $0x1a0] sm:$0xff] }
  0x46   : > { %796 = vmatpush2.bf16.msra.mxu0 %v1643_v60  ;;  %v1071_v60 = vld [vmem:[%s2305_s3 + $0x198] sm:$0xff] }
  0x47   : > { %869 = vmatpush2.bf16.msra.mxu1 %v1644_v61  ;;  %797 = vmatprep.subr.bf16.mxu0 %v1645_v62  ;;  %v1070_v61 = vld [vmem:[%s2305_s3 + $0x190] sm:$0xff]  ;;  %v1069_v62 = vld [vmem:[%s2305_s3 + $0x188] sm:$0xff] }
  0x48   : > { %870 = vmatprep.subr.bf16.mxu1 %v1647_v63  ;;  %v1068_v63 = vld [vmem:[%s2305_s3 + $0x180] sm:$0xff] }
  0x4a   : > { %798 = vmatpush2.bf16.msra.mxu0 %v1649_v0  ;;  %v1067_v0 = vld [vmem:[%s2305_s3 + $0x178] sm:$0xff] }
  0x4b   : > { %871 = vmatpush2.bf16.msra.mxu1 %v1650_v1  ;;  %1084 = vmatprep.subr.mxu0 %v1051_v2  ;;  %v1066_v1 = vld [vmem:[%s2305_s3 + $0x170] sm:$0xff] }
  0x4c   : > { %1223 = vmatprep.subr.mxu1 %v1051_v2  ;;  %v1065_v2 = vld [vmem:[%s2305_s3 + $0x168] sm:$0xff] }
  0x4d   : > { %800 = vmatmul.mubr.bf16.vlgmr.msra.gmra.mxu0 %v1651_v3  ;;  %v1064_v3 = vld [vmem:[%s2305_s3 + $0x160] sm:$0xff] }
  0x4e   : > { %873 = vmatmul.mubr.bf16.vlgmr.msra.gmra.mxu1 %v1654_v4  ;;  %809 = vmatprep.mubr.bf16.mxu0 %v1657_v5  ;;  %v1063_v4 = vld [vmem:[%s2305_s3 + $0x158] sm:$0xff]  ;;  %v1062_v5 = vld [vmem:[%s2305_s3 + $0x150] sm:$0xff] }
  0x4f   : > { %882 = vmatprep.mubr.bf16.mxu1 %v1659_v6  ;;  %1085 = vmatpush1.msra.mxu0 %v1050_v7  ;;  %v1061_v6 = vld [vmem:[%s2305_s3 + $0x148] sm:$0xff] }
  0x50   : > { %1224 = vmatpush1.msra.mxu1 %v1050_v7  ;;  %1086 = vmatprep.subr.mxu0 %v1049_v8  ;;  %v1060_v7 = vld [vmem:[%s2305_s3 + $0x140] sm:$0xff] }
  0x51   : > { %1225 = vmatprep.subr.mxu1 %v1049_v8  ;;  %1087 = vmatpush1.msra.mxu0 %v1048_v9  ;;  %v1059_v8 = vld [vmem:[%s2305_s3 + $0x138] sm:$0xff] }
  0x52   : > { %1226 = vmatpush1.msra.mxu1 %v1048_v9  ;;  %1088 = vmatprep.subr.mxu0 %v1047_v10  ;;  %v1058_v9 = vld [vmem:[%s2305_s3 + $0x130] sm:$0xff] }
  0x53   : > { %1227 = vmatprep.subr.mxu1 %v1047_v10  ;;  %1089 = vmatpush1.msra.mxu0 %v1046_v11  ;;  %v1057_v10 = vld [vmem:[%s2305_s3 + $0x128] sm:$0xff] }
  0x54   : > { %1228 = vmatpush1.msra.mxu1 %v1046_v11  ;;  %1090 = vmatprep.subr.mxu0 %v1045_v14  ;;  %v1056_v11 = vld [vmem:[%s2305_s3 + $0x120] sm:$0xff] }
  0x55   : > { %1229 = vmatprep.subr.mxu1 %v1045_v14  ;;  %810 = vmatmul.mubr.bf16.gmra.mxu0 %v1661_v12  ;;  %v1055_v12 = vld [vmem:[%s2305_s3 + $0x118] sm:$0xff]  ;;  %v1053_v14 = vld [vmem:[%s2305_s3 + $0x108] sm:$0xff] }
  0x56   : > { %883 = vmatmul.mubr.bf16.gmra.mxu1 %v1662_v13  ;;  %819 = vmatprep.mubr.bf16.mxu0 %v1663_v15  ;;  %v1054_v13 = vld [vmem:[%s2305_s3 + $0x110] sm:$0xff]  ;;  %v1052_v15 = vld [vmem:[%s2305_s3 + $0x100] sm:$0xff] }
  0x57   : > { %892 = vmatprep.mubr.bf16.mxu1 %v1665_v16  ;;  %1091 = vmatpush1.msra.mxu0 %v1044_v17 }
  0x58   : > { %1230 = vmatpush1.msra.mxu1 %v1044_v17  ;;  %1092 = vmatprep.subr.mxu0 %v1043_v18 }
  0x59   : > { %1231 = vmatprep.subr.mxu1 %v1043_v18  ;;  %1093 = vmatpush1.msra.mxu0 %v1042_v19 }
  0x5a   : > { %1232 = vmatpush1.msra.mxu1 %v1042_v19  ;;  %1094 = vmatprep.subr.mxu0 %v1041_v20 }
  0x5b   : > { %1233 = vmatprep.subr.mxu1 %v1041_v20  ;;  %1095 = vmatpush1.msra.mxu0 %v1040_v21  ;;  %v966_v20 = vlaneseq }
  0x5c   : > { %1234 = vmatpush1.msra.mxu1 %v1040_v21  ;;  %1096 = vmatprep.subr.mxu0 %v1039_v28 }
  0x5d   : > { %820 = vmatmul.mubr.bf16.gmra.mxu0 %v1667_v22  ;;  %1235 = vmatprep.subr.mxu1 %v1039_v28 }
  0x5e   : > { %893 = vmatmul.mubr.bf16.gmra.mxu1 %v1668_v23  ;;  %829 = vmatprep.mubr.bf16.mxu0 %v1669_v24 }
  0x5f   : > { %902 = vmatprep.mubr.bf16.mxu1 %v1671_v25  ;;  %1097 = vmatpush1.msra.mxu0 %v1038_v29  ;;  %v967_v25 = vshrl.u32 %v966_v20, 7 }
  0x60   : > { %1236 = vmatpush1.msra.mxu1 %v1038_v29  ;;  %1098 = vmatprep.subr.mxu0 %v1037_v30 }
  0x61   : > { %1237 = vmatprep.subr.mxu1 %v1037_v30  ;;  %1099 = vmatpush1.msra.mxu0 %v1036_v31  ;;  %v2160_v30 = vsub.s32 0, %v967_v25 }
  0x62   : > { %1238 = vmatpush1.msra.mxu1 %v1036_v31  ;;  %1100 = vmatprep.subr.mxu0 %v1035_v32  ;;  %v964_v31 = vld [vmem:[%s2304_s2] sm:$0x3] }
  0x63   : > { %1239 = vmatprep.subr.mxu1 %v1035_v32  ;;  %1101 = vmatpush1.msra.mxu0 %v1034_v33  ;;  %v972_v32 = vsub.s32 1, %v967_v25 }
  0x64   : > { %1240 = vmatpush1.msra.mxu1 %v1034_v33  ;;  %1102 = vmatprep.subr.mxu0 %v1033_v34 }
  0x65   : > { %830 = vmatmul.mubr.bf16.gmra.mxu0 %v1673_v26  ;;  %1241 = vmatprep.subr.mxu1 %v1033_v34 }
  0x66   : > { %903 = vmatmul.mubr.bf16.gmra.mxu1 %v1674_v27  ;;  %1103 = vmatpush1.msra.mxu0 %v1032_v35 }
  0x67   : > { %1242 = vmatpush1.msra.mxu1 %v1032_v35  ;;  %1104 = vmatprep.subr.mxu0 %v1031_v36 }
  0x68   : > { %1243 = vmatprep.subr.mxu1 %v1031_v36  ;;  %1105 = vmatpush1.msra.mxu0 %v1030_v37 }
  0x69   : > { %1244 = vmatpush1.msra.mxu1 %v1030_v37  ;;  %1106 = vmatprep.subr.mxu0 %v1029_v38 }
  0x6a   : > { %1245 = vmatprep.subr.mxu1 %v1029_v38  ;;  %1107 = vmatpush1.msra.mxu0 %v1028_v39 }
  0x6b   : > { %1246 = vmatpush1.msra.mxu1 %v1028_v39  ;;  %1108 = vmatprep.subr.mxu0 %v1027_v40 }
  0x6c   : > { %1247 = vmatprep.subr.mxu1 %v1027_v40  ;;  %1109 = vmatpush1.msra.mxu0 %v1026_v41  ;;  %v969_v40 = vrot.slane %v964_v31, %v2160_v30 }
  0x6d   : > { %1248 = vmatpush1.msra.mxu1 %v1026_v41  ;;  %1110 = vmatprep.subr.mxu0 %v1025_v42 }
  0x6e   : > { %1249 = vmatprep.subr.mxu1 %v1025_v42  ;;  %1111 = vmatpush1.msra.mxu0 %v1024_v43 }
  0x6f   : > { %1250 = vmatpush1.msra.mxu1 %v1024_v43  ;;  %1112 = vmatprep.subr.mxu0 %v1023_v44  ;;  %v973_v43 = vrot.slane %v964_v31, %v972_v32 }
  0x70   : > { %1251 = vmatprep.subr.mxu1 %v1023_v44  ;;  %1113 = vmatpush1.msra.mxu0 %v1022_v45 }
  0x71   : > { %1252 = vmatpush1.msra.mxu1 %v1022_v45  ;;  %1114 = vmatprep.subr.mxu0 %v1021_v46 }
  0x72   : > { %1253 = vmatprep.subr.mxu1 %v1021_v46  ;;  %1115 = vmatpush1.msra.mxu0 %v1020_v47 }
  0x73   : > { %1254 = vmatpush1.msra.mxu1 %v1020_v47  ;;  %1116 = vmatprep.subr.mxu0 %v1083_v48 }
  0x74   : > { %1255 = vmatprep.subr.mxu1 %v1083_v48  ;;  %1117 = vmatpush2.msra.mxu0 %v1082_v49 }
  0x75   : > { %1256 = vmatpush2.msra.mxu1 %v1082_v49  ;;  %1118 = vmatprep.subr.mxu0 %v1081_v50 }
  0x76   : > { %1257 = vmatprep.subr.mxu1 %v1081_v50  ;;  %1119 = vmatpush2.msra.mxu0 %v1080_v51 }
  0x77   : > { %1258 = vmatpush2.msra.mxu1 %v1080_v51  ;;  %1120 = vmatprep.subr.mxu0 %v1079_v52 }
  0x78   : > { %1259 = vmatprep.subr.mxu1 %v1079_v52  ;;  %1121 = vmatpush2.msra.mxu0 %v1078_v53 }
  0x79   : > { %1260 = vmatpush2.msra.mxu1 %v1078_v53  ;;  %1122 = vmatprep.subr.mxu0 %v1077_v54 }
  0x7a   : > { %1261 = vmatprep.subr.mxu1 %v1077_v54  ;;  %1123 = vmatpush2.msra.mxu0 %v1076_v55 }
  0x7b   : > { %1262 = vmatpush2.msra.mxu1 %v1076_v55  ;;  %1124 = vmatprep.subr.mxu0 %v1075_v56 }
  0x7c   : > { %1263 = vmatprep.subr.mxu1 %v1075_v56  ;;  %1125 = vmatpush2.msra.mxu0 %v1074_v57 }
  0x7d   : > { %1264 = vmatpush2.msra.mxu1 %v1074_v57  ;;  %1126 = vmatprep.subr.mxu0 %v1073_v58 }
  0x7e   : > { %1265 = vmatprep.subr.mxu1 %v1073_v58  ;;  %1127 = vmatpush2.msra.mxu0 %v1072_v59 }
  0x7f   : > { %1266 = vmatpush2.msra.mxu1 %v1072_v59  ;;  %1128 = vmatprep.subr.mxu0 %v1071_v60 }
  0x80   : > { %1267 = vmatprep.subr.mxu1 %v1071_v60  ;;  %1129 = vmatpush2.msra.mxu0 %v1070_v61 }
  0x81   : > { %1268 = vmatpush2.msra.mxu1 %v1070_v61  ;;  %1130 = vmatprep.subr.mxu0 %v1069_v62 }
  0x82   : > { %1269 = vmatprep.subr.mxu1 %v1069_v62  ;;  %1131 = vmatpush2.msra.mxu0 %v1068_v63 }
  0x83   : > { %1270 = vmatpush2.msra.mxu1 %v1068_v63  ;;  %1132 = vmatprep.subr.mxu0 %v1067_v0 }
  0x84   : > { %1271 = vmatprep.subr.mxu1 %v1067_v0  ;;  %1133 = vmatpush2.msra.mxu0 %v1066_v1 }
  0x85   : > { %1272 = vmatpush2.msra.mxu1 %v1066_v1  ;;  %1134 = vmatprep.subr.mxu0 %v1065_v2 }
  0x86   : > { %1273 = vmatprep.subr.mxu1 %v1065_v2  ;;  %1135 = vmatpush2.msra.mxu0 %v1064_v3 }
  0x87   : > { %1274 = vmatpush2.msra.mxu1 %v1064_v3  ;;  %1136 = vmatprep.subr.mxu0 %v1063_v4 }
  0x88   : > { %1275 = vmatprep.subr.mxu1 %v1063_v4  ;;  %1137 = vmatpush2.msra.mxu0 %v1062_v5 }
  0x89   : > { %1276 = vmatpush2.msra.mxu1 %v1062_v5  ;;  %1138 = vmatprep.subr.mxu0 %v1061_v6 }
  0x8a   : > { %1277 = vmatprep.subr.mxu1 %v1061_v6  ;;  %1139 = vmatpush2.msra.mxu0 %v1060_v7 }
  0x8b   : > { %1278 = vmatpush2.msra.mxu1 %v1060_v7  ;;  %1140 = vmatprep.subr.mxu0 %v1059_v8 }
  0x8c   : > { %1279 = vmatprep.subr.mxu1 %v1059_v8  ;;  %1141 = vmatpush2.msra.mxu0 %v1058_v9 }
  0x8d   : > { %1280 = vmatpush2.msra.mxu1 %v1058_v9  ;;  %1142 = vmatprep.subr.mxu0 %v1057_v10 }
  0x8e   : > { %1281 = vmatprep.subr.mxu1 %v1057_v10  ;;  %1143 = vmatpush2.msra.mxu0 %v1056_v11 }
  0x8f   : > { %1282 = vmatpush2.msra.mxu1 %v1056_v11  ;;  %1144 = vmatprep.subr.mxu0 %v1055_v12 }
  0x90   : > { %1283 = vmatprep.subr.mxu1 %v1055_v12  ;;  %1145 = vmatpush2.msra.mxu0 %v1054_v13 }
  0x91   : > { %1284 = vmatpush2.msra.mxu1 %v1054_v13  ;;  %1146 = vmatprep.subr.mxu0 %v1053_v14 }
  0x92   : > { %1285 = vmatprep.subr.mxu1 %v1053_v14  ;;  %1147 = vmatpush2.msra.mxu0 %v1052_v15 }
  0x93   : > { %1286 = vmatpush2.msra.mxu1 %v1052_v15 }
 0x10d   : > { %v801_v16 = vpop.f32.mrf.mxu0 }
 0x10e   : > { %v874_v17 = vpop.f32.mrf.mxu1 }
 0x10f   : > { %v803_v18 = vpop.f32.mrf.mxu0  ;;  %v875_v39 = vadd.f32 %v874_v17, %v801_v16 }
 0x110   : > { %v876_v19 = vpop.f32.mrf.mxu1 }
 0x111   : > { %v805_v21 = vpop.f32.mrf.mxu0  ;;  %v877_v42 = vadd.f32 %v876_v19, %v803_v18  ;;  %v2170_v53 = vadd.f32 %v969_v40, %v875_v39 }
 0x112   : > { %v878_v22 = vpop.f32.mrf.mxu1 }
 0x113   : > { %v807_v23 = vpop.f32.mrf.mxu0  ;;  %v879_v35 = vadd.f32 %v878_v22, %v805_v21  ;;  %v2174_v56 = vadd.f32 %v973_v43, %v877_v42 }
 0x114   : > { %v880_v24 = vpop.f32.mrf.mxu1 }
 0x115   : > { %v811_v26 = vpop.f32.mrf.mxu0  ;;  %v881_v36 = vadd.f32 %v880_v24, %v807_v23  ;;  %v2166_v47 = vadd.f32 %v969_v40, %v879_v35 }
 0x116   : > { %v884_v27 = vpop.f32.mrf.mxu1 }
 0x117   : > { %v813_v28 = vpop.f32.mrf.mxu0  ;;  %v885_v41 = vadd.f32 %v884_v27, %v811_v26  ;;  %v2168_v49 = vadd.f32 %v973_v43, %v881_v36  ;;  %v992_v60 = vadd.f32 %v2166_v47, %v2170_v53 }
 0x118   : > { %v886_v29 = vpop.f32.mrf.mxu1 }
 0x119   : > { %v815_v33 = vpop.f32.mrf.mxu0  ;;  %v887_v44 = vadd.f32 %v886_v29, %v813_v28  ;;  %v2172_v54 = vadd.f32 %v969_v40, %v885_v41  ;;  %v1005_v0 = vadd.f32 %v2168_v49, %v2174_v56 }
 0x11a   : > { %v888_v34 = vpop.f32.mrf.mxu1 }
 0x11b   : > { %v817_v37 = vpop.f32.mrf.mxu0  ;;  %v889_v48 = vadd.f32 %v888_v34, %v815_v33  ;;  %v2176_v57 = vadd.f32 %v973_v43, %v887_v44  ;;  %v993_v4 = vadd.f32 %v992_v60, %v2172_v54 }
 0x11c   : > { %v890_v38 = vpop.f32.mrf.mxu1 }
 0x11d   : > { %v821_v45 = vpop.f32.mrf.mxu0  ;;  %v891_v50 = vadd.f32 %v890_v38, %v817_v37  ;;  %v2180_v61 = vadd.f32 %v969_v40, %v889_v48  ;;  %v1006_v7 = vadd.f32 %v1005_v0, %v2176_v57 }
 0x11e   : > { %v894_v46 = vpop.f32.mrf.mxu1 }
 0x11f   : > { %v823_v51 = vpop.f32.mrf.mxu0  ;;  %v895_v55 = vadd.f32 %v894_v46, %v821_v45  ;;  %v983_v1 = vadd.f32 %v973_v43, %v891_v50  ;;  %v994_v10 = vadd.f32 %v993_v4, %v2180_v61 }
 0x120   : > { %v896_v52 = vpop.f32.mrf.mxu1 }
 0x121   : > { %v825_v58 = vpop.f32.mrf.mxu0  ;;  %v897_v62 = vadd.f32 %v896_v52, %v823_v51  ;;  %v2185_v5 = vadd.f32 %v969_v40, %v895_v55  ;;  %v1007_v14 = vadd.f32 %v1006_v7, %v983_v1 }
 0x122   : > { %v898_v59 = vpop.f32.mrf.mxu1 }
 0x123   : > { %v899_v63 = vadd.f32 %v898_v59, %v825_v58  ;;  %v827_v2 = vpop.f32.mrf.mxu0  ;;  %v985_v11 = vadd.f32 %v973_v43, %v897_v62  ;;  %v995_v17 = vadd.f32 %v994_v10, %v2185_v5 }
 0x124   : > { %v900_v3 = vpop.f32.mrf.mxu1 }
 0x125   : > { %v901_v6 = vadd.f32 %v900_v3, %v827_v2  ;;  %v831_v8 = vpop.f32.mrf.mxu0  ;;  %v2189_v12 = vadd.f32 %v969_v40, %v899_v63  ;;  %v1008_v23 = vadd.f32 %v1007_v14, %v985_v11 }
 0x126   : > { %v904_v9 = vpop.f32.mrf.mxu1 }
 0x127   : > { %v905_v13 = vadd.f32 %v904_v9, %v831_v8  ;;  %v833_v15 = vpop.f32.mrf.mxu0  ;;  %v987_v18 = vadd.f32 %v973_v43, %v901_v6  ;;  %v996_v24 = vadd.f32 %v995_v17, %v2189_v12 }
 0x128   : > { %v906_v16 = vpop.f32.mrf.mxu1 }
 0x129   : > { %v2192_v19 = vadd.f32 %v969_v40, %v905_v13  ;;  %v907_v20 = vadd.f32 %v906_v16, %v833_v15  ;;  %v835_v21 = vpop.f32.mrf.mxu0  ;;  %v1009_v29 = vadd.f32 %v1008_v23, %v987_v18 }
 0x12a   : > { %v908_v22 = vpop.f32.mrf.mxu1 }
 0x12b   : > { %v989_v25 = vadd.f32 %v973_v43, %v907_v20  ;;  %v909_v26 = vadd.f32 %v908_v22, %v835_v21  ;;  %v837_v27 = vpop.f32.mrf.mxu0  ;;  %v997_v31 = vadd.f32 %v996_v24, %v2192_v19 }
 0x12c   : > { %v910_v28 = vpop.f32.mrf.mxu1 }
 0x12d   : > { %v990_v32 = vadd.f32 %v969_v40, %v909_v26  ;;  %v911_v33 = vadd.f32 %v910_v28, %v837_v27  ;;  %v1010_v34 = vadd.f32 %v1009_v29, %v989_v25 }
 0x12f   : > { %v998_v35 = vadd.f32 %v997_v31, %v990_v32  ;;  %v991_v36 = vadd.f32 %v973_v43, %v911_v33 }
 0x131   : > { %v999_v37 = vrot.slane %v998_v35, 4  ;;  %v1011_v38 = vadd.f32 %v1010_v34, %v991_v36 }
 0x133   : > { %v1000_v39 = vadd.f32 %v999_v37, %v998_v35  ;;  %v1012_v41 = vrot.slane %v1011_v38, 4 }
 0x135   : > { %v1001_v42 = vrot.slane %v1000_v39, 2  ;;  %v1013_v44 = vadd.f32 %v1012_v41, %v1011_v38 }
 0x137   : > { %v1002_v45 = vadd.f32 %v1001_v42, %v1000_v39  ;;  %v1014_v46 = vrot.slane %v1013_v44, 2 }
 0x139   : > { %v1003_v48 = vrot.slane %v1002_v45, 1  ;;  %v1015_v50 = vadd.f32 %v1014_v46, %v1013_v44 }
 0x13b   : > { %v1016_v51 = vrot.slane %v1015_v50, 1  ;;  %v1004_v52 = vadd.f32 %v1003_v48, %v1002_v45 }
 0x13d   : > { %v1017_v55 = vadd.f32 %v1016_v51, %v1015_v50  ;;  %v1018_v59 = vmul.f32 0.00390625, %v1004_v52 }
 0x13f   : > { %v1019_v58 = vmul.f32 0.00390625, %v1017_v55 }
 0x141   : > { %1148 = vmatprep.mubr.f32.mxu0 %v1019_v58 }
 0x142   : > { %1149 = vmatmul.mubr.f32.vlgmr.msra.gmra.mxu0 %v1018_v59 }
 0x202   : > { %v1150_v40 = vpop.f32.mrf.mxu0 }
 0x203   : > { %v1158_v43 = vrot.slane %v1150_v40, %v2160_v30 }
 0x204   : > { %v1152_v60 = vpop.f32.mrf.mxu0 }
 0x205   : > { %v1162_v62 = vrot.slane %v1152_v60, %v2160_v30  ;;  %v2199_v63 = vsub.f32 %v2170_v53, %v1158_v43  ;;  %v2202_v0 = vsub.f32 %v2166_v47, %v1158_v43  ;;  %v2220_v47 = vsub.f32 %v2172_v54, %v1158_v43 }
 0x206   : > { %v1171_v54 = vsub.f32 %v2185_v5, %v1158_v43  ;;  %v1173_v16 = vsub.f32 %v2189_v12, %v1158_v43  ;;  %v1175_v22 = vsub.f32 %v2192_v19, %v1158_v43  ;;  %v1177_v28 = vsub.f32 %v990_v32, %v1158_v43 }
 0x207   : > { %v2205_v2 = vsub.f32 %v2174_v56, %v1162_v62  ;;  %v2208_v3 = vsub.f32 %v2168_v49, %v1162_v62  ;;  %v2211_v4 = vsub.f32 %v2176_v57, %v1162_v62  ;;  %v2213_v6 = vsub.f32 %v983_v1, %v1162_v62 }
 0x208   : > { %v2222_v8 = vsub.f32 %v985_v11, %v1162_v62  ;;  %v2225_v56 = vsub.f32 %v2180_v61, %v1158_v43  ;;  %v1179_v1 = vmul.f32 %v2199_v63, %v2199_v63  ;;  %v1181_v9 = vmul.f32 %v2202_v0, %v2202_v0 }
 0x209   : > { %v1180_v7 = vmul.f32 %v2205_v2, %v2205_v2  ;;  %v1182_v53 = vmul.f32 %v2208_v3, %v2208_v3  ;;  %v1184_v49 = vmul.f32 %v2211_v4, %v2211_v4  ;;  %v2233_v10 = vsub.f32 %v987_v18, %v1162_v62 }
 0x20a   : > { %v1186_v11 = vmul.f32 %v2213_v6, %v2213_v6  ;;  %v1183_v61 = vmul.f32 %v2220_v47, %v2220_v47  ;;  %v1195_v14 = vadd.f32 %v1181_v9, %v1179_v1  ;;  %v2240_v15 = vsub.f32 %v989_v25, %v1162_v62 }
 0x20b   : > { %v1208_v57 = vadd.f32 %v1182_v53, %v1180_v7  ;;  %v1188_v17 = vmul.f32 %v2222_v8, %v2222_v8  ;;  %v1185_v18 = vmul.f32 %v2225_v56, %v2225_v56  ;;  %v2247_v21 = vsub.f32 %v991_v36, %v1162_v62 }
 0x20c   : > { %v1196_v5 = vadd.f32 %v1195_v14, %v1183_v61  ;;  %v1190_v23 = vmul.f32 %v2233_v10, %v2233_v10  ;;  %v1187_v25 = vmul.f32 %v1171_v54, %v1171_v54  ;;  %v1192_v12 = vmul.f32 %v2240_v15, %v2240_v15 }
 0x20d   : > { %v1209_v13 = vadd.f32 %v1208_v57, %v1184_v49  ;;  %v1189_v29 = vmul.f32 %v1173_v16, %v1173_v16  ;;  %v1194_v33 = vmul.f32 %v2247_v21, %v2247_v21  ;;  %v1191_v35 = vmul.f32 %v1175_v22, %v1175_v22 }
 0x20e   : > { %v1197_v26 = vadd.f32 %v1196_v5, %v1185_v18  ;;  %v1193_v37 = vmul.f32 %v1177_v28, %v1177_v28 }
 0x20f   : > { %v1210_v20 = vadd.f32 %v1209_v13, %v1186_v11 }
 0x210   : > { %v1198_v31 = vadd.f32 %v1197_v26, %v1187_v25 }
 0x211   : > { %v1211_v24 = vadd.f32 %v1210_v20, %v1188_v17 }
 0x212   : > { %v1199_v36 = vadd.f32 %v1198_v31, %v1189_v29 }
 0x213   : > { %v1212_v27 = vadd.f32 %v1211_v24, %v1190_v23 }
 0x214   : > { %v1200_v38 = vadd.f32 %v1199_v36, %v1191_v35 }
 0x215   : > { %v1213_v34 = vadd.f32 %v1212_v27, %v1192_v12 }
 0x216   : > { %v1201_v41 = vadd.f32 %v1200_v38, %v1193_v37 }
 0x217   : > { %v1214_v19 = vadd.f32 %v1213_v34, %v1194_v33 }
 0x218   : > { %v1202_v44 = vrot.slane %v1201_v41, 4 }
 0x219   : > { %v1215_v39 = vrot.slane %v1214_v19, 4 }
 0x21a   : > { %v1203_v46 = vadd.f32 %v1202_v44, %v1201_v41 }
 0x21b   : > { %v1216_v42 = vadd.f32 %v1215_v39, %v1214_v19 }
 0x21c   : > { %v1204_v50 = vrot.slane %v1203_v46, 2 }
 0x21d   : > { %v1217_v45 = vrot.slane %v1216_v42, 2 }
 0x21e   : > { %v1205_v51 = vadd.f32 %v1204_v50, %v1203_v46 }
 0x21f   : > { %v1218_v48 = vadd.f32 %v1217_v45, %v1216_v42 }
 0x220   : > { %v1206_v55 = vrot.slane %v1205_v51, 1 }
 0x221   : > { %v1219_v32 = vrot.slane %v1218_v48, 1 }
 0x222   : > { %v1207_v59 = vadd.f32 %v1206_v55, %v1205_v51 }
 0x223   : > { %v1220_v52 = vadd.f32 %v1219_v32, %v1218_v48 }
 0x224   : > { %v1221_v40 = vmul.f32 0.00390625, %v1207_v59 }
 0x225   : > { %v1222_v58 = vmul.f32 0.00390625, %v1220_v52 }
 0x227   : > { %1287 = vmatprep.mubr.f32.mxu1 %v1222_v58 }
 0x228   : > { %1288 = vmatmul.mubr.f32.vlgmr.msra.gmra.mxu1 %v1221_v40 }
 0x2e8   : > { %v1289_v43 = vpop.f32.mrf.mxu1 }
 0x2e9   : > { %v1290_v60 = vadd.f32 1e-05, %v1289_v43 }
 0x2ea   : > { %v1291_v62 = vpop.f32.mrf.mxu1 }
 0x2eb   : > { %1675 = vrsqrt.f32 %v1290_v60  ;;  %v1292_v7 = vadd.f32 1e-05, %v1291_v62 }
 0x2ed   : > { %1677 = vrsqrt.f32 %v1292_v7 }
 0x2f8   : > { %v1676_v53 = vpop.eup %1675 }
 0x2f9   : > { %v1299_v49 = vrot.slane %v1676_v53, %v2160_v30 }
 0x2fa   : > { %v1678_v13 = vpop.eup %1677 }
 0x2fb   : > { %v1304_v57 = vmul.f32 %v1299_v49, %v2199_v63  ;;  %v1306_v1 = vmul.f32 %v1299_v49, %v2202_v0  ;;  %v1308_v9 = vmul.f32 %v1299_v49, %v2220_v47  ;;  %v1310_v11 = vmul.f32 %v1299_v49, %v2225_v56 }
 0x2fc   : > { %v1312_v61 = vmul.f32 %v1299_v49, %v1171_v54  ;;  %v1314_v14 = vmul.f32 %v1299_v49, %v1173_v16  ;;  %v1316_v63 = vmul.f32 %v1299_v49, %v1175_v22  ;;  %v1318_v0 = vmul.f32 %v1299_v49, %v1177_v28 }
 0x2fd   : > { %v1320_v47 = vmax.f32 %v1304_v57, 0.0  ;;  %v1322_v56 = vmax.f32 %v1306_v1, 0.0  ;;  %v1324_v17 = vmax.f32 %v1308_v9, 0.0  ;;  %v1326_v20 = vmax.f32 %v1310_v11, 0.0 }
 0x2fe   : > { %v1328_v18 = vmax.f32 %v1312_v61, 0.0  ;;  %v1330_v5 = vmax.f32 %v1314_v14, 0.0  ;;  %v1332_v23 = vmax.f32 %v1316_v63, 0.0  ;;  %v1334_v24 = vmax.f32 %v1318_v0, 0.0 }
 0x2ff   : > { %1336 = vst [vmem:[%s2266_s30] sm:$0xff] %v1320_v47  ;;  %1338 = vst [vmem:[%s2266_s30 + $0x10] sm:$0xff] %v1322_v56  ;;  %v1303_v54 = vrot.slane %v1678_v13, %v2160_v30 }
 0x300   : > { %1340 = vst [vmem:[%s2266_s30 + $0x20] sm:$0xff] %v1324_v17  ;;  %1342 = vst [vmem:[%s2266_s30 + $0x30] sm:$0xff] %v1326_v20 }
 0x301   : > { %1344 = vst [vmem:[%s2266_s30 + $0x40] sm:$0xff] %v1328_v18  ;;  %1346 = vst [vmem:[%s2266_s30 + $0x50] sm:$0xff] %v1330_v5  ;;  %v1305_v16 = vmul.f32 %v1303_v54, %v2205_v2  ;;  %v1307_v22 = vmul.f32 %v1303_v54, %v2208_v3  ;;  %v1309_v25 = vmul.f32 %v1303_v54, %v2211_v4 }
 0x302   : > { %1348 = vst [vmem:[%s2266_s30 + $0x60] sm:$0xff] %v1332_v23  ;;  %1350 = vst [vmem:[%s2266_s30 + $0x70] sm:$0xff] %v1334_v24  ;;  %v1311_v26 = vmul.f32 %v1303_v54, %v2213_v6  ;;  %v1313_v12 = vmul.f32 %v1303_v54, %v2222_v8  ;;  %v1315_v30 = vmul.f32 %v1303_v54, %v2233_v10 }
 0x303   : > { %v1317_v27 = vmul.f32 %v1303_v54, %v2240_v15  ;;  %v1319_v2 = vmul.f32 %v1303_v54, %v2247_v21  ;;  %v1321_v3 = vmax.f32 %v1305_v16, 0.0  ;;  %v1323_v28 = vmax.f32 %v1307_v22, 0.0 }
 0x304   : > { %v1325_v29 = vmax.f32 %v1309_v25, 0.0  ;;  %v1327_v4 = vmax.f32 %v1311_v26, 0.0  ;;  %v1329_v31 = vmax.f32 %v1313_v12, 0.0  ;;  %v1331_v33 = vmax.f32 %v1315_v30, 0.0 }
 0x305   : > { %v1333_v6 = vmax.f32 %v1317_v27, 0.0  ;;  %v1335_v34 = vmax.f32 %v1319_v2, 0.0  ;;  %1337 = vst [vmem:[%s2266_s30 + $0x8] sm:$0xff] %v1321_v3  ;;  %1339 = vst [vmem:[%s2266_s30 + $0x18] sm:$0xff] %v1323_v28 }
 0x306   : > { %1341 = vst [vmem:[%s2266_s30 + $0x28] sm:$0xff] %v1325_v29  ;;  %1343 = vst [vmem:[%s2266_s30 + $0x38] sm:$0xff] %v1327_v4 }
 0x307   : > { %1345 = vst [vmem:[%s2266_s30 + $0x48] sm:$0xff] %v1329_v31  ;;  %1347 = vst [vmem:[%s2266_s30 + $0x58] sm:$0xff] %v1331_v33 }
 0x308   : > { %1349 = vst [vmem:[%s2266_s30 + $0x68] sm:$0xff] %v1333_v6  ;;  %1351 = vst [vmem:[%s2266_s30 + $0x78] sm:$0xff] %v1335_v34 }
 0x309 PF: > { %s14_s17 = sadd.s32 1, %s1701_s17   ;;  %s2307_s15 = smov %s1697_s16 }
 0x30a   : > { %p11_p5 = scmp.ge.s32.totalorder %s14_s17, 4   ;;  %s2308_s16 = smov %s2310_s18 }
 0x30c   :  { %13 = sbr.rel (!%p11_p5) target bundleno = 2 (0x2), region = 77 }

// kernel: line_drawing_forward.23
= control target key start
LH: loop header
LB: loop body
LE: loop exit
PB: predicated region body
PF: predicated region fallthrough
CT: control target
= control target key end

     0   :  { %s3196_s12 = smov 0   ;;  %s3198_s13 = smov 0   ;;  %s3919_s0 = inlined_call_operand.vmem [shape: bf16[2,256,3200], index: 0, kind: input, shape index: {}]   ;;  %s3920_s1 = inlined_call_operand.vmem [shape: bf16[3200,128], index: 1, kind: input, shape index: {}]   ;;  %s3921_s2 = inlined_call_operand.vmem [shape: f32[1,128], index: 2, kind: input, shape index: {}]   ;;  %s3922_s3 = inlined_call_operand.vmem [shape: f32[2,256,128], index: 3, kind: output, shape index: {}]  }
   0x1   :  { %s3200_s14 = smov 0   ;;  %s3202_s15 = smov 0  }
   0x2   :  { %s3204_s16 = smov 0   ;;  %s3206_s17 = smov 0  }
   0x3   :  { %s3208_s18 = smov 0  }
   0x4 LB: > { %s22_s19 = sadd.s32 1, %s3165_s16  ;;  %s25_s20 = sadd.s32 1, %s3169_s17  ;;  %s3173_s18 = sphi %s3208_s18, %s13_s18   ;;  %s3169_s17 = sphi %s3206_s17, %s3974_s17   ;;  %s3165_s16 = sphi %s3204_s16, %s3973_s16   ;;  %s3161_s15 = sphi %s3202_s15, %s3972_s15   ;;  %s3157_s14 = sphi %s3200_s14, %s3971_s14   ;;  %s3153_s13 = sphi %s3198_s13, %s3970_s13   ;;  %s3149_s12 = sphi %s3196_s12, %s3969_s12  }
   0x5   : > { %p23_p0 = scmp.ge.s32.totalorder %s22_s19, 5  ;;  %p41_p1 = scmp.ne.s32.totalorder %s3153_s13, %s3149_s12 }
   0x6   : > { %p42_p2 = scmp.eq.s32.totalorder %s3173_s18, 0  ;;  %s34_s24 = sadd.s32 1, %s3153_s13 }
   0x7   : > { %s3976_s19 = smov (%p23_p0, %s22_s19), 0  ;;  %s3978_s20 = smov (!%p23_p0, %s25_s20), %s3169_s17 }
   0x8   : > { %p43_p3 = por %p42_p2, %p41_p1  ;;  %p27_p4 = scmp.ge.s32.totalorder %s3978_s20, 2 }
   0x9   : > { %s30_s21 = ssub.s32 %s3165_s16, %s3976_s19  ;;  %p2271_p6 = scmp.ge.s32.totalorder %s3173_s18, 10 }
   0xa   : > { %s3980_s20 = smov (%p27_p4, %s3978_s20), 0 }
   0xb   : > { %s29_s22 = ssub.s32 %s3169_s17, %s3980_s20  ;;  %143 = sbr.rel (%p2271_p6) target bundleno = 78 (0x4e), region = 20 }
   0xc   : > { %s31_s23 = sor.u32 %s30_s21, %s29_s22 }
   0xd   : > { %p32_p5 = scmp.eq.s32.totalorder %s31_s23, 0 }
   0xf   : > { %s3247_s25 = scalar_select %p32_p5, %s3153_s13, %s34_s24  }
  0x10   : > { %146 = sbr.rel (!%p43_p3) target bundleno = 78 (0x4e), region = 24  ;;  %s148_s26 = sand.u32 (%p43_p3), 1, %s3153_s13  }
  0x11   : > { %s151_s27 = smul.u32 (%p43_p3), 5, %s3165_s16 }
  0x12   : > { %s2779_s28 = smul.u32 (%p43_p3), 640, %s148_s26 }
  0x13   : > { %s2780_s29 = smul.u32 (%p43_p3), 800, %s3169_s17 }
  0x14   : > { %s3261_s8 = scalar_lea.vmem (%p43_p3), [#allocation3], %s2779_s28 }
  0x15   : > { %s153_s30 = sadd.s32 %s2780_s29, %s151_s27 }
  0x16   : > { %s2272_s4 = sshll.u32 %s153_s30, 2 }
  0x17   : > { %s3256_s7 = scalar_lea.vmem %s3919_s0, %s2272_s4 }
  0x18   : > { %v170_v0 = vld [vmem:[%s3256_s7] sm:$0xff]  ;;  %v172_v1 = vld [vmem:[%s3256_s7 + $0x8] sm:$0xff]  ;;  %v180_v5 = vld [vmem:[%s3256_s7 + $0xd0] sm:$0xff] }
  0x19   : > { %v174_v2 = vld [vmem:[%s3256_s7 + $0x64] sm:$0xff]  ;;  %171 = vst [vmem:[%s3261_s8] sm:$0xff] %v170_v0  ;;  %173 = vst [vmem:[%s3261_s8 + $0x8] sm:$0xff] %v172_v1  ;;  %v176_v3 = vld [vmem:[%s3256_s7 + $0x6c] sm:$0xff] }
  0x1a   : > { %175 = vst [vmem:[%s3261_s8 + $0x14] sm:$0xff] %v174_v2  ;;  %v178_v4 = vld [vmem:[%s3256_s7 + $0xc8] sm:$0xff]  ;;  %177 = vst [vmem:[%s3261_s8 + $0x1c] sm:$0xff] %v176_v3  ;;  %v184_v7 = vld [vmem:[%s3256_s7 + $0x134] sm:$0xff] }
  0x1b   : > { %179 = vst [vmem:[%s3261_s8 + $0x28] sm:$0xff] %v178_v4  ;;  %181 = vst [vmem:[%s3261_s8 + $0x30] sm:$0xff] %v180_v5  ;;  %v182_v6 = vld [vmem:[%s3256_s7 + $0x12c] sm:$0xff]  ;;  %v188_v9 = vld [vmem:[%s3256_s7 + $0x198] sm:$0xff] }
  0x1c   : > { %v186_v8 = vld [vmem:[%s3256_s7 + $0x190] sm:$0xff]  ;;  %183 = vst [vmem:[%s3261_s8 + $0x3c] sm:$0xff] %v182_v6  ;;  %185 = vst [vmem:[%s3261_s8 + $0x44] sm:$0xff] %v184_v7  ;;  %v192_v11 = vld [vmem:[%s3256_s7 + $0x1fc] sm:$0xff] }
  0x1d   : > { %187 = vst [vmem:[%s3261_s8 + $0x50] sm:$0xff] %v186_v8  ;;  %v190_v10 = vld [vmem:[%s3256_s7 + $0x1f4] sm:$0xff]  ;;  %189 = vst [vmem:[%s3261_s8 + $0x58] sm:$0xff] %v188_v9  ;;  %v196_v13 = vld [vmem:[%s3256_s7 + $0x260] sm:$0xff] }
  0x1e   : > { %191 = vst [vmem:[%s3261_s8 + $0x64] sm:$0xff] %v190_v10  ;;  %193 = vst [vmem:[%s3261_s8 + $0x6c] sm:$0xff] %v192_v11  ;;  %v194_v12 = vld [vmem:[%s3256_s7 + $0x258] sm:$0xff]  ;;  %v200_v15 = vld [vmem:[%s3256_s7 + $0x2c4] sm:$0xff] }
  0x1f   : > { %v198_v14 = vld [vmem:[%s3256_s7 + $0x2bc] sm:$0xff]  ;;  %195 = vst [vmem:[%s3261_s8 + $0x78] sm:$0xff] %v194_v12  ;;  %197 = vst [vmem:[%s3261_s8 + $0x80] sm:$0xff] %v196_v13  ;;  %v204_v17 = vld [vmem:[%s3256_s7 + $0x328] sm:$0xff] }
  0x20   : > { %199 = vst [vmem:[%s3261_s8 + $0x8c] sm:$0xff] %v198_v14  ;;  %v202_v16 = vld [vmem:[%s3256_s7 + $0x320] sm:$0xff]  ;;  %201 = vst [vmem:[%s3261_s8 + $0x94] sm:$0xff] %v200_v15  ;;  %v208_v19 = vld [vmem:[%s3256_s7 + $0x38c] sm:$0xff] }
  0x21   : > { %203 = vst [vmem:[%s3261_s8 + $0xa0] sm:$0xff] %v202_v16  ;;  %205 = vst [vmem:[%s3261_s8 + $0xa8] sm:$0xff] %v204_v17  ;;  %v206_v18 = vld [vmem:[%s3256_s7 + $0x384] sm:$0xff]  ;;  %v212_v21 = vld [vmem:[%s3256_s7 + $0x3f0] sm:$0xff] }
  0x22   : > { %v210_v20 = vld [vmem:[%s3256_s7 + $0x3e8] sm:$0xff]  ;;  %207 = vst [vmem:[%s3261_s8 + $0xb4] sm:$0xff] %v206_v18  ;;  %209 = vst [vmem:[%s3261_s8 + $0xbc] sm:$0xff] %v208_v19  ;;  %v216_v23 = vld [vmem:[%s3256_s7 + $0x454] sm:$0xff] }
  0x23   : > { %211 = vst [vmem:[%s3261_s8 + $0xc8] sm:$0xff] %v210_v20  ;;  %v214_v22 = vld [vmem:[%s3256_s7 + $0x44c] sm:$0xff]  ;;  %213 = vst [vmem:[%s3261_s8 + $0xd0] sm:$0xff] %v212_v21  ;;  %v220_v25 = vld [vmem:[%s3256_s7 + $0x4b8] sm:$0xff] }
  0x24   : > { %215 = vst [vmem:[%s3261_s8 + $0xdc] sm:$0xff] %v214_v22  ;;  %217 = vst [vmem:[%s3261_s8 + $0xe4] sm:$0xff] %v216_v23  ;;  %v218_v24 = vld [vmem:[%s3256_s7 + $0x4b0] sm:$0xff]  ;;  %v224_v27 = vld [vmem:[%s3256_s7 + $0x51c] sm:$0xff] }
  0x25   : > { %v222_v26 = vld [vmem:[%s3256_s7 + $0x514] sm:$0xff]  ;;  %219 = vst [vmem:[%s3261_s8 + $0xf0] sm:$0xff] %v218_v24  ;;  %221 = vst [vmem:[%s3261_s8 + $0xf8] sm:$0xff] %v220_v25  ;;  %v228_v29 = vld [vmem:[%s3256_s7 + $0x580] sm:$0xff] }
  0x26   : > { %223 = vst [vmem:[%s3261_s8 + $0x104] sm:$0xff] %v222_v26  ;;  %v226_v28 = vld [vmem:[%s3256_s7 + $0x578] sm:$0xff]  ;;  %225 = vst [vmem:[%s3261_s8 + $0x10c] sm:$0xff] %v224_v27  ;;  %v232_v31 = vld [vmem:[%s3256_s7 + $0x5e4] sm:$0xff] }
  0x27   : > { %227 = vst [vmem:[%s3261_s8 + $0x118] sm:$0xff] %v226_v28  ;;  %229 = vst [vmem:[%s3261_s8 + $0x120] sm:$0xff] %v228_v29  ;;  %v230_v30 = vld [vmem:[%s3256_s7 + $0x5dc] sm:$0xff]  ;;  %v236_v33 = vld [vmem:[%s3256_s7 + $0x648] sm:$0xff] }
  0x28   : > { %v234_v32 = vld [vmem:[%s3256_s7 + $0x640] sm:$0xff]  ;;  %231 = vst [vmem:[%s3261_s8 + $0x12c] sm:$0xff] %v230_v30  ;;  %233 = vst [vmem:[%s3261_s8 + $0x134] sm:$0xff] %v232_v31  ;;  %v240_v35 = vld [vmem:[%s3256_s7 + $0x6ac] sm:$0xff] }
  0x29   : > { %235 = vst [vmem:[%s3261_s8 + $0x140] sm:$0xff] %v234_v32  ;;  %v238_v34 = vld [vmem:[%s3256_s7 + $0x6a4] sm:$0xff]  ;;  %237 = vst [vmem:[%s3261_s8 + $0x148] sm:$0xff] %v236_v33  ;;  %v244_v37 = vld [vmem:[%s3256_s7 + $0x710] sm:$0xff] }
  0x2a   : > { %239 = vst [vmem:[%s3261_s8 + $0x154] sm:$0xff] %v238_v34  ;;  %241 = vst [vmem:[%s3261_s8 + $0x15c] sm:$0xff] %v240_v35  ;;  %v242_v36 = vld [vmem:[%s3256_s7 + $0x708] sm:$0xff]  ;;  %v248_v39 = vld [vmem:[%s3256_s7 + $0x774] sm:$0xff] }
  0x2b   : > { %v246_v38 = vld [vmem:[%s3256_s7 + $0x76c] sm:$0xff]  ;;  %243 = vst [vmem:[%s3261_s8 + $0x168] sm:$0xff] %v242_v36  ;;  %245 = vst [vmem:[%s3261_s8 + $0x170] sm:$0xff] %v244_v37  ;;  %v252_v41 = vld [vmem:[%s3256_s7 + $0x7d8] sm:$0xff] }
  0x2c   : > { %247 = vst [vmem:[%s3261_s8 + $0x17c] sm:$0xff] %v246_v38  ;;  %v250_v40 = vld [vmem:[%s3256_s7 + $0x7d0] sm:$0xff]  ;;  %249 = vst [vmem:[%s3261_s8 + $0x184] sm:$0xff] %v248_v39  ;;  %v256_v43 = vld [vmem:[%s3256_s7 + $0x83c] sm:$0xff] }
  0x2d   : > { %251 = vst [vmem:[%s3261_s8 + $0x190] sm:$0xff] %v250_v40  ;;  %253 = vst [vmem:[%s3261_s8 + $0x198] sm:$0xff] %v252_v41  ;;  %v254_v42 = vld [vmem:[%s3256_s7 + $0x834] sm:$0xff]  ;;  %v260_v45 = vld [vmem:[%s3256_s7 + $0x8a0] sm:$0xff] }
  0x2e   : > { %v258_v44 = vld [vmem:[%s3256_s7 + $0x898] sm:$0xff]  ;;  %255 = vst [vmem:[%s3261_s8 + $0x1a4] sm:$0xff] %v254_v42  ;;  %257 = vst [vmem:[%s3261_s8 + $0x1ac] sm:$0xff] %v256_v43  ;;  %v264_v47 = vld [vmem:[%s3256_s7 + $0x904] sm:$0xff] }
  0x2f   : > { %259 = vst [vmem:[%s3261_s8 + $0x1b8] sm:$0xff] %v258_v44  ;;  %v262_v46 = vld [vmem:[%s3256_s7 + $0x8fc] sm:$0xff]  ;;  %261 = vst [vmem:[%s3261_s8 + $0x1c0] sm:$0xff] %v260_v45  ;;  %v268_v49 = vld [vmem:[%s3256_s7 + $0x968] sm:$0xff] }
  0x30   : > { %263 = vst [vmem:[%s3261_s8 + $0x1cc] sm:$0xff] %v262_v46  ;;  %265 = vst [vmem:[%s3261_s8 + $0x1d4] sm:$0xff] %v264_v47  ;;  %v266_v48 = vld [vmem:[%s3256_s7 + $0x960] sm:$0xff]  ;;  %v272_v51 = vld [vmem:[%s3256_s7 + $0x9cc] sm:$0xff] }
  0x31   : > { %v270_v50 = vld [vmem:[%s3256_s7 + $0x9c4] sm:$0xff]  ;;  %267 = vst [vmem:[%s3261_s8 + $0x1e0] sm:$0xff] %v266_v48  ;;  %269 = vst [vmem:[%s3261_s8 + $0x1e8] sm:$0xff] %v268_v49  ;;  %v276_v53 = vld [vmem:[%s3256_s7 + $0xa30] sm:$0xff] }
  0x32   : > { %271 = vst [vmem:[%s3261_s8 + $0x1f4] sm:$0xff] %v270_v50  ;;  %v274_v52 = vld [vmem:[%s3256_s7 + $0xa28] sm:$0xff]  ;;  %273 = vst [vmem:[%s3261_s8 + $0x1fc] sm:$0xff] %v272_v51  ;;  %v280_v55 = vld [vmem:[%s3256_s7 + $0xa94] sm:$0xff] }
  0x33   : > { %275 = vst [vmem:[%s3261_s8 + $0x208] sm:$0xff] %v274_v52  ;;  %277 = vst [vmem:[%s3261_s8 + $0x210] sm:$0xff] %v276_v53  ;;  %v278_v54 = vld [vmem:[%s3256_s7 + $0xa8c] sm:$0xff]  ;;  %v284_v57 = vld [vmem:[%s3256_s7 + $0xaf8] sm:$0xff] }
  0x34   : > { %v282_v56 = vld [vmem:[%s3256_s7 + $0xaf0] sm:$0xff]  ;;  %279 = vst [vmem:[%s3261_s8 + $0x21c] sm:$0xff] %v278_v54  ;;  %281 = vst [vmem:[%s3261_s8 + $0x224] sm:$0xff] %v280_v55  ;;  %v288_v59 = vld [vmem:[%s3256_s7 + $0xb5c] sm:$0xff] }
  0x35   : > { %283 = vst [vmem:[%s3261_s8 + $0x230] sm:$0xff] %v282_v56  ;;  %v286_v58 = vld [vmem:[%s3256_s7 + $0xb54] sm:$0xff]  ;;  %285 = vst [vmem:[%s3261_s8 + $0x238] sm:$0xff] %v284_v57  ;;  %v292_v61 = vld [vmem:[%s3256_s7 + $0xbc0] sm:$0xff] }
  0x36   : > { %287 = vst [vmem:[%s3261_s8 + $0x244] sm:$0xff] %v286_v58  ;;  %289 = vst [vmem:[%s3261_s8 + $0x24c] sm:$0xff] %v288_v59  ;;  %v290_v60 = vld [vmem:[%s3256_s7 + $0xbb8] sm:$0xff]  ;;  %v296_v63 = vld [vmem:[%s3256_s7 + $0xc24] sm:$0xff] }
  0x37   : > { %v294_v62 = vld [vmem:[%s3256_s7 + $0xc1c] sm:$0xff]  ;;  %291 = vst [vmem:[%s3261_s8 + $0x258] sm:$0xff] %v290_v60  ;;  %293 = vst [vmem:[%s3261_s8 + $0x260] sm:$0xff] %v292_v61  ;;  %v2273_v0 = vld [vmem:[%s3256_s7 + $0x10] sm:$0xf] }
  0x38   : > { %295 = vst [vmem:[%s3261_s8 + $0x26c] sm:$0xff] %v294_v62  ;;  %v2275_v1 = vld [vmem:[%s3256_s7 + $0x74] sm:$0xf]  ;;  %297 = vst [vmem:[%s3261_s8 + $0x274] sm:$0xff] %v296_v63  ;;  %v2277_v2 = vld [vmem:[%s3256_s7 + $0xd8] sm:$0xf] }
  0x39   : > { %2274 = vst [vmem:[%s3261_s8 + $0x10] sm:$0xf] %v2273_v0  ;;  %2276 = vst [vmem:[%s3261_s8 + $0x24] sm:$0xf] %v2275_v1  ;;  %v2279_v3 = vld [vmem:[%s3256_s7 + $0x13c] sm:$0xf] }
  0x3a   : > { %v2281_v4 = vld [vmem:[%s3256_s7 + $0x1a0] sm:$0xf]  ;;  %2278 = vst [vmem:[%s3261_s8 + $0x38] sm:$0xf] %v2277_v2  ;;  %2280 = vst [vmem:[%s3261_s8 + $0x4c] sm:$0xf] %v2279_v3 }
  0x3b   : > { %2282 = vst [vmem:[%s3261_s8 + $0x60] sm:$0xf] %v2281_v4  ;;  %v2283_v5 = vld [vmem:[%s3256_s7 + $0x204] sm:$0xf]  ;;  %v2285_v6 = vld [vmem:[%s3256_s7 + $0x268] sm:$0xf] }
  0x3c   : > { %v2287_v7 = vld [vmem:[%s3256_s7 + $0x2cc] sm:$0xf]  ;;  %2284 = vst [vmem:[%s3261_s8 + $0x74] sm:$0xf] %v2283_v5  ;;  %2286 = vst [vmem:[%s3261_s8 + $0x88] sm:$0xf] %v2285_v6 }
  0x3d   : > { %2288 = vst [vmem:[%s3261_s8 + $0x9c] sm:$0xf] %v2287_v7  ;;  %v2289_v8 = vld [vmem:[%s3256_s7 + $0x330] sm:$0xf]  ;;  %v2291_v9 = vld [vmem:[%s3256_s7 + $0x394] sm:$0xf] }
  0x3e   : > { %v2293_v10 = vld [vmem:[%s3256_s7 + $0x3f8] sm:$0xf]  ;;  %2290 = vst [vmem:[%s3261_s8 + $0xb0] sm:$0xf] %v2289_v8  ;;  %2292 = vst [vmem:[%s3261_s8 + $0xc4] sm:$0xf] %v2291_v9 }
  0x3f   : > { %2294 = vst [vmem:[%s3261_s8 + $0xd8] sm:$0xf] %v2293_v10  ;;  %v2295_v11 = vld [vmem:[%s3256_s7 + $0x45c] sm:$0xf]  ;;  %v2297_v12 = vld [vmem:[%s3256_s7 + $0x4c0] sm:$0xf] }
  0x40   : > { %v2299_v13 = vld [vmem:[%s3256_s7 + $0x524] sm:$0xf]  ;;  %2296 = vst [vmem:[%s3261_s8 + $0xec] sm:$0xf] %v2295_v11  ;;  %2298 = vst [vmem:[%s3261_s8 + $0x100] sm:$0xf] %v2297_v12 }
  0x41   : > { %2300 = vst [vmem:[%s3261_s8 + $0x114] sm:$0xf] %v2299_v13  ;;  %v2301_v14 = vld [vmem:[%s3256_s7 + $0x588] sm:$0xf]  ;;  %v2303_v15 = vld [vmem:[%s3256_s7 + $0x5ec] sm:$0xf] }
  0x42   : > { %v2305_v16 = vld [vmem:[%s3256_s7 + $0x650] sm:$0xf]  ;;  %2302 = vst [vmem:[%s3261_s8 + $0x128] sm:$0xf] %v2301_v14  ;;  %2304 = vst [vmem:[%s3261_s8 + $0x13c] sm:$0xf] %v2303_v15 }
  0x43   : > { %2306 = vst [vmem:[%s3261_s8 + $0x150] sm:$0xf] %v2305_v16  ;;  %v2307_v17 = vld [vmem:[%s3256_s7 + $0x6b4] sm:$0xf]  ;;  %v2309_v18 = vld [vmem:[%s3256_s7 + $0x718] sm:$0xf] }
  0x44   : > { %v2311_v19 = vld [vmem:[%s3256_s7 + $0x77c] sm:$0xf]  ;;  %2308 = vst [vmem:[%s3261_s8 + $0x164] sm:$0xf] %v2307_v17  ;;  %2310 = vst [vmem:[%s3261_s8 + $0x178] sm:$0xf] %v2309_v18 }
  0x45   : > { %2312 = vst [vmem:[%s3261_s8 + $0x18c] sm:$0xf] %v2311_v19  ;;  %v2313_v20 = vld [vmem:[%s3256_s7 + $0x7e0] sm:$0xf]  ;;  %v2315_v21 = vld [vmem:[%s3256_s7 + $0x844] sm:$0xf] }
  0x46   : > { %v2317_v22 = vld [vmem:[%s3256_s7 + $0x8a8] sm:$0xf]  ;;  %2314 = vst [vmem:[%s3261_s8 + $0x1a0] sm:$0xf] %v2313_v20  ;;  %2316 = vst [vmem:[%s3261_s8 + $0x1b4] sm:$0xf] %v2315_v21 }
  0x47   : > { %2318 = vst [vmem:[%s3261_s8 + $0x1c8] sm:$0xf] %v2317_v22  ;;  %v2319_v23 = vld [vmem:[%s3256_s7 + $0x90c] sm:$0xf]  ;;  %v2321_v24 = vld [vmem:[%s3256_s7 + $0x970] sm:$0xf] }
  0x48   : > { %v2323_v25 = vld [vmem:[%s3256_s7 + $0x9d4] sm:$0xf]  ;;  %2320 = vst [vmem:[%s3261_s8 + $0x1dc] sm:$0xf] %v2319_v23  ;;  %2322 = vst [vmem:[%s3261_s8 + $0x1f0] sm:$0xf] %v2321_v24 }
  0x49   : > { %2324 = vst [vmem:[%s3261_s8 + $0x204] sm:$0xf] %v2323_v25  ;;  %v2325_v26 = vld [vmem:[%s3256_s7 + $0xa38] sm:$0xf]  ;;  %v2327_v27 = vld [vmem:[%s3256_s7 + $0xa9c] sm:$0xf] }
  0x4a   : > { %v2329_v28 = vld [vmem:[%s3256_s7 + $0xb00] sm:$0xf]  ;;  %2326 = vst [vmem:[%s3261_s8 + $0x218] sm:$0xf] %v2325_v26  ;;  %2328 = vst [vmem:[%s3261_s8 + $0x22c] sm:$0xf] %v2327_v27 }
  0x4b   : > { %2330 = vst [vmem:[%s3261_s8 + $0x240] sm:$0xf] %v2329_v28  ;;  %v2331_v29 = vld [vmem:[%s3256_s7 + $0xb64] sm:$0xf]  ;;  %v2333_v30 = vld [vmem:[%s3256_s7 + $0xbc8] sm:$0xf] }
  0x4c   : > { %v2335_v31 = vld [vmem:[%s3256_s7 + $0xc2c] sm:$0xf]  ;;  %2332 = vst [vmem:[%s3261_s8 + $0x254] sm:$0xf] %v2331_v29  ;;  %2334 = vst [vmem:[%s3261_s8 + $0x268] sm:$0xf] %v2333_v30 }
  0x4d   : > { %2336 = vst [vmem:[%s3261_s8 + $0x27c] sm:$0xf] %v2335_v31 }
  0x4e PF: > { %p2337_p7 = scmp.ge.s32.totalorder %s3173_s18, 1  ;;  %p383_p8 = scmp.lt.s32.totalorder %s3173_s18, 11 }
  0x50   : > { %p384_p9 = pnand %p2337_p7, %p383_p8 }
  0x52   : > { %387 = sbr.rel (%p384_p9) target bundleno = 593 (0x251), region = 54 }
  0x57   : > { %s390_s9 = sand.u32 1, %s3149_s12   ;;  %s419_s10 = smul.u32 80, %s3157_s14 }
  0x58   : > { %s2781_s11 = smul.u32 640, %s390_s9  ;;  %p425_p10 = scmp.lt.s32.totalorder %s3161_s15, 1 }
  0x59   : > { %p420_p11 = scmp.lt.s32.totalorder %s419_s10, 399  ;;  %p2341_p12 = scmp.ne.s32.totalorder %s3157_s14, 0 }
  0x5a   : > { %s3984_s15 = smov (!%p425_p10, %s3161_s15), 1  ;;  %s3468_s30 = scalar_lea.vmem [#allocation3], %s2781_s11 }
  0x5b   : > { %s3982_s10 = smov (!%p420_p11, %s419_s10), 399  ;;  %s2466_s26 = sshll.u32 %s3984_s15, 8 }
  0x5c   : > { %s2338_s21 = sshll.u32 %s3982_s10, 2  ;;  %s3466_s29 = scalar_lea.vmem %s3922_s3, %s2466_s26 }
  0x5d   : > { %s3461_s24 = scalar_lea.vmem %s3920_s1, %s2338_s21  ;;  %434 = sbr.rel (%p2341_p12) target bundleno = 115 (0x73), region = 62 }
  0x62   : > { %v3175_v32 = vmov 0.0  }
  0x63   : > { %435 = vst [vmem:[#allocation2 + $0xb0] sm:$0xff] %v3175_v32  ;;  %436 = vst [vmem:[#allocation2] sm:$0xff] %v3175_v32 }
  0x64   : > { %437 = vst [vmem:[#allocation2 + $0xd8] sm:$0xff] %v3175_v32  ;;  %438 = vst [vmem:[#allocation2 + $0x18] sm:$0xff] %v3175_v32 }
  0x65   : > { %439 = vst [vmem:[#allocation2 + $0x50] sm:$0xff] %v3175_v32  ;;  %440 = vst [vmem:[#allocation2 + $0x68] sm:$0xff] %v3175_v32 }
  0x66   : > { %441 = vst [vmem:[#allocation2 + $0x30] sm:$0xff] %v3175_v32  ;;  %442 = vst [vmem:[#allocation2 + $0x48] sm:$0xff] %v3175_v32 }
  0x67   : > { %443 = vst [vmem:[#allocation2 + $0x80] sm:$0xff] %v3175_v32  ;;  %444 = vst [vmem:[#allocation2 + $0x88] sm:$0xff] %v3175_v32 }
  0x68   : > { %445 = vst [vmem:[#allocation2 + $0xe8] sm:$0xff] %v3175_v32  ;;  %446 = vst [vmem:[#allocation2 + $0xb8] sm:$0xff] %v3175_v32 }
  0x69   : > { %447 = vst [vmem:[#allocation2 + $0x60] sm:$0xff] %v3175_v32  ;;  %448 = vst [vmem:[#allocation2 + $0xf0] sm:$0xff] %v3175_v32 }
  0x6a   : > { %449 = vst [vmem:[#allocation2 + $0x8] sm:$0xff] %v3175_v32  ;;  %450 = vst [vmem:[#allocation2 + $0x78] sm:$0xff] %v3175_v32 }
  0x6b   : > { %451 = vst [vmem:[#allocation2 + $0x38] sm:$0xff] %v3175_v32  ;;  %452 = vst [vmem:[#allocation2 + $0x58] sm:$0xff] %v3175_v32 }
  0x6c   : > { %453 = vst [vmem:[#allocation2 + $0x40] sm:$0xff] %v3175_v32  ;;  %454 = vst [vmem:[#allocation2 + $0xc8] sm:$0xff] %v3175_v32 }
  0x6d   : > { %455 = vst [vmem:[#allocation2 + $0xe0] sm:$0xff] %v3175_v32  ;;  %456 = vst [vmem:[#allocation2 + $0x90] sm:$0xff] %v3175_v32 }
  0x6e   : > { %457 = vst [vmem:[#allocation2 + $0x70] sm:$0xff] %v3175_v32  ;;  %458 = vst [vmem:[#allocation2 + $0xc0] sm:$0xff] %v3175_v32 }
  0x6f   : > { %459 = vst [vmem:[#allocation2 + $0xa8] sm:$0xff] %v3175_v32  ;;  %460 = vst [vmem:[#allocation2 + $0xd0] sm:$0xff] %v3175_v32 }
  0x70   : > { %461 = vst [vmem:[#allocation2 + $0x10] sm:$0xff] %v3175_v32  ;;  %462 = vst [vmem:[#allocation2 + $0x28] sm:$0xff] %v3175_v32 }
  0x71   : > { %463 = vst [vmem:[#allocation2 + $0xa0] sm:$0xff] %v3175_v32  ;;  %464 = vst [vmem:[#allocation2 + $0xf8] sm:$0xff] %v3175_v32 }
  0x72   : > { %465 = vst [vmem:[#allocation2 + $0x20] sm:$0xff] %v3175_v32  ;;  %466 = vst [vmem:[#allocation2 + $0x98] sm:$0xff] %v3175_v32 }
  0x73 PF: > { %v2839_v33 = vld [vmem:[%s3461_s24 + $0x78] sm:$0xff]   ;;  %v2841_v35 = vld [vmem:[%s3461_s24 + $0x70] sm:$0xff]   ;;  %v2843_v37 = vld [vmem:[%s3461_s24 + $0x68] sm:$0xff]   ;;  %p2462_p13 = scmp.ne.s32.totalorder %s3157_s14, 4 }
  0x74   : > { %v2840_v34 = vld [vmem:[%s3461_s24 + $0x38] sm:$0xff]   ;;  %2467 = vmatprep.subr.bf16.mxu0 %v2839_v33  ;;  %2763 = vmatprep.subr.bf16.mxu1 %v2839_v33  ;;  %v2842_v36 = vld [vmem:[%s3461_s24 + $0x30] sm:$0xff]   ;;  %v2844_v38 = vld [vmem:[%s3461_s24 + $0x28] sm:$0xff]  }
  0x75   : > { %2468 = vmatpush3.bf16.msra.mxu0 %v2840_v34  ;;  %2771 = vmatpush3.bf16.msra.mxu1 %v2840_v34  ;;  %v2845_v39 = vld [vmem:[%s3461_s24 + $0x60] sm:$0xff]   ;;  %v2847_v41 = vld [vmem:[%s3461_s24 + $0x58] sm:$0xff]   ;;  %v2849_v43 = vld [vmem:[%s3461_s24 + $0x50] sm:$0xff]  }
  0x76   : > { %2469 = vmatprep.subr.bf16.mxu0 %v2841_v35  ;;  %2764 = vmatprep.subr.bf16.mxu1 %v2841_v35  ;;  %v2846_v40 = vld [vmem:[%s3461_s24 + $0x20] sm:$0xff]   ;;  %v2848_v42 = vld [vmem:[%s3461_s24 + $0x18] sm:$0xff]   ;;  %v2850_v46 = vld [vmem:[%s3461_s24 + $0x10] sm:$0xff]  }
  0x77   : > { %v2857_v44 = vld [vmem:[%s3468_s30 + $0x4] ss:$20 sps:$4 sm:$0xff]   ;;  %v2851_v47 = vld [vmem:[%s3461_s24 + $0x48] sm:$0xff]   ;;  %v2855_v53 = vld [vmem:[%s3468_s30] ss:$20 sps:$4 sm:$0xff]  }
  0x78   : > { %v2860_v45 = vld [vmem:[%s3468_s30 + $0x1e4] ss:$20 sps:$4 sm:$0xff]   ;;  %1363 = vmatprep.mubr.bf16.mxu0 %v2857_v44  ;;  %v2852_v48 = vld [vmem:[%s3461_s24 + $0x8] sm:$0xff]   ;;  %v2858_v54 = vld [vmem:[%s3468_s30 + $0x1e0] ss:$20 sps:$4 sm:$0xff]  }
  0x79   : > { %2470 = vmatpush3.bf16.msra.mxu0 %v2842_v36  ;;  %2772 = vmatpush3.bf16.msra.mxu1 %v2842_v36  ;;  %v2853_v49 = vld [vmem:[%s3461_s24 + $0x40] sm:$0xff]   ;;  %v2861_v51 = vld [vmem:[%s3461_s24 + $0xf8] sm:$0xff]   ;;  %v2863_v56 = vld [vmem:[%s3461_s24 + $0xf0] sm:$0xff]  }
  0x7a   : > { %2471 = vmatprep.subr.bf16.mxu0 %v2843_v37  ;;  %2765 = vmatprep.subr.bf16.mxu1 %v2843_v37  ;;  %v2854_v50 = vld [vmem:[%s3461_s24] sm:$0xff]   ;;  %v2864_v52 = vld [vmem:[%s3461_s24 + $0x138] sm:$0xff]   ;;  %v2883_v59 = vld [vmem:[%s3461_s24 + $0x130] sm:$0xff]  }
  0x7b   : > { %1459 = vmatprep.mubr.bf16.mxu1 %v2860_v45  ;;  %v2862_v55 = vld [vmem:[%s3461_s24 + $0xb8] sm:$0xff]   ;;  %v2866_v57 = vld [vmem:[%s3468_s30 + $0x2c] ss:$20 sps:$4 sm:$0xff]   ;;  %v2865_v60 = vld [vmem:[%s3461_s24 + $0xb0] sm:$0xff]  }
  0x7c   : > { %v2868_v58 = vld [vmem:[%s3468_s30 + $0x20c] ss:$20 sps:$4 sm:$0xff]   ;;  %v2870_v61 = vld [vmem:[%s3468_s30 + $0x28] ss:$20 sps:$4 sm:$0xff]   ;;  %v2880_v6 = vld [vmem:[%s3468_s30 + $0x50] ss:$20 sps:$4 sm:$0xff]  }
  0x7d   : > { %2472 = vmatpush3.bf16.msra.mxu0 %v2844_v38  ;;  %2773 = vmatpush3.bf16.msra.mxu1 %v2844_v38  ;;  %v2872_v62 = vld [vmem:[%s3461_s24 + $0xe8] sm:$0xff]   ;;  %v2874_v2 = vld [vmem:[%s3461_s24 + $0xe0] sm:$0xff]   ;;  %v2882_v5 = vld [vmem:[%s3461_s24 + $0xd8] sm:$0xff]  }
  0x7e   : > { %2473 = vmatprep.subr.bf16.mxu0 %v2845_v39  ;;  %2766 = vmatprep.subr.bf16.mxu1 %v2845_v39  ;;  %v2871_v63 = vld [vmem:[%s3468_s30 + $0x208] ss:$20 sps:$4 sm:$0xff]   ;;  %v2875_v4 = vld [vmem:[%s3461_s24 + $0xa0] sm:$0xff]   ;;  %v2885_v10 = vld [vmem:[%s3461_s24 + $0xd0] sm:$0xff]  }
  0x7f   : > { %v2873_v0 = vld [vmem:[%s3461_s24 + $0xa8] sm:$0xff]   ;;  %v2881_v8 = vld [vmem:[%s3468_s30 + $0x230] ss:$20 sps:$4 sm:$0xff]   ;;  %v2884_v9 = vld [vmem:[%s3461_s24 + $0x98] sm:$0xff]  }
  0x80   : > { %v2876_v1 = vld [vmem:[%s3468_s30 + $0x54] ss:$20 sps:$4 sm:$0xff]   ;;  %v2887_v11 = vld [vmem:[%s3468_s30 + $0x7c] ss:$20 sps:$4 sm:$0xff]   ;;  %v2910_v14 = vld [vmem:[%s3461_s24 + $0x120] sm:$0xff]  }
  0x81   : > { %2474 = vmatpush3.bf16.msra.mxu0 %v2846_v40  ;;  %2774 = vmatpush3.bf16.msra.mxu1 %v2846_v40  ;;  %v2878_v3 = vld [vmem:[%s3468_s30 + $0x234] ss:$20 sps:$4 sm:$0xff]   ;;  %v2889_v12 = vld [vmem:[%s3468_s30 + $0x25c] ss:$20 sps:$4 sm:$0xff]   ;;  %v2891_v15 = vld [vmem:[%s3468_s30 + $0x78] ss:$20 sps:$4 sm:$0xff]  }
  0x82   : > { %2475 = vmatprep.subr.bf16.mxu0 %v2847_v41  ;;  %2767 = vmatprep.subr.bf16.mxu1 %v2847_v41  ;;  %v2896_v7 = vld [vmem:[%s3461_s24 + $0x128] sm:$0xff]   ;;  %v2886_v13 = vld [vmem:[%s3461_s24 + $0x90] sm:$0xff]   ;;  %v2895_v19 = vld [vmem:[%s3461_s24 + $0xc0] sm:$0xff]  }
  0x83   : > { %v2892_v16 = vld [vmem:[%s3468_s30 + $0x258] ss:$20 sps:$4 sm:$0xff]   ;;  %v2897_v23 = vld [vmem:[%s3461_s24 + $0x80] sm:$0xff]   ;;  %v2900_v24 = vld [vmem:[%s3468_s30 + $0x8] ss:$20 sps:$4 sm:$0xff]  }
  0x84   : > { %v2893_v17 = vld [vmem:[%s3461_s24 + $0xc8] sm:$0xff]   ;;  %v2898_v20 = vld [vmem:[%s3468_s30 + $0xa4] ss:$20 sps:$4 sm:$0xff]   ;;  %v2903_v25 = vld [vmem:[%s3468_s30 + $0xa0] ss:$20 sps:$4 sm:$0xff]  }
  0x85   : > { %2476 = vmatpush3.bf16.msra.mxu0 %v2848_v42  ;;  %2775 = vmatpush3.bf16.msra.mxu1 %v2848_v42  ;;  %v2894_v18 = vld [vmem:[%s3461_s24 + $0x88] sm:$0xff]   ;;  %v2917_v21 = vld [vmem:[%s3461_s24 + $0x118] sm:$0xff]   ;;  %v2930_v26 = vld [vmem:[%s3461_s24 + $0x110] sm:$0xff]  }
  0x86   : > { %2477 = vmatprep.subr.bf16.mxu0 %v2849_v43  ;;  %2768 = vmatprep.subr.bf16.mxu1 %v2849_v43  ;;  %v2902_v22 = vld [vmem:[%s3468_s30 + $0xc] ss:$20 sps:$4 sm:$0xff]   ;;  %v2906_v28 = vld [vmem:[%s3468_s30 + $0x34] ss:$20 sps:$4 sm:$0xff]   ;;  %v2909_v31 = vld [vmem:[%s3468_s30 + $0x30] ss:$20 sps:$4 sm:$0xff]  }
  0x87   : > { %v2904_v27 = vld [vmem:[%s3468_s30 + $0xcc] ss:$20 sps:$4 sm:$0xff]   ;;  %v2908_v30 = vld [vmem:[%s3468_s30 + $0xc8] ss:$20 sps:$4 sm:$0xff]   ;;  %v2915_v35 = vld [vmem:[%s3468_s30 + $0xf0] ss:$20 sps:$4 sm:$0xff]  }
  0x88   : > { %v2937_v29 = vld [vmem:[%s3461_s24 + $0x108] sm:$0xff]   ;;  %v2913_v33 = vld [vmem:[%s3468_s30 + $0x5c] ss:$20 sps:$4 sm:$0xff]   ;;  %v2950_v34 = vld [vmem:[%s3461_s24 + $0x100] sm:$0xff]  }
  0x89   : > { %2478 = vmatpush3.bf16.msra.mxu0 %v2850_v46  ;;  %2776 = vmatpush3.bf16.msra.mxu1 %v2850_v46  ;;  %v2911_v32 = vld [vmem:[%s3468_s30 + $0xf4] ss:$20 sps:$4 sm:$0xff]   ;;  %v2916_v36 = vld [vmem:[%s3468_s30 + $0x58] ss:$20 sps:$4 sm:$0xff]   ;;  %v2918_v37 = vld [vmem:[%s3468_s30 + $0x11c] ss:$20 sps:$4 sm:$0xff]  }
  0x8a   : > { %2479 = vmatprep.subr.bf16.mxu0 %v2851_v47  ;;  %2769 = vmatprep.subr.bf16.mxu1 %v2851_v47  ;;  %v2920_v38 = vld [vmem:[%s3468_s30 + $0x84] ss:$20 sps:$4 sm:$0xff]   ;;  %v2923_v40 = vld [vmem:[%s3468_s30 + $0x80] ss:$20 sps:$4 sm:$0xff]   ;;  %v2929_v44 = vld [vmem:[%s3468_s30 + $0xa8] ss:$20 sps:$4 sm:$0xff]  }
  0x8b   : > { %v2922_v39 = vld [vmem:[%s3468_s30 + $0x118] ss:$20 sps:$4 sm:$0xff]   ;;  %v2928_v43 = vld [vmem:[%s3468_s30 + $0x140] ss:$20 sps:$4 sm:$0xff]   ;;  %v2935_v47 = vld [vmem:[%s3468_s30 + $0x168] ss:$20 sps:$4 sm:$0xff]  }
  0x8c   : > { %v2924_v41 = vld [vmem:[%s3468_s30 + $0x144] ss:$20 sps:$4 sm:$0xff]   ;;  %v2926_v42 = vld [vmem:[%s3468_s30 + $0xac] ss:$20 sps:$4 sm:$0xff]   ;;  %v2933_v46 = vld [vmem:[%s3468_s30 + $0xd4] ss:$20 sps:$4 sm:$0xff]  }
  0x8d   : > { %2480 = vmatpush3.bf16.msra.mxu0 %v2852_v48  ;;  %2777 = vmatpush3.bf16.msra.mxu1 %v2852_v48  ;;  %v2931_v45 = vld [vmem:[%s3468_s30 + $0x16c] ss:$20 sps:$4 sm:$0xff]   ;;  %v2936_v48 = vld [vmem:[%s3468_s30 + $0xd0] ss:$20 sps:$4 sm:$0xff]  }
  0x8e   : > { %2481 = vmatprep.subr.bf16.mxu0 %v2853_v49  ;;  %2770 = vmatprep.subr.bf16.mxu1 %v2853_v49  ;;  %v2938_v49 = vld [vmem:[%s3468_s30 + $0x194] ss:$20 sps:$4 sm:$0xff]  }
  0x91   : > { %2482 = vmatpush3.bf16.msra.mxu0 %v2854_v50  ;;  %2778 = vmatpush3.bf16.msra.mxu1 %v2854_v50  ;;  %v2940_v50 = vld [vmem:[%s3468_s30 + $0xfc] ss:$20 sps:$4 sm:$0xff]  }
  0x92   : > { %2579 = vmatprep.subr.bf16.mxu1 %v2861_v51  ;;  %2715 = vmatprep.subr.bf16.mxu0 %v2864_v52  ;;  %v2942_v51 = vld [vmem:[%s3468_s30 + $0x190] ss:$20 sps:$4 sm:$0xff]  }
  0x94   : > { %1364 = vmatmul.mubr.bf16.vlgmr.msra.gmra.mxu0 %v2855_v53  ;;  %1460 = vmatmul.mubr.bf16.vlgmr.msra.gmra.mxu1 %v2858_v54  ;;  %v2944_v53 = vld [vmem:[%s3468_s30 + $0x1bc] ss:$20 sps:$4 sm:$0xff]   ;;  %v2946_v54 = vld [vmem:[%s3468_s30 + $0x124] ss:$20 sps:$4 sm:$0xff]  }
  0x95   : > { %2580 = vmatpush3.bf16.msra.mxu1 %v2862_v55  ;;  %2716 = vmatpush3.bf16.msra.mxu0 %v2864_v52  ;;  %v2943_v52 = vld [vmem:[%s3468_s30 + $0xf8] ss:$20 sps:$4 sm:$0xff]  }
  0x96   : > { %2581 = vmatprep.subr.bf16.mxu1 %v2863_v56  ;;  %1371 = vmatprep.mubr.bf16.mxu0 %v2866_v57  ;;  %v2948_v55 = vld [vmem:[%s3468_s30 + $0x1b8] ss:$20 sps:$4 sm:$0xff]   ;;  %v2949_v56 = vld [vmem:[%s3468_s30 + $0x120] ss:$20 sps:$4 sm:$0xff]  }
  0x97   : > { %1467 = vmatprep.mubr.bf16.mxu1 %v2868_v58  ;;  %2717 = vmatprep.subr.bf16.mxu0 %v2883_v59  ;;  %v2951_v57 = vld [vmem:[%s3468_s30 + $0x14c] ss:$20 sps:$4 sm:$0xff]   ;;  %v2953_v58 = vld [vmem:[%s3468_s30 + $0x10] ss:$20 sps:$4 sm:$0xff]  }
  0x99   : > { %2582 = vmatpush3.bf16.msra.mxu1 %v2865_v60  ;;  %2718 = vmatpush3.bf16.msra.mxu0 %v2883_v59  ;;  %v2954_v59 = vld [vmem:[%s3468_s30 + $0x148] ss:$20 sps:$4 sm:$0xff]   ;;  %v2955_v60 = vld [vmem:[%s3468_s30 + $0x38] ss:$20 sps:$4 sm:$0xff]  }
  0x9a   : > { %2583 = vmatprep.subr.bf16.mxu1 %v2872_v62  ;;  %2719 = vmatprep.subr.bf16.mxu0 %v2896_v7  ;;  %v2958_v62 = vld [vmem:[%s3468_s30 + $0x60] ss:$20 sps:$4 sm:$0xff]  }
  0x9c   : > { %1372 = vmatmul.mubr.bf16.gmra.mxu0 %v2870_v61  ;;  %1468 = vmatmul.mubr.bf16.gmra.mxu1 %v2871_v63  ;;  %v2956_v61 = vld [vmem:[%s3468_s30 + $0x174] ss:$20 sps:$4 sm:$0xff]   ;;  %v2959_v63 = vld [vmem:[%s3468_s30 + $0x170] ss:$20 sps:$4 sm:$0xff]  }
  0x9d   : > { %2584 = vmatpush3.bf16.msra.mxu1 %v2873_v0  ;;  %1379 = vmatprep.mubr.bf16.mxu0 %v2876_v1  ;;  %v2960_v0 = vld [vmem:[%s3468_s30 + $0x88] ss:$20 sps:$4 sm:$0xff]  }
  0x9e   : > { %2585 = vmatprep.subr.bf16.mxu1 %v2874_v2  ;;  %1475 = vmatprep.mubr.bf16.mxu1 %v2878_v3  ;;  %v2961_v1 = vld [vmem:[%s3468_s30 + $0x19c] ss:$20 sps:$4 sm:$0xff]   ;;  %v2964_v3 = vld [vmem:[%s3468_s30 + $0x198] ss:$20 sps:$4 sm:$0xff]  }
  0x9f   : > { %2720 = vmatpush3.bf16.msra.mxu0 %v2896_v7  ;;  %v2963_v2 = vld [vmem:[%s3468_s30 + $0xb0] ss:$20 sps:$4 sm:$0xff]   ;;  %v2969_v7 = vld [vmem:[%s3468_s30 + $0x1c0] ss:$20 sps:$4 sm:$0xff]  }
  0xa0   : > { %2721 = vmatprep.subr.bf16.mxu0 %v2910_v14 }
  0xa1   : > { %2586 = vmatpush3.bf16.msra.mxu1 %v2875_v4  ;;  %v2965_v4 = vld [vmem:[%s3468_s30 + $0xd8] ss:$20 sps:$4 sm:$0xff]  }
  0xa2   : > { %2587 = vmatprep.subr.bf16.mxu1 %v2882_v5  ;;  %v2966_v5 = vld [vmem:[%s3468_s30 + $0x1c4] ss:$20 sps:$4 sm:$0xff]  }
  0xa3   : > { %2722 = vmatpush3.bf16.msra.mxu0 %v2910_v14  ;;  %v2978_v14 = vld [vmem:[%s3468_s30 + $0x1a0] ss:$20 sps:$4 sm:$0xff]  }
  0xa4   : > { %1380 = vmatmul.mubr.bf16.gmra.mxu0 %v2880_v6  ;;  %1476 = vmatmul.mubr.bf16.gmra.mxu1 %v2881_v8  ;;  %v2968_v6 = vld [vmem:[%s3468_s30 + $0x100] ss:$20 sps:$4 sm:$0xff]   ;;  %v2970_v8 = vld [vmem:[%s3468_s30 + $0x128] ss:$20 sps:$4 sm:$0xff]  }
  0xa5   : > { %2588 = vmatpush3.bf16.msra.mxu1 %v2884_v9  ;;  %1387 = vmatprep.mubr.bf16.mxu0 %v2887_v11  ;;  %v2971_v9 = vld [vmem:[%s3468_s30 + $0x1ec] ss:$20 sps:$4 sm:$0xff]   ;;  %v2974_v11 = vld [vmem:[%s3468_s30 + $0x1e8] ss:$20 sps:$4 sm:$0xff]  }
  0xa6   : > { %2589 = vmatprep.subr.bf16.mxu1 %v2885_v10  ;;  %1483 = vmatprep.mubr.bf16.mxu1 %v2889_v12  ;;  %v2973_v10 = vld [vmem:[%s3468_s30 + $0x150] ss:$20 sps:$4 sm:$0xff]   ;;  %v2975_v12 = vld [vmem:[%s3468_s30 + $0x178] ss:$20 sps:$4 sm:$0xff]  }
  0xa7   : > { %2723 = vmatprep.subr.bf16.mxu0 %v2917_v21 }
  0xa8   : > { %2724 = vmatpush3.bf16.msra.mxu0 %v2917_v21  ;;  %v2986_v21 = vld [vmem:[%s3468_s30 + $0x264] ss:$20 sps:$4 sm:$0xff]  }
  0xa9   : > { %2590 = vmatpush3.bf16.msra.mxu1 %v2886_v13  ;;  %2725 = vmatprep.subr.bf16.mxu0 %v2930_v26  ;;  %v2976_v13 = vld [vmem:[%s3468_s30 + $0x214] ss:$20 sps:$4 sm:$0xff]  }
  0xaa   : > { %2591 = vmatprep.subr.bf16.mxu1 %v2893_v17  ;;  %v2981_v17 = vld [vmem:[%s3468_s30 + $0x23c] ss:$20 sps:$4 sm:$0xff]  }
  0xac   : > { %1388 = vmatmul.mubr.bf16.gmra.mxu0 %v2891_v15  ;;  %1484 = vmatmul.mubr.bf16.gmra.mxu1 %v2892_v16  ;;  %v2979_v15 = vld [vmem:[%s3468_s30 + $0x210] ss:$20 sps:$4 sm:$0xff]   ;;  %v2980_v16 = vld [vmem:[%s3468_s30 + $0x1c8] ss:$20 sps:$4 sm:$0xff]  }
  0xad   : > { %2592 = vmatpush3.bf16.msra.mxu1 %v2894_v18  ;;  %1395 = vmatprep.mubr.bf16.mxu0 %v2898_v20  ;;  %v2983_v18 = vld [vmem:[%s3468_s30 + $0x1f0] ss:$20 sps:$4 sm:$0xff]   ;;  %v2985_v20 = vld [vmem:[%s3468_s30 + $0x218] ss:$20 sps:$4 sm:$0xff]  }
  0xae   : > { %2593 = vmatprep.subr.bf16.mxu1 %v2895_v19  ;;  %1524 = vmatprep.mubr.bf16.mxu1 %v2902_v22  ;;  %v2984_v19 = vld [vmem:[%s3468_s30 + $0x238] ss:$20 sps:$4 sm:$0xff]   ;;  %v2988_v22 = vld [vmem:[%s3468_s30 + $0x240] ss:$20 sps:$4 sm:$0xff]  }
  0xaf   : > { %2726 = vmatpush3.bf16.msra.mxu0 %v2930_v26 }
  0xb0   : > { %2727 = vmatprep.subr.bf16.mxu0 %v2937_v29 }
  0xb1   : > { %2594 = vmatpush3.bf16.msra.mxu1 %v2897_v23  ;;  %v2989_v23 = vld [vmem:[%s3468_s30 + $0x260] ss:$20 sps:$4 sm:$0xff]  }
  0xb3   : > { %2728 = vmatpush3.bf16.msra.mxu0 %v2937_v29 }
  0xb4   : > { %1396 = vmatmul.mubr.bf16.gmra.mxu0 %v2903_v25  ;;  %1525 = vmatmul.mubr.bf16.vlgmr.msra.gmra.mxu1 %v2900_v24  ;;  %v2990_v24 = vld [vmem:[%s3468_s30 + $0x268] ss:$20 sps:$4 sm:$0xff]  }
  0xb5   : > { %1403 = vmatprep.mubr.bf16.mxu0 %v2904_v27  ;;  %1532 = vmatprep.mubr.bf16.mxu1 %v2906_v28 }
  0xb6   : > { %2729 = vmatprep.subr.bf16.mxu0 %v2950_v34 }
  0xb7   : > { %2730 = vmatpush3.bf16.msra.mxu0 %v2950_v34 }
  0xbc   : > { %1404 = vmatmul.mubr.bf16.gmra.mxu0 %v2908_v30  ;;  %1533 = vmatmul.mubr.bf16.gmra.mxu1 %v2909_v31 }
  0xbd   : > { %1411 = vmatprep.mubr.bf16.mxu0 %v2911_v32  ;;  %1540 = vmatprep.mubr.bf16.mxu1 %v2913_v33 }
  0xc4   : > { %1412 = vmatmul.mubr.bf16.gmra.mxu0 %v2915_v35  ;;  %1541 = vmatmul.mubr.bf16.gmra.mxu1 %v2916_v36 }
  0xc5   : > { %1419 = vmatprep.mubr.bf16.mxu0 %v2918_v37  ;;  %1548 = vmatprep.mubr.bf16.mxu1 %v2920_v38 }
  0xcc   : > { %1420 = vmatmul.mubr.bf16.gmra.mxu0 %v2922_v39  ;;  %1549 = vmatmul.mubr.bf16.gmra.mxu1 %v2923_v40 }
  0xcd   : > { %1427 = vmatprep.mubr.bf16.mxu0 %v2924_v41  ;;  %1556 = vmatprep.mubr.bf16.mxu1 %v2926_v42 }
  0xd4   : > { %1428 = vmatmul.mubr.bf16.gmra.mxu0 %v2928_v43  ;;  %1557 = vmatmul.mubr.bf16.gmra.mxu1 %v2929_v44 }
  0xd5   : > { %1435 = vmatprep.mubr.bf16.mxu0 %v2931_v45  ;;  %1564 = vmatprep.mubr.bf16.mxu1 %v2933_v46 }
  0xdc   : > { %1436 = vmatmul.mubr.bf16.gmra.mxu0 %v2935_v47  ;;  %1565 = vmatmul.mubr.bf16.gmra.mxu1 %v2936_v48 }
  0xdd   : > { %1443 = vmatprep.mubr.bf16.mxu0 %v2938_v49  ;;  %1572 = vmatprep.mubr.bf16.mxu1 %v2940_v50 }
  0xe4   : > { %1444 = vmatmul.mubr.bf16.gmra.mxu0 %v2942_v51  ;;  %1573 = vmatmul.mubr.bf16.gmra.mxu1 %v2943_v52 }
  0xe5   : > { %1451 = vmatprep.mubr.bf16.mxu0 %v2944_v53  ;;  %1580 = vmatprep.mubr.bf16.mxu1 %v2946_v54 }
  0xec   : > { %1452 = vmatmul.mubr.bf16.gmra.mxu0 %v2948_v55  ;;  %1581 = vmatmul.mubr.bf16.gmra.mxu1 %v2949_v56 }
  0xed   : > { %1588 = vmatprep.mubr.bf16.mxu1 %v2951_v57  ;;  %2731 = vmatprep.mubr.bf16.mxu0 %v2953_v58 }
  0xf4   : > { %1589 = vmatmul.mubr.bf16.gmra.mxu1 %v2954_v59  ;;  %2732 = vmatmul.mubr.bf16.vlgmr.msra.gmra.mxu0 %v2955_v60 }
  0xf5   : > { %1596 = vmatprep.mubr.bf16.mxu1 %v2956_v61  ;;  %2735 = vmatprep.mubr.bf16.mxu0 %v2958_v62 }
  0xfc   : > { %1597 = vmatmul.mubr.bf16.gmra.mxu1 %v2959_v63  ;;  %2736 = vmatmul.mubr.bf16.gmra.mxu0 %v2960_v0 }
  0xfd   : > { %1604 = vmatprep.mubr.bf16.mxu1 %v2961_v1  ;;  %2739 = vmatprep.mubr.bf16.mxu0 %v2963_v2 }
 0x104   : > { %1605 = vmatmul.mubr.bf16.gmra.mxu1 %v2964_v3  ;;  %2740 = vmatmul.mubr.bf16.gmra.mxu0 %v2965_v4 }
 0x105   : > { %1612 = vmatprep.mubr.bf16.mxu1 %v2966_v5  ;;  %2743 = vmatprep.mubr.bf16.mxu0 %v2968_v6 }
 0x10c   : > { %1613 = vmatmul.mubr.bf16.gmra.mxu1 %v2969_v7  ;;  %2744 = vmatmul.mubr.bf16.gmra.mxu0 %v2970_v8 }
 0x10d   : > { %1620 = vmatprep.mubr.bf16.mxu1 %v2971_v9  ;;  %2747 = vmatprep.mubr.bf16.mxu0 %v2973_v10 }
 0x114   : > { %1621 = vmatmul.mubr.bf16.gmra.mxu1 %v2974_v11  ;;  %2748 = vmatmul.mubr.bf16.gmra.mxu0 %v2975_v12 }
 0x115   : > { %1628 = vmatprep.mubr.bf16.mxu1 %v2976_v13  ;;  %2751 = vmatprep.mubr.bf16.mxu0 %v2978_v14 }
 0x11c   : > { %1629 = vmatmul.mubr.bf16.gmra.mxu1 %v2979_v15  ;;  %2752 = vmatmul.mubr.bf16.gmra.mxu0 %v2980_v16 }
 0x11d   : > { %1636 = vmatprep.mubr.bf16.mxu1 %v2981_v17  ;;  %2755 = vmatprep.mubr.bf16.mxu0 %v2983_v18 }
 0x124   : > { %1637 = vmatmul.mubr.bf16.gmra.mxu1 %v2984_v19  ;;  %2756 = vmatmul.mubr.bf16.gmra.mxu0 %v2985_v20 }
 0x125   : > { %1644 = vmatprep.mubr.bf16.mxu1 %v2986_v21  ;;  %2759 = vmatprep.mubr.bf16.mxu0 %v2988_v22 }
 0x12c   : > { %1645 = vmatmul.mubr.bf16.gmra.mxu1 %v2989_v23  ;;  %2760 = vmatmul.mubr.bf16.gmra.mxu0 %v2990_v24 }
 0x154   : > { %v2483_v25 = vpop.f32.mrf.mxu0  ;;  %v2555_v26 = vpop.f32.mrf.mxu1 }
 0x156   : > { %v2484_v27 = vpop.f32.mrf.mxu0  ;;  %v2556_v28 = vpop.f32.mrf.mxu1 }
 0x157   : > { %v3591_v29 = vadd.f32 %v2484_v27, %v2483_v25  ;;  %v3593_v30 = vadd.f32 %v2556_v28, %v2555_v26 }
 0x158   : > { %v2486_v31 = vpop.f32.mrf.mxu0  ;;  %v2558_v32 = vpop.f32.mrf.mxu1 }
 0x159   : > { %3923 = vst [vmem:[#allocation4_spill] sm:$0xff] %v3593_v30 }
 0x15a   : > { %v2487_v33 = vpop.f32.mrf.mxu0  ;;  %v2559_v34 = vpop.f32.mrf.mxu1 }
 0x15b   : > { %v3595_v35 = vadd.f32 %v2487_v33, %v2486_v31  ;;  %v3597_v36 = vadd.f32 %v2559_v34, %v2558_v32 }
 0x15c   : > { %v2489_v37 = vpop.f32.mrf.mxu0  ;;  %v2561_v38 = vpop.f32.mrf.mxu1 }
 0x15d   : > { %3924 = vst [vmem:[#allocation5_spill] sm:$0xff] %v3597_v36 }
 0x15e   : > { %v2490_v39 = vpop.f32.mrf.mxu0  ;;  %v2562_v40 = vpop.f32.mrf.mxu1 }
 0x15f   : > { %v3599_v41 = vadd.f32 %v2490_v39, %v2489_v37  ;;  %v3601_v42 = vadd.f32 %v2562_v40, %v2561_v38 }
 0x160   : > { %v2492_v43 = vpop.f32.mrf.mxu0  ;;  %v2564_v44 = vpop.f32.mrf.mxu1 }
 0x161   : > { %3925 = vst [vmem:[#allocation6_spill] sm:$0xff] %v3601_v42 }
 0x162   : > { %v2493_v45 = vpop.f32.mrf.mxu0  ;;  %v2565_v46 = vpop.f32.mrf.mxu1 }
 0x163   : > { %v3603_v47 = vadd.f32 %v2493_v45, %v2492_v43  ;;  %v3605_v48 = vadd.f32 %v2565_v46, %v2564_v44 }
 0x164   : > { %v2495_v49 = vpop.f32.mrf.mxu0  ;;  %v2567_v50 = vpop.f32.mrf.mxu1 }
 0x165   : > { %3926 = vst [vmem:[#allocation7_spill] sm:$0xff] %v3605_v48 }
 0x166   : > { %v2496_v51 = vpop.f32.mrf.mxu0  ;;  %v2568_v52 = vpop.f32.mrf.mxu1 }
 0x167   : > { %v3607_v53 = vadd.f32 %v2496_v51, %v2495_v49  ;;  %v3609_v54 = vadd.f32 %v2568_v52, %v2567_v50 }
 0x168   : > { %v2498_v55 = vpop.f32.mrf.mxu0  ;;  %v2570_v56 = vpop.f32.mrf.mxu1 }
 0x169   : > { %3927 = vst [vmem:[#allocation8_spill] sm:$0xff] %v3609_v54 }
 0x16a   : > { %v2499_v57 = vpop.f32.mrf.mxu0  ;;  %v2571_v58 = vpop.f32.mrf.mxu1 }
 0x16b   : > { %v3611_v59 = vadd.f32 %v2499_v57, %v2498_v55  ;;  %v3613_v60 = vadd.f32 %v2571_v58, %v2570_v56 }
 0x16c   : > { %v2501_v61 = vpop.f32.mrf.mxu0  ;;  %v2573_v62 = vpop.f32.mrf.mxu1 }
 0x16d   : > { %3928 = vst [vmem:[#allocation9_spill] sm:$0xff] %v3613_v60 }
 0x16e   : > { %v2502_v63 = vpop.f32.mrf.mxu0  ;;  %v2574_v0 = vpop.f32.mrf.mxu1 }
 0x16f   : > { %v3615_v1 = vadd.f32 %v2502_v63, %v2501_v61  ;;  %v3617_v2 = vadd.f32 %v2574_v0, %v2573_v62 }
 0x170   : > { %v2504_v3 = vpop.f32.mrf.mxu0  ;;  %v2576_v4 = vpop.f32.mrf.mxu1 }
 0x171   : > { %3929 = vst [vmem:[#allocation10_spill] sm:$0xff] %v3617_v2 }
 0x172   : > { %v2505_v5 = vpop.f32.mrf.mxu0  ;;  %v2577_v6 = vpop.f32.mrf.mxu1 }
 0x173   : > { %v3619_v7 = vadd.f32 %v2505_v5, %v2504_v3  ;;  %v3621_v8 = vadd.f32 %v2577_v6, %v2576_v4 }
 0x174   : > { %v2507_v9 = vpop.f32.mrf.mxu0  ;;  %v3623_v10 = vpop.f32.mrf.mxu1 }
 0x175   : > { %3930 = vst [vmem:[#allocation11_spill] sm:$0xff] %v3621_v8 }
 0x176   : > { %v2508_v11 = vpop.f32.mrf.mxu0  ;;  %v3625_v12 = vpop.f32.mrf.mxu1 }
 0x177   : > { %v3627_v13 = vadd.f32 %v2508_v11, %v2507_v9 }
 0x178   : > { %v2510_v14 = vpop.f32.mrf.mxu0  ;;  %v3629_v15 = vpop.f32.mrf.mxu1 }
 0x17a   : > { %v2511_v16 = vpop.f32.mrf.mxu0  ;;  %v3631_v17 = vpop.f32.mrf.mxu1 }
 0x17b   : > { %v3633_v18 = vadd.f32 %v2511_v16, %v2510_v14 }
 0x17c   : > { %v2513_v19 = vpop.f32.mrf.mxu0  ;;  %v2601_v20 = vpop.f32.mrf.mxu1 }
 0x17e   : > { %v2514_v21 = vpop.f32.mrf.mxu0  ;;  %v2602_v22 = vpop.f32.mrf.mxu1 }
 0x17f   : > { %v3635_v23 = vadd.f32 %v2514_v21, %v2513_v19  ;;  %v2603_v30 = vadd.f32 %v2602_v22, %v2601_v20  ;;  %v2600_v20 = vadd.f32 %v3631_v17, %v3629_v15 }
 0x180   : > { %v2516_v24 = vpop.f32.mrf.mxu0  ;;  %v2604_v25 = vpop.f32.mrf.mxu1 }
 0x182   : > { %v2517_v26 = vpop.f32.mrf.mxu0  ;;  %v2605_v27 = vpop.f32.mrf.mxu1 }
 0x183   : > { %v3637_v28 = vadd.f32 %v2517_v26, %v2516_v24 }
 0x184   : > { %v2519_v31 = vpop.f32.mrf.mxu0  ;;  %v3639_v32 = vpop.f32.mrf.mxu1 }
 0x186   : > { %v2520_v33 = vpop.f32.mrf.mxu0  ;;  %v3641_v34 = vpop.f32.mrf.mxu1 }
 0x187   : > { %v3643_v37 = vadd.f32 %v2520_v33, %v2519_v31 }
 0x188   : > { %v2522_v38 = vpop.f32.mrf.mxu0  ;;  %v3645_v39 = vpop.f32.mrf.mxu1 }
 0x18a   : > { %v2523_v40 = vpop.f32.mrf.mxu0  ;;  %v3647_v43 = vpop.f32.mrf.mxu1 }
 0x18b   : > { %v3649_v44 = vadd.f32 %v2523_v40, %v2522_v38 }
 0x18c   : > { %v3651_v45 = vpop.f32.mrf.mxu0  ;;  %v2613_v46 = vpop.f32.mrf.mxu1 }
 0x18d   : > { %3931 = vst [vmem:[#allocation12_spill] sm:$0xff] %v3649_v44  ;;  %v2609_v44 = vadd.f32 %v3641_v34, %v3639_v32  ;;  %v2612_v34 = vadd.f32 %v3647_v43, %v3645_v39  ;;  %v474_v39 = vld [vmem:[#allocation2 + $0x48] sm:$0xff] }
 0x18e   : > { %v3653_v49 = vpop.f32.mrf.mxu0  ;;  %v2614_v50 = vpop.f32.mrf.mxu1 }
 0x190   : > { %v3655_v51 = vpop.f32.mrf.mxu0  ;;  %v3657_v52 = vpop.f32.mrf.mxu1 }
 0x192   : > { %v3659_v55 = vpop.f32.mrf.mxu0  ;;  %v2617_v56 = vpop.f32.mrf.mxu1 }
 0x194   : > { %v3661_v57 = vpop.f32.mrf.mxu0  ;;  %v3663_v58 = vpop.f32.mrf.mxu1 }
 0x195   : > { %3932 = vst [vmem:[#allocation13_spill] sm:$0xff] %v3661_v57 }
 0x196   : > { %v3665_v61 = vpop.f32.mrf.mxu0  ;;  %v3667_v62 = vpop.f32.mrf.mxu1 }
 0x197   : > { %3933 = vst [vmem:[#allocation14_spill] sm:$0xff] %v3665_v61 }
 0x198   : > { %v3669_v63 = vpop.f32.mrf.mxu0  ;;  %v3671_v0 = vpop.f32.mrf.mxu1 }
 0x199   : > { %3934 = vst [vmem:[#allocation15_spill] sm:$0xff] %v3669_v63 }
 0x19a   : > { %v3673_v3 = vpop.f32.mrf.mxu0  ;;  %v3675_v4 = vpop.f32.mrf.mxu1 }
 0x19b   : > { %3935 = vst [vmem:[#allocation16_spill] sm:$0xff] %v3673_v3  ;;  %v2606_v3 = vadd.f32 %v2605_v27, %v2604_v25 }
 0x19c   : > { %v3677_v5 = vpop.f32.mrf.mxu0  ;;  %v3679_v6 = vpop.f32.mrf.mxu1 }
 0x19d   : > { %v1538_v25 = vadd.f32 %v2606_v3, %v3603_v47 }
 0x19e   : > { %v3681_v9 = vpop.f32.mrf.mxu0  ;;  %v3683_v11 = vpop.f32.mrf.mxu1 }
 0x1a0   : > { %v3685_v14 = vpop.f32.mrf.mxu0  ;;  %v3687_v16 = vpop.f32.mrf.mxu1 }
 0x1a1   : > { %3936 = vst [vmem:[#allocation17_spill] sm:$0xff] %v3685_v14 }
 0x1a2   : > { %v3689_v19 = vpop.f32.mrf.mxu0  ;;  %v3691_v21 = vpop.f32.mrf.mxu1 }
 0x1a3   : > { %3937 = vst [vmem:[#allocation18_spill] sm:$0xff] %v3689_v19 }
 0x1a4   : > { %v3693_v24 = vpop.f32.mrf.mxu0  ;;  %v3695_v26 = vpop.f32.mrf.mxu1 }
 0x1a5   : > { %3938 = vst [vmem:[#allocation19_spill] sm:$0xff] %v3693_v24 }
 0x1a6   : > { %v3697_v31 = vpop.f32.mrf.mxu0  ;;  %v3699_v33 = vpop.f32.mrf.mxu1 }
 0x1a7   : > { %3939 = vst [vmem:[#allocation20_spill] sm:$0xff] %v3697_v31 }
 0x1a8   : > { %v3701_v38 = vpop.f32.mrf.mxu0  ;;  %v3703_v40 = vpop.f32.mrf.mxu1 }
 0x1a9   : > { %3940 = vst [vmem:[#allocation21_spill] sm:$0xff] %v3701_v38  ;;  %v2597_v38 = vadd.f32 %v3625_v12, %v3623_v10  ;;  %v467_v10 = vld [vmem:[#allocation2 + $0xb0] sm:$0xff] }
 0x1aa   : > { %v3705_v8 = vpop.f32.mrf.mxu0  ;;  %v3707_v60 = vpop.f32.mrf.mxu1 }
 0x1ab   : > { %3941 = vst [vmem:[#allocation22_spill] sm:$0xff] %v3705_v8 }
 0x1ac   : > { %v3709_v2 = vpop.f32.mrf.mxu0  ;;  %v3711_v54 = vpop.f32.mrf.mxu1 }
 0x1ad   : > { %3942 = vst [vmem:[#allocation23_spill] sm:$0xff] %v3709_v2  ;;  %v1535_v2 = vadd.f32 %v2603_v30, %v3599_v41  ;;  %v470_v41 = vld [vmem:[#allocation2 + $0x18] sm:$0xff] }
 0x1ae   : > { %v3713_v36 = vpop.f32.mrf.mxu0  ;;  %v3715_v48 = vpop.f32.mrf.mxu1 }
 0x1af   : > { %3943 = vst [vmem:[#allocation24_spill] sm:$0xff] %v3713_v36  ;;  %v469_v36 = vld [vmem:[#allocation2 + $0xd8] sm:$0xff] }
 0x1b0   : > { %v3717_v42 = vpop.f32.mrf.mxu0  ;;  %v3719_v31 = vpop.f32.mrf.mxu1 }
 0x1b1   : > { %3944 = vst [vmem:[#allocation25_spill] sm:$0xff] %v3717_v42  ;;  %v1527_v42 = vadd.f32 %v2597_v38, %v3591_v29  ;;  %v1530_v29 = vadd.f32 %v2600_v20, %v3595_v35  ;;  %v473_v38 = vld [vmem:[#allocation2 + $0x30] sm:$0xff] }
 0x1b2   : > { %v3723_v24 = vpop.f32.mrf.mxu0  ;;  %v3725_v8 = vpop.f32.mrf.mxu1 }
 0x1b3   : > { %3945 = vst [vmem:[#allocation26_spill] sm:$0xff] %v3723_v24  ;;  %v2615_v24 = vadd.f32 %v2614_v50, %v2613_v46 }
 0x1b4   : > { %v3728_v63 = vpop.f32.mrf.mxu1  ;;  %v2733_v19 = vpop.f32.mrf.mxu0 }
 0x1b5   : > { %v1696_v22 = vadd.f32 %v2733_v19, %v1535_v2  ;;  %v468_v19 = vld [vmem:[#allocation2] sm:$0xff]  ;;  %v1551_v50 = vadd.f32 %v2615_v24, %v3615_v1 }
 0x1b6   : > { %v3733_v14 = vpop.f32.mrf.mxu1  ;;  %v1687_v12 = vpop.f32.mrf.mxu0 }
 0x1b7   : > { %v1816_v61 = vadd.f32 %v1696_v22, %v469_v36  ;;  %v1688_v57 = vadd.f32 %v1687_v12, %v1527_v42  ;;  %v2618_v36 = vadd.f32 %v2617_v56, %v3657_v52  ;;  %v471_v52 = vld [vmem:[#allocation2 + $0x50] sm:$0xff]  ;;  %v2627_v22 = vadd.f32 %v3683_v11, %v3679_v6  ;;  %v472_v6 = vld [vmem:[#allocation2 + $0x68] sm:$0xff] }
 0x1b8   : > { %v3736_v30 = vpop.f32.mrf.mxu1  ;;  %v2734_v27 = vpop.f32.mrf.mxu0 }
 0x1b9   : > { %1848 = vst [vmem:[#allocation2 + $0xd8] sm:$0xff] %v1816_v61  ;;  %v1814_v2 = vadd.f32 %v1688_v57, %v467_v10  ;;  %v1699_v15 = vadd.f32 %v2734_v27, %v1538_v25  ;;  %v1543_v61 = vadd.f32 %v2609_v44, %v3607_v53  ;;  %v1554_v10 = vadd.f32 %v2618_v36, %v3619_v7 }
 0x1ba   : > { %v3741_v17 = vpop.f32.mrf.mxu1  ;;  %v1690_v46 = vpop.f32.mrf.mxu0  ;;  %v2621_v25 = vadd.f32 %v3667_v62, %v3663_v58  ;;  %v477_v58 = vld [vmem:[#allocation2 + $0xe8] sm:$0xff] }
 0x1bb   : > { %1846 = vst [vmem:[#allocation2 + $0xb0] sm:$0xff] %v1814_v2  ;;  %v1817_v42 = vadd.f32 %v1699_v15, %v470_v41  ;;  %v1691_v47 = vadd.f32 %v1690_v46, %v1530_v29  ;;  %v1546_v41 = vadd.f32 %v2612_v34, %v3611_v59  ;;  %v2630_v2 = vadd.f32 %v3691_v21, %v3687_v16  ;;  %v475_v16 = vld [vmem:[#allocation2 + $0x80] sm:$0xff]  ;;  %v478_v34 = vld [vmem:[#allocation2 + $0xb8] sm:$0xff] }
 0x1bc   : > { %v3745_v3 = vpop.f32.mrf.mxu1  ;;  %v2737_v32 = vpop.f32.mrf.mxu0  ;;  %v1567_v29 = vadd.f32 %v2627_v22, %v3635_v23  ;;  %v2624_v46 = vadd.f32 %v3675_v4, %v3671_v0  ;;  %v2527_v0 = vadd.f32 %v3653_v49, %v3651_v45 }
 0x1bd   : > { %1849 = vst [vmem:[#allocation2 + $0x18] sm:$0xff] %v1817_v42  ;;  %v1815_v35 = vadd.f32 %v1691_v47, %v468_v19  ;;  %v1712_v57 = vadd.f32 %v2737_v32, %v1551_v50  ;;  %v1559_v42 = vadd.f32 %v2621_v25, %v3627_v13  ;;  %v2639_v50 = vadd.f32 %v3715_v48, %v3711_v54 }
 0x1be   : > { %v3750_v20 = vpop.f32.mrf.mxu1  ;;  %v1703_v56 = vpop.f32.mrf.mxu0  ;;  %v1570_v32 = vadd.f32 %v2630_v2, %v3637_v28  ;;  %v2633_v13 = vadd.f32 %v3699_v33, %v3695_v26  ;;  %v1562_v48 = vadd.f32 %v2624_v46, %v3633_v18  ;;  %v2642_v28 = vadd.f32 %v3725_v8, %v3719_v31  ;;  %v481_v33 = vld [vmem:[#allocation2 + $0x8] sm:$0xff]  ;;  %v479_v8 = vld [vmem:[#allocation2 + $0x60] sm:$0xff] }
 0x1bf   : > { %1847 = vst [vmem:[#allocation2] sm:$0xff] %v1815_v35  ;;  %v1820_v1 = vadd.f32 %v1712_v57, %v473_v38  ;;  %v1704_v24 = vadd.f32 %v1703_v56, %v1543_v61  ;;  %v1583_v22 = vadd.f32 %v2639_v50, %v2527_v0  ;;  %v2636_v18 = vadd.f32 %v3707_v60, %v3703_v40  ;;  %v482_v60 = vld [vmem:[#allocation2 + $0x78] sm:$0xff] }
 0x1c0   : > { %v3755_v12 = vpop.f32.mrf.mxu1  ;;  %v2738_v43 = vpop.f32.mrf.mxu0 }
 0x1c1   : > { %1852 = vst [vmem:[#allocation2 + $0x30] sm:$0xff] %v1820_v1  ;;  %v1818_v53 = vadd.f32 %v1704_v24, %v471_v52  ;;  %v1715_v44 = vadd.f32 %v2738_v43, %v1554_v10  ;;  %v476_v52 = vld [vmem:[#allocation2 + $0x88] sm:$0xff]  ;;  %v2530_v1 = vadd.f32 %v3659_v55, %v3655_v51  ;;  %v1575_v43 = vadd.f32 %v2633_v13, %v3643_v37  ;;  %v483_v13 = vld [vmem:[#allocation2 + $0x38] sm:$0xff] }
 0x1c2   : > { %v3760_v27 = vpop.f32.mrf.mxu1  ;;  %v1706_v11 = vpop.f32.mrf.mxu0 }
 0x1c3   : > { %1850 = vst [vmem:[#allocation2 + $0x50] sm:$0xff] %v1818_v53  ;;  %v1821_v7 = vadd.f32 %v1715_v44, %v474_v39  ;;  %v1707_v15 = vadd.f32 %v1706_v11, %v1546_v41  ;;  %v2651_v53 = vadd.f32 %v3750_v20, %v3745_v3  ;;  %v1586_v55 = vadd.f32 %v2642_v28, %v2530_v1  ;;  %v3948_v3 = vld [vmem:[#allocation14_spill] sm:$0xff]  ;;  %v3953_v28 = vld [vmem:[#allocation23_spill] sm:$0xff] }
 0x1c4   : > { %v3765_v19 = vpop.f32.mrf.mxu1  ;;  %v2741_v62 = vpop.f32.mrf.mxu0  ;;  %v2539_v41 = vadd.f32 %v3681_v9, %v3677_v5  ;;  %v2645_v11 = vadd.f32 %v3733_v14, %v3728_v63  ;;  %v2654_v5 = vadd.f32 %v3760_v27, %v3755_v12  ;;  %v3950_v63 = vld [vmem:[#allocation18_spill] sm:$0xff] }
 0x1c5   : > { %1853 = vst [vmem:[#allocation2 + $0x48] sm:$0xff] %v1821_v7  ;;  %v1819_v59 = vadd.f32 %v1707_v15, %v472_v6  ;;  %v1728_v36 = vadd.f32 %v2741_v62, %v1567_v29  ;;  %v3946_v7 = vld [vmem:[#allocation12_spill] sm:$0xff]  ;;  %v3947_v29 = vld [vmem:[#allocation13_spill] sm:$0xff]  ;;  %v480_v62 = vld [vmem:[#allocation2 + $0xf0] sm:$0xff] }
 0x1c6   : > { %v3770_v47 = vpop.f32.mrf.mxu1  ;;  %v1719_v21 = vpop.f32.mrf.mxu0  ;;  %v1578_v15 = vadd.f32 %v2636_v18, %v3946_v7  ;;  %v2533_v20 = vadd.f32 %v3948_v3, %v3947_v29  ;;  %v3960_v29 = vld [vmem:[#allocation22_spill] sm:$0xff] }
 0x1c7   : > { %1851 = vst [vmem:[#allocation2 + $0x68] sm:$0xff] %v1819_v59  ;;  %v1824_v23 = vadd.f32 %v1728_v36, %v477_v58  ;;  %v1720_v38 = vadd.f32 %v1719_v21, %v1559_v42  ;;  %v1599_v36 = vadd.f32 %v2651_v53, %v2539_v41  ;;  %v3949_v42 = vld [vmem:[#allocation17_spill] sm:$0xff]  ;;  %v485_v21 = vld [vmem:[#allocation2 + $0x40] sm:$0xff]  ;;  %v2657_v1 = vadd.f32 %v3770_v47, %v3765_v19  ;;  %v3958_v41 = vld [vmem:[#allocation26_spill] sm:$0xff] }
 0x1c8   : > { %v3777_v4 = vpop.f32.mrf.mxu1  ;;  %v2742_v35 = vpop.f32.mrf.mxu0  ;;  %v2542_v14 = vadd.f32 %v3950_v63, %v3949_v42  ;;  %v1591_v0 = vadd.f32 %v2645_v11, %v2533_v20  ;;  %v489_v19 = vld [vmem:[#allocation2 + $0x70] sm:$0xff]  ;;  %v487_v20 = vld [vmem:[#allocation2 + $0xe0] sm:$0xff] }
 0x1c9   : > { %1856 = vst [vmem:[#allocation2 + $0xe8] sm:$0xff] %v1824_v23  ;;  %v1822_v57 = vadd.f32 %v1720_v38, %v475_v16  ;;  %v1731_v61 = vadd.f32 %v2742_v35, %v1570_v32  ;;  %v2648_v23 = vadd.f32 %v3741_v17, %v3736_v30  ;;  %v3952_v35 = vld [vmem:[#allocation16_spill] sm:$0xff]  ;;  %v486_v30 = vld [vmem:[#allocation2 + $0xc8] sm:$0xff] }
 0x1ca   : > { %v3782_v54 = vpop.f32.mrf.mxu1  ;;  %v1722_v56 = vpop.f32.mrf.mxu0 }
 0x1cb   : > { %1854 = vst [vmem:[#allocation2 + $0x80] sm:$0xff] %v1822_v57  ;;  %v1825_v45 = vadd.f32 %v1731_v61, %v478_v34  ;;  %v1723_v49 = vadd.f32 %v1722_v56, %v1562_v48  ;;  %v3951_v34 = vld [vmem:[#allocation15_spill] sm:$0xff]  ;;  %v1602_v56 = vadd.f32 %v2654_v5, %v2542_v14  ;;  %v2660_v11 = vadd.f32 %v3782_v54, %v3777_v4 }
 0x1cc   : > { %v2661_v26 = vpop.f32.mrf.mxu1  ;;  %v2745_v24 = vpop.f32.mrf.mxu0  ;;  %v2536_v12 = vadd.f32 %v3952_v35, %v3951_v34  ;;  %v3961_v34 = vld [vmem:[#allocation6_spill] sm:$0xff] }
 0x1cd   : > { %1857 = vst [vmem:[#allocation2 + $0xb8] sm:$0xff] %v1825_v45  ;;  %v1823_v10 = vadd.f32 %v1723_v49, %v476_v52  ;;  %v1744_v39 = vadd.f32 %v2745_v24, %v1583_v22  ;;  %v3954_v45 = vld [vmem:[#allocation24_spill] sm:$0xff] }
 0x1ce   : > { %v2662_v25 = vpop.f32.mrf.mxu1  ;;  %v1735_v31 = vpop.f32.mrf.mxu0  ;;  %v2551_v49 = vadd.f32 %v3954_v45, %v3953_v28  ;;  %v1594_v18 = vadd.f32 %v2648_v23, %v2536_v12  ;;  %v491_v28 = vld [vmem:[#allocation2 + $0xa8] sm:$0xff] }
 0x1cf   : > { %1855 = vst [vmem:[#allocation2 + $0x88] sm:$0xff] %v1823_v10  ;;  %v1828_v44 = vadd.f32 %v1744_v39, %v481_v33  ;;  %v1736_v51 = vadd.f32 %v1735_v31, %v1575_v43  ;;  %v2663_v61 = vadd.f32 %v2662_v25, %v2661_v26  ;;  %v3955_v10 = vld [vmem:[#allocation19_spill] sm:$0xff]  ;;  %v3956_v39 = vld [vmem:[#allocation20_spill] sm:$0xff] }
 0x1d0   : > { %v2664_v6 = vpop.f32.mrf.mxu1  ;;  %v2746_v40 = vpop.f32.mrf.mxu0  ;;  %v2545_v26 = vadd.f32 %v3956_v39, %v3955_v10  ;;  %v484_v25 = vld [vmem:[#allocation2 + $0x58] sm:$0xff] }
 0x1d1   : > { %1860 = vst [vmem:[#allocation2 + $0x8] sm:$0xff] %v1828_v44  ;;  %v1826_v37 = vadd.f32 %v1736_v51, %v479_v8  ;;  %v1747_v2 = vadd.f32 %v2746_v40, %v1586_v55  ;;  %v1615_v51 = vadd.f32 %v2663_v61, %v2551_v49  ;;  %v3957_v55 = vld [vmem:[#allocation25_spill] sm:$0xff] }
 0x1d2   : > { %v2665_v58 = vpop.f32.mrf.mxu1  ;;  %v1738_v46 = vpop.f32.mrf.mxu0  ;;  %v1607_v7 = vadd.f32 %v2657_v1, %v2545_v26  ;;  %v3964_v26 = vld [vmem:[#allocation5_spill] sm:$0xff] }
 0x1d3   : > { %1858 = vst [vmem:[#allocation2 + $0x60] sm:$0xff] %v1826_v37  ;;  %v1829_v9 = vadd.f32 %v1747_v2, %v482_v60  ;;  %v1739_v59 = vadd.f32 %v1738_v46, %v1578_v15  ;;  %v2666_v31 = vadd.f32 %v2665_v58, %v2664_v6  ;;  %v2554_v60 = vadd.f32 %v3958_v41, %v3957_v55  ;;  %v3959_v15 = vld [vmem:[#allocation21_spill] sm:$0xff] }
 0x1d4   : > { %v2667_v16 = vpop.f32.mrf.mxu1  ;;  %v2749_v50 = vpop.f32.mrf.mxu0  ;;  %v2548_v6 = vadd.f32 %v3960_v29, %v3959_v15 }
 0x1d5   : > { %1861 = vst [vmem:[#allocation2 + $0x78] sm:$0xff] %v1829_v9  ;;  %v1827_v38 = vadd.f32 %v1739_v59, %v480_v62  ;;  %v1760_v32 = vadd.f32 %v2749_v50, %v1599_v36  ;;  %v1618_v9 = vadd.f32 %v2666_v31, %v2554_v60  ;;  %v490_v36 = vld [vmem:[#allocation2 + $0xc0] sm:$0xff]  ;;  %v488_v50 = vld [vmem:[#allocation2 + $0x90] sm:$0xff] }
 0x1d6   : > { %v2668_v27 = vpop.f32.mrf.mxu1  ;;  %v1751_v57 = vpop.f32.mrf.mxu0  ;;  %v1610_v14 = vadd.f32 %v2660_v11, %v2548_v6  ;;  %v495_v11 = vld [vmem:[#allocation2 + $0xa0] sm:$0xff]  ;;  %v3966_v6 = vld [vmem:[#allocation10_spill] sm:$0xff] }
 0x1d7   : > { %1859 = vst [vmem:[#allocation2 + $0xf0] sm:$0xff] %v1827_v38  ;;  %v1832_v48 = vadd.f32 %v1760_v32, %v485_v21  ;;  %v1752_v52 = vadd.f32 %v1751_v57, %v1591_v0  ;;  %v2669_v63 = vadd.f32 %v2668_v27, %v2667_v16  ;;  %v3962_v27 = vld [vmem:[#allocation4_spill] sm:$0xff] }
 0x1d8   : > { %v2670_v22 = vpop.f32.mrf.mxu1  ;;  %v2750_v17 = vpop.f32.mrf.mxu0 }
 0x1d9   : > { %1864 = vst [vmem:[#allocation2 + $0x40] sm:$0xff] %v1832_v48  ;;  %v1830_v33 = vadd.f32 %v1752_v52, %v483_v13  ;;  %v1763_v24 = vadd.f32 %v2750_v17, %v1602_v56  ;;  %v493_v13 = vld [vmem:[#allocation2 + $0x10] sm:$0xff]  ;;  %v1623_v52 = vadd.f32 %v2669_v63, %v3962_v27  ;;  %v3963_v17 = vld [vmem:[#allocation7_spill] sm:$0xff] }
 0x1da   : > { %v2671_v43 = vpop.f32.mrf.mxu1  ;;  %v1754_v8 = vpop.f32.mrf.mxu0 }
 0x1db   : > { %1862 = vst [vmem:[#allocation2 + $0x38] sm:$0xff] %v1830_v33  ;;  %v1833_v53 = vadd.f32 %v1763_v24, %v486_v30  ;;  %v1755_v44 = vadd.f32 %v1754_v8, %v1594_v18  ;;  %v2672_v61 = vadd.f32 %v2671_v43, %v2670_v22  ;;  %v494_v24 = vld [vmem:[#allocation2 + $0x28] sm:$0xff]  ;;  %v492_v8 = vld [vmem:[#allocation2 + $0xd0] sm:$0xff] }
 0x1dc   : > { %v2673_v40 = vpop.f32.mrf.mxu1  ;;  %v2753_v47 = vpop.f32.mrf.mxu0 }
 0x1dd   : > { %1865 = vst [vmem:[#allocation2 + $0xc8] sm:$0xff] %v1833_v53  ;;  %v1831_v37 = vadd.f32 %v1755_v44, %v484_v25  ;;  %v1776_v2 = vadd.f32 %v2753_v47, %v1615_v51  ;;  %v1626_v43 = vadd.f32 %v2672_v61, %v3964_v26 }
 0x1de   : > { %v2674_v3 = vpop.f32.mrf.mxu1  ;;  %v1767_v58 = vpop.f32.mrf.mxu0 }
 0x1df   : > { %1863 = vst [vmem:[#allocation2 + $0x58] sm:$0xff] %v1831_v37  ;;  %v1836_v62 = vadd.f32 %v1776_v2, %v489_v19  ;;  %v2675_v46 = vadd.f32 %v2674_v3, %v2673_v40  ;;  %v1768_v5 = vadd.f32 %v1767_v58, %v1607_v7  ;;  %v3965_v40 = vld [vmem:[#allocation8_spill] sm:$0xff]  ;;  %v3967_v58 = vld [vmem:[#allocation9_spill] sm:$0xff] }
 0x1e0   : > { %v2676_v59 = vpop.f32.mrf.mxu1  ;;  %v2754_v42 = vpop.f32.mrf.mxu0 }
 0x1e1   : > { %1868 = vst [vmem:[#allocation2 + $0x70] sm:$0xff] %v1836_v62  ;;  %v1834_v4 = vadd.f32 %v1768_v5, %v487_v20  ;;  %v1779_v54 = vadd.f32 %v2754_v42, %v1618_v9  ;;  %v1631_v35 = vadd.f32 %v2675_v46, %v3961_v34  ;;  %v497_v46 = vld [vmem:[#allocation2 + $0x20] sm:$0xff]  ;;  %v496_v9 = vld [vmem:[#allocation2 + $0xf8] sm:$0xff] }
 0x1e2   : > { %v2677_v21 = vpop.f32.mrf.mxu1  ;;  %v1770_v23 = vpop.f32.mrf.mxu0 }
 0x1e3   : > { %1866 = vst [vmem:[#allocation2 + $0xe0] sm:$0xff] %v1834_v4  ;;  %v1837_v38 = vadd.f32 %v1779_v54, %v490_v36  ;;  %v2678_v32 = vadd.f32 %v2677_v21, %v2676_v59  ;;  %v1771_v0 = vadd.f32 %v1770_v23, %v1610_v14  ;;  %v3968_v54 = vld [vmem:[#allocation11_spill] sm:$0xff] }
 0x1e4   : > { %v2679_v12 = vpop.f32.mrf.mxu1  ;;  %v2757_v57 = vpop.f32.mrf.mxu0 }
 0x1e5   : > { %1869 = vst [vmem:[#allocation2 + $0xc0] sm:$0xff] %v1837_v38  ;;  %v1835_v48 = vadd.f32 %v1771_v0, %v488_v50  ;;  %v1792_v16 = vadd.f32 %v2757_v57, %v1631_v35  ;;  %v1634_v1 = vadd.f32 %v2678_v32, %v3963_v17  ;;  %v498_v50 = vld [vmem:[#allocation2 + $0x98] sm:$0xff] }
 0x1e6   : > { %v2680_v56 = vpop.f32.mrf.mxu1  ;;  %v1783_v45 = vpop.f32.mrf.mxu0 }
 0x1e7   : > { %1867 = vst [vmem:[#allocation2 + $0x90] sm:$0xff] %v1835_v48  ;;  %v1840_v49 = vadd.f32 %v1792_v16, %v493_v13  ;;  %v1784_v30 = vadd.f32 %v1783_v45, %v1623_v52  ;;  %v2681_v10 = vadd.f32 %v2680_v56, %v2679_v12 }
 0x1e8   : > { %v2682_v33 = vpop.f32.mrf.mxu1  ;;  %v2758_v18 = vpop.f32.mrf.mxu0 }
 0x1e9   : > { %1872 = vst [vmem:[#allocation2 + $0x10] sm:$0xff] %v1840_v49  ;;  %v1838_v39 = vadd.f32 %v1784_v30, %v491_v28  ;;  %v1795_v22 = vadd.f32 %v2758_v18, %v1634_v1  ;;  %v1639_v19 = vadd.f32 %v2681_v10, %v3965_v40 }
 0x1ea   : > { %v2683_v25 = vpop.f32.mrf.mxu1  ;;  %v1786_v31 = vpop.f32.mrf.mxu0 }
 0x1eb   : > { %1870 = vst [vmem:[#allocation2 + $0xa8] sm:$0xff] %v1838_v39  ;;  %v1841_v53 = vadd.f32 %v1795_v22, %v494_v24  ;;  %v1787_v44 = vadd.f32 %v1786_v31, %v1626_v43  ;;  %v2684_v41 = vadd.f32 %v2683_v25, %v2682_v33 }
 0x1ec   : > { %v2685_v51 = vpop.f32.mrf.mxu1  ;;  %v2761_v55 = vpop.f32.mrf.mxu0 }
 0x1ed   : > { %1873 = vst [vmem:[#allocation2 + $0x28] sm:$0xff] %v1841_v53  ;;  %v1839_v60 = vadd.f32 %v1787_v44, %v492_v8  ;;  %v1642_v62 = vadd.f32 %v2684_v41, %v3967_v58 }
 0x1ee   : > { %v2686_v47 = vpop.f32.mrf.mxu1  ;;  %v1799_v37 = vpop.f32.mrf.mxu0 }
 0x1ef   : > { %1871 = vst [vmem:[#allocation2 + $0xd0] sm:$0xff] %v1839_v60  ;;  %v2687_v2 = vadd.f32 %v2686_v47, %v2685_v51  ;;  %v1800_v7 = vadd.f32 %v1799_v37, %v1639_v19 }
 0x1f0   : > { %v2688_v15 = vpop.f32.mrf.mxu1  ;;  %v2762_v29 = vpop.f32.mrf.mxu0 }
 0x1f1   : > { %v1647_v3 = vadd.f32 %v2687_v2, %v3966_v6  ;;  %v1842_v20 = vadd.f32 %v1800_v7, %v495_v11 }
 0x1f2   : > { %v2689_v5 = vpop.f32.mrf.mxu1  ;;  %v1802_v59 = vpop.f32.mrf.mxu0 }
 0x1f3   : > { %v1808_v36 = vadd.f32 %v2761_v55, %v1647_v3  ;;  %1874 = vst [vmem:[#allocation2 + $0xa0] sm:$0xff] %v1842_v20  ;;  %v2690_v42 = vadd.f32 %v2689_v5, %v2688_v15  ;;  %v1803_v63 = vadd.f32 %v1802_v59, %v1642_v62 }
 0x1f5   : > { %v1844_v4 = vadd.f32 %v1808_v36, %v497_v46  ;;  %v1650_v14 = vadd.f32 %v2690_v42, %v3968_v54  ;;  %v1843_v21 = vadd.f32 %v1803_v63, %v496_v9 }
 0x1f7   : > { %1876 = vst [vmem:[#allocation2 + $0x20] sm:$0xff] %v1844_v4  ;;  %v1811_v23 = vadd.f32 %v2762_v29, %v1650_v14  ;;  %1875 = vst [vmem:[#allocation2 + $0xf8] sm:$0xff] %v1843_v21  ;;  %1881 = sbr.rel (%p2462_p13) target bundleno = 593 (0x251), region = 66 }
 0x1f9   : > { %v1845_v38 = vadd.f32 %v1811_v23, %v498_v50 }
 0x1fb   : > { %1877 = vst [vmem:[#allocation2 + $0x98] sm:$0xff] %v1845_v38 }
 0x1fc   : > { %v1882_v32 = vld [vmem:[#allocation2 + $0xb0] sm:$0xff]  ;;  %v3832_v0 = vld [vmem:[%s3921_s2] ss:$0 sm:$0xff]  ;;  %v1884_v13 = vld [vmem:[#allocation2 + $0xd8] sm:$0xff] }
 0x1fd   : > { %v1883_v34 = vld [vmem:[#allocation2] sm:$0xff]  ;;  %v1921_v35 = vadd.f32 %v3832_v0, %v1882_v32  ;;  %v1885_v57 = vld [vmem:[#allocation2 + $0x18] sm:$0xff]  ;;  %v1886_v61 = vld [vmem:[#allocation2 + $0x50] sm:$0xff]  ;;  %v1923_v48 = vadd.f32 %v3832_v0, %v1884_v13 }
 0x1fe   : > { %v1922_v12 = vadd.f32 %v3832_v0, %v1883_v34  ;;  %v1924_v16 = vadd.f32 %v3832_v0, %v1885_v57  ;;  %v1925_v27 = vadd.f32 %v3832_v0, %v1886_v61  ;;  %v1887_v52 = vld [vmem:[#allocation2 + $0x68] sm:$0xff]  ;;  %v1888_v56 = vld [vmem:[#allocation2 + $0x30] sm:$0xff]  ;;  %v1890_v1 = vld [vmem:[#allocation2 + $0x80] sm:$0xff] }
 0x1ff   : > { %v1889_v28 = vld [vmem:[#allocation2 + $0x48] sm:$0xff]  ;;  %v1953_v45 = vsub.f32 0.0, %v1921_v35  ;;  %v1926_v30 = vadd.f32 %v3832_v0, %v1887_v52  ;;  %v1927_v17 = vadd.f32 %v3832_v0, %v1888_v56  ;;  %v1955_v24 = vsub.f32 0.0, %v1923_v48  ;;  %v1893_v26 = vld [vmem:[#allocation2 + $0xb8] sm:$0xff]  ;;  %v1894_v43 = vld [vmem:[#allocation2 + $0x60] sm:$0xff] }
 0x200   : > { %v1954_v49 = vsub.f32 0.0, %v1922_v12  ;;  %v1891_v33 = vld [vmem:[#allocation2 + $0x88] sm:$0xff]  ;;  %v1956_v18 = vsub.f32 0.0, %v1924_v16  ;;  %v1957_v10 = vsub.f32 0.0, %v1925_v27  ;;  %v1928_v39 = vadd.f32 %v3832_v0, %v1889_v28  ;;  %v1895_v2 = vld [vmem:[#allocation2 + $0xf0] sm:$0xff]  ;;  %v1897_v9 = vld [vmem:[#allocation2 + $0x78] sm:$0xff] }
 0x201   : > { %v1892_v22 = vld [vmem:[#allocation2 + $0xe8] sm:$0xff]  ;;  %v1985_v25 = vmul.f32 1.442695, %v1953_v45  ;;  %v1958_v31 = vsub.f32 0.0, %v1926_v30  ;;  %v1959_v53 = vsub.f32 0.0, %v1927_v17  ;;  %v1929_v41 = vadd.f32 %v3832_v0, %v1890_v1  ;;  %v1898_v13 = vld [vmem:[#allocation2 + $0x38] sm:$0xff] }
 0x202   : > { %v1987_v8 = vmul.f32 1.442695, %v1954_v49  ;;  %v1989_v44 = vmul.f32 1.442695, %v1955_v24  ;;  %v1991_v51 = vmul.f32 1.442695, %v1956_v18  ;;  %v1930_v11 = vadd.f32 %v3832_v0, %v1891_v33 }
 0x203   : > { %v1993_v55 = vmul.f32 1.442695, %v1957_v10  ;;  %2991 = vpow2.f32 %v1985_v25  ;;  %v1995_v60 = vmul.f32 1.442695, %v1958_v31  ;;  %v1997_v40 = vmul.f32 1.442695, %v1959_v53 }
 0x204   : > { %v1960_v19 = vsub.f32 0.0, %v1928_v39  ;;  %2993 = vpow2.f32 %v1987_v8  ;;  %v1961_v47 = vsub.f32 0.0, %v1929_v41  ;;  %v1931_v37 = vadd.f32 %v3832_v0, %v1892_v22  ;;  %v1896_v6 = vld [vmem:[#allocation2 + $0x8] sm:$0xff]  ;;  %v1899_v48 = vld [vmem:[#allocation2 + $0x58] sm:$0xff]  ;;  %v1900_v45 = vld [vmem:[#allocation2 + $0x40] sm:$0xff] }
 0x205   : > { %2995 = vpow2.f32 %v1989_v44  ;;  %v1932_v15 = vadd.f32 %v3832_v0, %v1893_v26  ;;  %v1933_v29 = vadd.f32 %v3832_v0, %v1894_v43  ;;  %v1962_v20 = vsub.f32 0.0, %v1930_v11  ;;  %v1901_v39 = vld [vmem:[#allocation2 + $0xc8] sm:$0xff]  ;;  %v1902_v25 = vld [vmem:[#allocation2 + $0xe0] sm:$0xff]  ;;  %v1903_v44 = vld [vmem:[#allocation2 + $0x90] sm:$0xff] }
 0x206   : > { %v1999_v7 = vmul.f32 1.442695, %v1960_v19  ;;  %2997 = vpow2.f32 %v1991_v51  ;;  %v2001_v3 = vmul.f32 1.442695, %v1961_v47  ;;  %v1963_v58 = vsub.f32 0.0, %v1931_v37  ;;  %v1905_v37 = vld [vmem:[#allocation2 + $0xc0] sm:$0xff] }
 0x207   : > { %2999 = vpow2.f32 %v1993_v55  ;;  %v1964_v62 = vsub.f32 0.0, %v1932_v15  ;;  %v1965_v46 = vsub.f32 0.0, %v1933_v29  ;;  %v1934_v5 = vadd.f32 %v3832_v0, %v1895_v2 }
 0x208   : > { %3001 = vpow2.f32 %v1995_v60  ;;  %v2003_v59 = vmul.f32 1.442695, %v1962_v20  ;;  %v1935_v36 = vadd.f32 %v3832_v0, %v1896_v6  ;;  %v2005_v42 = vmul.f32 1.442695, %v1963_v58  ;;  %v1904_v60 = vld [vmem:[#allocation2 + $0x70] sm:$0xff]  ;;  %v1906_v6 = vld [vmem:[#allocation2 + $0xa8] sm:$0xff] }
 0x209   : > { %3003 = vpow2.f32 %v1997_v40  ;;  %v1966_v63 = vsub.f32 0.0, %v1934_v5  ;;  %v2007_v4 = vmul.f32 1.442695, %v1964_v62  ;;  %v1936_v14 = vadd.f32 %v3832_v0, %v1897_v9 }
 0x20a   : > { %3005 = vpow2.f32 %v1999_v7  ;;  %v1967_v54 = vsub.f32 0.0, %v1935_v36  ;;  %v2009_v21 = vmul.f32 1.442695, %v1965_v46  ;;  %v1937_v28 = vadd.f32 %v3832_v0, %v1898_v13  ;;  %v1907_v46 = vld [vmem:[#allocation2 + $0xd0] sm:$0xff] }
 0x20b   : > { %3007 = vpow2.f32 %v2001_v3  ;;  %v2011_v50 = vmul.f32 1.442695, %v1966_v63  ;;  %v1968_v23 = vsub.f32 0.0, %v1936_v14  ;;  %v1938_v17 = vadd.f32 %v3832_v0, %v1899_v48 }
 0x20c   : > { %3009 = vpow2.f32 %v2003_v59  ;;  %v2013_v38 = vmul.f32 1.442695, %v1967_v54  ;;  %v1939_v10 = vadd.f32 %v3832_v0, %v1900_v45  ;;  %v1969_v43 = vsub.f32 0.0, %v1937_v28 }
 0x20d   : > { %3011 = vpow2.f32 %v2005_v42  ;;  %v2015_v32 = vmul.f32 1.442695, %v1968_v23  ;;  %v1970_v53 = vsub.f32 0.0, %v1938_v17  ;;  %v1940_v41 = vadd.f32 %v3832_v0, %v1901_v39  ;;  %v1908_v42 = vld [vmem:[#allocation2 + $0x10] sm:$0xff]  ;;  %v1913_v17 = vld [vmem:[#allocation2 + $0x98] sm:$0xff] }
 0x20e   : > { %3013 = vpow2.f32 %v2007_v4  ;;  %v1971_v47 = vsub.f32 0.0, %v1939_v10  ;;  %v1941_v11 = vadd.f32 %v3832_v0, %v1902_v25  ;;  %v2017_v15 = vmul.f32 1.442695, %v1969_v43 }
 0x20f   : > { %3015 = vpow2.f32 %v2009_v21  ;;  %v1942_v29 = vadd.f32 %v3832_v0, %v1903_v44  ;;  %v2019_v58 = vmul.f32 1.442695, %v1970_v53  ;;  %v1943_v62 = vadd.f32 %v3832_v0, %v1904_v60  ;;  %v1909_v21 = vld [vmem:[#allocation2 + $0x28] sm:$0xff] }
 0x210   : > { %v2992_v34 = vpop.eup %2991  ;;  %3017 = vpow2.f32 %v2011_v50  ;;  %v1972_v59 = vsub.f32 0.0, %v1940_v41  ;;  %v1944_v36 = vadd.f32 %v3832_v0, %v1905_v37  ;;  %v1973_v54 = vsub.f32 0.0, %v1941_v11 }
 0x211   : > { %v2994_v35 = vpop.eup %2993  ;;  %v2049_v12 = vadd.f32 1.0, %v2992_v34  ;;  %3019 = vpow2.f32 %v2013_v38  ;;  %v1945_v14 = vadd.f32 %v3832_v0, %v1906_v6  ;;  %v1974_v38 = vsub.f32 0.0, %v1942_v29  ;;  %v1910_v34 = vld [vmem:[#allocation2 + $0xa0] sm:$0xff] }
 0x212   : > { %v2996_v57 = vpop.eup %2995  ;;  %v2050_v61 = vadd.f32 1.0, %v2994_v35  ;;  %3021 = vpow2.f32 %v2015_v32  ;;  %v1946_v32 = vadd.f32 %v3832_v0, %v1907_v46  ;;  %v1975_v13 = vsub.f32 0.0, %v1943_v62 }
 0x213   : > { %v2998_v16 = vpop.eup %2997  ;;  %3023 = vrcp.f32 %v2049_v12  ;;  %v2051_v27 = vadd.f32 1.0, %v2996_v57  ;;  %v2021_v12 = vmul.f32 1.442695, %v1971_v47  ;;  %v1947_v57 = vadd.f32 %v3832_v0, %v1908_v42 }
 0x214   : > { %v3000_v52 = vpop.eup %2999  ;;  %3025 = vrcp.f32 %v2050_v61  ;;  %v2052_v56 = vadd.f32 1.0, %v2998_v16  ;;  %v1911_v61 = vld [vmem:[#allocation2 + $0xf8] sm:$0xff]  ;;  %v2023_v16 = vmul.f32 1.442695, %v1972_v59  ;;  %v2025_v45 = vmul.f32 1.442695, %v1973_v54 }
 0x215   : > { %v3002_v49 = vpop.eup %3001  ;;  %3027 = vrcp.f32 %v2051_v27  ;;  %v2053_v30 = vadd.f32 1.0, %v3000_v52  ;;  %v1976_v27 = vsub.f32 0.0, %v1944_v36  ;;  %v1948_v52 = vadd.f32 %v3832_v0, %v1909_v21 }
 0x216   : > { %v3004_v1 = vpop.eup %3003  ;;  %3029 = vrcp.f32 %v2052_v56  ;;  %v2054_v33 = vadd.f32 1.0, %v3002_v49  ;;  %v1912_v56 = vld [vmem:[#allocation2 + $0x20] sm:$0xff]  ;;  %v1977_v49 = vsub.f32 0.0, %v1945_v14  ;;  %v2029_v39 = vmul.f32 1.442695, %v1975_v13 }
 0x217   : > { %v3006_v24 = vpop.eup %3005  ;;  %3031 = vrcp.f32 %v2053_v30  ;;  %v2055_v18 = vadd.f32 1.0, %v3004_v1  ;;  %v1949_v30 = vadd.f32 %v3832_v0, %v1910_v34  ;;  %v2031_v25 = vmul.f32 1.442695, %v1976_v27 }
 0x218   : > { %v3008_v22 = vpop.eup %3007  ;;  %3033 = vrcp.f32 %v2054_v33  ;;  %v2056_v26 = vadd.f32 1.0, %v3006_v24  ;;  %v2027_v33 = vmul.f32 1.442695, %v1974_v38  ;;  %v1978_v24 = vsub.f32 0.0, %v1946_v32 }
 0x219   : > { %v3010_v8 = vpop.eup %3009  ;;  %3035 = vrcp.f32 %v2055_v18  ;;  %v2057_v31 = vadd.f32 1.0, %v3008_v22  ;;  %v1950_v18 = vadd.f32 %v3832_v0, %v1911_v61  ;;  %v1979_v22 = vsub.f32 0.0, %v1947_v57 }
 0x21a   : > { %v3012_v51 = vpop.eup %3011  ;;  %3037 = vrcp.f32 %v2056_v26  ;;  %v2058_v55 = vadd.f32 1.0, %v3010_v8  ;;  %v1951_v26 = vadd.f32 %v3832_v0, %v1912_v56  ;;  %v1980_v8 = vsub.f32 0.0, %v1948_v52 }
 0x21b   : > { %v3014_v40 = vpop.eup %3013  ;;  %3039 = vrcp.f32 %v2057_v31  ;;  %v2059_v19 = vadd.f32 1.0, %v3012_v51  ;;  %v1952_v31 = vadd.f32 %v3832_v0, %v1913_v17  ;;  %v2033_v44 = vmul.f32 1.442695, %v1977_v49 }
 0x21c   : > { %v3016_v2 = vpop.eup %3015  ;;  %3041 = vrcp.f32 %v2058_v55  ;;  %v2060_v7 = vadd.f32 1.0, %v3014_v40  ;;  %v1981_v51 = vsub.f32 0.0, %v1949_v30  ;;  %v2035_v41 = vmul.f32 1.442695, %v1978_v24 }
 0x21d   : > { %v3018_v3 = vpop.eup %3017  ;;  %3043 = vrcp.f32 %v2059_v19  ;;  %v2061_v20 = vadd.f32 1.0, %v3016_v2  ;;  %v1982_v60 = vsub.f32 0.0, %v1950_v18  ;;  %v2037_v19 = vmul.f32 1.442695, %v1979_v22 }
 0x21e   : > { %v3020_v5 = vpop.eup %3019  ;;  %3045 = vrcp.f32 %v2060_v7  ;;  %v2062_v9 = vadd.f32 1.0, %v3018_v3  ;;  %v1983_v47 = vsub.f32 0.0, %v1951_v26  ;;  %v2039_v11 = vmul.f32 1.442695, %v1980_v8 }
 0x21f   : > { %v3022_v63 = vpop.eup %3021  ;;  %3047 = vrcp.f32 %v2061_v20  ;;  %v2063_v4 = vadd.f32 1.0, %v3020_v5  ;;  %v1984_v37 = vsub.f32 0.0, %v1952_v31  ;;  %v2041_v7 = vmul.f32 1.442695, %v1981_v51 }
 0x220   : > { %v3024_v50 = vpop.eup %3023  ;;  %3049 = vrcp.f32 %v2062_v9  ;;  %v2064_v23 = vadd.f32 1.0, %v3022_v63  ;;  %v2043_v29 = vmul.f32 1.442695, %v1982_v60  ;;  %v2045_v3 = vmul.f32 1.442695, %v1983_v47 }
 0x221   : > { %v3026_v35 = vpop.eup %3025  ;;  %2145 = vst [vmem:[%s3466_s29] sm:$0xff] %v3024_v50  ;;  %3051 = vrcp.f32 %v2063_v4 }
 0x222   : > { %v3028_v48 = vpop.eup %3027  ;;  %2146 = vst [vmem:[%s3466_s29 + $0x8] sm:$0xff] %v3026_v35  ;;  %3053 = vrcp.f32 %v2064_v23 }
 0x223   : > { %v3030_v28 = vpop.eup %3029  ;;  %2147 = vst [vmem:[%s3466_s29 + $0x10] sm:$0xff] %v3028_v48  ;;  %3055 = vpow2.f32 %v2017_v15 }
 0x224   : > { %v3032_v1 = vpop.eup %3031  ;;  %2148 = vst [vmem:[%s3466_s29 + $0x18] sm:$0xff] %v3030_v28  ;;  %3057 = vpow2.f32 %v2019_v58  ;;  %v2047_v58 = vmul.f32 1.442695, %v1984_v37 }
 0x225   : > { %v3034_v10 = vpop.eup %3033  ;;  %2149 = vst [vmem:[%s3466_s29 + $0x20] sm:$0xff] %v3032_v1  ;;  %3059 = vpow2.f32 %v2021_v12 }
 0x226   : > { %v3036_v43 = vpop.eup %3035  ;;  %2150 = vst [vmem:[%s3466_s29 + $0x28] sm:$0xff] %v3034_v10  ;;  %3061 = vpow2.f32 %v2023_v16 }
 0x227   : > { %v3038_v53 = vpop.eup %3037  ;;  %2151 = vst [vmem:[%s3466_s29 + $0x30] sm:$0xff] %v3036_v43  ;;  %3063 = vpow2.f32 %v2025_v45 }
 0x228   : > { %v3040_v55 = vpop.eup %3039  ;;  %2152 = vst [vmem:[%s3466_s29 + $0x38] sm:$0xff] %v3038_v53  ;;  %3065 = vpow2.f32 %v2027_v33 }
 0x229   : > { %v3042_v40 = vpop.eup %3041  ;;  %2153 = vst [vmem:[%s3466_s29 + $0x40] sm:$0xff] %v3040_v55  ;;  %3067 = vpow2.f32 %v2029_v39 }
 0x22a   : > { %v3044_v0 = vpop.eup %3043  ;;  %2154 = vst [vmem:[%s3466_s29 + $0x48] sm:$0xff] %v3042_v40  ;;  %3069 = vpow2.f32 %v2031_v25 }
 0x22b   : > { %v3046_v2 = vpop.eup %3045  ;;  %2155 = vst [vmem:[%s3466_s29 + $0x50] sm:$0xff] %v3044_v0  ;;  %3071 = vpow2.f32 %v2033_v44 }
 0x22c   : > { %v3048_v15 = vpop.eup %3047  ;;  %2156 = vst [vmem:[%s3466_s29 + $0x58] sm:$0xff] %v3046_v2  ;;  %3073 = vpow2.f32 %v2035_v41 }
 0x22d   : > { %v3050_v6 = vpop.eup %3049  ;;  %2157 = vst [vmem:[%s3466_s29 + $0x60] sm:$0xff] %v3048_v15  ;;  %3075 = vpow2.f32 %v2037_v19 }
 0x22e   : > { %v3052_v20 = vpop.eup %3051  ;;  %2158 = vst [vmem:[%s3466_s29 + $0x68] sm:$0xff] %v3050_v6  ;;  %3077 = vpow2.f32 %v2039_v11 }
 0x22f   : > { %v3054_v62 = vpop.eup %3053  ;;  %2159 = vst [vmem:[%s3466_s29 + $0x70] sm:$0xff] %v3052_v20  ;;  %3079 = vpow2.f32 %v2041_v7 }
 0x230   : > { %v3056_v46 = vpop.eup %3055  ;;  %2160 = vst [vmem:[%s3466_s29 + $0x78] sm:$0xff] %v3054_v62  ;;  %3081 = vpow2.f32 %v2043_v29 }
 0x231   : > { %v3058_v5 = vpop.eup %3057  ;;  %v2065_v9 = vadd.f32 1.0, %v3056_v46  ;;  %3083 = vpow2.f32 %v2045_v3 }
 0x232   : > { %v3060_v59 = vpop.eup %3059  ;;  %v2066_v36 = vadd.f32 1.0, %v3058_v5  ;;  %3085 = vpow2.f32 %v2047_v58 }
 0x233   : > { %v3062_v42 = vpop.eup %3061  ;;  %3087 = vrcp.f32 %v2065_v9  ;;  %v2067_v63 = vadd.f32 1.0, %v3060_v59 }
 0x234   : > { %v3064_v4 = vpop.eup %3063  ;;  %3089 = vrcp.f32 %v2066_v36  ;;  %v2068_v54 = vadd.f32 1.0, %v3062_v42 }
 0x235   : > { %v3066_v14 = vpop.eup %3065  ;;  %3091 = vrcp.f32 %v2067_v63  ;;  %v2069_v21 = vadd.f32 1.0, %v3064_v4 }
 0x236   : > { %v3068_v50 = vpop.eup %3067  ;;  %3093 = vrcp.f32 %v2068_v54  ;;  %v2070_v23 = vadd.f32 1.0, %v3066_v14 }
 0x237   : > { %v3070_v38 = vpop.eup %3069  ;;  %3095 = vrcp.f32 %v2069_v21  ;;  %v2071_v32 = vadd.f32 1.0, %v3068_v50 }
 0x238   : > { %v3072_v34 = vpop.eup %3071  ;;  %3097 = vrcp.f32 %v2070_v23  ;;  %v2072_v35 = vadd.f32 1.0, %v3070_v38 }
 0x239   : > { %v3074_v12 = vpop.eup %3073  ;;  %3099 = vrcp.f32 %v2071_v32  ;;  %v2073_v13 = vadd.f32 1.0, %v3072_v34 }
 0x23a   : > { %v3076_v57 = vpop.eup %3075  ;;  %3101 = vrcp.f32 %v2072_v35  ;;  %v2074_v61 = vadd.f32 1.0, %v3074_v12 }
 0x23b   : > { %v3078_v48 = vpop.eup %3077  ;;  %3103 = vrcp.f32 %v2073_v13  ;;  %v2075_v16 = vadd.f32 1.0, %v3076_v57 }
 0x23c   : > { %v3080_v27 = vpop.eup %3079  ;;  %3105 = vrcp.f32 %v2074_v61  ;;  %v2076_v52 = vadd.f32 1.0, %v3078_v48 }
 0x23d   : > { %v3082_v56 = vpop.eup %3081  ;;  %3107 = vrcp.f32 %v2075_v16  ;;  %v2077_v28 = vadd.f32 1.0, %v3080_v27 }
 0x23e   : > { %v3084_v45 = vpop.eup %3083  ;;  %3109 = vrcp.f32 %v2076_v52  ;;  %v2078_v49 = vadd.f32 1.0, %v3082_v56 }
 0x23f   : > { %v3086_v30 = vpop.eup %3085  ;;  %3111 = vrcp.f32 %v2077_v28  ;;  %v2079_v17 = vadd.f32 1.0, %v3084_v45 }
 0x240   : > { %v3088_v1 = vpop.eup %3087  ;;  %3113 = vrcp.f32 %v2078_v49  ;;  %v2080_v33 = vadd.f32 1.0, %v3086_v30 }
 0x241   : > { %v3090_v24 = vpop.eup %3089  ;;  %2161 = vst [vmem:[%s3466_s29 + $0x80] sm:$0xff] %v3088_v1  ;;  %3115 = vrcp.f32 %v2079_v17 }
 0x242   : > { %v3092_v18 = vpop.eup %3091  ;;  %2162 = vst [vmem:[%s3466_s29 + $0x88] sm:$0xff] %v3090_v24  ;;  %3117 = vrcp.f32 %v2080_v33 }
 0x243   : > { %v3094_v10 = vpop.eup %3093  ;;  %2163 = vst [vmem:[%s3466_s29 + $0x90] sm:$0xff] %v3092_v18 }
 0x244   : > { %v3096_v39 = vpop.eup %3095  ;;  %2164 = vst [vmem:[%s3466_s29 + $0x98] sm:$0xff] %v3094_v10 }
 0x245   : > { %v3098_v22 = vpop.eup %3097  ;;  %2165 = vst [vmem:[%s3466_s29 + $0xa0] sm:$0xff] %v3096_v39 }
 0x246   : > { %v3100_v26 = vpop.eup %3099  ;;  %2166 = vst [vmem:[%s3466_s29 + $0xa8] sm:$0xff] %v3098_v22 }
 0x247   : > { %v3102_v43 = vpop.eup %3101  ;;  %2167 = vst [vmem:[%s3466_s29 + $0xb0] sm:$0xff] %v3100_v26 }
 0x248   : > { %v3104_v25 = vpop.eup %3103  ;;  %2168 = vst [vmem:[%s3466_s29 + $0xb8] sm:$0xff] %v3102_v43 }
 0x249   : > { %v3106_v8 = vpop.eup %3105  ;;  %2169 = vst [vmem:[%s3466_s29 + $0xc0] sm:$0xff] %v3104_v25 }
 0x24a   : > { %v3108_v31 = vpop.eup %3107  ;;  %2170 = vst [vmem:[%s3466_s29 + $0xc8] sm:$0xff] %v3106_v8 }
 0x24b   : > { %v3110_v53 = vpop.eup %3109  ;;  %2171 = vst [vmem:[%s3466_s29 + $0xd0] sm:$0xff] %v3108_v31 }
 0x24c   : > { %v3112_v44 = vpop.eup %3111  ;;  %2172 = vst [vmem:[%s3466_s29 + $0xd8] sm:$0xff] %v3110_v53 }
 0x24d   : > { %v3114_v51 = vpop.eup %3113  ;;  %2173 = vst [vmem:[%s3466_s29 + $0xe0] sm:$0xff] %v3112_v44 }
 0x24e   : > { %v3116_v55 = vpop.eup %3115  ;;  %2174 = vst [vmem:[%s3466_s29 + $0xe8] sm:$0xff] %v3114_v51 }
 0x24f   : > { %v3118_v41 = vpop.eup %3117  ;;  %2175 = vst [vmem:[%s3466_s29 + $0xf0] sm:$0xff] %v3116_v55 }
 0x250   : > { %2176 = vst [vmem:[%s3466_s29 + $0xf8] sm:$0xff] %v3118_v41 }
 0x251 PF: > { %s13_s18 = sadd.s32 1, %s3173_s18   ;;  %s3969_s12 = smov %s3153_s13 }
 0x252   : > { %p10_p0 = scmp.ge.s32.totalorder %s13_s18, 12   ;;  %s3970_s13 = smov %s3247_s25 }
 0x253   : > { %s3971_s14 = smov %s3165_s16  ;;  %s3972_s15 = smov %s3169_s17 }
 0x254   : > { %s3973_s16 = smov %s3976_s19  ;;  %s3974_s17 = smov %s3980_s20 }
 0x255   :  { %12 = sbr.rel (!%p10_p0) target bundleno = 4 (0x4), region = 110 }

</bundles_post_ra>
